<compile_context>
chip_gen: v7x
topology: tpu7x:2x2x1
jax: 0.10.0
libtpu: 0.0.40
codegen_flags: <defaults>
</compile_context>

<pallas_src>
import jax
import jax.numpy as jnp
from jax import lax
from jax.experimental import pallas as pl
from jax.experimental.pallas import tpu as pltpu

_IMG = 16                                   # spatial size used by the test input
_FIRE_CFG = [("fire1", 64, 16, 64, 64),
             ("fire2", 128, 32, 64, 64),
             ("fire3", 128, 64, 128, 128),
             ("fire4", 256, 64, 256, 256)]

# Row-padded f32 scratch used to stage shifted views of the current activation.
_OFF = 24          # start row of the staged activation (>= w+1 = 17, sublane aligned)
_GUARD = 17        # zeroed rows past the staged region (>= w+1)
_PAD_ROWS = 320    # >= _OFF + 256 + 2*16 + 2  (largest pool tap reach)
_PAD_COLS = 256    # widest staged activation (pool3 input, 256 channels)
# bf16 im2col scratch: (rows, 9*cin) column-banded patches for the 3x3 convs.
_COL_ROWS = 256    # largest spatial stage
_COL_COLS = 576    # 9 * largest squeeze width (64)


def _mm(a, w):
    """MXU matmul: bf16 operands, f32 accumulation."""
    return jnp.dot(a.astype(jnp.bfloat16), w, preferred_element_type=jnp.float32)


def _x_coord(m_rows, w):
    """Per-row x coordinate as an (m_rows, 1) iota (w is a power of two)."""
    return lax.broadcasted_iota(jnp.int32, (m_rows, 1), 0) & (w - 1)


def _conv3x3_im2col(s, w_ref, pad_ref, col_ref, *, w):
    """3x3 'same' conv (no bias/relu) as ONE im2col MXU matmul.

    s:      (h*w, cin) f32 activation rows (flattened NHWC of one image)
    w_ref:  (9*cin, cout) bf16 weights, K index = tap*cin + channel,
            tap t = (dy+1)*3 + (dx+1)
    """
    m_rows, cin = s.shape
    # Stage rows once; zero the guard rows past the region so dy-out-of-bounds
    # taps read real zeros (rows below _OFF stay zero from the kernel prologue).
    pad_ref[_OFF:_OFF + m_rows, 0:cin] = s
    pad_ref[_OFF + m_rows:_OFF + m_rows + _GUARD, 0:cin] = (
        jnp.zeros((_GUARD, cin), jnp.float32))
    xx = _x_coord(m_rows, w)
    s_bf = s.astype(jnp.bfloat16)
    for t in range(9):
        dy, dx = t // 3 - 1, t % 3 - 1
        if dy == 0 and dx == 0:
            tap = s_bf                                    # centre tap: no shift/mask
        else:
            start = _OFF + dy * w + dx
            tap = pad_ref[start:start + m_rows, 0:cin]    # shifted view of the rows
            if dx != 0:
                ok = ((xx + dx) >= 0) & ((xx + dx) < w)   # (rows, 1) lane-cheap mask
                tap = jnp.where(ok, tap, 0.0)             # Conv2d zero padding
            tap = tap.astype(jnp.bfloat16)
        col_ref[0:m_rows, t * cin:(t + 1) * cin] = tap
    return jnp.dot(col_ref[0:m_rows, 0:9 * cin], w_ref[...],
                   preferred_element_type=jnp.float32)


def _maxpool3x3s2(a, pad_ref, sel_ref, *, h, w):
    """MaxPool2d(k=3, s=2, ceil_mode=True) on flattened rows; h, w even.

    9 shifted whole-slab maxes followed by a precomputed one-hot selection
    matmul picking the stride-2 window starts.  Out-of-range taps use 0, which
    is exact because the pool input is post-ReLU (>= 0).
    """
    m_rows, c = a.shape
    ho, wo = h // 2, w // 2
    pad_ref[_OFF:_OFF + m_rows, 0:c] = a
    pad_ref[_OFF + m_rows:_OFF + m_rows + _GUARD, 0:c] = (
        jnp.zeros((_GUARD, c), jnp.float32))
    xx = _x_coord(m_rows, w)
    best = a                                              # tap (0, 0)
    for t in range(1, 9):
        dy, dx = t // 3, t % 3
        start = _OFF + dy * w + dx
        tap = pad_ref[start:start + m_rows, 0:c]
        if dx != 0:
            tap = jnp.where((xx + dx) < w, tap, 0.0)
        best = jnp.maximum(best, tap)
    # bf16 selection is exact for downstream use: the next conv casts to bf16.
    out = jnp.dot(sel_ref[...], best.astype(jnp.bfloat16),
                  preferred_element_type=jnp.float32)
    return out, ho, wo


def _squeezenet_kernel(x_ref, c1w, c1b,
                       f1sw, f1sb, f1ew, f1eb,
                       f2sw, f2sb, f2ew, f2eb,
                       f3sw, f3sb, f3ew, f3eb,
                       f4sw, f4sb, f4ew, f4eb,
                       sel1, sel2, sel3,
                       o_ref, pad_ref, col_ref):
    # Zero the shifted-view scratch once per image: guard rows then hold real
    # zeros and no tap ever reads uninitialized VMEM.
    pad_ref[...] = jnp.zeros((_PAD_ROWS, _PAD_COLS), jnp.float32)

    h = w = _IMG
    # conv1 (3x3, 3->64) + ReLU: im2col built in the wrapper -> one K=32 matmul
    a = jnp.maximum(
        jnp.dot(x_ref[0], c1w[...], preferred_element_type=jnp.float32) + c1b[...],
        0.0)

    fires = ((f1sw, f1sb, f1ew, f1eb),
             (f2sw, f2sb, f2ew, f2eb),
             (f3sw, f3sb, f3ew, f3eb),
             (f4sw, f4sb, f4ew, f4eb))
    sels = (sel1, sel2, sel3)
    for k, (sw, sb, ew, eb) in enumerate(fires):
        # squeeze (1x1) + ReLU -- stays in VMEM/vregs
        s = jnp.maximum(_mm(a, sw[...]) + sb[...], 0.0)
        # expand1 (1x1) folded into the centre tap of the pre-widened expand3:
        # a single im2col matmul produces the lane-dense (rows, e1+e3) slab
        # (fused channel concat + both branches).
        a = jnp.maximum(_conv3x3_im2col(s, ew, pad_ref, col_ref, w=w) + eb[...],
                        0.0)
        if k < 3:
            a, h, w = _maxpool3x3s2(a, pad_ref, sels[k], h=h, w=w)
    o_ref[0] = a


# ---------------------------------------------------------------------------
# Parameter / constant prep + public forward
# ---------------------------------------------------------------------------
def _make_pool_sel(h, w):
    """One-hot (ho*wo, h*w) bf16 matrix selecting the stride-2 window starts."""
    ho, wo = h // 2, w // 2
    r = jnp.arange(ho * wo)
    tgt = (r // wo) * (2 * w) + (r % wo) * 2
    return (jnp.arange(h * w)[None, :] == tgt[:, None]).astype(jnp.bfloat16)


def _prep_params(params):
    """Reshape/cast params to the kernel layout (bf16, im2col K, fused expand)."""
    bf = jnp.bfloat16
    c1w = params["conv1_w"].reshape(27, -1)            # (tap*3 + cin, 64)
    c1w = jnp.pad(c1w, ((0, 5), (0, 0))).astype(bf)    # K: 27 -> 32 (matches input pad)
    flat = [c1w, params["conv1_b"].reshape(1, -1)]
    for name, _cin, sq, e1, e3 in _FIRE_CFG:
        sw = params[name + "_sq_w"].astype(bf)                              # (cin, sq)
        sb = params[name + "_sq_b"].reshape(1, -1)
        e3w = jnp.pad(params[name + "_e3_w"].reshape(9, sq, e3),
                      ((0, 0), (0, 0), (e1, 0)))                            # (9, sq, e1+e3)
        e1w = jnp.pad(params[name + "_e1_w"], ((0, 0), (0, e3)))            # (sq, e1+e3)
        ew = e3w.at[4].add(e1w)            # fold 1x1 into centre tap (disjoint bands -> exact)
        ew = ew.reshape(9 * sq, e1 + e3).astype(bf)                         # im2col K layout
        eb = jnp.concatenate([params[name + "_e1_b"],
                              params[name + "_e3_b"]]).reshape(1, -1)
        flat += [sw, sb, ew, eb]
    return flat


@jax.jit
def squeezenet_forward(x_nchw, params):
    n = x_nchw.shape[0]
    assert x_nchw.shape[1:] == (3, _IMG, _IMG), x_nchw.shape
    # conv1 im2col in the wrapper: NCHW -> NHWC -> (N, 256, 27) -> pad K to 32, bf16
    x = jnp.transpose(x_nchw, (0, 2, 3, 1))
    xp = jnp.pad(x, ((0, 0), (1, 1), (1, 1), (0, 0)))
    taps = [xp[:, dy:dy + _IMG, dx:dx + _IMG, :] for dy in range(3) for dx in range(3)]
    xi = jnp.concatenate(taps, axis=-1).reshape(n, _IMG * _IMG, 27)
    xi = jnp.pad(xi, ((0, 0), (0, 0), (0, 5))).astype(jnp.bfloat16)

    consts = _prep_params(params)
    consts += [_make_pool_sel(16, 16), _make_pool_sel(8, 8), _make_pool_sel(4, 4)]

    hf = wf = _IMG // 8
    cf = _FIRE_CFG[-1][3] + _FIRE_CFG[-1][4]            # 512 output channels

    in_specs = [pl.BlockSpec((1, _IMG * _IMG, 32), lambda i: (i, 0, 0))]
    for p in consts:                                    # whole-array, revisited blocks
        in_specs.append(pl.BlockSpec(p.shape, lambda i, _nd=p.ndim: (0,) * _nd))

    out = pl.pallas_call(
        _squeezenet_kernel,
        grid=(n,),                                      # one image per program
        in_specs=in_specs,
        out_specs=pl.BlockSpec((1, hf * wf, cf), lambda i: (i, 0, 0)),
        out_shape=jax.ShapeDtypeStruct((n, hf * wf, cf), jnp.float32),
        scratch_shapes=[pltpu.VMEM((_PAD_ROWS, _PAD_COLS), jnp.float32),
                        pltpu.VMEM((_COL_ROWS, _COL_COLS), jnp.bfloat16)],
        # TODO(synk): on v7x, a true 2-TensorCore batch split may need
        # pltpu.CORE_PARALLEL / pl.core_map; "parallel" is kept for portability.
        compiler_params=pltpu.CompilerParams(dimension_semantics=("parallel",)),
    )(xi, *consts)

    # NHWC rows -> NCHW -> flatten(1), matching torch.flatten on NCHW
    out = out.reshape(n, hf, wf, cf).transpose(0, 3, 1, 2)
    return out.reshape(n, -1)


# ---------------------------------------------------------------------------
# Deterministic parameter init (HWIO for 3x3, (Cin, Cout) matrices for 1x1)
# ---------------------------------------------------------------------------
def init_params(key, num_classes=100):
    del num_classes  # the reference forward has no classifier head
    params = {}
    keys = iter(jax.random.split(key, 64))

    def add_conv(name, kh, kw, cin, cout):
        fan_in = kh * kw * cin
        w = jax.random.normal(next(keys), (kh, kw, cin, cout),
                              jnp.float32) / jnp.sqrt(float(fan_in))
        b = 0.01 * jax.random.normal(next(keys), (cout,), jnp.float32)
        if kh == 1:
            w = w.reshape(cin, cout)
        params[name + "_w"] = w
        params[name + "_b"] = b

    add_conv("conv1", 3, 3, 3, 64)
    for name, cin, sq, e1, e3 in _FIRE_CFG:
        add_conv(name + "_sq", 1, 1, cin, sq)
        add_conv(name + "_e1", 1, 1, sq, e1)
        add_conv(name + "_e3", 3, 3, sq, e3)
    return params


# ---------------------------------------------------------------------------
# Pure-JAX reference (bf16 MXU operands, f32 accumulate - mirrors the kernel)
# ---------------------------------------------------------------------------
def _pool_out(size):
    return -((size - 3) // -2) + 1


def _ref_forward(x_nchw, params):
    x = jnp.transpose(x_nchw, (0, 2, 3, 1))
    bf = jnp.bfloat16

    def conv(x, w, b, k):
        if k == 1:
            w = w.reshape(1, 1, *w.shape)
        y = lax.conv_general_dilated(
            x.astype(bf), w.astype(bf), (1, 1), "SAME" if k == 3 else "VALID",
            dimension_numbers=("NHWC", "HWIO", "NHWC"),
            preferred_element_type=jnp.float32)
        return jax.nn.relu(y + b.reshape(1, 1, 1, -1))

    def pool(x):
        _, h, wd, _ = x.shape
        ho, wo = _pool_out(h), _pool_out(wd)
        ph, pw = 2 * (ho - 1) + 3 - h, 2 * (wo - 1) + 3 - wd
        return lax.reduce_window(
            x, -jnp.inf, lax.max, (1, 3, 3, 1), (1, 2, 2, 1),
            ((0, 0), (0, ph), (0, pw), (0, 0)))

    def fire(x, name):
        s = conv(x, params[name + "_sq_w"], params[name + "_sq_b"], 1)
        e1 = conv(s, params[name + "_e1_w"], params[name + "_e1_b"], 1)
        e3 = conv(s, params[name + "_e3_w"], params[name + "_e3_b"], 3)
        return jnp.concatenate([e1, e3], axis=-1)

    x = conv(x, params["conv1_w"], params["conv1_b"], 3)
    x = fire(x, "fire1"); x = pool(x)
    x = fire(x, "fire2"); x = pool(x)
    x = fire(x, "fire3"); x = pool(x)
    x = fire(x, "fire4")
    x = jnp.transpose(x, (0, 3, 1, 2))
    return x.reshape(x.shape[0], -1)


if __name__ == "__main__":
    key = jax.random.PRNGKey(0)
    kx, kp = jax.random.split(key)
    # PyTorch-style NCHW input: batch=2, 3 channels (fixed by the module), 16x16
    x = jax.random.normal(kx, (2, 3, _IMG, _IMG), jnp.float32)
    params = init_params(kp)

    out = jax.block_until_ready(squeezenet_forward(x, params))
    # 16 -> pool 8 -> pool 4 -> pool 2 spatial; final channels 512 -> flatten 2048
    assert out.shape == (2, 512 * 2 * 2), out.shape

    ref = _ref_forward(x, params)
    err = float(jnp.max(jnp.abs(out - ref)))
    # bf16 MXU operands on both sides; tolerance covers accumulation-order noise.
    assert jnp.allclose(out, ref, rtol=2e-2, atol=2e-2), err

    print("KERNEL_OK")
</pallas_src>

<mosaic_0001>
module attributes {stable_mosaic.version = 11 : i64} {
  func.func @_squeezenet_kernel(%arg0: i32, %arg1: memref<1x256x32xbf16, #tpu.memory_space<vmem>>, %arg2: memref<32x64xbf16, #tpu.memory_space<vmem>>, %arg3: memref<1x64xf32, #tpu.memory_space<vmem>>, %arg4: memref<64x16xbf16, #tpu.memory_space<vmem>>, %arg5: memref<1x16xf32, #tpu.memory_space<vmem>>, %arg6: memref<144x128xbf16, #tpu.memory_space<vmem>>, %arg7: memref<1x128xf32, #tpu.memory_space<vmem>>, %arg8: memref<128x32xbf16, #tpu.memory_space<vmem>>, %arg9: memref<1x32xf32, #tpu.memory_space<vmem>>, %arg10: memref<288x128xbf16, #tpu.memory_space<vmem>>, %arg11: memref<1x128xf32, #tpu.memory_space<vmem>>, %arg12: memref<128x64xbf16, #tpu.memory_space<vmem>>, %arg13: memref<1x64xf32, #tpu.memory_space<vmem>>, %arg14: memref<576x256xbf16, #tpu.memory_space<vmem>>, %arg15: memref<1x256xf32, #tpu.memory_space<vmem>>, %arg16: memref<256x64xbf16, #tpu.memory_space<vmem>>, %arg17: memref<1x64xf32, #tpu.memory_space<vmem>>, %arg18: memref<576x512xbf16, #tpu.memory_space<vmem>>, %arg19: memref<1x512xf32, #tpu.memory_space<vmem>>, %arg20: memref<64x256xbf16, #tpu.memory_space<vmem>>, %arg21: memref<16x64xbf16, #tpu.memory_space<vmem>>, %arg22: memref<4x16xbf16, #tpu.memory_space<vmem>>, %arg23: memref<1x4x512xf32, #tpu.memory_space<vmem>>, %arg24: memref<320x256xf32, #tpu.memory_space<vmem>>, %arg25: memref<256x576xbf16, #tpu.memory_space<vmem>>) attributes {dimension_semantics = [#tpu.dimension_semantics<parallel>], iteration_bounds = array<i64: 2>, scalar_prefetch = 0 : i64, scratch_operands = 2 : i64, tpu.core_type = #tpu.core_type<tc>, window_params = [{transform_indices = @transform_0, window_bounds = array<i64: 1, 256, 32>}, {pipeline_mode = #tpu.pipeline_mode<synchronous>, transform_indices = @transform_1, window_bounds = array<i64: 32, 64>}, {pipeline_mode = #tpu.pipeline_mode<synchronous>, transform_indices = @transform_2, window_bounds = array<i64: 1, 64>}, {pipeline_mode = #tpu.pipeline_mode<synchronous>, transform_indices = @transform_3, window_bounds = array<i64: 64, 16>}, {pipeline_mode = #tpu.pipeline_mode<synchronous>, transform_indices = @transform_4, window_bounds = array<i64: 1, 16>}, {pipeline_mode = #tpu.pipeline_mode<synchronous>, transform_indices = @transform_5, window_bounds = array<i64: 144, 128>}, {pipeline_mode = #tpu.pipeline_mode<synchronous>, transform_indices = @transform_6, window_bounds = array<i64: 1, 128>}, {pipeline_mode = #tpu.pipeline_mode<synchronous>, transform_indices = @transform_7, window_bounds = array<i64: 128, 32>}, {pipeline_mode = #tpu.pipeline_mode<synchronous>, transform_indices = @transform_8, window_bounds = array<i64: 1, 32>}, {pipeline_mode = #tpu.pipeline_mode<synchronous>, transform_indices = @transform_9, window_bounds = array<i64: 288, 128>}, {pipeline_mode = #tpu.pipeline_mode<synchronous>, transform_indices = @transform_10, window_bounds = array<i64: 1, 128>}, {pipeline_mode = #tpu.pipeline_mode<synchronous>, transform_indices = @transform_11, window_bounds = array<i64: 128, 64>}, {pipeline_mode = #tpu.pipeline_mode<synchronous>, transform_indices = @transform_12, window_bounds = array<i64: 1, 64>}, {pipeline_mode = #tpu.pipeline_mode<synchronous>, transform_indices = @transform_13, window_bounds = array<i64: 576, 256>}, {pipeline_mode = #tpu.pipeline_mode<synchronous>, transform_indices = @transform_14, window_bounds = array<i64: 1, 256>}, {pipeline_mode = #tpu.pipeline_mode<synchronous>, transform_indices = @transform_15, window_bounds = array<i64: 256, 64>}, {pipeline_mode = #tpu.pipeline_mode<synchronous>, transform_indices = @transform_16, window_bounds = array<i64: 1, 64>}, {pipeline_mode = #tpu.pipeline_mode<synchronous>, transform_indices = @transform_17, window_bounds = array<i64: 576, 512>}, {pipeline_mode = #tpu.pipeline_mode<synchronous>, transform_indices = @transform_18, window_bounds = array<i64: 1, 512>}, {pipeline_mode = #tpu.pipeline_mode<synchronous>, transform_indices = @transform_19, window_bounds = array<i64: 64, 256>}, {pipeline_mode = #tpu.pipeline_mode<synchronous>, transform_indices = @transform_20, window_bounds = array<i64: 16, 64>}, {pipeline_mode = #tpu.pipeline_mode<synchronous>, transform_indices = @transform_21, window_bounds = array<i64: 4, 16>}, {transform_indices = @transform_22, window_bounds = array<i64: 1, 4, 512>}]} {
    %cst = arith.constant 0.000000e+00 : f32
    %0 = vector.broadcast %cst : f32 to vector<320x256xf32>
    %c0 = arith.constant 0 : index
    %c0_0 = arith.constant 0 : index
    %1 = vector.load %arg24[%c0, %c0_0] : memref<320x256xf32, #tpu.memory_space<vmem>>, vector<320x256xf32>
    tpu.vector_store %arg24[%c0, %c0_0], %0 {strides = array<i32>} : memref<320x256xf32, #tpu.memory_space<vmem>>, vector<320x256xf32>,
    %c0_1 = arith.constant 0 : index
    %c0_2 = arith.constant 0 : index
    %c0_3 = arith.constant 0 : index
    %2 = vector.load %arg1[%c0_1, %c0_2, %c0_3] : memref<1x256x32xbf16, #tpu.memory_space<vmem>>, vector<1x256x32xbf16>
    %3 = vector.shape_cast %2 : vector<1x256x32xbf16> to vector<256x32xbf16>
    %c0_4 = arith.constant 0 : index
    %c0_5 = arith.constant 0 : index
    %4 = vector.load %arg2[%c0_4, %c0_5] : memref<32x64xbf16, #tpu.memory_space<vmem>>, vector<32x64xbf16>
    %cst_6 = arith.constant dense<0.000000e+00> : vector<256x64xf32>
    %5 = tpu.matmul %3, %4, %cst_6 {dimension_numbers = #tpu.dot_dimension_numbers<[1], [0], [0], [1], [0, 0, 1, 1], [], []>} : vector<256x32xbf16>, vector<32x64xbf16>, vector<256x64xf32> -> vector<256x64xf32>
    %c0_7 = arith.constant 0 : index
    %c0_8 = arith.constant 0 : index
    %6 = vector.load %arg3[%c0_7, %c0_8] : memref<1x64xf32, #tpu.memory_space<vmem>>, vector<1x64xf32>
    %7 = vector.broadcast %6 : vector<1x64xf32> to vector<256x64xf32>
    %8 = arith.addf %5, %7 : vector<256x64xf32>
    %cst_9 = arith.constant 0.000000e+00 : f32
    %9 = vector.broadcast %cst_9 : f32 to vector<256x64xf32>
    %10 = arith.maximumf %8, %9 : vector<256x64xf32>
    %c0_10 = arith.constant 0 : index
    %c0_11 = arith.constant 0 : index
    %11 = vector.load %arg4[%c0_10, %c0_11] : memref<64x16xbf16, #tpu.memory_space<vmem>>, vector<64x16xbf16>
    %12 = arith.truncf %10 : vector<256x64xf32> to vector<256x64xbf16>
    %cst_12 = arith.constant dense<0.000000e+00> : vector<256x16xf32>
    %13 = tpu.matmul %12, %11, %cst_12 {dimension_numbers = #tpu.dot_dimension_numbers<[1], [0], [0], [1], [0, 0, 1, 1], [], []>} : vector<256x64xbf16>, vector<64x16xbf16>, vector<256x16xf32> -> vector<256x16xf32>
    %c0_13 = arith.constant 0 : index
    %c0_14 = arith.constant 0 : index
    %14 = vector.load %arg5[%c0_13, %c0_14] : memref<1x16xf32, #tpu.memory_space<vmem>>, vector<1x16xf32>
    %15 = vector.broadcast %14 : vector<1x16xf32> to vector<256x16xf32>
    %16 = arith.addf %13, %15 : vector<256x16xf32>
    %cst_15 = arith.constant 0.000000e+00 : f32
    %17 = vector.broadcast %cst_15 : f32 to vector<256x16xf32>
    %18 = arith.maximumf %16, %17 : vector<256x16xf32>
    %c24 = arith.constant 24 : index
    %c0_16 = arith.constant 0 : index
    %19 = vector.load %arg24[%c24, %c0_16] : memref<320x256xf32, #tpu.memory_space<vmem>>, vector<256x16xf32>
    tpu.vector_store %arg24[%c24, %c0_16], %18 {strides = array<i32>} : memref<320x256xf32, #tpu.memory_space<vmem>>, vector<256x16xf32>,
    %cst_17 = arith.constant 0.000000e+00 : f32
    %20 = vector.broadcast %cst_17 : f32 to vector<17x16xf32>
    %c280 = arith.constant 280 : index
    %c0_18 = arith.constant 0 : index
    %21 = vector.load %arg24[%c280, %c0_18] : memref<320x256xf32, #tpu.memory_space<vmem>>, vector<17x16xf32>
    tpu.vector_store %arg24[%c280, %c0_18], %20 {strides = array<i32>} : memref<320x256xf32, #tpu.memory_space<vmem>>, vector<17x16xf32>,
    %22 = tpu.iota {dimensions = array<i32: 0>} : vector<256x1xi32>
    %c15_i32 = arith.constant 15 : i32
    %23 = vector.broadcast %c15_i32 : i32 to vector<256x1xi32>
    %24 = arith.andi %22, %23 : vector<256x1xi32>
    %25 = arith.truncf %18 : vector<256x16xf32> to vector<256x16xbf16>
    %c7 = arith.constant 7 : index
    %c0_19 = arith.constant 0 : index
    %26 = vector.load %arg24[%c7, %c0_19] : memref<320x256xf32, #tpu.memory_space<vmem>>, vector<256x16xf32>
    %c-1_i32 = arith.constant -1 : i32
    %27 = vector.broadcast %c-1_i32 : i32 to vector<256x1xi32>
    %28 = arith.addi %24, %27 : vector<256x1xi32>
    %c0_i32 = arith.constant 0 : i32
    %29 = vector.broadcast %c0_i32 : i32 to vector<256x1xi32>
    %30 = arith.cmpi sge, %28, %29 : vector<256x1xi32>
    %c-1_i32_20 = arith.constant -1 : i32
    %31 = vector.broadcast %c-1_i32_20 : i32 to vector<256x1xi32>
    %32 = arith.addi %24, %31 : vector<256x1xi32>
    %c16_i32 = arith.constant 16 : i32
    %33 = vector.broadcast %c16_i32 : i32 to vector<256x1xi32>
    %34 = arith.cmpi slt, %32, %33 : vector<256x1xi32>
    %35 = arith.andi %30, %34 : vector<256x1xi1>
    %cst_21 = arith.constant 0.000000e+00 : f32
    %36 = vector.shape_cast %35 : vector<256x1xi1> to vector<256x1xi1>
    %37 = vector.broadcast %36 : vector<256x1xi1> to vector<256x16xi1>
    %38 = vector.broadcast %cst_21 : f32 to vector<256x16xf32>
    %39 = arith.select %37, %26, %38 : vector<256x16xi1>, vector<256x16xf32>
    %40 = arith.truncf %39 : vector<256x16xf32> to vector<256x16xbf16>
    %c0_22 = arith.constant 0 : index
    %c0_23 = arith.constant 0 : index
    %41 = vector.load %arg25[%c0_22, %c0_23] : memref<256x576xbf16, #tpu.memory_space<vmem>>, vector<256x16xbf16>
    tpu.vector_store %arg25[%c0_22, %c0_23], %40 {strides = array<i32>} : memref<256x576xbf16, #tpu.memory_space<vmem>>, vector<256x16xbf16>,
    %c8 = arith.constant 8 : index
    %c0_24 = arith.constant 0 : index
    %42 = vector.load %arg24[%c8, %c0_24] : memref<320x256xf32, #tpu.memory_space<vmem>>, vector<256x16xf32>
    %43 = arith.truncf %42 : vector<256x16xf32> to vector<256x16xbf16>
    %c0_25 = arith.constant 0 : index
    %c16 = arith.constant 16 : index
    %44 = vector.load %arg25[%c0_25, %c16] : memref<256x576xbf16, #tpu.memory_space<vmem>>, vector<256x16xbf16>
    tpu.vector_store %arg25[%c0_25, %c16], %43 {strides = array<i32>} : memref<256x576xbf16, #tpu.memory_space<vmem>>, vector<256x16xbf16>,
    %c9 = arith.constant 9 : index
    %c0_26 = arith.constant 0 : index
    %45 = vector.load %arg24[%c9, %c0_26] : memref<320x256xf32, #tpu.memory_space<vmem>>, vector<256x16xf32>
    %c1_i32 = arith.constant 1 : i32
    %46 = vector.broadcast %c1_i32 : i32 to vector<256x1xi32>
    %47 = arith.addi %24, %46 : vector<256x1xi32>
    %c0_i32_27 = arith.constant 0 : i32
    %48 = vector.broadcast %c0_i32_27 : i32 to vector<256x1xi32>
    %49 = arith.cmpi sge, %47, %48 : vector<256x1xi32>
    %c1_i32_28 = arith.constant 1 : i32
    %50 = vector.broadcast %c1_i32_28 : i32 to vector<256x1xi32>
    %51 = arith.addi %24, %50 : vector<256x1xi32>
    %c16_i32_29 = arith.constant 16 : i32
    %52 = vector.broadcast %c16_i32_29 : i32 to vector<256x1xi32>
    %53 = arith.cmpi slt, %51, %52 : vector<256x1xi32>
    %54 = arith.andi %49, %53 : vector<256x1xi1>
    %cst_30 = arith.constant 0.000000e+00 : f32
    %55 = vector.shape_cast %54 : vector<256x1xi1> to vector<256x1xi1>
    %56 = vector.broadcast %55 : vector<256x1xi1> to vector<256x16xi1>
    %57 = vector.broadcast %cst_30 : f32 to vector<256x16xf32>
    %58 = arith.select %56, %45, %57 : vector<256x16xi1>, vector<256x16xf32>
    %59 = arith.truncf %58 : vector<256x16xf32> to vector<256x16xbf16>
    %c0_31 = arith.constant 0 : index
    %c32 = arith.constant 32 : index
    %60 = vector.load %arg25[%c0_31, %c32] : memref<256x576xbf16, #tpu.memory_space<vmem>>, vector<256x16xbf16>
    tpu.vector_store %arg25[%c0_31, %c32], %59 {strides = array<i32>} : memref<256x576xbf16, #tpu.memory_space<vmem>>, vector<256x16xbf16>,
    %c23 = arith.constant 23 : index
    %c0_32 = arith.constant 0 : index
    %61 = vector.load %arg24[%c23, %c0_32] : memref<320x256xf32, #tpu.memory_space<vmem>>, vector<256x16xf32>
    %c-1_i32_33 = arith.constant -1 : i32
    %62 = vector.broadcast %c-1_i32_33 : i32 to vector<256x1xi32>
    %63 = arith.addi %24, %62 : vector<256x1xi32>
    %c0_i32_34 = arith.constant 0 : i32
    %64 = vector.broadcast %c0_i32_34 : i32 to vector<256x1xi32>
    %65 = arith.cmpi sge, %63, %64 : vector<256x1xi32>
    %c-1_i32_35 = arith.constant -1 : i32
    %66 = vector.broadcast %c-1_i32_35 : i32 to vector<256x1xi32>
    %67 = arith.addi %24, %66 : vector<256x1xi32>
    %c16_i32_36 = arith.constant 16 : i32
    %68 = vector.broadcast %c16_i32_36 : i32 to vector<256x1xi32>
    %69 = arith.cmpi slt, %67, %68 : vector<256x1xi32>
    %70 = arith.andi %65, %69 : vector<256x1xi1>
    %cst_37 = arith.constant 0.000000e+00 : f32
    %71 = vector.shape_cast %70 : vector<256x1xi1> to vector<256x1xi1>
    %72 = vector.broadcast %71 : vector<256x1xi1> to vector<256x16xi1>
    %73 = vector.broadcast %cst_37 : f32 to vector<256x16xf32>
    %74 = arith.select %72, %61, %73 : vector<256x16xi1>, vector<256x16xf32>
    %75 = arith.truncf %74 : vector<256x16xf32> to vector<256x16xbf16>
    %c0_38 = arith.constant 0 : index
    %c48 = arith.constant 48 : index
    %76 = vector.load %arg25[%c0_38, %c48] : memref<256x576xbf16, #tpu.memory_space<vmem>>, vector<256x16xbf16>
    tpu.vector_store %arg25[%c0_38, %c48], %75 {strides = array<i32>} : memref<256x576xbf16, #tpu.memory_space<vmem>>, vector<256x16xbf16>,
    %c0_39 = arith.constant 0 : index
    %c64 = arith.constant 64 : index
    %77 = vector.load %arg25[%c0_39, %c64] : memref<256x576xbf16, #tpu.memory_space<vmem>>, vector<256x16xbf16>
    tpu.vector_store %arg25[%c0_39, %c64], %25 {strides = array<i32>} : memref<256x576xbf16, #tpu.memory_space<vmem>>, vector<256x16xbf16>,
    %c25 = arith.constant 25 : index
    %c0_40 = arith.constant 0 : index
    %78 = vector.load %arg24[%c25, %c0_40] : memref<320x256xf32, #tpu.memory_space<vmem>>, vector<256x16xf32>
    %c1_i32_41 = arith.constant 1 : i32
    %79 = vector.broadcast %c1_i32_41 : i32 to vector<256x1xi32>
    %80 = arith.addi %24, %79 : vector<256x1xi32>
    %c0_i32_42 = arith.constant 0 : i32
    %81 = vector.broadcast %c0_i32_42 : i32 to vector<256x1xi32>
    %82 = arith.cmpi sge, %80, %81 : vector<256x1xi32>
    %c1_i32_43 = arith.constant 1 : i32
    %83 = vector.broadcast %c1_i32_43 : i32 to vector<256x1xi32>
    %84 = arith.addi %24, %83 : vector<256x1xi32>
    %c16_i32_44 = arith.constant 16 : i32
    %85 = vector.broadcast %c16_i32_44 : i32 to vector<256x1xi32>
    %86 = arith.cmpi slt, %84, %85 : vector<256x1xi32>
    %87 = arith.andi %82, %86 : vector<256x1xi1>
    %cst_45 = arith.constant 0.000000e+00 : f32
    %88 = vector.shape_cast %87 : vector<256x1xi1> to vector<256x1xi1>
    %89 = vector.broadcast %88 : vector<256x1xi1> to vector<256x16xi1>
    %90 = vector.broadcast %cst_45 : f32 to vector<256x16xf32>
    %91 = arith.select %89, %78, %90 : vector<256x16xi1>, vector<256x16xf32>
    %92 = arith.truncf %91 : vector<256x16xf32> to vector<256x16xbf16>
    %c0_46 = arith.constant 0 : index
    %c80 = arith.constant 80 : index
    %93 = vector.load %arg25[%c0_46, %c80] : memref<256x576xbf16, #tpu.memory_space<vmem>>, vector<256x16xbf16>
    tpu.vector_store %arg25[%c0_46, %c80], %92 {strides = array<i32>} : memref<256x576xbf16, #tpu.memory_space<vmem>>, vector<256x16xbf16>,
    %c39 = arith.constant 39 : index
    %c0_47 = arith.constant 0 : index
    %94 = vector.load %arg24[%c39, %c0_47] : memref<320x256xf32, #tpu.memory_space<vmem>>, vector<256x16xf32>
    %c-1_i32_48 = arith.constant -1 : i32
    %95 = vector.broadcast %c-1_i32_48 : i32 to vector<256x1xi32>
    %96 = arith.addi %24, %95 : vector<256x1xi32>
    %c0_i32_49 = arith.constant 0 : i32
    %97 = vector.broadcast %c0_i32_49 : i32 to vector<256x1xi32>
    %98 = arith.cmpi sge, %96, %97 : vector<256x1xi32>
    %c-1_i32_50 = arith.constant -1 : i32
    %99 = vector.broadcast %c-1_i32_50 : i32 to vector<256x1xi32>
    %100 = arith.addi %24, %99 : vector<256x1xi32>
    %c16_i32_51 = arith.constant 16 : i32
    %101 = vector.broadcast %c16_i32_51 : i32 to vector<256x1xi32>
    %102 = arith.cmpi slt, %100, %101 : vector<256x1xi32>
    %103 = arith.andi %98, %102 : vector<256x1xi1>
    %cst_52 = arith.constant 0.000000e+00 : f32
    %104 = vector.shape_cast %103 : vector<256x1xi1> to vector<256x1xi1>
    %105 = vector.broadcast %104 : vector<256x1xi1> to vector<256x16xi1>
    %106 = vector.broadcast %cst_52 : f32 to vector<256x16xf32>
    %107 = arith.select %105, %94, %106 : vector<256x16xi1>, vector<256x16xf32>
    %108 = arith.truncf %107 : vector<256x16xf32> to vector<256x16xbf16>
    %c0_53 = arith.constant 0 : index
    %c96 = arith.constant 96 : index
    %109 = vector.load %arg25[%c0_53, %c96] : memref<256x576xbf16, #tpu.memory_space<vmem>>, vector<256x16xbf16>
    tpu.vector_store %arg25[%c0_53, %c96], %108 {strides = array<i32>} : memref<256x576xbf16, #tpu.memory_space<vmem>>, vector<256x16xbf16>,
    %c40 = arith.constant 40 : index
    %c0_54 = arith.constant 0 : index
    %110 = vector.load %arg24[%c40, %c0_54] : memref<320x256xf32, #tpu.memory_space<vmem>>, vector<256x16xf32>
    %111 = arith.truncf %110 : vector<256x16xf32> to vector<256x16xbf16>
    %c0_55 = arith.constant 0 : index
    %c112 = arith.constant 112 : index
    %112 = vector.load %arg25[%c0_55, %c112] : memref<256x576xbf16, #tpu.memory_space<vmem>>, vector<256x16xbf16>
    tpu.vector_store %arg25[%c0_55, %c112], %111 {strides = array<i32>} : memref<256x576xbf16, #tpu.memory_space<vmem>>, vector<256x16xbf16>,
    %c41 = arith.constant 41 : index
    %c0_56 = arith.constant 0 : index
    %113 = vector.load %arg24[%c41, %c0_56] : memref<320x256xf32, #tpu.memory_space<vmem>>, vector<256x16xf32>
    %c1_i32_57 = arith.constant 1 : i32
    %114 = vector.broadcast %c1_i32_57 : i32 to vector<256x1xi32>
    %115 = arith.addi %24, %114 : vector<256x1xi32>
    %c0_i32_58 = arith.constant 0 : i32
    %116 = vector.broadcast %c0_i32_58 : i32 to vector<256x1xi32>
    %117 = arith.cmpi sge, %115, %116 : vector<256x1xi32>
    %c1_i32_59 = arith.constant 1 : i32
    %118 = vector.broadcast %c1_i32_59 : i32 to vector<256x1xi32>
    %119 = arith.addi %24, %118 : vector<256x1xi32>
    %c16_i32_60 = arith.constant 16 : i32
    %120 = vector.broadcast %c16_i32_60 : i32 to vector<256x1xi32>
    %121 = arith.cmpi slt, %119, %120 : vector<256x1xi32>
    %122 = arith.andi %117, %121 : vector<256x1xi1>
    %cst_61 = arith.constant 0.000000e+00 : f32
    %123 = vector.shape_cast %122 : vector<256x1xi1> to vector<256x1xi1>
    %124 = vector.broadcast %123 : vector<256x1xi1> to vector<256x16xi1>
    %125 = vector.broadcast %cst_61 : f32 to vector<256x16xf32>
    %126 = arith.select %124, %113, %125 : vector<256x16xi1>, vector<256x16xf32>
    %127 = arith.truncf %126 : vector<256x16xf32> to vector<256x16xbf16>
    %c0_62 = arith.constant 0 : index
    %c128 = arith.constant 128 : index
    %128 = vector.load %arg25[%c0_62, %c128] : memref<256x576xbf16, #tpu.memory_space<vmem>>, vector<256x16xbf16>
    tpu.vector_store %arg25[%c0_62, %c128], %127 {strides = array<i32>} : memref<256x576xbf16, #tpu.memory_space<vmem>>, vector<256x16xbf16>,
    %c0_63 = arith.constant 0 : index
    %c0_64 = arith.constant 0 : index
    %129 = vector.load %arg25[%c0_63, %c0_64] : memref<256x576xbf16, #tpu.memory_space<vmem>>, vector<256x144xbf16>
    %c0_65 = arith.constant 0 : index
    %c0_66 = arith.constant 0 : index
    %130 = vector.load %arg6[%c0_65, %c0_66] : memref<144x128xbf16, #tpu.memory_space<vmem>>, vector<144x128xbf16>
    %cst_67 = arith.constant dense<0.000000e+00> : vector<256x128xf32>
    %131 = tpu.matmul %129, %130, %cst_67 {dimension_numbers = #tpu.dot_dimension_numbers<[1], [0], [0], [1], [0, 0, 1, 1], [], []>} : vector<256x144xbf16>, vector<144x128xbf16>, vector<256x128xf32> -> vector<256x128xf32>
    %c0_68 = arith.constant 0 : index
    %c0_69 = arith.constant 0 : index
    %132 = vector.load %arg7[%c0_68, %c0_69] : memref<1x128xf32, #tpu.memory_space<vmem>>, vector<1x128xf32>
    %133 = vector.broadcast %132 : vector<1x128xf32> to vector<256x128xf32>
    %134 = arith.addf %131, %133 : vector<256x128xf32>
    %cst_70 = arith.constant 0.000000e+00 : f32
    %135 = vector.broadcast %cst_70 : f32 to vector<256x128xf32>
    %136 = arith.maximumf %134, %135 : vector<256x128xf32>
    %c24_71 = arith.constant 24 : index
    %c0_72 = arith.constant 0 : index
    %137 = vector.load %arg24[%c24_71, %c0_72] : memref<320x256xf32, #tpu.memory_space<vmem>>, vector<256x128xf32>
    tpu.vector_store %arg24[%c24_71, %c0_72], %136 {strides = array<i32>} : memref<320x256xf32, #tpu.memory_space<vmem>>, vector<256x128xf32>,
    %cst_73 = arith.constant 0.000000e+00 : f32
    %138 = vector.broadcast %cst_73 : f32 to vector<17x128xf32>
    %c280_74 = arith.constant 280 : index
    %c0_75 = arith.constant 0 : index
    %139 = vector.load %arg24[%c280_74, %c0_75] : memref<320x256xf32, #tpu.memory_space<vmem>>, vector<17x128xf32>
    tpu.vector_store %arg24[%c280_74, %c0_75], %138 {strides = array<i32>} : memref<320x256xf32, #tpu.memory_space<vmem>>, vector<17x128xf32>,
    %140 = tpu.iota {dimensions = array<i32: 0>} : vector<256x1xi32>
    %c15_i32_76 = arith.constant 15 : i32
    %141 = vector.broadcast %c15_i32_76 : i32 to vector<256x1xi32>
    %142 = arith.andi %140, %141 : vector<256x1xi32>
    %c25_77 = arith.constant 25 : index
    %c0_78 = arith.constant 0 : index
    %143 = vector.load %arg24[%c25_77, %c0_78] : memref<320x256xf32, #tpu.memory_space<vmem>>, vector<256x128xf32>
    %c1_i32_79 = arith.constant 1 : i32
    %144 = vector.broadcast %c1_i32_79 : i32 to vector<256x1xi32>
    %145 = arith.addi %142, %144 : vector<256x1xi32>
    %c16_i32_80 = arith.constant 16 : i32
    %146 = vector.broadcast %c16_i32_80 : i32 to vector<256x1xi32>
    %147 = arith.cmpi slt, %145, %146 : vector<256x1xi32>
    %cst_81 = arith.constant 0.000000e+00 : f32
    %148 = vector.shape_cast %147 : vector<256x1xi1> to vector<256x1xi1>
    %149 = vector.broadcast %148 : vector<256x1xi1> to vector<256x128xi1>
    %150 = vector.broadcast %cst_81 : f32 to vector<256x128xf32>
    %151 = arith.select %149, %143, %150 : vector<256x128xi1>, vector<256x128xf32>
    %152 = arith.maximumf %136, %151 : vector<256x128xf32>
    %c26 = arith.constant 26 : index
    %c0_82 = arith.constant 0 : index
    %153 = vector.load %arg24[%c26, %c0_82] : memref<320x256xf32, #tpu.memory_space<vmem>>, vector<256x128xf32>
    %c2_i32 = arith.constant 2 : i32
    %154 = vector.broadcast %c2_i32 : i32 to vector<256x1xi32>
    %155 = arith.addi %142, %154 : vector<256x1xi32>
    %c16_i32_83 = arith.constant 16 : i32
    %156 = vector.broadcast %c16_i32_83 : i32 to vector<256x1xi32>
    %157 = arith.cmpi slt, %155, %156 : vector<256x1xi32>
    %cst_84 = arith.constant 0.000000e+00 : f32
    %158 = vector.shape_cast %157 : vector<256x1xi1> to vector<256x1xi1>
    %159 = vector.broadcast %158 : vector<256x1xi1> to vector<256x128xi1>
    %160 = vector.broadcast %cst_84 : f32 to vector<256x128xf32>
    %161 = arith.select %159, %153, %160 : vector<256x128xi1>, vector<256x128xf32>
    %162 = arith.maximumf %152, %161 : vector<256x128xf32>
    %c40_85 = arith.constant 40 : index
    %c0_86 = arith.constant 0 : index
    %163 = vector.load %arg24[%c40_85, %c0_86] : memref<320x256xf32, #tpu.memory_space<vmem>>, vector<256x128xf32>
    %164 = arith.maximumf %162, %163 : vector<256x128xf32>
    %c41_87 = arith.constant 41 : index
    %c0_88 = arith.constant 0 : index
    %165 = vector.load %arg24[%c41_87, %c0_88] : memref<320x256xf32, #tpu.memory_space<vmem>>, vector<256x128xf32>
    %c1_i32_89 = arith.constant 1 : i32
    %166 = vector.broadcast %c1_i32_89 : i32 to vector<256x1xi32>
    %167 = arith.addi %142, %166 : vector<256x1xi32>
    %c16_i32_90 = arith.constant 16 : i32
    %168 = vector.broadcast %c16_i32_90 : i32 to vector<256x1xi32>
    %169 = arith.cmpi slt, %167, %168 : vector<256x1xi32>
    %cst_91 = arith.constant 0.000000e+00 : f32
    %170 = vector.shape_cast %169 : vector<256x1xi1> to vector<256x1xi1>
    %171 = vector.broadcast %170 : vector<256x1xi1> to vector<256x128xi1>
    %172 = vector.broadcast %cst_91 : f32 to vector<256x128xf32>
    %173 = arith.select %171, %165, %172 : vector<256x128xi1>, vector<256x128xf32>
    %174 = arith.maximumf %164, %173 : vector<256x128xf32>
    %c42 = arith.constant 42 : index
    %c0_92 = arith.constant 0 : index
    %175 = vector.load %arg24[%c42, %c0_92] : memref<320x256xf32, #tpu.memory_space<vmem>>, vector<256x128xf32>
    %c2_i32_93 = arith.constant 2 : i32
    %176 = vector.broadcast %c2_i32_93 : i32 to vector<256x1xi32>
    %177 = arith.addi %142, %176 : vector<256x1xi32>
    %c16_i32_94 = arith.constant 16 : i32
    %178 = vector.broadcast %c16_i32_94 : i32 to vector<256x1xi32>
    %179 = arith.cmpi slt, %177, %178 : vector<256x1xi32>
    %cst_95 = arith.constant 0.000000e+00 : f32
    %180 = vector.shape_cast %179 : vector<256x1xi1> to vector<256x1xi1>
    %181 = vector.broadcast %180 : vector<256x1xi1> to vector<256x128xi1>
    %182 = vector.broadcast %cst_95 : f32 to vector<256x128xf32>
    %183 = arith.select %181, %175, %182 : vector<256x128xi1>, vector<256x128xf32>
    %184 = arith.maximumf %174, %183 : vector<256x128xf32>
    %c56 = arith.constant 56 : index
    %c0_96 = arith.constant 0 : index
    %185 = vector.load %arg24[%c56, %c0_96] : memref<320x256xf32, #tpu.memory_space<vmem>>, vector<256x128xf32>
    %186 = arith.maximumf %184, %185 : vector<256x128xf32>
    %c57 = arith.constant 57 : index
    %c0_97 = arith.constant 0 : index
    %187 = vector.load %arg24[%c57, %c0_97] : memref<320x256xf32, #tpu.memory_space<vmem>>, vector<256x128xf32>
    %c1_i32_98 = arith.constant 1 : i32
    %188 = vector.broadcast %c1_i32_98 : i32 to vector<256x1xi32>
    %189 = arith.addi %142, %188 : vector<256x1xi32>
    %c16_i32_99 = arith.constant 16 : i32
    %190 = vector.broadcast %c16_i32_99 : i32 to vector<256x1xi32>
    %191 = arith.cmpi slt, %189, %190 : vector<256x1xi32>
    %cst_100 = arith.constant 0.000000e+00 : f32
    %192 = vector.shape_cast %191 : vector<256x1xi1> to vector<256x1xi1>
    %193 = vector.broadcast %192 : vector<256x1xi1> to vector<256x128xi1>
    %194 = vector.broadcast %cst_100 : f32 to vector<256x128xf32>
    %195 = arith.select %193, %187, %194 : vector<256x128xi1>, vector<256x128xf32>
    %196 = arith.maximumf %186, %195 : vector<256x128xf32>
    %c58 = arith.constant 58 : index
    %c0_101 = arith.constant 0 : index
    %197 = vector.load %arg24[%c58, %c0_101] : memref<320x256xf32, #tpu.memory_space<vmem>>, vector<256x128xf32>
    %c2_i32_102 = arith.constant 2 : i32
    %198 = vector.broadcast %c2_i32_102 : i32 to vector<256x1xi32>
    %199 = arith.addi %142, %198 : vector<256x1xi32>
    %c16_i32_103 = arith.constant 16 : i32
    %200 = vector.broadcast %c16_i32_103 : i32 to vector<256x1xi32>
    %201 = arith.cmpi slt, %199, %200 : vector<256x1xi32>
    %cst_104 = arith.constant 0.000000e+00 : f32
    %202 = vector.shape_cast %201 : vector<256x1xi1> to vector<256x1xi1>
    %203 = vector.broadcast %202 : vector<256x1xi1> to vector<256x128xi1>
    %204 = vector.broadcast %cst_104 : f32 to vector<256x128xf32>
    %205 = arith.select %203, %197, %204 : vector<256x128xi1>, vector<256x128xf32>
    %206 = arith.maximumf %196, %205 : vector<256x128xf32>
    %c0_105 = arith.constant 0 : index
    %c0_106 = arith.constant 0 : index
    %207 = vector.load %arg20[%c0_105, %c0_106] : memref<64x256xbf16, #tpu.memory_space<vmem>>, vector<64x256xbf16>
    %208 = arith.truncf %206 : vector<256x128xf32> to vector<256x128xbf16>
    %cst_107 = arith.constant dense<0.000000e+00> : vector<64x128xf32>
    %209 = tpu.matmul %207, %208, %cst_107 {dimension_numbers = #tpu.dot_dimension_numbers<[1], [0], [0], [1], [0, 0, 1, 1], [], []>} : vector<64x256xbf16>, vector<256x128xbf16>, vector<64x128xf32> -> vector<64x128xf32>
    %c0_108 = arith.constant 0 : index
    %c0_109 = arith.constant 0 : index
    %210 = vector.load %arg8[%c0_108, %c0_109] : memref<128x32xbf16, #tpu.memory_space<vmem>>, vector<128x32xbf16>
    %211 = arith.truncf %209 : vector<64x128xf32> to vector<64x128xbf16>
    %cst_110 = arith.constant dense<0.000000e+00> : vector<64x32xf32>
    %212 = tpu.matmul %211, %210, %cst_110 {dimension_numbers = #tpu.dot_dimension_numbers<[1], [0], [0], [1], [0, 0, 1, 1], [], []>} : vector<64x128xbf16>, vector<128x32xbf16>, vector<64x32xf32> -> vector<64x32xf32>
    %c0_111 = arith.constant 0 : index
    %c0_112 = arith.constant 0 : index
    %213 = vector.load %arg9[%c0_111, %c0_112] : memref<1x32xf32, #tpu.memory_space<vmem>>, vector<1x32xf32>
    %214 = vector.broadcast %213 : vector<1x32xf32> to vector<64x32xf32>
    %215 = arith.addf %212, %214 : vector<64x32xf32>
    %cst_113 = arith.constant 0.000000e+00 : f32
    %216 = vector.broadcast %cst_113 : f32 to vector<64x32xf32>
    %217 = arith.maximumf %215, %216 : vector<64x32xf32>
    %c24_114 = arith.constant 24 : index
    %c0_115 = arith.constant 0 : index
    %218 = vector.load %arg24[%c24_114, %c0_115] : memref<320x256xf32, #tpu.memory_space<vmem>>, vector<64x32xf32>
    tpu.vector_store %arg24[%c24_114, %c0_115], %217 {strides = array<i32>} : memref<320x256xf32, #tpu.memory_space<vmem>>, vector<64x32xf32>,
    %cst_116 = arith.constant 0.000000e+00 : f32
    %219 = vector.broadcast %cst_116 : f32 to vector<17x32xf32>
    %c88 = arith.constant 88 : index
    %c0_117 = arith.constant 0 : index
    %220 = vector.load %arg24[%c88, %c0_117] : memref<320x256xf32, #tpu.memory_space<vmem>>, vector<17x32xf32>
    tpu.vector_store %arg24[%c88, %c0_117], %219 {strides = array<i32>} : memref<320x256xf32, #tpu.memory_space<vmem>>, vector<17x32xf32>,
    %221 = tpu.iota {dimensions = array<i32: 0>} : vector<64x1xi32>
    %c7_i32 = arith.constant 7 : i32
    %222 = vector.broadcast %c7_i32 : i32 to vector<64x1xi32>
    %223 = arith.andi %221, %222 : vector<64x1xi32>
    %224 = arith.truncf %217 : vector<64x32xf32> to vector<64x32xbf16>
    %c15 = arith.constant 15 : index
    %c0_118 = arith.constant 0 : index
    %225 = vector.load %arg24[%c15, %c0_118] : memref<320x256xf32, #tpu.memory_space<vmem>>, vector<64x32xf32>
    %c-1_i32_119 = arith.constant -1 : i32
    %226 = vector.broadcast %c-1_i32_119 : i32 to vector<64x1xi32>
    %227 = arith.addi %223, %226 : vector<64x1xi32>
    %c0_i32_120 = arith.constant 0 : i32
    %228 = vector.broadcast %c0_i32_120 : i32 to vector<64x1xi32>
    %229 = arith.cmpi sge, %227, %228 : vector<64x1xi32>
    %c-1_i32_121 = arith.constant -1 : i32
    %230 = vector.broadcast %c-1_i32_121 : i32 to vector<64x1xi32>
    %231 = arith.addi %223, %230 : vector<64x1xi32>
    %c8_i32 = arith.constant 8 : i32
    %232 = vector.broadcast %c8_i32 : i32 to vector<64x1xi32>
    %233 = arith.cmpi slt, %231, %232 : vector<64x1xi32>
    %234 = arith.andi %229, %233 : vector<64x1xi1>
    %cst_122 = arith.constant 0.000000e+00 : f32
    %235 = vector.shape_cast %234 : vector<64x1xi1> to vector<64x1xi1>
    %236 = vector.broadcast %235 : vector<64x1xi1> to vector<64x32xi1>
    %237 = vector.broadcast %cst_122 : f32 to vector<64x32xf32>
    %238 = arith.select %236, %225, %237 : vector<64x32xi1>, vector<64x32xf32>
    %239 = arith.truncf %238 : vector<64x32xf32> to vector<64x32xbf16>
    %c0_123 = arith.constant 0 : index
    %c0_124 = arith.constant 0 : index
    %240 = vector.load %arg25[%c0_123, %c0_124] : memref<256x576xbf16, #tpu.memory_space<vmem>>, vector<64x32xbf16>
    tpu.vector_store %arg25[%c0_123, %c0_124], %239 {strides = array<i32>} : memref<256x576xbf16, #tpu.memory_space<vmem>>, vector<64x32xbf16>,
    %c16_125 = arith.constant 16 : index
    %c0_126 = arith.constant 0 : index
    %241 = vector.load %arg24[%c16_125, %c0_126] : memref<320x256xf32, #tpu.memory_space<vmem>>, vector<64x32xf32>
    %242 = arith.truncf %241 : vector<64x32xf32> to vector<64x32xbf16>
    %c0_127 = arith.constant 0 : index
    %c32_128 = arith.constant 32 : index
    %243 = vector.load %arg25[%c0_127, %c32_128] : memref<256x576xbf16, #tpu.memory_space<vmem>>, vector<64x32xbf16>
    tpu.vector_store %arg25[%c0_127, %c32_128], %242 {strides = array<i32>} : memref<256x576xbf16, #tpu.memory_space<vmem>>, vector<64x32xbf16>,
    %c17 = arith.constant 17 : index
    %c0_129 = arith.constant 0 : index
    %244 = vector.load %arg24[%c17, %c0_129] : memref<320x256xf32, #tpu.memory_space<vmem>>, vector<64x32xf32>
    %c1_i32_130 = arith.constant 1 : i32
    %245 = vector.broadcast %c1_i32_130 : i32 to vector<64x1xi32>
    %246 = arith.addi %223, %245 : vector<64x1xi32>
    %c0_i32_131 = arith.constant 0 : i32
    %247 = vector.broadcast %c0_i32_131 : i32 to vector<64x1xi32>
    %248 = arith.cmpi sge, %246, %247 : vector<64x1xi32>
    %c1_i32_132 = arith.constant 1 : i32
    %249 = vector.broadcast %c1_i32_132 : i32 to vector<64x1xi32>
    %250 = arith.addi %223, %249 : vector<64x1xi32>
    %c8_i32_133 = arith.constant 8 : i32
    %251 = vector.broadcast %c8_i32_133 : i32 to vector<64x1xi32>
    %252 = arith.cmpi slt, %250, %251 : vector<64x1xi32>
    %253 = arith.andi %248, %252 : vector<64x1xi1>
    %cst_134 = arith.constant 0.000000e+00 : f32
    %254 = vector.shape_cast %253 : vector<64x1xi1> to vector<64x1xi1>
    %255 = vector.broadcast %254 : vector<64x1xi1> to vector<64x32xi1>
    %256 = vector.broadcast %cst_134 : f32 to vector<64x32xf32>
    %257 = arith.select %255, %244, %256 : vector<64x32xi1>, vector<64x32xf32>
    %258 = arith.truncf %257 : vector<64x32xf32> to vector<64x32xbf16>
    %c0_135 = arith.constant 0 : index
    %c64_136 = arith.constant 64 : index
    %259 = vector.load %arg25[%c0_135, %c64_136] : memref<256x576xbf16, #tpu.memory_space<vmem>>, vector<64x32xbf16>
    tpu.vector_store %arg25[%c0_135, %c64_136], %258 {strides = array<i32>} : memref<256x576xbf16, #tpu.memory_space<vmem>>, vector<64x32xbf16>,
    %c23_137 = arith.constant 23 : index
    %c0_138 = arith.constant 0 : index
    %260 = vector.load %arg24[%c23_137, %c0_138] : memref<320x256xf32, #tpu.memory_space<vmem>>, vector<64x32xf32>
    %c-1_i32_139 = arith.constant -1 : i32
    %261 = vector.broadcast %c-1_i32_139 : i32 to vector<64x1xi32>
    %262 = arith.addi %223, %261 : vector<64x1xi32>
    %c0_i32_140 = arith.constant 0 : i32
    %263 = vector.broadcast %c0_i32_140 : i32 to vector<64x1xi32>
    %264 = arith.cmpi sge, %262, %263 : vector<64x1xi32>
    %c-1_i32_141 = arith.constant -1 : i32
    %265 = vector.broadcast %c-1_i32_141 : i32 to vector<64x1xi32>
    %266 = arith.addi %223, %265 : vector<64x1xi32>
    %c8_i32_142 = arith.constant 8 : i32
    %267 = vector.broadcast %c8_i32_142 : i32 to vector<64x1xi32>
    %268 = arith.cmpi slt, %266, %267 : vector<64x1xi32>
    %269 = arith.andi %264, %268 : vector<64x1xi1>
    %cst_143 = arith.constant 0.000000e+00 : f32
    %270 = vector.shape_cast %269 : vector<64x1xi1> to vector<64x1xi1>
    %271 = vector.broadcast %270 : vector<64x1xi1> to vector<64x32xi1>
    %272 = vector.broadcast %cst_143 : f32 to vector<64x32xf32>
    %273 = arith.select %271, %260, %272 : vector<64x32xi1>, vector<64x32xf32>
    %274 = arith.truncf %273 : vector<64x32xf32> to vector<64x32xbf16>
    %c0_144 = arith.constant 0 : index
    %c96_145 = arith.constant 96 : index
    %275 = vector.load %arg25[%c0_144, %c96_145] : memref<256x576xbf16, #tpu.memory_space<vmem>>, vector<64x32xbf16>
    tpu.vector_store %arg25[%c0_144, %c96_145], %274 {strides = array<i32>} : memref<256x576xbf16, #tpu.memory_space<vmem>>, vector<64x32xbf16>,
    %c0_146 = arith.constant 0 : index
    %c128_147 = arith.constant 128 : index
    %276 = vector.load %arg25[%c0_146, %c128_147] : memref<256x576xbf16, #tpu.memory_space<vmem>>, vector<64x32xbf16>
    tpu.vector_store %arg25[%c0_146, %c128_147], %224 {strides = array<i32>} : memref<256x576xbf16, #tpu.memory_space<vmem>>, vector<64x32xbf16>,
    %c25_148 = arith.constant 25 : index
    %c0_149 = arith.constant 0 : index
    %277 = vector.load %arg24[%c25_148, %c0_149] : memref<320x256xf32, #tpu.memory_space<vmem>>, vector<64x32xf32>
    %c1_i32_150 = arith.constant 1 : i32
    %278 = vector.broadcast %c1_i32_150 : i32 to vector<64x1xi32>
    %279 = arith.addi %223, %278 : vector<64x1xi32>
    %c0_i32_151 = arith.constant 0 : i32
    %280 = vector.broadcast %c0_i32_151 : i32 to vector<64x1xi32>
    %281 = arith.cmpi sge, %279, %280 : vector<64x1xi32>
    %c1_i32_152 = arith.constant 1 : i32
    %282 = vector.broadcast %c1_i32_152 : i32 to vector<64x1xi32>
    %283 = arith.addi %223, %282 : vector<64x1xi32>
    %c8_i32_153 = arith.constant 8 : i32
    %284 = vector.broadcast %c8_i32_153 : i32 to vector<64x1xi32>
    %285 = arith.cmpi slt, %283, %284 : vector<64x1xi32>
    %286 = arith.andi %281, %285 : vector<64x1xi1>
    %cst_154 = arith.constant 0.000000e+00 : f32
    %287 = vector.shape_cast %286 : vector<64x1xi1> to vector<64x1xi1>
    %288 = vector.broadcast %287 : vector<64x1xi1> to vector<64x32xi1>
    %289 = vector.broadcast %cst_154 : f32 to vector<64x32xf32>
    %290 = arith.select %288, %277, %289 : vector<64x32xi1>, vector<64x32xf32>
    %291 = arith.truncf %290 : vector<64x32xf32> to vector<64x32xbf16>
    %c0_155 = arith.constant 0 : index
    %c160 = arith.constant 160 : index
    %292 = vector.load %arg25[%c0_155, %c160] : memref<256x576xbf16, #tpu.memory_space<vmem>>, vector<64x32xbf16>
    tpu.vector_store %arg25[%c0_155, %c160], %291 {strides = array<i32>} : memref<256x576xbf16, #tpu.memory_space<vmem>>, vector<64x32xbf16>,
    %c31 = arith.constant 31 : index
    %c0_156 = arith.constant 0 : index
    %293 = vector.load %arg24[%c31, %c0_156] : memref<320x256xf32, #tpu.memory_space<vmem>>, vector<64x32xf32>
    %c-1_i32_157 = arith.constant -1 : i32
    %294 = vector.broadcast %c-1_i32_157 : i32 to vector<64x1xi32>
    %295 = arith.addi %223, %294 : vector<64x1xi32>
    %c0_i32_158 = arith.constant 0 : i32
    %296 = vector.broadcast %c0_i32_158 : i32 to vector<64x1xi32>
    %297 = arith.cmpi sge, %295, %296 : vector<64x1xi32>
    %c-1_i32_159 = arith.constant -1 : i32
    %298 = vector.broadcast %c-1_i32_159 : i32 to vector<64x1xi32>
    %299 = arith.addi %223, %298 : vector<64x1xi32>
    %c8_i32_160 = arith.constant 8 : i32
    %300 = vector.broadcast %c8_i32_160 : i32 to vector<64x1xi32>
    %301 = arith.cmpi slt, %299, %300 : vector<64x1xi32>
    %302 = arith.andi %297, %301 : vector<64x1xi1>
    %cst_161 = arith.constant 0.000000e+00 : f32
    %303 = vector.shape_cast %302 : vector<64x1xi1> to vector<64x1xi1>
    %304 = vector.broadcast %303 : vector<64x1xi1> to vector<64x32xi1>
    %305 = vector.broadcast %cst_161 : f32 to vector<64x32xf32>
    %306 = arith.select %304, %293, %305 : vector<64x32xi1>, vector<64x32xf32>
    %307 = arith.truncf %306 : vector<64x32xf32> to vector<64x32xbf16>
    %c0_162 = arith.constant 0 : index
    %c192 = arith.constant 192 : index
    %308 = vector.load %arg25[%c0_162, %c192] : memref<256x576xbf16, #tpu.memory_space<vmem>>, vector<64x32xbf16>
    tpu.vector_store %arg25[%c0_162, %c192], %307 {strides = array<i32>} : memref<256x576xbf16, #tpu.memory_space<vmem>>, vector<64x32xbf16>,
    %c32_163 = arith.constant 32 : index
    %c0_164 = arith.constant 0 : index
    %309 = vector.load %arg24[%c32_163, %c0_164] : memref<320x256xf32, #tpu.memory_space<vmem>>, vector<64x32xf32>
    %310 = arith.truncf %309 : vector<64x32xf32> to vector<64x32xbf16>
    %c0_165 = arith.constant 0 : index
    %c224 = arith.constant 224 : index
    %311 = vector.load %arg25[%c0_165, %c224] : memref<256x576xbf16, #tpu.memory_space<vmem>>, vector<64x32xbf16>
    tpu.vector_store %arg25[%c0_165, %c224], %310 {strides = array<i32>} : memref<256x576xbf16, #tpu.memory_space<vmem>>, vector<64x32xbf16>,
    %c33 = arith.constant 33 : index
    %c0_166 = arith.constant 0 : index
    %312 = vector.load %arg24[%c33, %c0_166] : memref<320x256xf32, #tpu.memory_space<vmem>>, vector<64x32xf32>
    %c1_i32_167 = arith.constant 1 : i32
    %313 = vector.broadcast %c1_i32_167 : i32 to vector<64x1xi32>
    %314 = arith.addi %223, %313 : vector<64x1xi32>
    %c0_i32_168 = arith.constant 0 : i32
    %315 = vector.broadcast %c0_i32_168 : i32 to vector<64x1xi32>
    %316 = arith.cmpi sge, %314, %315 : vector<64x1xi32>
    %c1_i32_169 = arith.constant 1 : i32
    %317 = vector.broadcast %c1_i32_169 : i32 to vector<64x1xi32>
    %318 = arith.addi %223, %317 : vector<64x1xi32>
    %c8_i32_170 = arith.constant 8 : i32
    %319 = vector.broadcast %c8_i32_170 : i32 to vector<64x1xi32>
    %320 = arith.cmpi slt, %318, %319 : vector<64x1xi32>
    %321 = arith.andi %316, %320 : vector<64x1xi1>
    %cst_171 = arith.constant 0.000000e+00 : f32
    %322 = vector.shape_cast %321 : vector<64x1xi1> to vector<64x1xi1>
    %323 = vector.broadcast %322 : vector<64x1xi1> to vector<64x32xi1>
    %324 = vector.broadcast %cst_171 : f32 to vector<64x32xf32>
    %325 = arith.select %323, %312, %324 : vector<64x32xi1>, vector<64x32xf32>
    %326 = arith.truncf %325 : vector<64x32xf32> to vector<64x32xbf16>
    %c0_172 = arith.constant 0 : index
    %c256 = arith.constant 256 : index
    %327 = vector.load %arg25[%c0_172, %c256] : memref<256x576xbf16, #tpu.memory_space<vmem>>, vector<64x32xbf16>
    tpu.vector_store %arg25[%c0_172, %c256], %326 {strides = array<i32>} : memref<256x576xbf16, #tpu.memory_space<vmem>>, vector<64x32xbf16>,
    %c0_173 = arith.constant 0 : index
    %c0_174 = arith.constant 0 : index
    %328 = vector.load %arg25[%c0_173, %c0_174] : memref<256x576xbf16, #tpu.memory_space<vmem>>, vector<64x288xbf16>
    %c0_175 = arith.constant 0 : index
    %c0_176 = arith.constant 0 : index
    %329 = vector.load %arg10[%c0_175, %c0_176] : memref<288x128xbf16, #tpu.memory_space<vmem>>, vector<288x128xbf16>
    %cst_177 = arith.constant dense<0.000000e+00> : vector<64x128xf32>
    %330 = tpu.matmul %328, %329, %cst_177 {dimension_numbers = #tpu.dot_dimension_numbers<[1], [0], [0], [1], [0, 0, 1, 1], [], []>} : vector<64x288xbf16>, vector<288x128xbf16>, vector<64x128xf32> -> vector<64x128xf32>
    %c0_178 = arith.constant 0 : index
    %c0_179 = arith.constant 0 : index
    %331 = vector.load %arg11[%c0_178, %c0_179] : memref<1x128xf32, #tpu.memory_space<vmem>>, vector<1x128xf32>
    %332 = vector.broadcast %331 : vector<1x128xf32> to vector<64x128xf32>
    %333 = arith.addf %330, %332 : vector<64x128xf32>
    %cst_180 = arith.constant 0.000000e+00 : f32
    %334 = vector.broadcast %cst_180 : f32 to vector<64x128xf32>
    %335 = arith.maximumf %333, %334 : vector<64x128xf32>
    %c24_181 = arith.constant 24 : index
    %c0_182 = arith.constant 0 : index
    %336 = vector.load %arg24[%c24_181, %c0_182] : memref<320x256xf32, #tpu.memory_space<vmem>>, vector<64x128xf32>
    tpu.vector_store %arg24[%c24_181, %c0_182], %335 {strides = array<i32>} : memref<320x256xf32, #tpu.memory_space<vmem>>, vector<64x128xf32>,
    %cst_183 = arith.constant 0.000000e+00 : f32
    %337 = vector.broadcast %cst_183 : f32 to vector<17x128xf32>
    %c88_184 = arith.constant 88 : index
    %c0_185 = arith.constant 0 : index
    %338 = vector.load %arg24[%c88_184, %c0_185] : memref<320x256xf32, #tpu.memory_space<vmem>>, vector<17x128xf32>
    tpu.vector_store %arg24[%c88_184, %c0_185], %337 {strides = array<i32>} : memref<320x256xf32, #tpu.memory_space<vmem>>, vector<17x128xf32>,
    %339 = tpu.iota {dimensions = array<i32: 0>} : vector<64x1xi32>
    %c7_i32_186 = arith.constant 7 : i32
    %340 = vector.broadcast %c7_i32_186 : i32 to vector<64x1xi32>
    %341 = arith.andi %339, %340 : vector<64x1xi32>
    %c25_187 = arith.constant 25 : index
    %c0_188 = arith.constant 0 : index
    %342 = vector.load %arg24[%c25_187, %c0_188] : memref<320x256xf32, #tpu.memory_space<vmem>>, vector<64x128xf32>
    %c1_i32_189 = arith.constant 1 : i32
    %343 = vector.broadcast %c1_i32_189 : i32 to vector<64x1xi32>
    %344 = arith.addi %341, %343 : vector<64x1xi32>
    %c8_i32_190 = arith.constant 8 : i32
    %345 = vector.broadcast %c8_i32_190 : i32 to vector<64x1xi32>
    %346 = arith.cmpi slt, %344, %345 : vector<64x1xi32>
    %cst_191 = arith.constant 0.000000e+00 : f32
    %347 = vector.shape_cast %346 : vector<64x1xi1> to vector<64x1xi1>
    %348 = vector.broadcast %347 : vector<64x1xi1> to vector<64x128xi1>
    %349 = vector.broadcast %cst_191 : f32 to vector<64x128xf32>
    %350 = arith.select %348, %342, %349 : vector<64x128xi1>, vector<64x128xf32>
    %351 = arith.maximumf %335, %350 : vector<64x128xf32>
    %c26_192 = arith.constant 26 : index
    %c0_193 = arith.constant 0 : index
    %352 = vector.load %arg24[%c26_192, %c0_193] : memref<320x256xf32, #tpu.memory_space<vmem>>, vector<64x128xf32>
    %c2_i32_194 = arith.constant 2 : i32
    %353 = vector.broadcast %c2_i32_194 : i32 to vector<64x1xi32>
    %354 = arith.addi %341, %353 : vector<64x1xi32>
    %c8_i32_195 = arith.constant 8 : i32
    %355 = vector.broadcast %c8_i32_195 : i32 to vector<64x1xi32>
    %356 = arith.cmpi slt, %354, %355 : vector<64x1xi32>
    %cst_196 = arith.constant 0.000000e+00 : f32
    %357 = vector.shape_cast %356 : vector<64x1xi1> to vector<64x1xi1>
    %358 = vector.broadcast %357 : vector<64x1xi1> to vector<64x128xi1>
    %359 = vector.broadcast %cst_196 : f32 to vector<64x128xf32>
    %360 = arith.select %358, %352, %359 : vector<64x128xi1>, vector<64x128xf32>
    %361 = arith.maximumf %351, %360 : vector<64x128xf32>
    %c32_197 = arith.constant 32 : index
    %c0_198 = arith.constant 0 : index
    %362 = vector.load %arg24[%c32_197, %c0_198] : memref<320x256xf32, #tpu.memory_space<vmem>>, vector<64x128xf32>
    %363 = arith.maximumf %361, %362 : vector<64x128xf32>
    %c33_199 = arith.constant 33 : index
    %c0_200 = arith.constant 0 : index
    %364 = vector.load %arg24[%c33_199, %c0_200] : memref<320x256xf32, #tpu.memory_space<vmem>>, vector<64x128xf32>
    %c1_i32_201 = arith.constant 1 : i32
    %365 = vector.broadcast %c1_i32_201 : i32 to vector<64x1xi32>
    %366 = arith.addi %341, %365 : vector<64x1xi32>
    %c8_i32_202 = arith.constant 8 : i32
    %367 = vector.broadcast %c8_i32_202 : i32 to vector<64x1xi32>
    %368 = arith.cmpi slt, %366, %367 : vector<64x1xi32>
    %cst_203 = arith.constant 0.000000e+00 : f32
    %369 = vector.shape_cast %368 : vector<64x1xi1> to vector<64x1xi1>
    %370 = vector.broadcast %369 : vector<64x1xi1> to vector<64x128xi1>
    %371 = vector.broadcast %cst_203 : f32 to vector<64x128xf32>
    %372 = arith.select %370, %364, %371 : vector<64x128xi1>, vector<64x128xf32>
    %373 = arith.maximumf %363, %372 : vector<64x128xf32>
    %c34 = arith.constant 34 : index
    %c0_204 = arith.constant 0 : index
    %374 = vector.load %arg24[%c34, %c0_204] : memref<320x256xf32, #tpu.memory_space<vmem>>, vector<64x128xf32>
    %c2_i32_205 = arith.constant 2 : i32
    %375 = vector.broadcast %c2_i32_205 : i32 to vector<64x1xi32>
    %376 = arith.addi %341, %375 : vector<64x1xi32>
    %c8_i32_206 = arith.constant 8 : i32
    %377 = vector.broadcast %c8_i32_206 : i32 to vector<64x1xi32>
    %378 = arith.cmpi slt, %376, %377 : vector<64x1xi32>
    %cst_207 = arith.constant 0.000000e+00 : f32
    %379 = vector.shape_cast %378 : vector<64x1xi1> to vector<64x1xi1>
    %380 = vector.broadcast %379 : vector<64x1xi1> to vector<64x128xi1>
    %381 = vector.broadcast %cst_207 : f32 to vector<64x128xf32>
    %382 = arith.select %380, %374, %381 : vector<64x128xi1>, vector<64x128xf32>
    %383 = arith.maximumf %373, %382 : vector<64x128xf32>
    %c40_208 = arith.constant 40 : index
    %c0_209 = arith.constant 0 : index
    %384 = vector.load %arg24[%c40_208, %c0_209] : memref<320x256xf32, #tpu.memory_space<vmem>>, vector<64x128xf32>
    %385 = arith.maximumf %383, %384 : vector<64x128xf32>
    %c41_210 = arith.constant 41 : index
    %c0_211 = arith.constant 0 : index
    %386 = vector.load %arg24[%c41_210, %c0_211] : memref<320x256xf32, #tpu.memory_space<vmem>>, vector<64x128xf32>
    %c1_i32_212 = arith.constant 1 : i32
    %387 = vector.broadcast %c1_i32_212 : i32 to vector<64x1xi32>
    %388 = arith.addi %341, %387 : vector<64x1xi32>
    %c8_i32_213 = arith.constant 8 : i32
    %389 = vector.broadcast %c8_i32_213 : i32 to vector<64x1xi32>
    %390 = arith.cmpi slt, %388, %389 : vector<64x1xi32>
    %cst_214 = arith.constant 0.000000e+00 : f32
    %391 = vector.shape_cast %390 : vector<64x1xi1> to vector<64x1xi1>
    %392 = vector.broadcast %391 : vector<64x1xi1> to vector<64x128xi1>
    %393 = vector.broadcast %cst_214 : f32 to vector<64x128xf32>
    %394 = arith.select %392, %386, %393 : vector<64x128xi1>, vector<64x128xf32>
    %395 = arith.maximumf %385, %394 : vector<64x128xf32>
    %c42_215 = arith.constant 42 : index
    %c0_216 = arith.constant 0 : index
    %396 = vector.load %arg24[%c42_215, %c0_216] : memref<320x256xf32, #tpu.memory_space<vmem>>, vector<64x128xf32>
    %c2_i32_217 = arith.constant 2 : i32
    %397 = vector.broadcast %c2_i32_217 : i32 to vector<64x1xi32>
    %398 = arith.addi %341, %397 : vector<64x1xi32>
    %c8_i32_218 = arith.constant 8 : i32
    %399 = vector.broadcast %c8_i32_218 : i32 to vector<64x1xi32>
    %400 = arith.cmpi slt, %398, %399 : vector<64x1xi32>
    %cst_219 = arith.constant 0.000000e+00 : f32
    %401 = vector.shape_cast %400 : vector<64x1xi1> to vector<64x1xi1>
    %402 = vector.broadcast %401 : vector<64x1xi1> to vector<64x128xi1>
    %403 = vector.broadcast %cst_219 : f32 to vector<64x128xf32>
    %404 = arith.select %402, %396, %403 : vector<64x128xi1>, vector<64x128xf32>
    %405 = arith.maximumf %395, %404 : vector<64x128xf32>
    %c0_220 = arith.constant 0 : index
    %c0_221 = arith.constant 0 : index
    %406 = vector.load %arg21[%c0_220, %c0_221] : memref<16x64xbf16, #tpu.memory_space<vmem>>, vector<16x64xbf16>
    %407 = arith.truncf %405 : vector<64x128xf32> to vector<64x128xbf16>
    %cst_222 = arith.constant dense<0.000000e+00> : vector<16x128xf32>
    %408 = tpu.matmul %406, %407, %cst_222 {dimension_numbers = #tpu.dot_dimension_numbers<[1], [0], [0], [1], [0, 0, 1, 1], [], []>} : vector<16x64xbf16>, vector<64x128xbf16>, vector<16x128xf32> -> vector<16x128xf32>
    %c0_223 = arith.constant 0 : index
    %c0_224 = arith.constant 0 : index
    %409 = vector.load %arg12[%c0_223, %c0_224] : memref<128x64xbf16, #tpu.memory_space<vmem>>, vector<128x64xbf16>
    %410 = arith.truncf %408 : vector<16x128xf32> to vector<16x128xbf16>
    %cst_225 = arith.constant dense<0.000000e+00> : vector<16x64xf32>
    %411 = tpu.matmul %410, %409, %cst_225 {dimension_numbers = #tpu.dot_dimension_numbers<[1], [0], [0], [1], [0, 0, 1, 1], [], []>} : vector<16x128xbf16>, vector<128x64xbf16>, vector<16x64xf32> -> vector<16x64xf32>
    %c0_226 = arith.constant 0 : index
    %c0_227 = arith.constant 0 : index
    %412 = vector.load %arg13[%c0_226, %c0_227] : memref<1x64xf32, #tpu.memory_space<vmem>>, vector<1x64xf32>
    %413 = vector.broadcast %412 : vector<1x64xf32> to vector<16x64xf32>
    %414 = arith.addf %411, %413 : vector<16x64xf32>
    %cst_228 = arith.constant 0.000000e+00 : f32
    %415 = vector.broadcast %cst_228 : f32 to vector<16x64xf32>
    %416 = arith.maximumf %414, %415 : vector<16x64xf32>
    %c24_229 = arith.constant 24 : index
    %c0_230 = arith.constant 0 : index
    %417 = vector.load %arg24[%c24_229, %c0_230] : memref<320x256xf32, #tpu.memory_space<vmem>>, vector<16x64xf32>
    tpu.vector_store %arg24[%c24_229, %c0_230], %416 {strides = array<i32>} : memref<320x256xf32, #tpu.memory_space<vmem>>, vector<16x64xf32>,
    %cst_231 = arith.constant 0.000000e+00 : f32
    %418 = vector.broadcast %cst_231 : f32 to vector<17x64xf32>
    %c40_232 = arith.constant 40 : index
    %c0_233 = arith.constant 0 : index
    %419 = vector.load %arg24[%c40_232, %c0_233] : memref<320x256xf32, #tpu.memory_space<vmem>>, vector<17x64xf32>
    tpu.vector_store %arg24[%c40_232, %c0_233], %418 {strides = array<i32>} : memref<320x256xf32, #tpu.memory_space<vmem>>, vector<17x64xf32>,
    %420 = tpu.iota {dimensions = array<i32: 0>} : vector<16x1xi32>
    %c3_i32 = arith.constant 3 : i32
    %421 = vector.broadcast %c3_i32 : i32 to vector<16x1xi32>
    %422 = arith.andi %420, %421 : vector<16x1xi32>
    %423 = arith.truncf %416 : vector<16x64xf32> to vector<16x64xbf16>
    %c19 = arith.constant 19 : index
    %c0_234 = arith.constant 0 : index
    %424 = vector.load %arg24[%c19, %c0_234] : memref<320x256xf32, #tpu.memory_space<vmem>>, vector<16x64xf32>
    %c-1_i32_235 = arith.constant -1 : i32
    %425 = vector.broadcast %c-1_i32_235 : i32 to vector<16x1xi32>
    %426 = arith.addi %422, %425 : vector<16x1xi32>
    %c0_i32_236 = arith.constant 0 : i32
    %427 = vector.broadcast %c0_i32_236 : i32 to vector<16x1xi32>
    %428 = arith.cmpi sge, %426, %427 : vector<16x1xi32>
    %c-1_i32_237 = arith.constant -1 : i32
    %429 = vector.broadcast %c-1_i32_237 : i32 to vector<16x1xi32>
    %430 = arith.addi %422, %429 : vector<16x1xi32>
    %c4_i32 = arith.constant 4 : i32
    %431 = vector.broadcast %c4_i32 : i32 to vector<16x1xi32>
    %432 = arith.cmpi slt, %430, %431 : vector<16x1xi32>
    %433 = arith.andi %428, %432 : vector<16x1xi1>
    %cst_238 = arith.constant 0.000000e+00 : f32
    %434 = vector.shape_cast %433 : vector<16x1xi1> to vector<16x1xi1>
    %435 = vector.broadcast %434 : vector<16x1xi1> to vector<16x64xi1>
    %436 = vector.broadcast %cst_238 : f32 to vector<16x64xf32>
    %437 = arith.select %435, %424, %436 : vector<16x64xi1>, vector<16x64xf32>
    %438 = arith.truncf %437 : vector<16x64xf32> to vector<16x64xbf16>
    %c0_239 = arith.constant 0 : index
    %c0_240 = arith.constant 0 : index
    %439 = vector.load %arg25[%c0_239, %c0_240] : memref<256x576xbf16, #tpu.memory_space<vmem>>, vector<16x64xbf16>
    tpu.vector_store %arg25[%c0_239, %c0_240], %438 {strides = array<i32>} : memref<256x576xbf16, #tpu.memory_space<vmem>>, vector<16x64xbf16>,
    %c20 = arith.constant 20 : index
    %c0_241 = arith.constant 0 : index
    %440 = vector.load %arg24[%c20, %c0_241] : memref<320x256xf32, #tpu.memory_space<vmem>>, vector<16x64xf32>
    %441 = arith.truncf %440 : vector<16x64xf32> to vector<16x64xbf16>
    %c0_242 = arith.constant 0 : index
    %c64_243 = arith.constant 64 : index
    %442 = vector.load %arg25[%c0_242, %c64_243] : memref<256x576xbf16, #tpu.memory_space<vmem>>, vector<16x64xbf16>
    tpu.vector_store %arg25[%c0_242, %c64_243], %441 {strides = array<i32>} : memref<256x576xbf16, #tpu.memory_space<vmem>>, vector<16x64xbf16>,
    %c21 = arith.constant 21 : index
    %c0_244 = arith.constant 0 : index
    %443 = vector.load %arg24[%c21, %c0_244] : memref<320x256xf32, #tpu.memory_space<vmem>>, vector<16x64xf32>
    %c1_i32_245 = arith.constant 1 : i32
    %444 = vector.broadcast %c1_i32_245 : i32 to vector<16x1xi32>
    %445 = arith.addi %422, %444 : vector<16x1xi32>
    %c0_i32_246 = arith.constant 0 : i32
    %446 = vector.broadcast %c0_i32_246 : i32 to vector<16x1xi32>
    %447 = arith.cmpi sge, %445, %446 : vector<16x1xi32>
    %c1_i32_247 = arith.constant 1 : i32
    %448 = vector.broadcast %c1_i32_247 : i32 to vector<16x1xi32>
    %449 = arith.addi %422, %448 : vector<16x1xi32>
    %c4_i32_248 = arith.constant 4 : i32
    %450 = vector.broadcast %c4_i32_248 : i32 to vector<16x1xi32>
    %451 = arith.cmpi slt, %449, %450 : vector<16x1xi32>
    %452 = arith.andi %447, %451 : vector<16x1xi1>
    %cst_249 = arith.constant 0.000000e+00 : f32
    %453 = vector.shape_cast %452 : vector<16x1xi1> to vector<16x1xi1>
    %454 = vector.broadcast %453 : vector<16x1xi1> to vector<16x64xi1>
    %455 = vector.broadcast %cst_249 : f32 to vector<16x64xf32>
    %456 = arith.select %454, %443, %455 : vector<16x64xi1>, vector<16x64xf32>
    %457 = arith.truncf %456 : vector<16x64xf32> to vector<16x64xbf16>
    %c0_250 = arith.constant 0 : index
    %c128_251 = arith.constant 128 : index
    %458 = vector.load %arg25[%c0_250, %c128_251] : memref<256x576xbf16, #tpu.memory_space<vmem>>, vector<16x64xbf16>
    tpu.vector_store %arg25[%c0_250, %c128_251], %457 {strides = array<i32>} : memref<256x576xbf16, #tpu.memory_space<vmem>>, vector<16x64xbf16>,
    %c23_252 = arith.constant 23 : index
    %c0_253 = arith.constant 0 : index
    %459 = vector.load %arg24[%c23_252, %c0_253] : memref<320x256xf32, #tpu.memory_space<vmem>>, vector<16x64xf32>
    %c-1_i32_254 = arith.constant -1 : i32
    %460 = vector.broadcast %c-1_i32_254 : i32 to vector<16x1xi32>
    %461 = arith.addi %422, %460 : vector<16x1xi32>
    %c0_i32_255 = arith.constant 0 : i32
    %462 = vector.broadcast %c0_i32_255 : i32 to vector<16x1xi32>
    %463 = arith.cmpi sge, %461, %462 : vector<16x1xi32>
    %c-1_i32_256 = arith.constant -1 : i32
    %464 = vector.broadcast %c-1_i32_256 : i32 to vector<16x1xi32>
    %465 = arith.addi %422, %464 : vector<16x1xi32>
    %c4_i32_257 = arith.constant 4 : i32
    %466 = vector.broadcast %c4_i32_257 : i32 to vector<16x1xi32>
    %467 = arith.cmpi slt, %465, %466 : vector<16x1xi32>
    %468 = arith.andi %463, %467 : vector<16x1xi1>
    %cst_258 = arith.constant 0.000000e+00 : f32
    %469 = vector.shape_cast %468 : vector<16x1xi1> to vector<16x1xi1>
    %470 = vector.broadcast %469 : vector<16x1xi1> to vector<16x64xi1>
    %471 = vector.broadcast %cst_258 : f32 to vector<16x64xf32>
    %472 = arith.select %470, %459, %471 : vector<16x64xi1>, vector<16x64xf32>
    %473 = arith.truncf %472 : vector<16x64xf32> to vector<16x64xbf16>
    %c0_259 = arith.constant 0 : index
    %c192_260 = arith.constant 192 : index
    %474 = vector.load %arg25[%c0_259, %c192_260] : memref<256x576xbf16, #tpu.memory_space<vmem>>, vector<16x64xbf16>
    tpu.vector_store %arg25[%c0_259, %c192_260], %473 {strides = array<i32>} : memref<256x576xbf16, #tpu.memory_space<vmem>>, vector<16x64xbf16>,
    %c0_261 = arith.constant 0 : index
    %c256_262 = arith.constant 256 : index
    %475 = vector.load %arg25[%c0_261, %c256_262] : memref<256x576xbf16, #tpu.memory_space<vmem>>, vector<16x64xbf16>
    tpu.vector_store %arg25[%c0_261, %c256_262], %423 {strides = array<i32>} : memref<256x576xbf16, #tpu.memory_space<vmem>>, vector<16x64xbf16>,
    %c25_263 = arith.constant 25 : index
    %c0_264 = arith.constant 0 : index
    %476 = vector.load %arg24[%c25_263, %c0_264] : memref<320x256xf32, #tpu.memory_space<vmem>>, vector<16x64xf32>
    %c1_i32_265 = arith.constant 1 : i32
    %477 = vector.broadcast %c1_i32_265 : i32 to vector<16x1xi32>
    %478 = arith.addi %422, %477 : vector<16x1xi32>
    %c0_i32_266 = arith.constant 0 : i32
    %479 = vector.broadcast %c0_i32_266 : i32 to vector<16x1xi32>
    %480 = arith.cmpi sge, %478, %479 : vector<16x1xi32>
    %c1_i32_267 = arith.constant 1 : i32
    %481 = vector.broadcast %c1_i32_267 : i32 to vector<16x1xi32>
    %482 = arith.addi %422, %481 : vector<16x1xi32>
    %c4_i32_268 = arith.constant 4 : i32
    %483 = vector.broadcast %c4_i32_268 : i32 to vector<16x1xi32>
    %484 = arith.cmpi slt, %482, %483 : vector<16x1xi32>
    %485 = arith.andi %480, %484 : vector<16x1xi1>
    %cst_269 = arith.constant 0.000000e+00 : f32
    %486 = vector.shape_cast %485 : vector<16x1xi1> to vector<16x1xi1>
    %487 = vector.broadcast %486 : vector<16x1xi1> to vector<16x64xi1>
    %488 = vector.broadcast %cst_269 : f32 to vector<16x64xf32>
    %489 = arith.select %487, %476, %488 : vector<16x64xi1>, vector<16x64xf32>
    %490 = arith.truncf %489 : vector<16x64xf32> to vector<16x64xbf16>
    %c0_270 = arith.constant 0 : index
    %c320 = arith.constant 320 : index
    %491 = vector.load %arg25[%c0_270, %c320] : memref<256x576xbf16, #tpu.memory_space<vmem>>, vector<16x64xbf16>
    tpu.vector_store %arg25[%c0_270, %c320], %490 {strides = array<i32>} : memref<256x576xbf16, #tpu.memory_space<vmem>>, vector<16x64xbf16>,
    %c27 = arith.constant 27 : index
    %c0_271 = arith.constant 0 : index
    %492 = vector.load %arg24[%c27, %c0_271] : memref<320x256xf32, #tpu.memory_space<vmem>>, vector<16x64xf32>
    %c-1_i32_272 = arith.constant -1 : i32
    %493 = vector.broadcast %c-1_i32_272 : i32 to vector<16x1xi32>
    %494 = arith.addi %422, %493 : vector<16x1xi32>
    %c0_i32_273 = arith.constant 0 : i32
    %495 = vector.broadcast %c0_i32_273 : i32 to vector<16x1xi32>
    %496 = arith.cmpi sge, %494, %495 : vector<16x1xi32>
    %c-1_i32_274 = arith.constant -1 : i32
    %497 = vector.broadcast %c-1_i32_274 : i32 to vector<16x1xi32>
    %498 = arith.addi %422, %497 : vector<16x1xi32>
    %c4_i32_275 = arith.constant 4 : i32
    %499 = vector.broadcast %c4_i32_275 : i32 to vector<16x1xi32>
    %500 = arith.cmpi slt, %498, %499 : vector<16x1xi32>
    %501 = arith.andi %496, %500 : vector<16x1xi1>
    %cst_276 = arith.constant 0.000000e+00 : f32
    %502 = vector.shape_cast %501 : vector<16x1xi1> to vector<16x1xi1>
    %503 = vector.broadcast %502 : vector<16x1xi1> to vector<16x64xi1>
    %504 = vector.broadcast %cst_276 : f32 to vector<16x64xf32>
    %505 = arith.select %503, %492, %504 : vector<16x64xi1>, vector<16x64xf32>
    %506 = arith.truncf %505 : vector<16x64xf32> to vector<16x64xbf16>
    %c0_277 = arith.constant 0 : index
    %c384 = arith.constant 384 : index
    %507 = vector.load %arg25[%c0_277, %c384] : memref<256x576xbf16, #tpu.memory_space<vmem>>, vector<16x64xbf16>
    tpu.vector_store %arg25[%c0_277, %c384], %506 {strides = array<i32>} : memref<256x576xbf16, #tpu.memory_space<vmem>>, vector<16x64xbf16>,
    %c28 = arith.constant 28 : index
    %c0_278 = arith.constant 0 : index
    %508 = vector.load %arg24[%c28, %c0_278] : memref<320x256xf32, #tpu.memory_space<vmem>>, vector<16x64xf32>
    %509 = arith.truncf %508 : vector<16x64xf32> to vector<16x64xbf16>
    %c0_279 = arith.constant 0 : index
    %c448 = arith.constant 448 : index
    %510 = vector.load %arg25[%c0_279, %c448] : memref<256x576xbf16, #tpu.memory_space<vmem>>, vector<16x64xbf16>
    tpu.vector_store %arg25[%c0_279, %c448], %509 {strides = array<i32>} : memref<256x576xbf16, #tpu.memory_space<vmem>>, vector<16x64xbf16>,
    %c29 = arith.constant 29 : index
    %c0_280 = arith.constant 0 : index
    %511 = vector.load %arg24[%c29, %c0_280] : memref<320x256xf32, #tpu.memory_space<vmem>>, vector<16x64xf32>
    %c1_i32_281 = arith.constant 1 : i32
    %512 = vector.broadcast %c1_i32_281 : i32 to vector<16x1xi32>
    %513 = arith.addi %422, %512 : vector<16x1xi32>
    %c0_i32_282 = arith.constant 0 : i32
    %514 = vector.broadcast %c0_i32_282 : i32 to vector<16x1xi32>
    %515 = arith.cmpi sge, %513, %514 : vector<16x1xi32>
    %c1_i32_283 = arith.constant 1 : i32
    %516 = vector.broadcast %c1_i32_283 : i32 to vector<16x1xi32>
    %517 = arith.addi %422, %516 : vector<16x1xi32>
    %c4_i32_284 = arith.constant 4 : i32
    %518 = vector.broadcast %c4_i32_284 : i32 to vector<16x1xi32>
    %519 = arith.cmpi slt, %517, %518 : vector<16x1xi32>
    %520 = arith.andi %515, %519 : vector<16x1xi1>
    %cst_285 = arith.constant 0.000000e+00 : f32
    %521 = vector.shape_cast %520 : vector<16x1xi1> to vector<16x1xi1>
    %522 = vector.broadcast %521 : vector<16x1xi1> to vector<16x64xi1>
    %523 = vector.broadcast %cst_285 : f32 to vector<16x64xf32>
    %524 = arith.select %522, %511, %523 : vector<16x64xi1>, vector<16x64xf32>
    %525 = arith.truncf %524 : vector<16x64xf32> to vector<16x64xbf16>
    %c0_286 = arith.constant 0 : index
    %c512 = arith.constant 512 : index
    %526 = vector.load %arg25[%c0_286, %c512] : memref<256x576xbf16, #tpu.memory_space<vmem>>, vector<16x64xbf16>
    tpu.vector_store %arg25[%c0_286, %c512], %525 {strides = array<i32>} : memref<256x576xbf16, #tpu.memory_space<vmem>>, vector<16x64xbf16>,
    %c0_287 = arith.constant 0 : index
    %c0_288 = arith.constant 0 : index
    %527 = vector.load %arg25[%c0_287, %c0_288] : memref<256x576xbf16, #tpu.memory_space<vmem>>, vector<16x576xbf16>
    %c0_289 = arith.constant 0 : index
    %c0_290 = arith.constant 0 : index
    %528 = vector.load %arg14[%c0_289, %c0_290] : memref<576x256xbf16, #tpu.memory_space<vmem>>, vector<576x256xbf16>
    %cst_291 = arith.constant dense<0.000000e+00> : vector<16x256xf32>
    %529 = tpu.matmul %527, %528, %cst_291 {dimension_numbers = #tpu.dot_dimension_numbers<[1], [0], [0], [1], [0, 0, 1, 1], [], []>} : vector<16x576xbf16>, vector<576x256xbf16>, vector<16x256xf32> -> vector<16x256xf32>
    %c0_292 = arith.constant 0 : index
    %c0_293 = arith.constant 0 : index
    %530 = vector.load %arg15[%c0_292, %c0_293] : memref<1x256xf32, #tpu.memory_space<vmem>>, vector<1x256xf32>
    %531 = vector.broadcast %530 : vector<1x256xf32> to vector<16x256xf32>
    %532 = arith.addf %529, %531 : vector<16x256xf32>
    %cst_294 = arith.constant 0.000000e+00 : f32
    %533 = vector.broadcast %cst_294 : f32 to vector<16x256xf32>
    %534 = arith.maximumf %532, %533 : vector<16x256xf32>
    %c24_295 = arith.constant 24 : index
    %c0_296 = arith.constant 0 : index
    %535 = vector.load %arg24[%c24_295, %c0_296] : memref<320x256xf32, #tpu.memory_space<vmem>>, vector<16x256xf32>
    tpu.vector_store %arg24[%c24_295, %c0_296], %534 {strides = array<i32>} : memref<320x256xf32, #tpu.memory_space<vmem>>, vector<16x256xf32>,
    %cst_297 = arith.constant 0.000000e+00 : f32
    %536 = vector.broadcast %cst_297 : f32 to vector<17x256xf32>
    %c40_298 = arith.constant 40 : index
    %c0_299 = arith.constant 0 : index
    %537 = vector.load %arg24[%c40_298, %c0_299] : memref<320x256xf32, #tpu.memory_space<vmem>>, vector<17x256xf32>
    tpu.vector_store %arg24[%c40_298, %c0_299], %536 {strides = array<i32>} : memref<320x256xf32, #tpu.memory_space<vmem>>, vector<17x256xf32>,
    %538 = tpu.iota {dimensions = array<i32: 0>} : vector<16x1xi32>
    %c3_i32_300 = arith.constant 3 : i32
    %539 = vector.broadcast %c3_i32_300 : i32 to vector<16x1xi32>
    %540 = arith.andi %538, %539 : vector<16x1xi32>
    %c25_301 = arith.constant 25 : index
    %c0_302 = arith.constant 0 : index
    %541 = vector.load %arg24[%c25_301, %c0_302] : memref<320x256xf32, #tpu.memory_space<vmem>>, vector<16x256xf32>
    %c1_i32_303 = arith.constant 1 : i32
    %542 = vector.broadcast %c1_i32_303 : i32 to vector<16x1xi32>
    %543 = arith.addi %540, %542 : vector<16x1xi32>
    %c4_i32_304 = arith.constant 4 : i32
    %544 = vector.broadcast %c4_i32_304 : i32 to vector<16x1xi32>
    %545 = arith.cmpi slt, %543, %544 : vector<16x1xi32>
    %cst_305 = arith.constant 0.000000e+00 : f32
    %546 = vector.shape_cast %545 : vector<16x1xi1> to vector<16x1xi1>
    %547 = vector.broadcast %546 : vector<16x1xi1> to vector<16x256xi1>
    %548 = vector.broadcast %cst_305 : f32 to vector<16x256xf32>
    %549 = arith.select %547, %541, %548 : vector<16x256xi1>, vector<16x256xf32>
    %550 = arith.maximumf %534, %549 : vector<16x256xf32>
    %c26_306 = arith.constant 26 : index
    %c0_307 = arith.constant 0 : index
    %551 = vector.load %arg24[%c26_306, %c0_307] : memref<320x256xf32, #tpu.memory_space<vmem>>, vector<16x256xf32>
    %c2_i32_308 = arith.constant 2 : i32
    %552 = vector.broadcast %c2_i32_308 : i32 to vector<16x1xi32>
    %553 = arith.addi %540, %552 : vector<16x1xi32>
    %c4_i32_309 = arith.constant 4 : i32
    %554 = vector.broadcast %c4_i32_309 : i32 to vector<16x1xi32>
    %555 = arith.cmpi slt, %553, %554 : vector<16x1xi32>
    %cst_310 = arith.constant 0.000000e+00 : f32
    %556 = vector.shape_cast %555 : vector<16x1xi1> to vector<16x1xi1>
    %557 = vector.broadcast %556 : vector<16x1xi1> to vector<16x256xi1>
    %558 = vector.broadcast %cst_310 : f32 to vector<16x256xf32>
    %559 = arith.select %557, %551, %558 : vector<16x256xi1>, vector<16x256xf32>
    %560 = arith.maximumf %550, %559 : vector<16x256xf32>
    %c28_311 = arith.constant 28 : index
    %c0_312 = arith.constant 0 : index
    %561 = vector.load %arg24[%c28_311, %c0_312] : memref<320x256xf32, #tpu.memory_space<vmem>>, vector<16x256xf32>
    %562 = arith.maximumf %560, %561 : vector<16x256xf32>
    %c29_313 = arith.constant 29 : index
    %c0_314 = arith.constant 0 : index
    %563 = vector.load %arg24[%c29_313, %c0_314] : memref<320x256xf32, #tpu.memory_space<vmem>>, vector<16x256xf32>
    %c1_i32_315 = arith.constant 1 : i32
    %564 = vector.broadcast %c1_i32_315 : i32 to vector<16x1xi32>
    %565 = arith.addi %540, %564 : vector<16x1xi32>
    %c4_i32_316 = arith.constant 4 : i32
    %566 = vector.broadcast %c4_i32_316 : i32 to vector<16x1xi32>
    %567 = arith.cmpi slt, %565, %566 : vector<16x1xi32>
    %cst_317 = arith.constant 0.000000e+00 : f32
    %568 = vector.shape_cast %567 : vector<16x1xi1> to vector<16x1xi1>
    %569 = vector.broadcast %568 : vector<16x1xi1> to vector<16x256xi1>
    %570 = vector.broadcast %cst_317 : f32 to vector<16x256xf32>
    %571 = arith.select %569, %563, %570 : vector<16x256xi1>, vector<16x256xf32>
    %572 = arith.maximumf %562, %571 : vector<16x256xf32>
    %c30 = arith.constant 30 : index
    %c0_318 = arith.constant 0 : index
    %573 = vector.load %arg24[%c30, %c0_318] : memref<320x256xf32, #tpu.memory_space<vmem>>, vector<16x256xf32>
    %c2_i32_319 = arith.constant 2 : i32
    %574 = vector.broadcast %c2_i32_319 : i32 to vector<16x1xi32>
    %575 = arith.addi %540, %574 : vector<16x1xi32>
    %c4_i32_320 = arith.constant 4 : i32
    %576 = vector.broadcast %c4_i32_320 : i32 to vector<16x1xi32>
    %577 = arith.cmpi slt, %575, %576 : vector<16x1xi32>
    %cst_321 = arith.constant 0.000000e+00 : f32
    %578 = vector.shape_cast %577 : vector<16x1xi1> to vector<16x1xi1>
    %579 = vector.broadcast %578 : vector<16x1xi1> to vector<16x256xi1>
    %580 = vector.broadcast %cst_321 : f32 to vector<16x256xf32>
    %581 = arith.select %579, %573, %580 : vector<16x256xi1>, vector<16x256xf32>
    %582 = arith.maximumf %572, %581 : vector<16x256xf32>
    %c32_322 = arith.constant 32 : index
    %c0_323 = arith.constant 0 : index
    %583 = vector.load %arg24[%c32_322, %c0_323] : memref<320x256xf32, #tpu.memory_space<vmem>>, vector<16x256xf32>
    %584 = arith.maximumf %582, %583 : vector<16x256xf32>
    %c33_324 = arith.constant 33 : index
    %c0_325 = arith.constant 0 : index
    %585 = vector.load %arg24[%c33_324, %c0_325] : memref<320x256xf32, #tpu.memory_space<vmem>>, vector<16x256xf32>
    %c1_i32_326 = arith.constant 1 : i32
    %586 = vector.broadcast %c1_i32_326 : i32 to vector<16x1xi32>
    %587 = arith.addi %540, %586 : vector<16x1xi32>
    %c4_i32_327 = arith.constant 4 : i32
    %588 = vector.broadcast %c4_i32_327 : i32 to vector<16x1xi32>
    %589 = arith.cmpi slt, %587, %588 : vector<16x1xi32>
    %cst_328 = arith.constant 0.000000e+00 : f32
    %590 = vector.shape_cast %589 : vector<16x1xi1> to vector<16x1xi1>
    %591 = vector.broadcast %590 : vector<16x1xi1> to vector<16x256xi1>
    %592 = vector.broadcast %cst_328 : f32 to vector<16x256xf32>
    %593 = arith.select %591, %585, %592 : vector<16x256xi1>, vector<16x256xf32>
    %594 = arith.maximumf %584, %593 : vector<16x256xf32>
    %c34_329 = arith.constant 34 : index
    %c0_330 = arith.constant 0 : index
    %595 = vector.load %arg24[%c34_329, %c0_330] : memref<320x256xf32, #tpu.memory_space<vmem>>, vector<16x256xf32>
    %c2_i32_331 = arith.constant 2 : i32
    %596 = vector.broadcast %c2_i32_331 : i32 to vector<16x1xi32>
    %597 = arith.addi %540, %596 : vector<16x1xi32>
    %c4_i32_332 = arith.constant 4 : i32
    %598 = vector.broadcast %c4_i32_332 : i32 to vector<16x1xi32>
    %599 = arith.cmpi slt, %597, %598 : vector<16x1xi32>
    %cst_333 = arith.constant 0.000000e+00 : f32
    %600 = vector.shape_cast %599 : vector<16x1xi1> to vector<16x1xi1>
    %601 = vector.broadcast %600 : vector<16x1xi1> to vector<16x256xi1>
    %602 = vector.broadcast %cst_333 : f32 to vector<16x256xf32>
    %603 = arith.select %601, %595, %602 : vector<16x256xi1>, vector<16x256xf32>
    %604 = arith.maximumf %594, %603 : vector<16x256xf32>
    %c0_334 = arith.constant 0 : index
    %c0_335 = arith.constant 0 : index
    %605 = vector.load %arg22[%c0_334, %c0_335] : memref<4x16xbf16, #tpu.memory_space<vmem>>, vector<4x16xbf16>
    %606 = arith.truncf %604 : vector<16x256xf32> to vector<16x256xbf16>
    %cst_336 = arith.constant dense<0.000000e+00> : vector<4x256xf32>
    %607 = tpu.matmul %605, %606, %cst_336 {dimension_numbers = #tpu.dot_dimension_numbers<[1], [0], [0], [1], [0, 0, 1, 1], [], []>} : vector<4x16xbf16>, vector<16x256xbf16>, vector<4x256xf32> -> vector<4x256xf32>
    %c0_337 = arith.constant 0 : index
    %c0_338 = arith.constant 0 : index
    %608 = vector.load %arg16[%c0_337, %c0_338] : memref<256x64xbf16, #tpu.memory_space<vmem>>, vector<256x64xbf16>
    %609 = arith.truncf %607 : vector<4x256xf32> to vector<4x256xbf16>
    %cst_339 = arith.constant dense<0.000000e+00> : vector<4x64xf32>
    %610 = tpu.matmul %609, %608, %cst_339 {dimension_numbers = #tpu.dot_dimension_numbers<[1], [0], [0], [1], [0, 0, 1, 1], [], []>} : vector<4x256xbf16>, vector<256x64xbf16>, vector<4x64xf32> -> vector<4x64xf32>
    %c0_340 = arith.constant 0 : index
    %c0_341 = arith.constant 0 : index
    %611 = vector.load %arg17[%c0_340, %c0_341] : memref<1x64xf32, #tpu.memory_space<vmem>>, vector<1x64xf32>
    %612 = vector.broadcast %611 : vector<1x64xf32> to vector<4x64xf32>
    %613 = arith.addf %610, %612 : vector<4x64xf32>
    %cst_342 = arith.constant 0.000000e+00 : f32
    %614 = vector.broadcast %cst_342 : f32 to vector<4x64xf32>
    %615 = arith.maximumf %613, %614 : vector<4x64xf32>
    %c24_343 = arith.constant 24 : index
    %c0_344 = arith.constant 0 : index
    %616 = vector.load %arg24[%c24_343, %c0_344] : memref<320x256xf32, #tpu.memory_space<vmem>>, vector<4x64xf32>
    tpu.vector_store %arg24[%c24_343, %c0_344], %615 {strides = array<i32>} : memref<320x256xf32, #tpu.memory_space<vmem>>, vector<4x64xf32>,
    %cst_345 = arith.constant 0.000000e+00 : f32
    %617 = vector.broadcast %cst_345 : f32 to vector<17x64xf32>
    %c28_346 = arith.constant 28 : index
    %c0_347 = arith.constant 0 : index
    %618 = vector.load %arg24[%c28_346, %c0_347] : memref<320x256xf32, #tpu.memory_space<vmem>>, vector<17x64xf32>
    tpu.vector_store %arg24[%c28_346, %c0_347], %617 {strides = array<i32>} : memref<320x256xf32, #tpu.memory_space<vmem>>, vector<17x64xf32>,
    %619 = tpu.iota {dimensions = array<i32: 0>} : vector<4x1xi32>
    %c1_i32_348 = arith.constant 1 : i32
    %620 = vector.broadcast %c1_i32_348 : i32 to vector<4x1xi32>
    %621 = arith.andi %619, %620 : vector<4x1xi32>
    %622 = arith.truncf %615 : vector<4x64xf32> to vector<4x64xbf16>
    %c21_349 = arith.constant 21 : index
    %c0_350 = arith.constant 0 : index
    %623 = vector.load %arg24[%c21_349, %c0_350] : memref<320x256xf32, #tpu.memory_space<vmem>>, vector<4x64xf32>
    %c-1_i32_351 = arith.constant -1 : i32
    %624 = vector.broadcast %c-1_i32_351 : i32 to vector<4x1xi32>
    %625 = arith.addi %621, %624 : vector<4x1xi32>
    %c0_i32_352 = arith.constant 0 : i32
    %626 = vector.broadcast %c0_i32_352 : i32 to vector<4x1xi32>
    %627 = arith.cmpi sge, %625, %626 : vector<4x1xi32>
    %c-1_i32_353 = arith.constant -1 : i32
    %628 = vector.broadcast %c-1_i32_353 : i32 to vector<4x1xi32>
    %629 = arith.addi %621, %628 : vector<4x1xi32>
    %c2_i32_354 = arith.constant 2 : i32
    %630 = vector.broadcast %c2_i32_354 : i32 to vector<4x1xi32>
    %631 = arith.cmpi slt, %629, %630 : vector<4x1xi32>
    %632 = arith.andi %627, %631 : vector<4x1xi1>
    %cst_355 = arith.constant 0.000000e+00 : f32
    %633 = vector.shape_cast %632 : vector<4x1xi1> to vector<4x1xi1>
    %634 = vector.broadcast %633 : vector<4x1xi1> to vector<4x64xi1>
    %635 = vector.broadcast %cst_355 : f32 to vector<4x64xf32>
    %636 = arith.select %634, %623, %635 : vector<4x64xi1>, vector<4x64xf32>
    %637 = arith.truncf %636 : vector<4x64xf32> to vector<4x64xbf16>
    %c0_356 = arith.constant 0 : index
    %c0_357 = arith.constant 0 : index
    %638 = vector.load %arg25[%c0_356, %c0_357] : memref<256x576xbf16, #tpu.memory_space<vmem>>, vector<4x64xbf16>
    tpu.vector_store %arg25[%c0_356, %c0_357], %637 {strides = array<i32>} : memref<256x576xbf16, #tpu.memory_space<vmem>>, vector<4x64xbf16>,
    %c22 = arith.constant 22 : index
    %c0_358 = arith.constant 0 : index
    %639 = vector.load %arg24[%c22, %c0_358] : memref<320x256xf32, #tpu.memory_space<vmem>>, vector<4x64xf32>
    %640 = arith.truncf %639 : vector<4x64xf32> to vector<4x64xbf16>
    %c0_359 = arith.constant 0 : index
    %c64_360 = arith.constant 64 : index
    %641 = vector.load %arg25[%c0_359, %c64_360] : memref<256x576xbf16, #tpu.memory_space<vmem>>, vector<4x64xbf16>
    tpu.vector_store %arg25[%c0_359, %c64_360], %640 {strides = array<i32>} : memref<256x576xbf16, #tpu.memory_space<vmem>>, vector<4x64xbf16>,
    %c23_361 = arith.constant 23 : index
    %c0_362 = arith.constant 0 : index
    %642 = vector.load %arg24[%c23_361, %c0_362] : memref<320x256xf32, #tpu.memory_space<vmem>>, vector<4x64xf32>
    %c1_i32_363 = arith.constant 1 : i32
    %643 = vector.broadcast %c1_i32_363 : i32 to vector<4x1xi32>
    %644 = arith.addi %621, %643 : vector<4x1xi32>
    %c0_i32_364 = arith.constant 0 : i32
    %645 = vector.broadcast %c0_i32_364 : i32 to vector<4x1xi32>
    %646 = arith.cmpi sge, %644, %645 : vector<4x1xi32>
    %c1_i32_365 = arith.constant 1 : i32
    %647 = vector.broadcast %c1_i32_365 : i32 to vector<4x1xi32>
    %648 = arith.addi %621, %647 : vector<4x1xi32>
    %c2_i32_366 = arith.constant 2 : i32
    %649 = vector.broadcast %c2_i32_366 : i32 to vector<4x1xi32>
    %650 = arith.cmpi slt, %648, %649 : vector<4x1xi32>
    %651 = arith.andi %646, %650 : vector<4x1xi1>
    %cst_367 = arith.constant 0.000000e+00 : f32
    %652 = vector.shape_cast %651 : vector<4x1xi1> to vector<4x1xi1>
    %653 = vector.broadcast %652 : vector<4x1xi1> to vector<4x64xi1>
    %654 = vector.broadcast %cst_367 : f32 to vector<4x64xf32>
    %655 = arith.select %653, %642, %654 : vector<4x64xi1>, vector<4x64xf32>
    %656 = arith.truncf %655 : vector<4x64xf32> to vector<4x64xbf16>
    %c0_368 = arith.constant 0 : index
    %c128_369 = arith.constant 128 : index
    %657 = vector.load %arg25[%c0_368, %c128_369] : memref<256x576xbf16, #tpu.memory_space<vmem>>, vector<4x64xbf16>
    tpu.vector_store %arg25[%c0_368, %c128_369], %656 {strides = array<i32>} : memref<256x576xbf16, #tpu.memory_space<vmem>>, vector<4x64xbf16>,
    %c23_370 = arith.constant 23 : index
    %c0_371 = arith.constant 0 : index
    %658 = vector.load %arg24[%c23_370, %c0_371] : memref<320x256xf32, #tpu.memory_space<vmem>>, vector<4x64xf32>
    %c-1_i32_372 = arith.constant -1 : i32
    %659 = vector.broadcast %c-1_i32_372 : i32 to vector<4x1xi32>
    %660 = arith.addi %621, %659 : vector<4x1xi32>
    %c0_i32_373 = arith.constant 0 : i32
    %661 = vector.broadcast %c0_i32_373 : i32 to vector<4x1xi32>
    %662 = arith.cmpi sge, %660, %661 : vector<4x1xi32>
    %c-1_i32_374 = arith.constant -1 : i32
    %663 = vector.broadcast %c-1_i32_374 : i32 to vector<4x1xi32>
    %664 = arith.addi %621, %663 : vector<4x1xi32>
    %c2_i32_375 = arith.constant 2 : i32
    %665 = vector.broadcast %c2_i32_375 : i32 to vector<4x1xi32>
    %666 = arith.cmpi slt, %664, %665 : vector<4x1xi32>
    %667 = arith.andi %662, %666 : vector<4x1xi1>
    %cst_376 = arith.constant 0.000000e+00 : f32
    %668 = vector.shape_cast %667 : vector<4x1xi1> to vector<4x1xi1>
    %669 = vector.broadcast %668 : vector<4x1xi1> to vector<4x64xi1>
    %670 = vector.broadcast %cst_376 : f32 to vector<4x64xf32>
    %671 = arith.select %669, %658, %670 : vector<4x64xi1>, vector<4x64xf32>
    %672 = arith.truncf %671 : vector<4x64xf32> to vector<4x64xbf16>
    %c0_377 = arith.constant 0 : index
    %c192_378 = arith.constant 192 : index
    %673 = vector.load %arg25[%c0_377, %c192_378] : memref<256x576xbf16, #tpu.memory_space<vmem>>, vector<4x64xbf16>
    tpu.vector_store %arg25[%c0_377, %c192_378], %672 {strides = array<i32>} : memref<256x576xbf16, #tpu.memory_space<vmem>>, vector<4x64xbf16>,
    %c0_379 = arith.constant 0 : index
    %c256_380 = arith.constant 256 : index
    %674 = vector.load %arg25[%c0_379, %c256_380] : memref<256x576xbf16, #tpu.memory_space<vmem>>, vector<4x64xbf16>
    tpu.vector_store %arg25[%c0_379, %c256_380], %622 {strides = array<i32>} : memref<256x576xbf16, #tpu.memory_space<vmem>>, vector<4x64xbf16>,
    %c25_381 = arith.constant 25 : index
    %c0_382 = arith.constant 0 : index
    %675 = vector.load %arg24[%c25_381, %c0_382] : memref<320x256xf32, #tpu.memory_space<vmem>>, vector<4x64xf32>
    %c1_i32_383 = arith.constant 1 : i32
    %676 = vector.broadcast %c1_i32_383 : i32 to vector<4x1xi32>
    %677 = arith.addi %621, %676 : vector<4x1xi32>
    %c0_i32_384 = arith.constant 0 : i32
    %678 = vector.broadcast %c0_i32_384 : i32 to vector<4x1xi32>
    %679 = arith.cmpi sge, %677, %678 : vector<4x1xi32>
    %c1_i32_385 = arith.constant 1 : i32
    %680 = vector.broadcast %c1_i32_385 : i32 to vector<4x1xi32>
    %681 = arith.addi %621, %680 : vector<4x1xi32>
    %c2_i32_386 = arith.constant 2 : i32
    %682 = vector.broadcast %c2_i32_386 : i32 to vector<4x1xi32>
    %683 = arith.cmpi slt, %681, %682 : vector<4x1xi32>
    %684 = arith.andi %679, %683 : vector<4x1xi1>
    %cst_387 = arith.constant 0.000000e+00 : f32
    %685 = vector.shape_cast %684 : vector<4x1xi1> to vector<4x1xi1>
    %686 = vector.broadcast %685 : vector<4x1xi1> to vector<4x64xi1>
    %687 = vector.broadcast %cst_387 : f32 to vector<4x64xf32>
    %688 = arith.select %686, %675, %687 : vector<4x64xi1>, vector<4x64xf32>
    %689 = arith.truncf %688 : vector<4x64xf32> to vector<4x64xbf16>
    %c0_388 = arith.constant 0 : index
    %c320_389 = arith.constant 320 : index
    %690 = vector.load %arg25[%c0_388, %c320_389] : memref<256x576xbf16, #tpu.memory_space<vmem>>, vector<4x64xbf16>
    tpu.vector_store %arg25[%c0_388, %c320_389], %689 {strides = array<i32>} : memref<256x576xbf16, #tpu.memory_space<vmem>>, vector<4x64xbf16>,
    %c25_390 = arith.constant 25 : index
    %c0_391 = arith.constant 0 : index
    %691 = vector.load %arg24[%c25_390, %c0_391] : memref<320x256xf32, #tpu.memory_space<vmem>>, vector<4x64xf32>
    %c-1_i32_392 = arith.constant -1 : i32
    %692 = vector.broadcast %c-1_i32_392 : i32 to vector<4x1xi32>
    %693 = arith.addi %621, %692 : vector<4x1xi32>
    %c0_i32_393 = arith.constant 0 : i32
    %694 = vector.broadcast %c0_i32_393 : i32 to vector<4x1xi32>
    %695 = arith.cmpi sge, %693, %694 : vector<4x1xi32>
    %c-1_i32_394 = arith.constant -1 : i32
    %696 = vector.broadcast %c-1_i32_394 : i32 to vector<4x1xi32>
    %697 = arith.addi %621, %696 : vector<4x1xi32>
    %c2_i32_395 = arith.constant 2 : i32
    %698 = vector.broadcast %c2_i32_395 : i32 to vector<4x1xi32>
    %699 = arith.cmpi slt, %697, %698 : vector<4x1xi32>
    %700 = arith.andi %695, %699 : vector<4x1xi1>
    %cst_396 = arith.constant 0.000000e+00 : f32
    %701 = vector.shape_cast %700 : vector<4x1xi1> to vector<4x1xi1>
    %702 = vector.broadcast %701 : vector<4x1xi1> to vector<4x64xi1>
    %703 = vector.broadcast %cst_396 : f32 to vector<4x64xf32>
    %704 = arith.select %702, %691, %703 : vector<4x64xi1>, vector<4x64xf32>
    %705 = arith.truncf %704 : vector<4x64xf32> to vector<4x64xbf16>
    %c0_397 = arith.constant 0 : index
    %c384_398 = arith.constant 384 : index
    %706 = vector.load %arg25[%c0_397, %c384_398] : memref<256x576xbf16, #tpu.memory_space<vmem>>, vector<4x64xbf16>
    tpu.vector_store %arg25[%c0_397, %c384_398], %705 {strides = array<i32>} : memref<256x576xbf16, #tpu.memory_space<vmem>>, vector<4x64xbf16>,
    %c26_399 = arith.constant 26 : index
    %c0_400 = arith.constant 0 : index
    %707 = vector.load %arg24[%c26_399, %c0_400] : memref<320x256xf32, #tpu.memory_space<vmem>>, vector<4x64xf32>
    %708 = arith.truncf %707 : vector<4x64xf32> to vector<4x64xbf16>
    %c0_401 = arith.constant 0 : index
    %c448_402 = arith.constant 448 : index
    %709 = vector.load %arg25[%c0_401, %c448_402] : memref<256x576xbf16, #tpu.memory_space<vmem>>, vector<4x64xbf16>
    tpu.vector_store %arg25[%c0_401, %c448_402], %708 {strides = array<i32>} : memref<256x576xbf16, #tpu.memory_space<vmem>>, vector<4x64xbf16>,
    %c27_403 = arith.constant 27 : index
    %c0_404 = arith.constant 0 : index
    %710 = vector.load %arg24[%c27_403, %c0_404] : memref<320x256xf32, #tpu.memory_space<vmem>>, vector<4x64xf32>
    %c1_i32_405 = arith.constant 1 : i32
    %711 = vector.broadcast %c1_i32_405 : i32 to vector<4x1xi32>
    %712 = arith.addi %621, %711 : vector<4x1xi32>
    %c0_i32_406 = arith.constant 0 : i32
    %713 = vector.broadcast %c0_i32_406 : i32 to vector<4x1xi32>
    %714 = arith.cmpi sge, %712, %713 : vector<4x1xi32>
    %c1_i32_407 = arith.constant 1 : i32
    %715 = vector.broadcast %c1_i32_407 : i32 to vector<4x1xi32>
    %716 = arith.addi %621, %715 : vector<4x1xi32>
    %c2_i32_408 = arith.constant 2 : i32
    %717 = vector.broadcast %c2_i32_408 : i32 to vector<4x1xi32>
    %718 = arith.cmpi slt, %716, %717 : vector<4x1xi32>
    %719 = arith.andi %714, %718 : vector<4x1xi1>
    %cst_409 = arith.constant 0.000000e+00 : f32
    %720 = vector.shape_cast %719 : vector<4x1xi1> to vector<4x1xi1>
    %721 = vector.broadcast %720 : vector<4x1xi1> to vector<4x64xi1>
    %722 = vector.broadcast %cst_409 : f32 to vector<4x64xf32>
    %723 = arith.select %721, %710, %722 : vector<4x64xi1>, vector<4x64xf32>
    %724 = arith.truncf %723 : vector<4x64xf32> to vector<4x64xbf16>
    %c0_410 = arith.constant 0 : index
    %c512_411 = arith.constant 512 : index
    %725 = vector.load %arg25[%c0_410, %c512_411] : memref<256x576xbf16, #tpu.memory_space<vmem>>, vector<4x64xbf16>
    tpu.vector_store %arg25[%c0_410, %c512_411], %724 {strides = array<i32>} : memref<256x576xbf16, #tpu.memory_space<vmem>>, vector<4x64xbf16>,
    %c0_412 = arith.constant 0 : index
    %c0_413 = arith.constant 0 : index
    %726 = vector.load %arg25[%c0_412, %c0_413] : memref<256x576xbf16, #tpu.memory_space<vmem>>, vector<4x576xbf16>
    %c0_414 = arith.constant 0 : index
    %c0_415 = arith.constant 0 : index
    %727 = vector.load %arg18[%c0_414, %c0_415] : memref<576x512xbf16, #tpu.memory_space<vmem>>, vector<576x512xbf16>
    %cst_416 = arith.constant dense<0.000000e+00> : vector<4x512xf32>
    %728 = tpu.matmul %726, %727, %cst_416 {dimension_numbers = #tpu.dot_dimension_numbers<[1], [0], [0], [1], [0, 0, 1, 1], [], []>} : vector<4x576xbf16>, vector<576x512xbf16>, vector<4x512xf32> -> vector<4x512xf32>
    %c0_417 = arith.constant 0 : index
    %c0_418 = arith.constant 0 : index
    %729 = vector.load %arg19[%c0_417, %c0_418] : memref<1x512xf32, #tpu.memory_space<vmem>>, vector<1x512xf32>
    %730 = vector.broadcast %729 : vector<1x512xf32> to vector<4x512xf32>
    %731 = arith.addf %728, %730 : vector<4x512xf32>
    %cst_419 = arith.constant 0.000000e+00 : f32
    %732 = vector.broadcast %cst_419 : f32 to vector<4x512xf32>
    %733 = arith.maximumf %731, %732 : vector<4x512xf32>
    %c0_420 = arith.constant 0 : index
    %c0_421 = arith.constant 0 : index
    %c0_422 = arith.constant 0 : index
    %734 = vector.load %arg23[%c0_420, %c0_421, %c0_422] : memref<1x4x512xf32, #tpu.memory_space<vmem>>, vector<1x4x512xf32>
    %735 = vector.shape_cast %734 : vector<1x4x512xf32> to vector<4x512xf32>
    %736 = vector.shape_cast %733 : vector<4x512xf32> to vector<1x4x512xf32>
    tpu.vector_store %arg23[%c0_420, %c0_421, %c0_422], %736 {strides = array<i32>} : memref<1x4x512xf32, #tpu.memory_space<vmem>>, vector<1x4x512xf32>,
    return
  }
  func.func @transform_0(%arg0: i32) -> (i32, i32, i32) {
    %c0_i32 = arith.constant 0 : i32
    %c0_i32_0 = arith.constant 0 : i32
    %c0_i32_1 = arith.constant 0 : i32
    return %arg0, %c0_i32, %c0_i32_0 : i32, i32, i32
  }
  func.func @transform_1(%arg0: i32) -> (i32, i32) {
    %c0_i32 = arith.constant 0 : i32
    %c0_i32_0 = arith.constant 0 : i32
    %c0_i32_1 = arith.constant 0 : i32
    return %c0_i32, %c0_i32_0 : i32, i32
  }
  func.func @transform_2(%arg0: i32) -> (i32, i32) {
    %c0_i32 = arith.constant 0 : i32
    %c0_i32_0 = arith.constant 0 : i32
    %c0_i32_1 = arith.constant 0 : i32
    return %c0_i32, %c0_i32_0 : i32, i32
  }
  func.func @transform_3(%arg0: i32) -> (i32, i32) {
    %c0_i32 = arith.constant 0 : i32
    %c0_i32_0 = arith.constant 0 : i32
    %c0_i32_1 = arith.constant 0 : i32
    return %c0_i32, %c0_i32_0 : i32, i32
  }
  func.func @transform_4(%arg0: i32) -> (i32, i32) {
    %c0_i32 = arith.constant 0 : i32
    %c0_i32_0 = arith.constant 0 : i32
    %c0_i32_1 = arith.constant 0 : i32
    return %c0_i32, %c0_i32_0 : i32, i32
  }
  func.func @transform_5(%arg0: i32) -> (i32, i32) {
    %c0_i32 = arith.constant 0 : i32
    %c0_i32_0 = arith.constant 0 : i32
    %c0_i32_1 = arith.constant 0 : i32
    return %c0_i32, %c0_i32_0 : i32, i32
  }
  func.func @transform_6(%arg0: i32) -> (i32, i32) {
    %c0_i32 = arith.constant 0 : i32
    %c0_i32_0 = arith.constant 0 : i32
    %c0_i32_1 = arith.constant 0 : i32
    return %c0_i32, %c0_i32_0 : i32, i32
  }
  func.func @transform_7(%arg0: i32) -> (i32, i32) {
    %c0_i32 = arith.constant 0 : i32
    %c0_i32_0 = arith.constant 0 : i32
    %c0_i32_1 = arith.constant 0 : i32
    return %c0_i32, %c0_i32_0 : i32, i32
  }
  func.func @transform_8(%arg0: i32) -> (i32, i32) {
    %c0_i32 = arith.constant 0 : i32
    %c0_i32_0 = arith.constant 0 : i32
    %c0_i32_1 = arith.constant 0 : i32
    return %c0_i32, %c0_i32_0 : i32, i32
  }
  func.func @transform_9(%arg0: i32) -> (i32, i32) {
    %c0_i32 = arith.constant 0 : i32
    %c0_i32_0 = arith.constant 0 : i32
    %c0_i32_1 = arith.constant 0 : i32
    return %c0_i32, %c0_i32_0 : i32, i32
  }
  func.func @transform_10(%arg0: i32) -> (i32, i32) {
    %c0_i32 = arith.constant 0 : i32
    %c0_i32_0 = arith.constant 0 : i32
    %c0_i32_1 = arith.constant 0 : i32
    return %c0_i32, %c0_i32_0 : i32, i32
  }
  func.func @transform_11(%arg0: i32) -> (i32, i32) {
    %c0_i32 = arith.constant 0 : i32
    %c0_i32_0 = arith.constant 0 : i32
    %c0_i32_1 = arith.constant 0 : i32
    return %c0_i32, %c0_i32_0 : i32, i32
  }
  func.func @transform_12(%arg0: i32) -> (i32, i32) {
    %c0_i32 = arith.constant 0 : i32
    %c0_i32_0 = arith.constant 0 : i32
    %c0_i32_1 = arith.constant 0 : i32
    return %c0_i32, %c0_i32_0 : i32, i32
  }
  func.func @transform_13(%arg0: i32) -> (i32, i32) {
    %c0_i32 = arith.constant 0 : i32
    %c0_i32_0 = arith.constant 0 : i32
    %c0_i32_1 = arith.constant 0 : i32
    return %c0_i32, %c0_i32_0 : i32, i32
  }
  func.func @transform_14(%arg0: i32) -> (i32, i32) {
    %c0_i32 = arith.constant 0 : i32
    %c0_i32_0 = arith.constant 0 : i32
    %c0_i32_1 = arith.constant 0 : i32
    return %c0_i32, %c0_i32_0 : i32, i32
  }
  func.func @transform_15(%arg0: i32) -> (i32, i32) {
    %c0_i32 = arith.constant 0 : i32
    %c0_i32_0 = arith.constant 0 : i32
    %c0_i32_1 = arith.constant 0 : i32
    return %c0_i32, %c0_i32_0 : i32, i32
  }
  func.func @transform_16(%arg0: i32) -> (i32, i32) {
    %c0_i32 = arith.constant 0 : i32
    %c0_i32_0 = arith.constant 0 : i32
    %c0_i32_1 = arith.constant 0 : i32
    return %c0_i32, %c0_i32_0 : i32, i32
  }
  func.func @transform_17(%arg0: i32) -> (i32, i32) {
    %c0_i32 = arith.constant 0 : i32
    %c0_i32_0 = arith.constant 0 : i32
    %c0_i32_1 = arith.constant 0 : i32
    return %c0_i32, %c0_i32_0 : i32, i32
  }
  func.func @transform_18(%arg0: i32) -> (i32, i32) {
    %c0_i32 = arith.constant 0 : i32
    %c0_i32_0 = arith.constant 0 : i32
    %c0_i32_1 = arith.constant 0 : i32
    return %c0_i32, %c0_i32_0 : i32, i32
  }
  func.func @transform_19(%arg0: i32) -> (i32, i32) {
    %c0_i32 = arith.constant 0 : i32
    %c0_i32_0 = arith.constant 0 : i32
    %c0_i32_1 = arith.constant 0 : i32
    return %c0_i32, %c0_i32_0 : i32, i32
  }
  func.func @transform_20(%arg0: i32) -> (i32, i32) {
    %c0_i32 = arith.constant 0 : i32
    %c0_i32_0 = arith.constant 0 : i32
    %c0_i32_1 = arith.constant 0 : i32
    return %c0_i32, %c0_i32_0 : i32, i32
  }
  func.func @transform_21(%arg0: i32) -> (i32, i32) {
    %c0_i32 = arith.constant 0 : i32
    %c0_i32_0 = arith.constant 0 : i32
    %c0_i32_1 = arith.constant 0 : i32
    return %c0_i32, %c0_i32_0 : i32, i32
  }
  func.func @transform_22(%arg0: i32) -> (i32, i32, i32) {
    %c0_i32 = arith.constant 0 : i32
    %c0_i32_0 = arith.constant 0 : i32
    %c0_i32_1 = arith.constant 0 : i32
    return %arg0, %c0_i32, %c0_i32_0 : i32, i32, i32
  }
}

</mosaic_0001>

<bundles_post_ra>
// kernel: squeezenet_forward.1
= control target key start
LH: loop header
LB: loop body
LE: loop exit
PB: predicated region body
PF: predicated region fallthrough
CT: control target
= control target key end

     0   :  { %s15178_s0 = inlined_call_operand.vmem [shape: bf16[2,256,32], index: 0, kind: input, shape index: {}]   ;;  %s15179_s1 = inlined_call_operand.vmem [shape: bf16[32,64], index: 1, kind: input, shape index: {}]   ;;  %s15180_s2 = inlined_call_operand.vmem [shape: f32[1,64], index: 2, kind: input, shape index: {}]   ;;  %s15181_s3 = inlined_call_operand.vmem [shape: bf16[64,16], index: 3, kind: input, shape index: {}]   ;;  %s15182_s4 = inlined_call_operand.vmem [shape: f32[1,16], index: 4, kind: input, shape index: {}]   ;;  %s15183_s5 = inlined_call_operand.vmem [shape: bf16[144,128], index: 5, kind: input, shape index: {}]   ;;  %s15184_s6 = inlined_call_operand.vmem [shape: f32[1,128], index: 6, kind: input, shape index: {}]   ;;  %s15185_s7 = inlined_call_operand.vmem [shape: bf16[128,32], index: 7, kind: input, shape index: {}]   ;;  %s15186_s8 = inlined_call_operand.vmem [shape: f32[1,32], index: 8, kind: input, shape index: {}]   ;;  %s15187_s9 = inlined_call_operand.vmem [shape: bf16[288,128], index: 9, kind: input, shape index: {}]   ;;  %s15188_s10 = inlined_call_operand.vmem [shape: f32[1,128], index: 10, kind: input, shape index: {}]   ;;  %s15189_s11 = inlined_call_operand.vmem [shape: bf16[128,64], index: 11, kind: input, shape index: {}]   ;;  %s15190_s12 = inlined_call_operand.vmem [shape: f32[1,64], index: 12, kind: input, shape index: {}]   ;;  %s15191_s13 = inlined_call_operand.vmem [shape: bf16[576,256], index: 13, kind: input, shape index: {}]   ;;  %s15192_s14 = inlined_call_operand.vmem [shape: f32[1,256], index: 14, kind: input, shape index: {}]   ;;  %s15193_s15 = inlined_call_operand.vmem [shape: bf16[256,64], index: 15, kind: input, shape index: {}]   ;;  %s15194_s16 = inlined_call_operand.vmem [shape: f32[1,64], index: 16, kind: input, shape index: {}]   ;;  %s15195_s17 = inlined_call_operand.vmem [shape: bf16[576,512], index: 17, kind: input, shape index: {}]   ;;  %s15196_s18 = inlined_call_operand.vmem [shape: f32[1,512], index: 18, kind: input, shape index: {}]   ;;  %s15197_s19 = inlined_call_operand.vmem [shape: bf16[64,256], index: 19, kind: input, shape index: {}]   ;;  %s15198_s20 = inlined_call_operand.vmem [shape: bf16[16,64], index: 20, kind: input, shape index: {}]   ;;  %s15199_s21 = inlined_call_operand.vmem [shape: bf16[4,16], index: 21, kind: input, shape index: {}]   ;;  %s15200_s22 = inlined_call_operand.vmem [shape: f32[2,4,512], index: 22, kind: output, shape index: {}]  }
   0x1   :  { %15344 = sst [smem:[#allocation68_spill]] %s15178_s0 }
   0x2   :  { %15345 = sst [smem:[#allocation69_spill]] %s15179_s1 }
   0x3   :  { %15346 = sst [smem:[#allocation70_spill]] %s15180_s2 }
   0x4   :  { %15347 = sst [smem:[#allocation71_spill]] %s15181_s3  ;;  %s10783_s3 = smov 0  }
   0x5   :  { %15348 = sst [smem:[#allocation72_spill]] %s15182_s4 }
   0x6   :  { %15349 = sst [smem:[#allocation73_spill]] %s15183_s5 }
   0x7   :  { %15350 = sst [smem:[#allocation74_spill]] %s15184_s6 }
   0x8   :  { %15351 = sst [smem:[#allocation75_spill]] %s15185_s7 }
   0x9   :  { %15352 = sst [smem:[#allocation76_spill]] %s15186_s8 }
   0xa LB: > { %s9476_s28 = sadd.s32 4294967295, %s10655_s3   ;;  %p9480_p0 = scmp.ge.s32.totalorder %s10655_s3, 1  ;;  %s10655_s3 = sphi %s10783_s3, %s32_s3  }
   0xb   : > { %p612_p1 = scmp.lt.s32.totalorder %s10655_s3, 3 }
   0xd   : > { %p613_p2 = pnand %p9480_p0, %p612_p1 }
   0xf   : > { %616 = sbr.rel (%p613_p2) target bundleno = 3743 (0xe9f), region = 108 }
  0x16   : > { %s15353_s4 = sld [smem:[#allocation69_spill]]  ;;  %p674_p3 = scmp.lt.s32.totalorder %s9476_s28, 1  ;;  %vm15236_vm0 = vcmask 261120   ;;  %v10657_v22 = vmov 0.0   ;;  %vm15235_vm1 = vcmask 523264   ;;  %vm15341_vm2 = vcmask 130048  }
  0x17   : > { %s15354_s24 = sld [smem:[#allocation71_spill]]  ;;  %s15355_s29 = sld [smem:[#allocation68_spill]]  ;;  %686 = vst [vmem:[#allocation2 + $0x8] sm:$0xff] %v10657_v22  ;;  %695 = vst [vmem:[#allocation2 + $0x50] sm:$0xff] %v10657_v22  ;;  %vm15343_vm3 = vcmask 1040384   ;;  %vm2089_vm5 = vcmask 261248  }
  0x18   : > { %s15743_s28 = smov (!%p674_p3, %s9476_s28), 1  ;;  %685 = vst [vmem:[#allocation2] sm:$0xff] %v10657_v22  ;;  %687 = vst [vmem:[#allocation2 + $0x10] sm:$0xff] %v10657_v22  ;;  %s10659_s2 = smov 16   ;;  %vm15333_vm6 = vcmask 1046528  }
  0x19   : > { %s9857_s26 = sshll.u32 %s15743_s28, 7  ;;  %689 = vst [vmem:[#allocation2 + $0x20] sm:$0xff] %v10657_v22  ;;  %691 = vst [vmem:[#allocation2 + $0x30] sm:$0xff] %v10657_v22  ;;  %s15359_s1 = sld [smem:[#allocation72_spill]] }
  0x1a   : > { %693 = vst [vmem:[#allocation2 + $0x40] sm:$0xff] %v10657_v22  ;;  %697 = vst [vmem:[#allocation2 + $0x60] sm:$0xff] %v10657_v22  ;;  %s15334_s0 = smov 64   ;;  %s10662_s25 = smov 112  }
  0x1b   : > { %699 = vst [vmem:[#allocation2 + $0x70] sm:$0xff] %v10657_v22  ;;  %701 = vst [vmem:[#allocation2 + $0x80] sm:$0xff] %v10657_v22  ;;  %s15336_s27 = smov 96   ;;  %s15518_s23 = sld [smem:[#allocation74_spill]] }
  0x1c   : > { %v10225_v0 = vld [vmem:[%s15353_s4] sm:$0xff]   ;;  %v10226_v1 = vld [vmem:[%s15353_s4 + $0x8] sm:$0xff]   ;;  %703 = vst [vmem:[#allocation2 + $0x90] sm:$0xff] %v10657_v22  ;;  %705 = vst [vmem:[#allocation2 + $0xa0] sm:$0xff] %v10657_v22  ;;  %s15662_s7 = sld [smem:[#allocation75_spill]]  ;;  %s15663_s8 = sld [smem:[#allocation76_spill]] }
  0x1d   : > { %10031 = vmatprep.subr.bf16.mxu0 %v10225_v0  ;;  %v10243_v2 = vld [vmem:[%s15354_s24] sm:$0xff]   ;;  %v10244_v3 = vld [vmem:[%s15354_s24 + $0x8] sm:$0xff]   ;;  %s10809_s30 = scalar_lea.vmem %s15355_s29, %s9857_s26  ;;  %v10245_v20 = vld [vmem:[%s15354_s24 + $0x10] sm:$0xff]   ;;  %707 = vst [vmem:[#allocation2 + $0xb0] sm:$0xff] %v10657_v22  ;;  %s15356_s26 = sld [smem:[#allocation70_spill]] }
  0x1e   : > { %10032 = vmatpush3.bf16.msra.mxu0 %v10225_v0  ;;  %10067 = vmatprep.subr.bf16.mxu1 %v10243_v2  ;;  %v10227_v4 = vld [vmem:[%s10809_s30] sm:$0xff]   ;;  %v10228_v5 = vld [vmem:[%s10809_s30 + $0x8] sm:$0xff]   ;;  %v10229_v6 = vld [vmem:[%s10809_s30 + $0x10] sm:$0xff]   ;;  %709 = vst [vmem:[#allocation2 + $0xc0] sm:$0xff] %v10657_v22  ;;  %s10666_s29 = smov 80   ;;  %s15674_s6 = smov 32  }
  0x1f   : > { %10033 = vmatprep.subr.bf16.mxu0 %v10226_v1  ;;  %10068 = vmatpush3.bf16.msra.mxu1 %v10243_v2  ;;  %v10230_v7 = vld [vmem:[%s10809_s30 + $0x18] sm:$0xff]   ;;  %v10231_v8 = vld [vmem:[%s10809_s30 + $0x20] sm:$0xff]   ;;  %v10232_v9 = vld [vmem:[%s10809_s30 + $0x28] sm:$0xff]   ;;  %711 = vst [vmem:[#allocation2 + $0xd0] sm:$0xff] %v10657_v22  ;;  %s9858_s5 = sshll.u32 %s15743_s28, 4 }
  0x20   : > { %10069 = vmatprep.subr.bf16.mxu1 %v10244_v3  ;;  %10035 = vmatprep.mubr.msk.bf16.mxu0 %vm15236_vm0, %v10227_v4  ;;  %v10233_v10 = vld [vmem:[%s10809_s30 + $0x30] sm:$0xff]   ;;  %v10234_v11 = vld [vmem:[%s10809_s30 + $0x38] sm:$0xff]   ;;  %v10235_v12 = vld [vmem:[%s10809_s30 + $0x40] sm:$0xff]   ;;  %713 = vst [vmem:[#allocation2 + $0xe0] sm:$0xff] %v10657_v22 }
  0x21   : > { %v10236_v13 = vld [vmem:[%s10809_s30 + $0x48] sm:$0xff]   ;;  %v10237_v14 = vld [vmem:[%s10809_s30 + $0x50] sm:$0xff]   ;;  %v10238_v15 = vld [vmem:[%s10809_s30 + $0x58] sm:$0xff]   ;;  %715 = vst [vmem:[#allocation2 + $0xf0] sm:$0xff] %v10657_v22 }
  0x22   : > { %10034 = vmatpush3.bf16.msra.mxu0 %v10226_v1  ;;  %v10239_v16 = vld [vmem:[%s10809_s30 + $0x60] sm:$0xff]   ;;  %v10240_v17 = vld [vmem:[%s10809_s30 + $0x68] sm:$0xff]   ;;  %v10241_v18 = vld [vmem:[%s10809_s30 + $0x70] sm:$0xff]   ;;  %717 = vst [vmem:[#allocation2 + $0x100] sm:$0xff] %v10657_v22 }
  0x23   : > { %10070 = vmatpush3.bf16.msra.mxu1 %v10244_v3  ;;  %v10242_v19 = vld [vmem:[%s10809_s30 + $0x78] sm:$0xff]   ;;  %719 = vst [vmem:[#allocation2 + $0x110] sm:$0xff] %v10657_v22  ;;  %721 = vst [vmem:[#allocation2 + $0x120] sm:$0xff] %v10657_v22  ;;  %v10894_v23 = vld [vmem:[%s15356_s26] ss:$0 sm:$0xff]  ;;  %s15358_s30 = sld [smem:[#allocation73_spill]] }
  0x24   : > { %10071 = vmatprep.subr.bf16.mxu1 %v10245_v20  ;;  %v10246_v21 = vld [vmem:[%s15354_s24 + $0x18] sm:$0xff]   ;;  %723 = vst [vmem:[#allocation2 + $0x130] sm:$0xff] %v10657_v22  ;;  %725 = vst [vmem:[#allocation2 + $0x140] sm:$0xff] %v10657_v22  ;;  %s15338_s26 = smov 32  }
  0x25   : > { %10036 = vmatmul.mubr.msk.bf16.vlgmr.msra.gmra.mrb[0].mxu0 %vm15236_vm0, %v10228_v5  ;;  %727 = vst [vmem:[#allocation2 + $0x150] sm:$0xff] %v10657_v22  ;;  %729 = vst [vmem:[#allocation2 + $0x160] sm:$0xff] %v10657_v22 }
  0x26   : > { %10039 = vmatprep.mubr.msk.bf16.mxu0 %vm15236_vm0, %v10229_v6  ;;  %731 = vst [vmem:[#allocation2 + $0x170] sm:$0xff] %v10657_v22  ;;  %733 = vst [vmem:[#allocation2 + $0x180] sm:$0xff] %v10657_v22 }
  0x27   : > { %10072 = vmatpush3.bf16.msra.mxu1 %v10245_v20  ;;  %735 = vst [vmem:[#allocation2 + $0x190] sm:$0xff] %v10657_v22  ;;  %737 = vst [vmem:[#allocation2 + $0x1a0] sm:$0xff] %v10657_v22 }
  0x28   : > { %10073 = vmatprep.subr.bf16.mxu1 %v10246_v21  ;;  %739 = vst [vmem:[#allocation2 + $0x1b0] sm:$0xff] %v10657_v22  ;;  %741 = vst [vmem:[#allocation2 + $0x1c0] sm:$0xff] %v10657_v22 }
  0x29   : > { %743 = vst [vmem:[#allocation2 + $0x1d0] sm:$0xff] %v10657_v22  ;;  %745 = vst [vmem:[#allocation2 + $0x1e0] sm:$0xff] %v10657_v22 }
  0x2a   : > { %747 = vst [vmem:[#allocation2 + $0x1f0] sm:$0xff] %v10657_v22  ;;  %749 = vst [vmem:[#allocation2 + $0x200] sm:$0xff] %v10657_v22 }
  0x2b   : > { %10074 = vmatpush3.bf16.msra.mxu1 %v10246_v21  ;;  %751 = vst [vmem:[#allocation2 + $0x210] sm:$0xff] %v10657_v22  ;;  %753 = vst [vmem:[#allocation2 + $0x220] sm:$0xff] %v10657_v22 }
  0x2c   : > { %755 = vst [vmem:[#allocation2 + $0x230] sm:$0xff] %v10657_v22  ;;  %757 = vst [vmem:[#allocation2 + $0x240] sm:$0xff] %v10657_v22 }
  0x2d   : > { %10040 = vmatmul.mubr.msk.bf16.gmra.mrb[4].mxu0 %vm15236_vm0, %v10230_v7  ;;  %759 = vst [vmem:[#allocation2 + $0x250] sm:$0xff] %v10657_v22  ;;  %763 = vst [vmem:[#allocation2 + $0x270] sm:$0xff] %v10657_v22 }
  0x2e   : > { %10043 = vmatprep.mubr.msk.bf16.mxu0 %vm15236_vm0, %v10231_v8  ;;  %7702 = vst [vmem:[#allocation2 + $0x58] sm:$0xff] %v10657_v22  ;;  %7704 = vst [vmem:[#allocation2 + $0x68] sm:$0xff] %v10657_v22 }
  0x2f   : > { %1472 = vst.msk [vmem:[#allocation2 + $0x230] sm:$0xff] %vm15341_vm2, %v10657_v22  ;;  %1473 = vst.msk [vmem:[#allocation2 + $0x240] sm:$0xff] %vm15341_vm2, %v10657_v22 }
  0x35   : > { %10044 = vmatmul.mubr.msk.bf16.gmra.mrb[8].mxu0 %vm15236_vm0, %v10232_v9 }
  0x36   : > { %10047 = vmatprep.mubr.msk.bf16.mxu0 %vm15236_vm0, %v10233_v10 }
  0x3d   : > { %10048 = vmatmul.mubr.msk.bf16.gmra.mrb[12].mxu0 %vm15236_vm0, %v10234_v11 }
  0x3e   : > { %10051 = vmatprep.mubr.msk.bf16.mxu0 %vm15236_vm0, %v10235_v12 }
  0x45   : > { %10052 = vmatmul.mubr.msk.bf16.gmra.mrb[16].mxu0 %vm15236_vm0, %v10236_v13 }
  0x46   : > { %10055 = vmatprep.mubr.msk.bf16.mxu0 %vm15236_vm0, %v10237_v14 }
  0x4d   : > { %10056 = vmatmul.mubr.msk.bf16.gmra.mrb[20].mxu0 %vm15236_vm0, %v10238_v15 }
  0x4e   : > { %10059 = vmatprep.mubr.msk.bf16.mxu0 %vm15236_vm0, %v10239_v16 }
  0x55   : > { %10060 = vmatmul.mubr.msk.bf16.gmra.mrb[24].mxu0 %vm15236_vm0, %v10240_v17 }
  0x56   : > { %10063 = vmatprep.mubr.msk.bf16.mxu0 %vm15236_vm0, %v10241_v18 }
  0x5d   : > { %10064 = vmatmul.mubr.msk.bf16.gmra.mrb[28].mxu0 %vm15236_vm0, %v10242_v19 }
  0xf8   : > { %v10037_v24 = vpop.f32.mrb[0].mxu0 }
  0xf9   : > { %v992_v25 = vadd.f32 %v10037_v24, %v10894_v23  ;;  %v983_v26 = vpop.f32.mrb[1].mxu0 }
  0xfa   : > { %v984_v27 = vadd.f32 %v10894_v23, %v983_v26  ;;  %v10038_v28 = vpop.f32.mrb[2].mxu0 }
  0xfb   : > { %v995_v29 = vadd.f32 %v10038_v28, %v10894_v23  ;;  %v986_v30 = vpop.f32.mrb[3].mxu0  ;;  %v1112_v32 = vmax.f32 %v992_v25, 0.0 }
  0xfc   : > { %v987_v31 = vadd.f32 %v10894_v23, %v986_v30  ;;  %v1110_v34 = vmax.f32 %v984_v27, 0.0 }
  0xfd   : > { %v1113_v33 = vmax.f32 %v995_v29, 0.0 }
  0xfe   : > { %v1111_v35 = vmax.f32 %v987_v31, 0.0 }
  0xff   : > { %v1151_v36 = vpack.c.bf16 %v1113_v33, %v1112_v32 }
 0x100   : > { %v10041_v37 = vpop.f32.mrb[4].mxu0  ;;  %v1150_v38 = vpack.c.bf16 %v1111_v35, %v1110_v34 }
 0x101   : > { %v1008_v39 = vadd.f32 %v10041_v37, %v10894_v23  ;;  %v999_v40 = vpop.f32.mrb[5].mxu0 }
 0x102   : > { %v1000_v41 = vadd.f32 %v10894_v23, %v999_v40  ;;  %v10042_v42 = vpop.f32.mrb[6].mxu0  ;;  %10075 = vmatprep.mubr.msk.bf16.mxu1 %vm15235_vm1, %v1150_v38 }
 0x103   : > { %v1116_v43 = vmax.f32 %v1008_v39, 0.0  ;;  %v1011_v44 = vadd.f32 %v10042_v42, %v10894_v23  ;;  %v1002_v45 = vpop.f32.mrb[7].mxu0  ;;  %10076 = vmatmul.mubr.msk.bf16.vlgmr.msra.gmra.mrb[0].mxu1 %vm15235_vm1, %v1151_v36 }
 0x104   : > { %v1114_v46 = vmax.f32 %v1000_v41, 0.0  ;;  %v1003_v47 = vadd.f32 %v10894_v23, %v1002_v45 }
 0x105   : > { %v1117_v48 = vmax.f32 %v1011_v44, 0.0 }
 0x106   : > { %v1115_v49 = vmax.f32 %v1003_v47, 0.0 }
 0x107   : > { %v1153_v50 = vpack.c.bf16 %v1117_v48, %v1116_v43 }
 0x108   : > { %v1152_v51 = vpack.c.bf16 %v1115_v49, %v1114_v46  ;;  %v10045_v52 = vpop.f32.mrb[8].mxu0 }
 0x109   : > { %v1024_v53 = vadd.f32 %v10045_v52, %v10894_v23  ;;  %v1015_v54 = vpop.f32.mrb[9].mxu0 }
 0x10a   : > { %v1016_v55 = vadd.f32 %v10894_v23, %v1015_v54  ;;  %v10046_v56 = vpop.f32.mrb[10].mxu0  ;;  %10079 = vmatprep.mubr.msk.bf16.mxu1 %vm15235_vm1, %v1152_v51 }
 0x10b   : > { %v1120_v57 = vmax.f32 %v1024_v53, 0.0  ;;  %v1027_v58 = vadd.f32 %v10046_v56, %v10894_v23  ;;  %v1018_v59 = vpop.f32.mrb[11].mxu0  ;;  %10080 = vmatmul.mubr.msk.bf16.gmra.mrb[4].mxu1 %vm15235_vm1, %v1153_v50 }
 0x10c   : > { %v1118_v60 = vmax.f32 %v1016_v55, 0.0  ;;  %v1019_v61 = vadd.f32 %v10894_v23, %v1018_v59 }
 0x10d   : > { %v1121_v62 = vmax.f32 %v1027_v58, 0.0 }
 0x10e   : > { %v1119_v63 = vmax.f32 %v1019_v61, 0.0 }
 0x10f   : > { %v1155_v0 = vpack.c.bf16 %v1121_v62, %v1120_v57 }
 0x110   : > { %v1154_v1 = vpack.c.bf16 %v1119_v63, %v1118_v60  ;;  %v10049_v2 = vpop.f32.mrb[12].mxu0 }
 0x111   : > { %v1040_v3 = vadd.f32 %v10049_v2, %v10894_v23  ;;  %v1031_v4 = vpop.f32.mrb[13].mxu0 }
 0x112   : > { %10083 = vmatprep.mubr.msk.bf16.mxu1 %vm15235_vm1, %v1154_v1  ;;  %v1032_v5 = vadd.f32 %v10894_v23, %v1031_v4  ;;  %v10050_v6 = vpop.f32.mrb[14].mxu0 }
 0x113   : > { %10084 = vmatmul.mubr.msk.bf16.gmra.mrb[8].mxu1 %vm15235_vm1, %v1155_v0  ;;  %v1124_v7 = vmax.f32 %v1040_v3, 0.0  ;;  %v1043_v8 = vadd.f32 %v10050_v6, %v10894_v23  ;;  %v1034_v9 = vpop.f32.mrb[15].mxu0 }
 0x114   : > { %v1122_v10 = vmax.f32 %v1032_v5, 0.0  ;;  %v1035_v11 = vadd.f32 %v10894_v23, %v1034_v9 }
 0x115   : > { %v1125_v12 = vmax.f32 %v1043_v8, 0.0 }
 0x116   : > { %v1123_v13 = vmax.f32 %v1035_v11, 0.0 }
 0x117   : > { %v1157_v14 = vpack.c.bf16 %v1125_v12, %v1124_v7 }
 0x118   : > { %v1156_v15 = vpack.c.bf16 %v1123_v13, %v1122_v10  ;;  %v10053_v16 = vpop.f32.mrb[16].mxu0  ;;  %v10658_v10 = vmov 0.0|0.0  }
 0x119   : > { %v1056_v17 = vadd.f32 %v10053_v16, %v10894_v23  ;;  %v1047_v18 = vpop.f32.mrb[17].mxu0  ;;  %2041 = vrot.lane.b32.xlu0 %v10658_v10, %s10659_s2 }
 0x11a   : > { %10087 = vmatprep.mubr.msk.bf16.mxu1 %vm15235_vm1, %v1156_v15  ;;  %v1048_v19 = vadd.f32 %v10894_v23, %v1047_v18  ;;  %v10054_v20 = vpop.f32.mrb[18].mxu0  ;;  %v1557_v15 = vld [vmem:[#allocation2] sm:$0x80] }
 0x11b   : > { %10088 = vmatmul.mubr.msk.bf16.gmra.mrb[12].mxu1 %vm15235_vm1, %v1157_v14  ;;  %v1128_v21 = vmax.f32 %v1056_v17, 0.0  ;;  %v1059_v24 = vadd.f32 %v10054_v20, %v10894_v23  ;;  %v1050_v25 = vpop.f32.mrb[19].mxu0  ;;  %v10955_v14 = vrot.slane %v10657_v22, 7  ;;  %v1816_v16 = vrot.slane %v1557_v15, 7  ;;  %v10247_v20 = vld [vmem:[%s15358_s30] sm:$0xff]  }
 0x11c   : > { %v1126_v26 = vmax.f32 %v1048_v19, 0.0  ;;  %v1051_v27 = vadd.f32 %v10894_v23, %v1050_v25  ;;  %v15205_v19 = vmov 0   ;;  %v10972_v25 = vld [vmem:[%s15359_s1] ss:$0 sm:$0xff]  ;;  %s10663_s1 = smov 48  }
 0x11d   : > { %v1129_v28 = vmax.f32 %v1059_v24, 0.0  ;;  %v1818_v17 = vsel %vm15343_vm3, %v1816_v16, %v10955_v14  ;;  %4063 = vmatprep.subr.bf16.mxu0 %v15205_v19 }
 0x11e   : > { %v1127_v29 = vmax.f32 %v1051_v27, 0.0  ;;  %4064 = vmatpush1.bf16.msra.mxu0 %v10247_v20 }
 0x11f   : > { %v1159_v30 = vpack.c.bf16 %v1129_v28, %v1128_v21  ;;  %4065 = vmatprep.subr.bf16.mxu0 %v15205_v19 }
 0x120   : > { %v1158_v31 = vpack.c.bf16 %v1127_v29, %v1126_v26  ;;  %v10057_v32 = vpop.f32.mrb[20].mxu0  ;;  %v10248_v26 = vld [vmem:[%s15358_s30 + $0x8] sm:$0xff]  }
 0x121   : > { %v1072_v33 = vadd.f32 %v10057_v32, %v10894_v23  ;;  %v1063_v34 = vpop.f32.mrb[21].mxu0 }
 0x122   : > { %10091 = vmatprep.mubr.msk.bf16.mxu1 %vm15235_vm1, %v1158_v31  ;;  %v1064_v35 = vadd.f32 %v10894_v23, %v1063_v34  ;;  %v10058_v36 = vpop.f32.mrb[22].mxu0  ;;  %4066 = vmatpush1.bf16.msra.mxu0 %v10248_v26 }
 0x123   : > { %10092 = vmatmul.mubr.msk.bf16.gmra.mrb[16].mxu1 %vm15235_vm1, %v1159_v30  ;;  %v1132_v37 = vmax.f32 %v1072_v33, 0.0  ;;  %v1075_v38 = vadd.f32 %v10058_v36, %v10894_v23  ;;  %v1066_v39 = vpop.f32.mrb[23].mxu0  ;;  %4067 = vmatprep.subr.bf16.mxu0 %v15205_v19  ;;  %v10249_v33 = vld [vmem:[%s15358_s30 + $0x10] sm:$0xff]  }
 0x124   : > { %v1130_v40 = vmax.f32 %v1064_v35, 0.0  ;;  %v1067_v41 = vadd.f32 %v10894_v23, %v1066_v39 }
 0x125   : > { %v1133_v42 = vmax.f32 %v1075_v38, 0.0 }
 0x126   : > { %v1131_v43 = vmax.f32 %v1067_v41, 0.0  ;;  %4068 = vmatpush1.bf16.msra.mxu0 %v10249_v33 }
 0x127   : > { %v1161_v44 = vpack.c.bf16 %v1133_v42, %v1132_v37  ;;  %4069 = vmatprep.subr.bf16.mxu0 %v15205_v19 }
 0x128   : > { %v1160_v45 = vpack.c.bf16 %v1131_v43, %v1130_v40  ;;  %v10061_v46 = vpop.f32.mrb[24].mxu0  ;;  %v2106_v43 = vld [vmem:[#allocation2 + $0x10] sm:$0xfe] }
 0x129   : > { %v1088_v47 = vadd.f32 %v10061_v46, %v10894_v23  ;;  %v1079_v48 = vpop.f32.mrb[25].mxu0 }
 0x12a   : > { %10095 = vmatprep.mubr.msk.bf16.mxu1 %vm15235_vm1, %v1160_v45  ;;  %v1080_v49 = vadd.f32 %v10894_v23, %v1079_v48  ;;  %v10062_v50 = vpop.f32.mrb[26].mxu0  ;;  %v10250_v45 = vld [vmem:[%s15358_s30 + $0x18] sm:$0xff]  }
 0x12b   : > { %10096 = vmatmul.mubr.msk.bf16.gmra.mrb[20].mxu1 %vm15235_vm1, %v1161_v44  ;;  %v1136_v51 = vmax.f32 %v1088_v47, 0.0  ;;  %v1091_v52 = vadd.f32 %v10062_v50, %v10894_v23  ;;  %v1082_v53 = vpop.f32.mrb[27].mxu0  ;;  %4070 = vmatpush1.bf16.msra.mxu0 %v10250_v45  ;;  %v10253_v45 = vld [vmem:[%s15358_s30 + $0x30] sm:$0xff]  }
 0x12c   : > { %v1134_v54 = vmax.f32 %v1080_v49, 0.0  ;;  %v1083_v55 = vadd.f32 %v10894_v23, %v1082_v53  ;;  %v2365_v53 = vrot.slane %v2106_v43, 1  ;;  %4071 = vmatprep.subr.bf16.mxu0 %v15205_v19 }
 0x12d   : > { %v1137_v56 = vmax.f32 %v1091_v52, 0.0  ;;  %v2591_v52 = vld [vmem:[#allocation2 + $0x20] sm:$0x80] }
 0x12e   : > { %v1135_v57 = vmax.f32 %v1083_v55, 0.0 }
 0x12f   : > { %v1163_v58 = vpack.c.bf16 %v1137_v56, %v1136_v51 }
 0x130   : > { %v1162_v59 = vpack.c.bf16 %v1135_v57, %v1134_v54  ;;  %v10065_v60 = vpop.f32.mrb[28].mxu0  ;;  %v2366_v54 = vrot.slane %v10657_v22, 1 }
 0x131   : > { %v1104_v61 = vadd.f32 %v10065_v60, %v10894_v23  ;;  %v1095_v62 = vpop.f32.mrb[29].mxu0 }
 0x132   : > { %10099 = vmatprep.mubr.msk.bf16.mxu1 %vm15235_vm1, %v1162_v59  ;;  %v1096_v63 = vadd.f32 %v10894_v23, %v1095_v62  ;;  %v10066_v0 = vpop.f32.mrb[30].mxu0  ;;  %v10251_v59 = vld [vmem:[%s15358_s30 + $0x20] sm:$0xff]  }
 0x133   : > { %10100 = vmatmul.mubr.msk.bf16.gmra.mrb[24].mxu1 %vm15235_vm1, %v1163_v58  ;;  %v1140_v1 = vmax.f32 %v1104_v61, 0.0  ;;  %v1107_v2 = vadd.f32 %v10066_v0, %v10894_v23  ;;  %v1098_v3 = vpop.f32.mrb[31].mxu0  ;;  %v2657_v0 = vrot.slane %v2591_v52, 7  ;;  %4072 = vmatpush1.bf16.msra.mxu0 %v10251_v59 }
 0x134   : > { %v1138_v4 = vmax.f32 %v1096_v63, 0.0  ;;  %v1099_v5 = vadd.f32 %v10894_v23, %v1098_v3  ;;  %v1476_v23 = vlaneseq  ;;  %4073 = vmatprep.subr.bf16.mxu0 %v15205_v19 }
 0x135   : > { %v1141_v6 = vmax.f32 %v1107_v2, 0.0 }
 0x136   : > { %v1139_v7 = vmax.f32 %v1099_v5, 0.0  ;;  %v10949_v11 = vshrl.u32 %v1476_v23, 7 }
 0x137   : > { %v1165_v8 = vpack.c.bf16 %v1141_v6, %v1140_v1 }
 0x138   : > { %v1164_v9 = vpack.c.bf16 %v1139_v7, %v1138_v4  ;;  %15357 = vst [vmem:[#allocation4_spill] sm:$0xff] %v10949_v11  ;;  %v1509_v12 = vand.u32 15, %v10949_v11  ;;  %v10979_v28 = vadd.s32 8, %v10949_v11  ;;  %v10992_v41 = vadd.s32 16, %v10949_v11 }
 0x139   : > { %v10997_v44 = vadd.s32 24, %v10949_v11  ;;  %v11028_v4 = vsel %vm15333_vm6, %v2365_v53, %v2366_v54  ;;  %v11055_v20 = vadd.s32 32, %v10949_v11 }
 0x13a   : > { %10103 = vmatprep.mubr.msk.bf16.mxu1 %vm15235_vm1, %v1164_v9  ;;  %v10952_v13 = vadd.s32 4294967295, %v1509_v12  ;;  %15360 = vst [vmem:[#allocation5_spill] sm:$0xff] %v10979_v28  ;;  %v15211_v39 = vand.u32 15, %v10979_v28  ;;  %15361 = vst [vmem:[#allocation6_spill] sm:$0xff] %v10992_v41  ;;  %v1511_v55 = vand.u32 15, %v10992_v41 }
 0x13b   : > { %10104 = vmatmul.mubr.msk.bf16.gmra.mrb[28].mxu1 %vm15235_vm1, %v1165_v8  ;;  %15362 = vst [vmem:[#allocation7_spill] sm:$0xff] %v10997_v44  ;;  %v15210_v58 = vand.u32 15, %v10997_v44  ;;  %15366 = vst [vmem:[#allocation11_spill] sm:$0xff] %v11055_v20 }
 0x13c   : > { %vm1622_vm4 = vcmp.ge.s32.totalorder %v10952_v13, 0  ;;  %v11006_v49 = vadd.s32 1, %v15211_v39  ;;  %v11030_v5 = vadd.s32 4294967295, %v1511_v55 }
 0x13d   : > { %v1913_v18 = vsel %vm1622_vm4, %v1818_v17, 0.0  ;;  %v11042_v23 = vadd.s32 1, %v15210_v58 }
 0x13e   : > { %v1945_v21 = vpack.c.bf16 %v10955_v14, %v1913_v18  ;;  %15363 = vst [vmem:[#allocation8_spill] sm:$0xff] %v11006_v49  ;;  %vm15321_vm7 = vcmp.lt.s32.totalorder %v11006_v49, 16  ;;  %v11052_v18 = vadd.s32 40, %v10949_v11  ;;  %vm1624_vm8 = vcmp.ge.s32.totalorder %v11030_v5, 0 }
 0x13f   : > { %15364 = vst [vmem:[#allocation9_spill] sm:$0xff] %v11042_v23  ;;  %vm15317_vm9 = vcmp.lt.s32.totalorder %v11042_v23, 16 }
 0x140   : > { %1961 = vst.msk [vmem:[#allocation3] sm:$0xff] %vm15341_vm2, %v1945_v21  ;;  %15365 = vst [vmem:[#allocation10_spill] sm:$0xff] %v11052_v18 }
 0x18b   : > { %v2042_v24 = vpop.permute.xlu0 %2041 }
 0x18c   : > { %2090 = vst.msk [vmem:[#allocation3] sm:$0xff] %vm2089_vm5, %v2042_v24 }
 0x1d6   : > { %v10077_v27 = vpop.f32.mrb[0].mxu1 }
 0x1d7   : > { %v1289_v29 = vadd.f32 %v10077_v27, %v10972_v25  ;;  %v1280_v30 = vpop.f32.mrb[1].mxu1 }
 0x1d8   : > { %v1281_v31 = vadd.f32 %v10972_v25, %v1280_v30  ;;  %v10078_v32 = vpop.f32.mrb[2].mxu1  ;;  %v10252_v30 = vld [vmem:[%s15358_s30 + $0x28] sm:$0xff]  }
 0x1d9   : > { %v1409_v34 = vmax.f32 %v1289_v29, 0.0  ;;  %v1292_v35 = vadd.f32 %v10078_v32, %v10972_v25  ;;  %v1283_v36 = vpop.f32.mrb[3].mxu1  ;;  %4074 = vmatpush1.bf16.msra.mxu0 %v10252_v30 }
 0x1da   : > { %v1407_v37 = vmax.f32 %v1281_v31, 0.0  ;;  %v1284_v38 = vadd.f32 %v10972_v25, %v1283_v36  ;;  %4075 = vmatprep.subr.bf16.mxu0 %v15205_v19 }
 0x1db   : > { %1442 = vst.msk [vmem:[#allocation2 + $0x50] sm:$0xff] %vm15341_vm2, %v1409_v34  ;;  %v1410_v40 = vmax.f32 %v1292_v35, 0.0 }
 0x1dc   : > { %1440 = vst.msk [vmem:[#allocation2 + $0x30] sm:$0xff] %vm15341_vm2, %v1407_v37  ;;  %v1408_v42 = vmax.f32 %v1284_v38, 0.0 }
 0x1dd   : > { %1443 = vst.msk [vmem:[#allocation2 + $0x60] sm:$0xff] %vm15341_vm2, %v1410_v40  ;;  %v1542_v46 = vpack.c.bf16 %v1410_v40, %v1409_v34  ;;  %4076 = vmatpush1.bf16.msra.mxu0 %v10253_v45 }
 0x1de   : > { %1441 = vst.msk [vmem:[#allocation2 + $0x40] sm:$0xff] %vm15341_vm2, %v1408_v42  ;;  %v10081_v47 = vpop.f32.mrb[4].mxu1  ;;  %v1541_v48 = vpack.c.bf16 %v1408_v42, %v1407_v37  ;;  %4077 = vmatprep.subr.bf16.mxu0 %v15205_v19 }
 0x1df   : > { %v1305_v50 = vadd.f32 %v10081_v47, %v10972_v25  ;;  %2901 = vrot.lane.b32.xlu0 %v1542_v46, %s15334_s0  ;;  %v1296_v51 = vpop.f32.mrb[5].mxu1 }
 0x1e0   : > { %v1297_v56 = vadd.f32 %v10972_v25, %v1296_v51  ;;  %v10082_v57 = vpop.f32.mrb[6].mxu1  ;;  %2899 = vrot.lane.b32.xlu1 %v1541_v48, %s15334_s0 }
 0x1e1   : > { %v1413_v60 = vmax.f32 %v1305_v50, 0.0  ;;  %v1308_v61 = vadd.f32 %v10082_v57, %v10972_v25  ;;  %v1299_v22 = vpop.f32.mrb[7].mxu1 }
 0x1e2   : > { %v1411_v62 = vmax.f32 %v1297_v56, 0.0  ;;  %v1300_v63 = vadd.f32 %v10972_v25, %v1299_v22  ;;  %v11021_v1 = vld [vmem:[#allocation2 + $0x50] sm:$0xfe] }
 0x1e3   : > { %1446 = vst.msk [vmem:[#allocation2 + $0x90] sm:$0xff] %vm15341_vm2, %v1413_v60  ;;  %v1414_v2 = vmax.f32 %v1308_v61, 0.0  ;;  %v11024_v3 = vld [vmem:[#allocation2 + $0x30] sm:$0xff]  ;;  %v3743_v34 = vrot.slane %v11021_v1, 1  ;;  %v15209_v61 = vand.u32 15, %v11052_v18  ;;  %v10254_v1 = vld [vmem:[%s15358_s30 + $0x38] sm:$0xff]  }
 0x1e4   : > { %1444 = vst.msk [vmem:[#allocation2 + $0x70] sm:$0xff] %vm15341_vm2, %v1411_v62  ;;  %v1412_v6 = vmax.f32 %v1300_v63, 0.0  ;;  %v11034_v7 = vld [vmem:[#allocation2 + $0x50] sm:$0xff]  ;;  %v11036_v8 = vld [vmem:[#allocation2 + $0x60] sm:$0xff]  ;;  %v2658_v9 = vrot.slane %v11024_v3, 7  ;;  %v2368_v10 = vrot.slane %v11024_v3, 1  ;;  %4078 = vmatpush1.bf16.msra.mxu0 %v10254_v1 }
 0x1e5   : > { %1447 = vst.msk [vmem:[#allocation2 + $0xa0] sm:$0xff] %vm15341_vm2, %v1414_v2  ;;  %v11045_v12 = vpack.c.bf16 %v1414_v2, %v1413_v60  ;;  %v3580_v15 = vpack.c.bf16 %v11036_v8, %v11034_v7  ;;  %v11049_v16 = vld [vmem:[#allocation2 + $0x40] sm:$0xff]  ;;  %v3323_v35 = vrot.slane %v11034_v7, 7  ;;  %v11072_v36 = vld [vmem:[#allocation2 + $0x30] sm:$0xfe]  ;;  %v11077_v40 = vrot.slane %v11036_v8, 1  ;;  %4079 = vmatprep.subr.bf16.mxu0 %v15205_v19 }
 0x1e6   : > { %v3256_v17 = vld [vmem:[#allocation2 + $0x40] sm:$0x80]  ;;  %1445 = vst.msk [vmem:[#allocation2 + $0x80] sm:$0xff] %vm15341_vm2, %v1412_v6  ;;  %v1543_v21 = vpack.c.bf16 %v1412_v6, %v1411_v62  ;;  %v10085_v24 = vpop.f32.mrb[8].mxu1  ;;  %v2010_v26 = vpack.c.bf16 %v11049_v16, %v11024_v3  ;;  %v2659_v27 = vsel %vm15343_vm3, %v2657_v0, %v2658_v9  ;;  %v2660_v29 = vrot.slane %v11049_v16, 7 }
 0x1e7   : > { %v1321_v31 = vadd.f32 %v10085_v24, %v10972_v25  ;;  %3612 = vrot.lane.b32.xlu0 %v3580_v15, %s10662_s25  ;;  %v1312_v32 = vpop.f32.mrb[9].mxu1  ;;  %v2369_v33 = vsel %vm15333_vm6, %v2366_v54, %v2368_v10  ;;  %v3322_v42 = vrot.slane %v3256_v17, 7  ;;  %v3325_v43 = vrot.slane %v11036_v8, 7 }
 0x1e8   : > { %v1313_v37 = vadd.f32 %v10972_v25, %v1312_v32  ;;  %v10086_v38 = vpop.f32.mrb[10].mxu1  ;;  %2043 = vrot.lane.b32.xlu1 %v2010_v26, %s10659_s2  ;;  %v2661_v50 = vsel %vm15343_vm3, %v2658_v9, %v2660_v29  ;;  %v2754_v51 = vsel %vm1622_vm4, %v2659_v27, 0.0  ;;  %v2463_v54 = vsel %vm15321_vm7, %v2369_v33, 0.0 }
 0x1e9   : > { %v1417_v46 = vmax.f32 %v1321_v31, 0.0  ;;  %v1324_v47 = vadd.f32 %v10086_v38, %v10972_v25  ;;  %v1315_v48 = vpop.f32.mrb[11].mxu1  ;;  %v3324_v55 = vsel %vm15343_vm3, %v3322_v42, %v3323_v35  ;;  %v3030_v59 = vrot.slane %v11072_v36, 1 }
 0x1ea   : > { %v1415_v52 = vmax.f32 %v1313_v37, 0.0  ;;  %v1316_v53 = vadd.f32 %v10972_v25, %v1315_v48  ;;  %v11099_v60 = vrot.slane %v11049_v16, 1  ;;  %v3745_v62 = vsel %vm15333_vm6, %v3743_v34, %v11077_v40  ;;  %v11134_v26 = vld [vmem:[#allocation2 + $0x90] sm:$0xff]  ;;  %v10255_v37 = vld [vmem:[%s15358_s30 + $0x40] sm:$0xff]  }
 0x1eb   : > { %1450 = vst.msk [vmem:[#allocation2 + $0xd0] sm:$0xff] %vm15341_vm2, %v1417_v46  ;;  %v1418_v56 = vmax.f32 %v1324_v47, 0.0  ;;  %2045 = vrot.lane.b32.xlu0 %v3580_v15, %s10659_s2  ;;  %v11095_v57 = vld [vmem:[#allocation2 + $0x70] sm:$0xff]  ;;  %v3419_v0 = vsel %vm1622_vm4, %v3324_v55, 0.0  ;;  %v2786_v6 = vpack.c.bf16 %v2661_v50, %v2754_v51  ;;  %v2494_v9 = vpack.c.bf16 %v2463_v54, %v11028_v4  ;;  %4080 = vmatpush1.bf16.msra.mxu0 %v10255_v37 }
 0x1ec   : > { %1448 = vst.msk [vmem:[#allocation2 + $0xb0] sm:$0xff] %vm15341_vm2, %v1415_v52  ;;  %v1416_v22 = vmax.f32 %v1316_v53, 0.0  ;;  %2903 = vrot.lane.b32.xlu1 %v1543_v21, %s15334_s0  ;;  %v3746_v63 = vrot.slane %v11095_v57, 1  ;;  %v3033_v15 = vrot.slane %v11034_v7, 1  ;;  %v11131_v24 = vsel %vm15343_vm3, %v3323_v35, %v3325_v43  ;;  %v11172_v55 = vld [vmem:[#allocation2 + $0xa0] sm:$0xff] }
 0x1ed   : > { %1451 = vst.msk [vmem:[#allocation2 + $0xe0] sm:$0xff] %vm15341_vm2, %v1418_v56  ;;  %v11114_v2 = vpack.c.bf16 %v1418_v56, %v1417_v46  ;;  %v11118_v16 = vld [vmem:[#allocation2 + $0x80] sm:$0xff]  ;;  %v2663_v4 = vsel %vm15343_vm3, %v2660_v29, %v3323_v35  ;;  %v3451_v31 = vpack.c.bf16 %v11131_v24, %v3419_v0  ;;  %v3032_v35 = vsel %vm15333_vm6, %v3030_v59, %v11099_v60 }
 0x1ee   : > { %1449 = vst.msk [vmem:[#allocation2 + $0xc0] sm:$0xff] %vm15341_vm2, %v1416_v22  ;;  %v11122_v13 = vpack.c.bf16 %v1416_v22, %v1415_v52  ;;  %v11126_v17 = vsel %vm15333_vm6, %v11077_v40, %v3746_v63  ;;  %v10089_v21 = vpop.f32.mrb[12].mxu1  ;;  %v3034_v33 = vsel %vm15333_vm6, %v11099_v60, %v3033_v15  ;;  %v3748_v36 = vrot.slane %v11118_v16, 1 }
 0x1ef   : > { %2905 = vrot.lane.b32.xlu0 %v11045_v12, %s15334_s0  ;;  %v3841_v27 = vsel %vm15321_vm7, %v11126_v17, 0.0  ;;  %v1337_v30 = vadd.f32 %v10089_v21, %v10972_v25  ;;  %v1328_v32 = vpop.f32.mrb[13].mxu1  ;;  %v2756_v46 = vsel %vm1624_vm8, %v2663_v4, 0.0  ;;  %v3750_v47 = vrot.slane %v11134_v26, 1 }
 0x1f0   : > { %2818 = vrot.lane.b32.xlu1 %v2786_v6, %s10663_s1  ;;  %v3872_v29 = vpack.c.bf16 %v3841_v27, %v3745_v62  ;;  %v1329_v12 = vadd.f32 %v10972_v25, %v1328_v32  ;;  %v10090_v34 = vpop.f32.mrb[14].mxu1  ;;  %v3128_v51 = vsel %vm15321_vm7, %v3034_v33, 0.0  ;;  %v11165_v52 = vsel %vm15333_vm6, %v3746_v63, %v3748_v36 }
 0x1f1   : > { %v1421_v38 = vmax.f32 %v1337_v30, 0.0  ;;  %v1340_v42 = vadd.f32 %v10090_v34, %v10972_v25  ;;  %v1331_v45 = vpop.f32.mrb[15].mxu1  ;;  %v11170_v54 = vsel %vm15333_vm6, %v3748_v36, %v3750_v47  ;;  %v11176_v56 = vadd.s32 1, %v15209_v61 }
 0x1f2   : > { %3888 = vst.msk [vmem:[#allocation3 + $0x8] sm:$0xff] %vm15341_vm2, %v3872_v29  ;;  %v1419_v48 = vmax.f32 %v1329_v12, 0.0  ;;  %v1332_v50 = vadd.f32 %v10972_v25, %v1331_v45  ;;  %v11179_v59 = vadd.s32 48, %v10949_v11  ;;  %v3843_v62 = vsel %vm15317_vm9, %v11170_v54, 0.0 }
 0x1f3   : > { %2526 = vrot.lane.b32.xlu0 %v2494_v9, %s15338_s26  ;;  %1454 = vst.msk [vmem:[#allocation2 + $0x110] sm:$0xff] %vm15341_vm2, %v1421_v38  ;;  %v1422_v53 = vmax.f32 %v1340_v42, 0.0  ;;  %15367 = vst [vmem:[#allocation12_spill] sm:$0xff] %v11176_v56  ;;  %v11186_v63 = vld [vmem:[#allocation2 + $0xb0] sm:$0xff]  ;;  %v11189_v0 = vadd.s32 56, %v10949_v11  ;;  %v11192_v1 = vadd.s32 72, %v10949_v11  ;;  %v3159_v9 = vpack.c.bf16 %v3128_v51, %v3032_v35 }
 0x1f4   : > { %15368 = vst [vmem:[#allocation13_spill] sm:$0xff] %v11179_v59  ;;  %3483 = vrot.lane.b32.xlu1 %v3451_v31, %s15336_s27  ;;  %1452 = vst.msk [vmem:[#allocation2 + $0xf0] sm:$0xff] %vm15341_vm2, %v1419_v48  ;;  %v1420_v22 = vmax.f32 %v1332_v50, 0.0  ;;  %v2787_v21 = vpack.c.bf16 %v11131_v24, %v2756_v46  ;;  %v3873_v4 = vpack.c.bf16 %v3843_v62, %v11165_v52  ;;  %v2465_v31 = vsel %vm15317_vm9, %v3034_v33, 0.0 }
 0x1f5   : > { %15369 = vst [vmem:[#allocation14_spill] sm:$0xff] %v11189_v0  ;;  %15370 = vst [vmem:[#allocation15_spill] sm:$0xff] %v11192_v1  ;;  %v11195_v6 = vpack.c.bf16 %v1422_v53, %v1421_v38  ;;  %v2371_v30 = vsel %vm15333_vm6, %v2368_v10, %v11099_v60  ;;  %v3752_v32 = vrot.slane %v11172_v55, 1  ;;  %v3754_v24 = vrot.slane %v11186_v63, 1 }
 0x1f6   : > { %1455 = vst.msk [vmem:[#allocation2 + $0x120] sm:$0xff] %vm15341_vm2, %v1422_v53  ;;  %1453 = vst.msk [vmem:[#allocation2 + $0x100] sm:$0xff] %vm15341_vm2, %v1420_v22  ;;  %v11200_v27 = vpack.c.bf16 %v1420_v22, %v1419_v48  ;;  %v10093_v29 = vpop.f32.mrb[16].mxu1  ;;  %v1513_v12 = vand.u32 15, %v11055_v20  ;;  %v1515_v3 = vand.u32 15, %v11179_v59  ;;  %vm15241_vm10 = vcmp.lt.s32.totalorder %v11176_v56, 16 }
 0x1f7   : > { %3191 = vrot.lane.b32.xlu0 %v3159_v9, %s10666_s29  ;;  %3889 = vst.msk [vmem:[#allocation3 + $0x30] sm:$0xff] %vm15341_vm2, %v3873_v4  ;;  %v1344_v34 = vpop.f32.mrb[17].mxu1  ;;  %v1353_v10 = vadd.f32 %v10093_v29, %v10972_v25  ;;  %v15208_v33 = vand.u32 15, %v11189_v0  ;;  %v15207_v35 = vand.u32 15, %v11192_v1  ;;  %v2495_v37 = vpack.c.bf16 %v2465_v31, %v2371_v30  ;;  %v11245_v30 = vld [vmem:[#allocation2 + $0xd0] sm:$0xff] }
 0x1f8   : > { %2820 = vrot.lane.b32.xlu1 %v2787_v21, %s10663_s1  ;;  %v10094_v60 = vpop.f32.mrb[18].mxu1  ;;  %v3581_v38 = vpack.c.bf16 %v11118_v16, %v11095_v57  ;;  %v11222_v42 = vsel %vm15333_vm6, %v3750_v47, %v3752_v32  ;;  %v11225_v45 = vsel %vm15333_vm6, %v3752_v32, %v3754_v24  ;;  %v1345_v51 = vadd.f32 %v10972_v25, %v1344_v34 }
 0x1f9   : > { %v3905_v36 = vld [vmem:[#allocation3 + $0x8] sm:$0xff]  ;;  %v1347_v46 = vpop.f32.mrb[19].mxu1  ;;  %v3845_v48 = vsel %vm15241_vm10, %v11225_v45, 0.0  ;;  %v1425_v50 = vmax.f32 %v1353_v10, 0.0  ;;  %v1356_v53 = vadd.f32 %v10094_v60, %v10972_v25  ;;  %v11237_v62 = vadd.s32 64, %v10949_v11  ;;  %v11255_v10 = vld [vmem:[#allocation2 + $0xc0] sm:$0xff] }
 0x1fa   : > { %9551 = vmatprep.mubr.msk.bf16.mxu0 %vm15341_vm2, %v3905_v36  ;;  %v3874_v47 = vpack.c.bf16 %v3845_v48, %v11222_v42  ;;  %v1348_v22 = vadd.f32 %v10972_v25, %v1347_v46  ;;  %v1423_v9 = vmax.f32 %v1345_v51, 0.0  ;;  %v11243_v4 = vadd.s32 1, %v15208_v33  ;;  %v11355_v41 = vld [vmem:[#allocation2 + $0x110] sm:$0xff] }
 0x1fb   : > { %2528 = vrot.lane.b32.xlu0 %v2495_v37, %s15338_s26  ;;  %1458 = vst.msk [vmem:[#allocation2 + $0x150] sm:$0xff] %vm15341_vm2, %v1425_v50  ;;  %v1426_v21 = vmax.f32 %v1356_v53, 0.0  ;;  %v11248_v31 = vadd.s32 80, %v10949_v11  ;;  %v3582_v32 = vpack.c.bf16 %v11172_v55, %v11134_v26  ;;  %v11253_v29 = vadd.s32 4294967295, %v1513_v12 }
 0x1fc   : > { %3614 = vrot.lane.b32.xlu1 %v3581_v38, %s10662_s25  ;;  %15371 = vst [vmem:[#allocation16_spill] sm:$0xff] %v11243_v4  ;;  %3890 = vst.msk [vmem:[#allocation3 + $0x58] sm:$0xff] %vm15341_vm2, %v3874_v47  ;;  %v1424_v34 = vmax.f32 %v1348_v22, 0.0  ;;  %v11259_v60 = vadd.s32 1, %v15207_v35  ;;  %v3327_v36 = vrot.slane %v11095_v57, 7  ;;  %v11266_v46 = vadd.s32 4294967295, %v1515_v3 }
 0x1fd   : > { %1456 = vst.msk [vmem:[#allocation2 + $0x130] sm:$0xff] %vm15341_vm2, %v1423_v9  ;;  %1459 = vst.msk [vmem:[#allocation2 + $0x160] sm:$0xff] %vm15341_vm2, %v1426_v21  ;;  %v11264_v37 = vpack.c.bf16 %v1426_v21, %v1425_v50  ;;  %v3756_v12 = vrot.slane %v11255_v10, 1  ;;  %v3758_v53 = vrot.slane %v11245_v30, 1  ;;  %v11274_v57 = vld [vmem:[#allocation2 + $0xe0] sm:$0xff]  ;;  %v11278_v50 = vadd.s32 88, %v10949_v11 }
 0x1fe   : > { %15372 = vst [vmem:[#allocation17_spill] sm:$0xff] %v11259_v60  ;;  %v10097_v48 = vpop.f32.mrb[20].mxu1  ;;  %1457 = vst.msk [vmem:[#allocation2 + $0x140] sm:$0xff] %vm15341_vm2, %v1424_v34  ;;  %v11271_v51 = vpack.c.bf16 %v1424_v34, %v1423_v9  ;;  %vm15316_vm11 = vcmp.lt.s32.totalorder %v11243_v4, 16  ;;  %v11285_v21 = vld [vmem:[#allocation2 + $0xf0] sm:$0xff]  ;;  %v11289_v19 = vadd.s32 104, %v10949_v11  ;;  %v3328_v61 = vsel %vm15343_vm3, %v3325_v43, %v3327_v36 }
 0x1ff   : > { %3616 = vrot.lane.b32.xlu0 %v3582_v32, %s10662_s25  ;;  %v1360_v22 = vpop.f32.mrb[21].mxu1  ;;  %15373 = vst [vmem:[#allocation18_spill] sm:$0xff] %v11278_v50  ;;  %v11283_v3 = vsel %vm15333_vm6, %v3754_v24, %v3756_v12  ;;  %v3130_v35 = vsel %vm15317_vm9, %v11126_v17, 0.0  ;;  %v3329_v33 = vrot.slane %v11118_v16, 7  ;;  %vm1626_vm12 = vcmp.ge.s32.totalorder %v11253_v29, 0  ;;  %v11362_v1 = vld [vmem:[#allocation2 + $0x100] sm:$0xff] }
 0x200   : > { %2047 = vrot.lane.b32.xlu1 %v3581_v38, %s10659_s2  ;;  %v10098_v9 = vpop.f32.mrb[22].mxu1  ;;  %15374 = vst [vmem:[#allocation19_spill] sm:$0xff] %v11289_v19  ;;  %v11297_v38 = vsel %vm15333_vm6, %v3756_v12, %v3758_v53  ;;  %vm15315_vm13 = vcmp.lt.s32.totalorder %v11259_v60, 16  ;;  %v3760_v39 = vrot.slane %v11274_v57, 1  ;;  %v11308_v16 = vadd.s32 96, %v10949_v11 }
 0x201   : > { %v1363_v24 = vpop.f32.mrb[23].mxu1  ;;  %v3847_v58 = vsel %vm15316_vm11, %v11297_v38, 0.0  ;;  %v3036_v12 = vsel %vm15333_vm6, %v3033_v15, %v11077_v40  ;;  %v3762_v43 = vrot.slane %v11285_v21, 1  ;;  %v15215_v34 = vand.u32 15, %v11278_v50 }
 0x202   : > { %v3875_v8 = vpack.c.bf16 %v3847_v58, %v11283_v3  ;;  %v3160_v47 = vpack.c.bf16 %v3130_v35, %v3036_v12  ;;  %v11321_v59 = vsel %vm15333_vm6, %v3758_v53, %v3760_v39  ;;  %v3330_v7 = vsel %vm15343_vm3, %v3327_v36, %v3329_v33 }
 0x203   : > { %2049 = vrot.lane.b32.xlu0 %v3582_v32, %s10659_s2  ;;  %v1369_v32 = vadd.f32 %v10097_v48, %v10972_v25  ;;  %v3421_v58 = vsel %vm1624_vm8, %v3328_v61, 0.0  ;;  %v3331_v40 = vrot.slane %v11134_v26, 7  ;;  %vm1628_vm14 = vcmp.ge.s32.totalorder %v11266_v46, 0 }
 0x204   : > { %2907 = vrot.lane.b32.xlu1 %v11122_v13, %s15334_s0  ;;  %3891 = vst.msk [vmem:[#allocation3 + $0x80] sm:$0xff] %vm15341_vm2, %v3875_v8  ;;  %v11332_v15 = vsel %vm15333_vm6, %v3760_v39, %v3762_v43  ;;  %v1361_v48 = vadd.f32 %v10972_v25, %v1360_v22  ;;  %v1372_v36 = vadd.f32 %v10098_v9, %v10972_v25  ;;  %v2467_v26 = vsel %vm15241_vm10, %v11126_v17, 0.0 }
 0x205   : > { %v3849_v13 = vsel %vm15315_vm13, %v11332_v15, 0.0  ;;  %v1429_v35 = vmax.f32 %v1369_v32, 0.0  ;;  %v1364_v8 = vadd.f32 %v10972_v25, %v1363_v24  ;;  %v11348_v20 = vadd.s32 1, %v15215_v34 }
 0x206   : > { %v10101_v53 = vpop.f32.mrb[24].mxu1  ;;  %v3876_v39 = vpack.c.bf16 %v3849_v13, %v11321_v59  ;;  %v3332_v22 = vsel %vm15343_vm3, %v3329_v33, %v3331_v40  ;;  %v1430_v9 = vmax.f32 %v1372_v36, 0.0  ;;  %v11358_v13 = vadd.s32 120, %v10949_v11 }
 0x207   : > { %2909 = vrot.lane.b32.xlu0 %v11114_v2, %s15334_s0  ;;  %15375 = vst [vmem:[#allocation20_spill] sm:$0xff] %v11348_v20  ;;  %v11350_v32 = vpop.f32.mrb[25].mxu1  ;;  %1462 = vst.msk [vmem:[#allocation2 + $0x190] sm:$0xff] %vm15341_vm2, %v1429_v35  ;;  %v1427_v2 = vmax.f32 %v1361_v48, 0.0  ;;  %v3452_v24 = vpack.c.bf16 %v3330_v7, %v3421_v58  ;;  %v1428_v50 = vmax.f32 %v1364_v8, 0.0  ;;  %v11365_v33 = vadd.s32 112, %v10949_v11 }
 0x208   : > { %3193 = vrot.lane.b32.xlu1 %v3160_v47, %s10666_s29  ;;  %v10102_v17 = vpop.f32.mrb[26].mxu1  ;;  %15376 = vst [vmem:[#allocation21_spill] sm:$0xff] %v11358_v13  ;;  %3892 = vst.msk [vmem:[#allocation3 + $0xa8] sm:$0xff] %vm15341_vm2, %v3876_v39  ;;  %v2496_v48 = vpack.c.bf16 %v2467_v26, %v3036_v12  ;;  %v2758_v36 = vsel %vm1626_vm12, %v3328_v61, 0.0  ;;  %v11371_v58 = vpack.c.bf16 %v1430_v9, %v1429_v35  ;;  %v3764_v34 = vrot.slane %v11362_v1, 1  ;;  %v11381_v61 = vld [vmem:[#allocation2 + $0x120] sm:$0xff] }
 0x209   : > { %v1379_v47 = vpop.f32.mrb[27].mxu1  ;;  %1460 = vst.msk [vmem:[#allocation2 + $0x170] sm:$0xff] %vm15341_vm2, %v1427_v2  ;;  %1463 = vst.msk [vmem:[#allocation2 + $0x1a0] sm:$0xff] %vm15341_vm2, %v1430_v9  ;;  %v3423_v39 = vsel %vm1626_vm12, %v3332_v22, 0.0  ;;  %v11378_v8 = vpack.c.bf16 %v1428_v50, %v1427_v2  ;;  %v3766_v12 = vrot.slane %v11355_v41, 1  ;;  %v11384_v26 = vadd.s32 136, %v10949_v11 }
 0x20a   : > { %15377 = vst [vmem:[#allocation22_spill] sm:$0xff] %v11371_v58  ;;  %1461 = vst.msk [vmem:[#allocation2 + $0x180] sm:$0xff] %vm15341_vm2, %v1428_v50  ;;  %vm15314_vm15 = vcmp.lt.s32.totalorder %v11348_v20, 16  ;;  %v11389_v35 = vsel %vm15333_vm6, %v3762_v43, %v3764_v34  ;;  %v15381_v9 = vand.u32 15, %v11289_v19  ;;  %v11395_v50 = vld [vmem:[#allocation2 + $0x130] sm:$0xff]  ;;  %v2788_v0 = vpack.c.bf16 %v3330_v7, %v2758_v36  ;;  %v11813_v20 = vld [vmem:[#allocation2 + $0x8] sm:$0xff] }
 0x20b   : > { %3485 = vrot.lane.b32.xlu0 %v3452_v24, %s15336_s27  ;;  %15378 = vst [vmem:[#allocation23_spill] sm:$0xff] %v11378_v8  ;;  %15379 = vst [vmem:[#allocation24_spill] sm:$0xff] %v11384_v26  ;;  %v15383_v18 = vrot.slane %v11172_v55, 7  ;;  %v11405_v43 = vsel %vm15333_vm6, %v3764_v34, %v3766_v12  ;;  %v3768_v7 = vrot.slane %v11381_v61, 1  ;;  %v1521_v34 = vand.u32 15, %v11308_v16  ;;  %v11512_v8 = vld [vmem:[#allocation2 + $0x160] sm:$0xff] }
 0x20c   : > { %2530 = vrot.lane.b32.xlu1 %v2496_v48, %s15338_s26  ;;  %15380 = vst [vmem:[#allocation25_spill] sm:$0xff] %v11389_v35  ;;  %v11393_v24 = vadd.s32 1, %v15381_v9  ;;  %v3132_v48 = vsel %vm15241_vm10, %v11170_v54, 0.0  ;;  %v2760_v9 = vsel %vm1628_vm14, %v3332_v22, 0.0  ;;  %v3851_v2 = vsel %vm15314_vm15, %v11405_v43, 0.0 }
 0x20d   : > { %v3334_v23 = vsel %vm15343_vm3, %v3331_v40, %v15383_v18  ;;  %v3877_v18 = vpack.c.bf16 %v3851_v2, %v11389_v35  ;;  %v3770_v40 = vrot.slane %v11395_v50, 1  ;;  %v11425_v22 = vsel %vm15333_vm6, %v3766_v12, %v3768_v7 }
 0x20e   : > { %15382 = vst [vmem:[#allocation26_spill] sm:$0xff] %v11393_v24  ;;  %v3453_v44 = vpack.c.bf16 %v3334_v23, %v3423_v39  ;;  %v11413_v36 = vpop.f32.mrb[28].mxu1  ;;  %vm15313_vm4 = vcmp.lt.s32.totalorder %v11393_v24, 16  ;;  %v1385_v56 = vadd.f32 %v10101_v53, %v10972_v25  ;;  %v3161_v16 = vpack.c.bf16 %v3132_v48, %v11165_v52 }
 0x20f   : > { %2822 = vrot.lane.b32.xlu0 %v2788_v0, %s10663_s1  ;;  %v11420_v19 = vpop.f32.mrb[29].mxu1  ;;  %v15384_v0 = vand.u32 15, %v11358_v13  ;;  %v2789_v39 = vpack.c.bf16 %v3334_v23, %v2760_v9  ;;  %3893 = vst.msk [vmem:[#allocation3 + $0xd0] sm:$0xff] %vm15341_vm2, %v3877_v18  ;;  %v11440_v12 = vsel %vm15333_vm6, %v3768_v7, %v3770_v40  ;;  %v1377_v48 = vadd.f32 %v10972_v25, %v11350_v32 }
 0x210   : > { %3487 = vrot.lane.b32.xlu1 %v3453_v44, %s15336_s27  ;;  %v11432_v49 = vpop.f32.mrb[30].mxu1  ;;  %v2469_v44 = vsel %vm15316_vm11, %v11170_v54, 0.0  ;;  %v3853_v53 = vsel %vm15313_vm4, %v11440_v12, 0.0  ;;  %v1388_v23 = vadd.f32 %v10102_v17, %v10972_v25  ;;  %v1380_v9 = vadd.f32 %v10972_v25, %v1379_v47 }
 0x211   : > { %v11430_v2 = vadd.s32 1, %v15384_v0  ;;  %v11442_v28 = vpop.f32.mrb[31].mxu1  ;;  %v1433_v0 = vmax.f32 %v1385_v56, 0.0  ;;  %v3878_v54 = vpack.c.bf16 %v3853_v53, %v11425_v22  ;;  %v1523_v7 = vand.u32 15, %v11365_v33 }
 0x212   : > { %v15386_v18 = vand.u32 15, %v11384_v26  ;;  %v15388_v56 = vand.u32 15, %v11237_v62  ;;  %v1431_v32 = vmax.f32 %v1377_v48, 0.0  ;;  %v1434_v17 = vmax.f32 %v1388_v23, 0.0  ;;  %v11474_v62 = vld [vmem:[#allocation2 + $0x140] sm:$0xff]  ;;  %v1560_v26 = vld [vmem:[#allocation2 + $0x30] sm:$0xff] }
 0x213   : > { %15385 = vst [vmem:[#allocation27_spill] sm:$0xff] %v11430_v2  ;;  %3195 = vrot.lane.b32.xlu0 %v3161_v16, %s10666_s29  ;;  %1466 = vst.msk [vmem:[#allocation2 + $0x1d0] sm:$0xff] %vm15341_vm2, %v1433_v0  ;;  %v11464_v16 = vld [vmem:[#allocation2 + $0x150] sm:$0xff]  ;;  %v2497_v47 = vpack.c.bf16 %v2469_v44, %v11165_v52  ;;  %v15390_v33 = vand.u32 15, %v11248_v31  ;;  %v3583_v48 = vpack.c.bf16 %v11255_v10, %v11186_v63  ;;  %vm15312_vm1 = vcmp.lt.s32.totalorder %v11430_v2, 16  ;;  %v11484_v44 = vld [vmem:[#allocation2 + $0x60] sm:$0xff] }
 0x214   : > { %v11456_v13 = vadd.s32 1, %v15386_v18  ;;  %2824 = vrot.lane.b32.xlu1 %v2789_v39, %s10663_s1  ;;  %v11461_v58 = vadd.s32 4294967295, %v15388_v56  ;;  %15389 = vst [vmem:[#allocation29_spill] sm:$0xff] %v11464_v16  ;;  %3894 = vst.msk [vmem:[#allocation3 + $0xf8] sm:$0xff] %vm15341_vm2, %v3878_v54  ;;  %v11472_v18 = vadd.s32 4294967295, %v1521_v34  ;;  %v1432_v39 = vmax.f32 %v1380_v9, 0.0 }
 0x215   : > { %v11469_v53 = vadd.s32 4294967295, %v15390_v33  ;;  %v1561_v56 = vld [vmem:[#allocation2 + $0x40] sm:$0xff]  ;;  %1464 = vst.msk [vmem:[#allocation2 + $0x1b0] sm:$0xff] %vm15341_vm2, %v1431_v32  ;;  %1467 = vst.msk [vmem:[#allocation2 + $0x1e0] sm:$0xff] %vm15341_vm2, %v1434_v17  ;;  %v11480_v52 = vpack.c.bf16 %v1434_v17, %v1433_v0  ;;  %v3772_v31 = vrot.slane %v11474_v62, 1  ;;  %v1562_v34 = vld [vmem:[#allocation2 + $0x50] sm:$0xff]  ;;  %v3584_v0 = vpack.c.bf16 %v11274_v57, %v11245_v30 }
 0x216   : > { %15387 = vst [vmem:[#allocation28_spill] sm:$0xff] %v11456_v13  ;;  %1465 = vst.msk [vmem:[#allocation2 + $0x1c0] sm:$0xff] %vm15341_vm2, %v1432_v39  ;;  %v11488_v23 = vpack.c.bf16 %v1432_v39, %v1431_v32  ;;  %v11490_v54 = vadd.s32 4294967295, %v1523_v7  ;;  %v3774_v9 = vrot.slane %v11464_v16, 1  ;;  %vm15265_vm0 = vcmp.lt.s32.totalorder %v11456_v13, 16 }
 0x217   : > { %15391 = vst [vmem:[#allocation30_spill] sm:$0xff] %v11480_v52  ;;  %2532 = vrot.lane.b32.xlu0 %v2497_v47, %s15338_s26  ;;  %v11498_v17 = vsel %vm15333_vm6, %v3770_v40, %v3772_v31  ;;  %v1823_v33 = vrot.slane %v1561_v56, 7  ;;  %v1821_v47 = vrot.slane %v1560_v26, 7  ;;  %v11506_v7 = vsel %vm15312_vm1, %v11440_v12, 0.0 }
 0x218   : > { %15392 = vst [vmem:[#allocation31_spill] sm:$0xff] %v11488_v23  ;;  %3618 = vrot.lane.b32.xlu1 %v3583_v48, %s10662_s25  ;;  %v11501_v52 = vsel %vm15333_vm6, %v3772_v31, %v3774_v9  ;;  %v1825_v32 = vrot.slane %v1562_v34, 7  ;;  %v11519_v31 = vld [vmem:[#allocation2 + $0x170] sm:$0xff]  ;;  %v3335_v34 = vrot.slane %v11186_v63, 7  ;;  %vm1630_vm10 = vcmp.ge.s32.totalorder %v11461_v58, 0 }
 0x219   : > { %v3855_v23 = vsel %vm15312_vm1, %v11501_v52, 0.0  ;;  %v1822_v26 = vsel %vm15343_vm3, %v10955_v14, %v1821_v47  ;;  %v1824_v40 = vsel %vm15343_vm3, %v1821_v47, %v1823_v33  ;;  %v3134_v14 = vsel %vm15316_vm11, %v11225_v45, 0.0 }
 0x21a   : > { %v3879_v39 = vpack.c.bf16 %v3855_v23, %v11498_v17  ;;  %v1915_v35 = vsel %vm1624_vm8, %v1822_v26, 0.0  ;;  %v1826_v16 = vsel %vm15343_vm3, %v1823_v33, %v1825_v32  ;;  %v15393_v56 = vrot.slane %v11484_v44, 7 }
 0x21b   : > { %3620 = vrot.lane.b32.xlu0 %v3584_v0, %s10662_s25  ;;  %v1946_v47 = vpack.c.bf16 %v1824_v40, %v1915_v35  ;;  %v1917_v23 = vsel %vm1626_vm12, %v1826_v16, 0.0  ;;  %v3776_v33 = vrot.slane %v11512_v8, 1  ;;  %v15243_v26 = vrot.slane %v11519_v31, 1 }
 0x21c   : > { %2051 = vrot.lane.b32.xlu1 %v3583_v48, %s10659_s2  ;;  %v1828_v63 = vsel %vm15343_vm3, %v1825_v32, %v15393_v56  ;;  %3895 = vst.msk [vmem:[#allocation3 + $0x120] sm:$0xff] %vm15341_vm2, %v3879_v39  ;;  %v11541_v48 = vsel %vm15265_vm0, %v11440_v12, 0.0  ;;  %v3337_v35 = vrot.slane %v11255_v10, 7  ;;  %vm1632_vm8 = vcmp.ge.s32.totalorder %v11469_v53, 0 }
 0x21d   : > { %v1947_v5 = vpack.c.bf16 %v1828_v63, %v1917_v23  ;;  %1962 = vst.msk [vmem:[#allocation3 + $0x28] sm:$0xff] %vm15341_vm2, %v1946_v47  ;;  %v1493_v16 = vadd.s32 128, %v10949_v11  ;;  %v1401_v32 = vadd.f32 %v11413_v36, %v10972_v25  ;;  %v15394_v12 = vrot.slane %v11172_v55, 7 }
 0x21e   : > { %v3339_v10 = vrot.slane %v11245_v30, 7  ;;  %v11560_v40 = vsel %vm15333_vm6, %v3774_v9, %v3776_v33  ;;  %v11565_v56 = vsel %vm15333_vm6, %v3776_v33, %v15243_v26  ;;  %v3162_v36 = vpack.c.bf16 %v3134_v14, %v11222_v42 }
 0x21f   : > { %2053 = vrot.lane.b32.xlu0 %v3584_v0, %s10659_s2  ;;  %v3336_v39 = vsel %vm15343_vm3, %v15394_v12, %v3335_v34  ;;  %1963 = vst.msk [vmem:[#allocation3 + $0x50] sm:$0xff] %vm15341_vm2, %v1947_v5  ;;  %v3857_v55 = vsel %vm15265_vm0, %v11565_v56, 0.0  ;;  %v1437_v30 = vmax.f32 %v1401_v32, 0.0  ;;  %v11574_v0 = vadd.s32 144, %v10949_v11 }
 0x220   : > { %2911 = vrot.lane.b32.xlu1 %v11200_v27, %s15334_s0  ;;  %v2471_v9 = vsel %vm15315_vm13, %v11225_v45, 0.0  ;;  %v15242_v47 = vrot.slane %v11274_v57, 7  ;;  %v3880_v63 = vpack.c.bf16 %v3857_v55, %v11560_v40  ;;  %v1393_v27 = vadd.f32 %v10972_v25, %v11420_v19 }
 0x221   : > { %v3338_v14 = vsel %vm15343_vm3, %v3335_v34, %v3337_v35  ;;  %v3425_v23 = vsel %vm1628_vm14, %v3336_v39, 0.0  ;;  %1470 = vst.msk [vmem:[#allocation2 + $0x210] sm:$0xff] %vm15341_vm2, %v1437_v30  ;;  %v1404_v5 = vadd.f32 %v11432_v49, %v10972_v25  ;;  %v1396_v45 = vadd.f32 %v10972_v25, %v11442_v28 }
 0x222   : > { %v3340_v33 = vsel %vm15343_vm3, %v3337_v35, %v3339_v10  ;;  %3896 = vst.msk [vmem:[#allocation3 + $0x148] sm:$0xff] %vm15341_vm2, %v3880_v63  ;;  %v1525_v19 = vand.u32 15, %v1493_v16  ;;  %v1435_v34 = vmax.f32 %v1393_v27, 0.0  ;;  %v11598_v32 = vsel %vm15265_vm0, %v11501_v52, 0.0  ;;  %v1565_v27 = vld [vmem:[#allocation2 + $0x80] sm:$0xff] }
 0x223   : > { %2913 = vrot.lane.b32.xlu0 %v11195_v6, %s15334_s0  ;;  %v1438_v49 = vmax.f32 %v1404_v5, 0.0  ;;  %v1436_v12 = vmax.f32 %v1396_v45, 0.0  ;;  %v11604_v6 = vld [vmem:[#allocation2 + $0x190] sm:$0xff]  ;;  %v3454_v35 = vpack.c.bf16 %v3338_v14, %v3425_v23  ;;  %v2498_v16 = vpack.c.bf16 %v2471_v9, %v11222_v42 }
 0x224   : > { %3197 = vrot.lane.b32.xlu1 %v3162_v36, %s10666_s29  ;;  %v2762_v55 = vsel %vm1630_vm10, %v3336_v39, 0.0  ;;  %v3342_v63 = vsel %vm15343_vm3, %v3339_v10, %v15242_v47  ;;  %1468 = vst.msk [vmem:[#allocation2 + $0x1f0] sm:$0xff] %vm15341_vm2, %v1435_v34  ;;  %v1564_v36 = vld [vmem:[#allocation2 + $0x70] sm:$0xff]  ;;  %v3427_v5 = vsel %vm1630_vm10, %v3340_v33, 0.0  ;;  %v3136_v23 = vsel %vm15315_vm13, %v11297_v38, 0.0  ;;  %v11624_v10 = vld [vmem:[#allocation2 + $0x180] sm:$0xff] }
 0x225   : > { %1471 = vst.msk [vmem:[#allocation2 + $0x220] sm:$0xff] %vm15341_vm2, %v1438_v49  ;;  %v11619_v42 = vpack.c.bf16 %v1438_v49, %v1437_v30  ;;  %1469 = vst.msk [vmem:[#allocation2 + $0x200] sm:$0xff] %vm15341_vm2, %v1436_v12  ;;  %v11622_v39 = vpack.c.bf16 %v1436_v12, %v1435_v34  ;;  %v1566_v9 = vld [vmem:[#allocation2 + $0x90] sm:$0xff]  ;;  %v2764_v45 = vsel %vm1632_vm8, %v3340_v33, 0.0  ;;  %v11630_v25 = vadd.s32 152, %v10949_v11  ;;  %v11634_v49 = vld [vmem:[#allocation2 + $0xa0] sm:$0xff] }
 0x226   : > { %v3780_v29 = vrot.slane %v11624_v10, 1  ;;  %v2790_v34 = vpack.c.bf16 %v3338_v14, %v2762_v55  ;;  %v11637_v12 = vadd.s32 4294967295, %v1525_v19  ;;  %v1829_v47 = vrot.slane %v1564_v36, 7 }
 0x227   : > { %15395 = vst [vmem:[#allocation32_spill] sm:$0xff] %v11619_v42  ;;  %15396 = vst [vmem:[#allocation33_spill] sm:$0xff] %v11622_v39  ;;  %3489 = vrot.lane.b32.xlu0 %v3454_v35, %s15336_s27  ;;  %v1831_v28 = vrot.slane %v1565_v27, 7  ;;  %v3455_v35 = vpack.c.bf16 %v3342_v63, %v3427_v5  ;;  %v3163_v26 = vpack.c.bf16 %v3136_v23, %v11283_v3  ;;  %vm1634_vm12 = vcmp.ge.s32.totalorder %v11472_v18, 0 }
 0x228   : > { %15397 = vst [vmem:[#allocation34_spill] sm:$0xff] %v11630_v25  ;;  %2534 = vrot.lane.b32.xlu1 %v2498_v16, %s15338_s26  ;;  %v15252_v33 = vand.u32 15, %v11630_v25  ;;  %v1833_v13 = vrot.slane %v1566_v9, 7  ;;  %v2791_v60 = vpack.c.bf16 %v3342_v63, %v2764_v45  ;;  %v15398_v30 = vrot.slane %v11484_v44, 7  ;;  %v11678_v45 = vld [vmem:[#allocation2 + $0x1b0] sm:$0xff] }
 0x229   : > { %v1832_v16 = vsel %vm15343_vm3, %v1829_v47, %v1831_v28  ;;  %v15253_v14 = vrot.slane %v11634_v49, 7  ;;  %v15400_v55 = vrot.slane %v11604_v6, 1  ;;  %v3343_v46 = vrot.slane %v11285_v21, 7  ;;  %15402 = vst [vmem:[#allocation36_spill] sm:$0xff] %v11678_v45  ;;  %v1570_v25 = vld [vmem:[#allocation2 + $0xd0] sm:$0xff] }
 0x22a   : > { %v1830_v4 = vsel %vm15343_vm3, %v15398_v30, %v1829_v47  ;;  %v11650_v19 = vadd.s32 1, %v15252_v33  ;;  %v1834_v63 = vsel %vm15343_vm3, %v1831_v28, %v1833_v13  ;;  %v15401_v47 = vrot.slane %v11519_v31, 1  ;;  %v11676_v28 = vld [vmem:[#allocation2 + $0x1a0] sm:$0xff] }
 0x22b   : > { %2826 = vrot.lane.b32.xlu0 %v2790_v34, %s10663_s1  ;;  %v11655_v36 = vsel %vm15333_vm6, %v3780_v29, %v15400_v55  ;;  %v1919_v44 = vsel %vm1628_vm14, %v1830_v4, 0.0  ;;  %v1836_v23 = vsel %vm15343_vm3, %v1833_v13, %v15253_v14  ;;  %v1921_v9 = vsel %vm1630_vm10, %v1834_v63, 0.0 }
 0x22c   : > { %15399 = vst [vmem:[#allocation35_spill] sm:$0xff] %v11650_v19  ;;  %3491 = vrot.lane.b32.xlu1 %v3455_v35, %s15336_s27  ;;  %v11664_v27 = vsel %vm15333_vm6, %v15401_v47, %v3780_v29  ;;  %v1948_v5 = vpack.c.bf16 %v1832_v16, %v1919_v44  ;;  %v2473_v4 = vsel %vm15314_vm15, %v11297_v38, 0.0  ;;  %vm15251_vm14 = vcmp.lt.s32.totalorder %v11650_v19, 16 }
 0x22d   : > { %v1949_v29 = vpack.c.bf16 %v1836_v23, %v1921_v9  ;;  %v3345_v30 = vrot.slane %v11362_v1, 7  ;;  %v11684_v13 = vsel %vm15251_vm14, %v11501_v52, 0.0  ;;  %v3859_v38 = vsel %vm15251_vm14, %v11655_v36, 0.0 }
 0x22e   : > { %1964 = vst.msk [vmem:[#allocation3 + $0x78] sm:$0xff] %vm15341_vm2, %v1948_v5  ;;  %v11693_v58 = vsel %vm15251_vm14, %v11565_v56, 0.0  ;;  %v3881_v35 = vpack.c.bf16 %v3859_v38, %v11664_v27  ;;  %v11703_v16 = vadd.s32 168, %v10949_v11  ;;  %v2499_v55 = vpack.c.bf16 %v2473_v4, %v11283_v3 }
 0x22f   : > { %3199 = vrot.lane.b32.xlu0 %v3163_v26, %s10666_s29  ;;  %1965 = vst.msk [vmem:[#allocation3 + $0xa0] sm:$0xff] %vm15341_vm2, %v1949_v29  ;;  %v15404_v44 = vand.u32 15, %v11574_v0  ;;  %v3784_v63 = vrot.slane %v11676_v28, 1  ;;  %v3786_v47 = vrot.slane %v11678_v45, 1  ;;  %v3585_v5 = vpack.c.bf16 %v11362_v1, %v11285_v21  ;;  %v11736_v21 = vld [vmem:[#allocation2 + $0x1d0] sm:$0xff] }
 0x230   : > { %15403 = vst [vmem:[#allocation37_spill] sm:$0xff] %v11703_v16  ;;  %2828 = vrot.lane.b32.xlu1 %v2791_v60, %s10663_s1  ;;  %v15405_v23 = vrot.slane %v11274_v57, 7  ;;  %3897 = vst.msk [vmem:[#allocation3 + $0x170] sm:$0xff] %vm15341_vm2, %v3881_v35  ;;  %v15250_v60 = vand.u32 15, %v11703_v16  ;;  %v11721_v3 = vadd.s32 184, %v10949_v11  ;;  %v3586_v0 = vpack.c.bf16 %v11381_v61, %v11355_v41 }
 0x231   : > { %v11709_v26 = vadd.s32 4294967295, %v15404_v44  ;;  %v11728_v4 = vsel %vm15314_vm15, %v11332_v15, 0.0  ;;  %v11733_v1 = vsel %vm15313_vm4, %v11332_v15, 0.0  ;;  %v3347_v57 = vrot.slane %v11355_v41, 7  ;;  %15407 = vst [vmem:[#allocation39_spill] sm:$0xff] %v11736_v21 }
 0x232   : > { %v3344_v9 = vsel %vm15343_vm3, %v15405_v23, %v3343_v46  ;;  %15406 = vst [vmem:[#allocation38_spill] sm:$0xff] %v11721_v3  ;;  %v11740_v29 = vsel %vm15343_vm3, %v3343_v46, %v3345_v30  ;;  %vm1636_vm10 = vcmp.ge.s32.totalorder %v11490_v54, 0  ;;  %v11745_v38 = vadd.s32 1, %v15250_v60  ;;  %v11766_v60 = vld [vmem:[#allocation2 + $0x1c0] sm:$0xff]  ;;  %v11799_v16 = vld [vmem:[#allocation2 + $0x230] sm:$0x1] }
 0x233   : > { %2536 = vrot.lane.b32.xlu0 %v2499_v55, %s15338_s26  ;;  %v11748_v35 = vsel %vm15333_vm6, %v3784_v63, %v3786_v47  ;;  %v15254_v15 = vand.u32 15, %v11721_v3  ;;  %v11754_v41 = vsel %vm1632_vm8, %v3344_v9, 0.0  ;;  %v11758_v46 = vsel %vm1634_vm12, %v3344_v9, 0.0  ;;  %v1568_v55 = vld [vmem:[#allocation2 + $0xb0] sm:$0xff] }
 0x234   : > { %15408 = vst [vmem:[#allocation40_spill] sm:$0xff] %v11745_v38  ;;  %3622 = vrot.lane.b32.xlu1 %v3585_v5, %s10662_s25  ;;  %v15409_v44 = vrot.slane %v11604_v6, 1  ;;  %vm15264_vm14 = vcmp.lt.s32.totalorder %v11745_v38, 16  ;;  %v3788_v52 = vrot.slane %v11766_v60, 1  ;;  %v3348_v34 = vsel %vm15343_vm3, %v3345_v30, %v3347_v57  ;;  %v11797_v3 = vld [vmem:[#allocation2 + $0x230] sm:$0xff] }
 0x235   : > { %v11771_v33 = vadd.s32 1, %v15254_v15  ;;  %v11779_v14 = vsel %vm15264_vm14, %v11565_v56, 0.0  ;;  %v3164_v15 = vpack.c.bf16 %v11728_v4, %v11321_v59  ;;  %15413 = vst [vmem:[#allocation44_spill] sm:$0xff] %v11797_v3  ;;  %v15414_v30 = vrot.slane %v11381_v61, 7  ;;  %v1569_v56 = vld [vmem:[#allocation2 + $0xc0] sm:$0xff]  ;;  %4288 = vst [vmem:[#allocation2 + $0x230] sm:$0xff] %v11813_v20 }
 0x236   : > { %v11764_v23 = vsel %vm15333_vm6, %v15409_v44, %v3784_v63  ;;  %v3861_v63 = vsel %vm15264_vm14, %v11748_v35, 0.0  ;;  %v11787_v44 = vsel %vm15264_vm14, %v11655_v36, 0.0  ;;  %v11830_v4 = vld [vmem:[#allocation2 + $0xe0] sm:$0xff]  ;;  %v11835_v38 = vsel %vm15313_vm4, %v11405_v43, 0.0 }
 0x237   : > { %15410 = vst [vmem:[#allocation41_spill] sm:$0xff] %v11764_v23  ;;  %15411 = vst [vmem:[#allocation42_spill] sm:$0xff] %v11771_v33  ;;  %3624 = vrot.lane.b32.xlu0 %v3586_v0, %s10662_s25  ;;  %v3882_v9 = vpack.c.bf16 %v3861_v63, %v11764_v23  ;;  %v11809_v19 = vsel %vm15343_vm3, %v3347_v57, %v15414_v30  ;;  %vm15303_vm14 = vcmp.lt.s32.totalorder %v11771_v33, 16  ;;  %v15416_v30 = vrot.slane %v11736_v21, 1 }
 0x238   : > { %15412 = vst [vmem:[#allocation43_spill] sm:$0xff] %v11787_v44  ;;  %2055 = vrot.lane.b32.xlu1 %v3585_v5, %s10659_s2  ;;  %v11818_v5 = vsel %vm1634_vm12, %v3348_v34, 0.0  ;;  %v11823_v57 = vsel %vm15333_vm6, %v3786_v47, %v3788_v52  ;;  %vm1638_vm0 = vcmp.ge.s32.totalorder %v11637_v12, 0  ;;  %v1839_v42 = vrot.slane %v1569_v56, 7 }
 0x239   : > { %3898 = vst.msk [vmem:[#allocation3 + $0x198] sm:$0xff] %vm15341_vm2, %v3882_v9  ;;  %15415 = vst [vmem:[#allocation45_spill] sm:$0xff] %v11823_v57  ;;  %v11828_v63 = vsel %vm15333_vm6, %v3788_v52, %v15416_v30  ;;  %v11841_v9 = vsel %vm15303_vm14, %v11655_v36, 0.0  ;;  %v1837_v52 = vrot.slane %v1568_v55, 7  ;;  %v1841_v39 = vrot.slane %v1570_v25, 7  ;;  %v11879_v30 = vld [vmem:[#allocation2 + $0x1f0] sm:$0xff] }
 0x23a   : > { %15417 = vst [vmem:[#allocation46_spill] sm:$0xff] %v11841_v9  ;;  %v3863_v47 = vsel %vm15303_vm14, %v11828_v63, 0.0  ;;  %v11854_v36 = vsel %vm1636_vm10, %v3348_v34, 0.0  ;;  %v3351_v45 = vrot.slane %v11395_v50, 7  ;;  %v15418_v55 = vrot.slane %v11634_v49, 7  ;;  %15421 = vst [vmem:[#allocation49_spill] sm:$0xff] %v11879_v30 }
 0x23b   : > { %2057 = vrot.lane.b32.xlu0 %v3586_v0, %s10659_s2  ;;  %v3883_v24 = vpack.c.bf16 %v3863_v47, %v11823_v57  ;;  %v15271_v44 = vrot.slane %v11830_v4, 7  ;;  %v11862_v47 = vld [vmem:[#allocation2 + $0x1e0] sm:$0xff]  ;;  %v1840_v25 = vsel %vm15343_vm3, %v1837_v52, %v1839_v42  ;;  %v1842_v34 = vsel %vm15343_vm3, %v1839_v42, %v1841_v39  ;;  %v15422_v42 = vld [vmem:[#allocation29_spill] sm:$0xff] }
 0x23c   : > { %2915 = vrot.lane.b32.xlu1 %v11271_v51, %s15334_s0  ;;  %v1838_v0 = vsel %vm15343_vm3, %v15418_v55, %v1837_v52  ;;  %15419 = vst [vmem:[#allocation47_spill] sm:$0xff] %v11862_v47  ;;  %v11871_v56 = vsel %vm15303_vm14, %v11748_v35, 0.0  ;;  %v3353_v49 = vrot.slane %v11474_v62, 7  ;;  %v1925_v52 = vsel %vm1634_vm12, %v1842_v34, 0.0 }
 0x23d   : > { %3899 = vst.msk [vmem:[#allocation3 + $0x1c0] sm:$0xff] %vm15341_vm2, %v3883_v24  ;;  %v1923_v51 = vsel %vm1632_vm8, %v1838_v0, 0.0  ;;  %15420 = vst [vmem:[#allocation48_spill] sm:$0xff] %v11871_v56  ;;  %v1844_v24 = vsel %vm15343_vm3, %v1841_v39, %v15271_v44  ;;  %v11886_v53 = vsel %vm15312_vm1, %v11405_v43, 0.0  ;;  %v3355_v0 = vrot.slane %v15422_v42, 7 }
 0x23e   : > { %v1950_v55 = vpack.c.bf16 %v1840_v25, %v1923_v51  ;;  %v1951_v25 = vpack.c.bf16 %v1844_v24, %v1925_v52  ;;  %v3457_v18 = vpack.c.bf16 %v11809_v19, %v11818_v5  ;;  %v15423_v39 = vrot.slane %v11381_v61, 7  ;;  %v11903_v24 = vld [vmem:[#allocation2 + $0x240] sm:$0x7f]  ;;  %v11916_v51 = vld [vmem:[#allocation2 + $0x210] sm:$0xff] }
 0x23f   : > { %2917 = vrot.lane.b32.xlu0 %v11264_v37, %s15334_s0  ;;  %vm1640_vm8 = vcmp.ge.s32.totalorder %v11709_v26, 0  ;;  %v11900_v43 = vadd.s32 200, %v10949_v11  ;;  %v3792_v34 = vrot.slane %v11862_v47, 1  ;;  %v11905_v52 = vld [vmem:[#allocation2 + $0x240] sm:$0xff]  ;;  %v2793_v61 = vpack.c.bf16 %v11809_v19, %v11854_v36 }
 0x240   : > { %3201 = vrot.lane.b32.xlu1 %v3164_v15, %s10666_s29  ;;  %v3352_v37 = vsel %vm15343_vm3, %v15423_v39, %v3351_v45  ;;  %1966 = vst.msk [vmem:[#allocation3 + $0xc8] sm:$0xff] %vm15341_vm2, %v1950_v55  ;;  %v15425_v15 = vld [vmem:[#allocation25_spill] sm:$0xff]  ;;  %1967 = vst.msk [vmem:[#allocation3 + $0xf0] sm:$0xff] %vm15341_vm2, %v1951_v25  ;;  %v3794_v39 = vrot.slane %v11879_v30, 1  ;;  %v11914_v55 = vadd.s32 216, %v10949_v11  ;;  %v11922_v33 = vsel %vm15343_vm3, %v3351_v45, %v3353_v49  ;;  %v11926_v36 = vld [vmem:[#allocation2 + $0x200] sm:$0xff] }
 0x241   : > { %15424 = vst [vmem:[#allocation29_spill] sm:$0xff] %v11900_v43  ;;  %v3165_v5 = vpack.c.bf16 %v11835_v38, %v15425_v15  ;;  %4289 = vst [vmem:[#allocation2 + $0x240] sm:$0xff] %v11813_v20  ;;  %v15279_v19 = vand.u32 15, %v11900_v43  ;;  %v15428_v25 = vpack.c.bf16 %v11740_v29, %v11754_v41  ;;  %v11934_v2 = vsel %vm1636_vm10, %v3352_v37, 0.0  ;;  %v12065_v43 = vld [vmem:[#allocation2 + $0x120] sm:$0xff] }
 0x242   : > { %15426 = vst [vmem:[#allocation25_spill] sm:$0xff] %v11914_v55  ;;  %15427 = vst [vmem:[#allocation50_spill] sm:$0xff] %v11926_v36  ;;  %v3356_v44 = vsel %vm15343_vm3, %v3353_v49, %v3355_v0  ;;  %v11939_v56 = vrot.slane %v11926_v36, 1  ;;  %v15429_v38 = vpack.c.bf16 %v11733_v1, %v11321_v59  ;;  %v11947_v41 = vpack.c.bf16 %v11474_v62, %v11395_v50 }
 0x243   : > { %3493 = vrot.lane.b32.xlu0 %v15428_v25, %s15336_s27  ;;  %v11951_v25 = vadd.s32 1, %v15279_v19  ;;  %v11954_v49 = vsel %vm15333_vm6, %v3792_v34, %v3794_v39  ;;  %v11959_v36 = vpack.c.bf16 %v11512_v8, %v15422_v42  ;;  %v11963_v59 = vsel %vm1638_vm0, %v3352_v37, 0.0 }
 0x244   : > { %2538 = vrot.lane.b32.xlu1 %v15429_v38, %s15338_s26  ;;  %v15431_v50 = vrot.slane %v11736_v21, 1  ;;  %v15433_v1 = vand.u32 15, %v11914_v55  ;;  %v15435_v45 = vrot.slane %v11512_v8, 7  ;;  %v11983_v37 = vsel %vm1638_vm0, %v3356_v44, 0.0  ;;  %v12055_v21 = vld [vmem:[#allocation2 + $0x220] sm:$0xff] }
 0x245   : > { %15430 = vst [vmem:[#allocation51_spill] sm:$0xff] %v11951_v25  ;;  %vm15283_vm12 = vcmp.lt.s32.totalorder %v11951_v25, 16  ;;  %v12017_v19 = vsel %vm15333_vm6, %v3794_v39, %v11939_v56  ;;  %v1572_v25 = vld [vmem:[#allocation2 + $0xf0] sm:$0xff]  ;;  %v1501_v55 = vadd.s32 192, %v10949_v11  ;;  %v1505_v23 = vadd.s32 224, %v10949_v11 }
 0x246   : > { %v11968_v62 = vsel %vm15333_vm6, %v15431_v50, %v3792_v34  ;;  %v11972_v38 = vadd.s32 1, %v15433_v1  ;;  %v11979_v42 = vsel %vm15343_vm3, %v3355_v0, %v15435_v45  ;;  %v15436_v34 = vpack.c.bf16 %v11740_v29, %v11758_v46  ;;  %15440 = vst [vmem:[#allocation56_spill] sm:$0xff] %v12017_v19 }
 0x247   : > { %15432 = vst [vmem:[#allocation52_spill] sm:$0xff] %v11968_v62  ;;  %v11993_v50 = vsel %vm15283_vm12, %v11748_v35, 0.0  ;;  %v3865_v0 = vsel %vm15283_vm12, %v11954_v49, 0.0  ;;  %v12001_v45 = vsel %vm15283_vm12, %v11828_v63, 0.0  ;;  %v15439_v1 = vrot.slane %v11916_v51, 1 }
 0x248   : > { %15434 = vst [vmem:[#allocation53_spill] sm:$0xff] %v11972_v38  ;;  %2830 = vrot.lane.b32.xlu0 %v15436_v34, %s10663_s1  ;;  %15437 = vst [vmem:[#allocation54_spill] sm:$0xff] %v11993_v50  ;;  %3495 = vrot.lane.b32.xlu1 %v3457_v18, %s15336_s27  ;;  %v3884_v46 = vpack.c.bf16 %v3865_v0, %v11968_v62  ;;  %v12025_v18 = vsel %vm1640_vm8, %v3356_v44, 0.0  ;;  %vm15301_vm12 = vcmp.lt.s32.totalorder %v11972_v38, 16  ;;  %v1573_v0 = vld [vmem:[#allocation2 + $0x100] sm:$0xff]  ;;  %v1497_v34 = vadd.s32 160, %v10949_v11 }
 0x249   : > { %15438 = vst [vmem:[#allocation55_spill] sm:$0xff] %v12001_v45  ;;  %v12007_v29 = vsel %vm15333_vm6, %v11939_v56, %v15439_v1  ;;  %v1499_v35 = vadd.s32 176, %v10949_v11  ;;  %v12034_v39 = vsel %vm15301_vm12, %v11828_v63, 0.0  ;;  %v1574_v44 = vld [vmem:[#allocation2 + $0x110] sm:$0xff]  ;;  %v12046_v63 = vrot.slane %v11862_v47, 7 }
 0x24a   : > { %3900 = vst.msk [vmem:[#allocation3 + $0x1e8] sm:$0xff] %vm15341_vm2, %v3884_v46  ;;  %15441 = vst [vmem:[#allocation57_spill] sm:$0xff] %v12034_v39  ;;  %v3867_v1 = vsel %vm15301_vm12, %v12007_v29, 0.0  ;;  %v1845_v46 = vrot.slane %v1572_v25, 7  ;;  %v1847_v50 = vrot.slane %v1573_v0, 7  ;;  %v1849_v39 = vrot.slane %v1574_v44, 7 }
 0x24b   : > { %v3885_v45 = vpack.c.bf16 %v3867_v1, %v12017_v19  ;;  %v12058_v1 = vrot.slane %v11879_v30, 7  ;;  %v1529_v38 = vand.u32 15, %v1497_v34  ;;  %v1531_v57 = vand.u32 15, %v1499_v35 }
 0x24c   : > { %3203 = vrot.lane.b32.xlu0 %v3165_v5, %s10666_s29  ;;  %2832 = vrot.lane.b32.xlu1 %v2793_v61, %s10663_s1  ;;  %v12052_v5 = vsel %vm15301_vm12, %v11954_v49, 0.0  ;;  %v15443_v61 = vrot.slane %v11830_v4, 7  ;;  %v1848_v47 = vsel %vm15343_vm3, %v1845_v46, %v1847_v50  ;;  %v15444_v30 = vpack.c.bf16 %v11886_v53, %v15425_v15 }
 0x24d   : > { %15442 = vst [vmem:[#allocation58_spill] sm:$0xff] %v12052_v5  ;;  %3901 = vst.msk [vmem:[#allocation3 + $0x210] sm:$0xff] %vm15341_vm2, %v3885_v45  ;;  %v1533_v4 = vand.u32 15, %v1501_v55  ;;  %v1537_v0 = vand.u32 15, %v1505_v23  ;;  %v1850_v35 = vsel %vm15343_vm3, %v1847_v50, %v1849_v39  ;;  %v15302_v34 = vrot.slane %v12065_v43, 7 }
 0x24e   : > { %v1846_v25 = vsel %vm15343_vm3, %v15443_v61, %v1845_v46  ;;  %v1503_v61 = vadd.s32 208, %v10949_v11  ;;  %v12080_v54 = vadd.s32 232, %v10949_v11  ;;  %v3800_v44 = vrot.slane %v12055_v21, 1 }
 0x24f   : > { %v1927_v45 = vsel %vm1636_vm10, %v1846_v25, 0.0  ;;  %v12089_v23 = vadd.s32 4294967295, %v1537_v0  ;;  %v15300_v53 = vrot.slane %v11797_v3, 1  ;;  %v12096_v55 = vadd.s32 4294967295, %v1529_v38  ;;  %v2138_v25 = vld [vmem:[#allocation2 + $0x210] sm:$0x1] }
 0x250   : > { %2540 = vrot.lane.b32.xlu0 %v15444_v30, %s15338_s26  ;;  %v1952_v9 = vpack.c.bf16 %v1848_v47, %v1927_v45  ;;  %3626 = vrot.lane.b32.xlu1 %v11947_v41, %s10662_s25  ;;  %15445 = vst [vmem:[#allocation59_spill] sm:$0xff] %v12080_v54  ;;  %v12086_v30 = vsel %vm15343_vm3, %v12046_v63, %v12058_v1  ;;  %v1929_v47 = vsel %vm1638_vm0, %v1850_v35, 0.0  ;;  %v15299_v46 = vand.u32 15, %v12080_v54  ;;  %v15453_v35 = vld [vmem:[#allocation23_spill] sm:$0xff] }
 0x251   : > { %v1852_v50 = vsel %vm15343_vm3, %v1849_v39, %v15302_v34  ;;  %v12106_v12 = vadd.s32 4294967295, %v1533_v4  ;;  %vm1650_vm0 = vcmp.ge.s32.totalorder %v12089_v23, 0  ;;  %v1535_v38 = vand.u32 15, %v1503_v61  ;;  %v12123_v4 = vpop.permute.xlu0 %2901 }
 0x252   : > { %1968 = vst.msk [vmem:[#allocation3 + $0x118] sm:$0xff] %vm15341_vm2, %v1952_v9  ;;  %v12104_v9 = vadd.s32 4294967295, %v1531_v57  ;;  %v1953_v0 = vpack.c.bf16 %v1852_v50, %v1929_v47  ;;  %v12114_v39 = vsel %vm1650_vm0, %v12086_v30, 0.0  ;;  %v12118_v45 = vadd.s32 1, %v15299_v46  ;;  %v12135_v46 = vpop.permute.xlu1 %2899 }
 0x253   : > { %15446 = vst [vmem:[#allocation60_spill] sm:$0xff] %v12114_v39  ;;  %v3803_v57 = vsel %vm15333_vm6, %v3800_v44, %v15300_v53  ;;  %v12133_v47 = vadd.s32 248, %v10949_v11  ;;  %v2428_v50 = vrot.slane %v2138_v25, 1  ;;  %v3093_v15 = vrot.slane %v11799_v16, 1 }
 0x254   : > { %3628 = vrot.lane.b32.xlu0 %v11959_v36, %s10662_s25  ;;  %2059 = vrot.lane.b32.xlu1 %v11947_v41, %s10659_s2  ;;  %15447 = vst [vmem:[#allocation61_spill] sm:$0xff] %v12118_v45  ;;  %1969 = vst.msk [vmem:[#allocation3 + $0x140] sm:$0xff] %vm15341_vm2, %v1953_v0  ;;  %v15448_v41 = vrot.slane %v11916_v51, 1  ;;  %vm15310_vm10 = vcmp.lt.s32.totalorder %v12118_v45, 16  ;;  %v1507_v53 = vadd.s32 240, %v10949_v11  ;;  %v3383_v0 = vrot.slane %v11797_v3, 7 }
 0x255   : > { %15450 = vst [vmem:[#allocation63_spill] sm:$0xff] %v12133_v47  ;;  %vm1642_vm12 = vcmp.ge.s32.totalorder %v12096_v55, 0  ;;  %v3869_v25 = vsel %vm15310_vm10, %v3803_v57, 0.0  ;;  %v12154_v16 = vsel %vm15310_vm10, %v11954_v49, 0.0  ;;  %v15311_v34 = vand.u32 15, %v12133_v47  ;;  %v1576_v45 = vld [vmem:[#allocation2 + $0x130] sm:$0xff] }
 0x256   : > { %v12129_v61 = vsel %vm15333_vm6, %v15448_v41, %v3800_v44  ;;  %v12147_v41 = vsel %vm15310_vm10, %v12007_v29, 0.0  ;;  %15452 = vst [vmem:[#allocation65_spill] sm:$0xff] %v12154_v16  ;;  %vm1644_vm14 = vcmp.ge.s32.totalorder %v12104_v9, 0  ;;  %v1539_v5 = vand.u32 15, %v1507_v53  ;;  %v1577_v53 = vld [vmem:[#allocation2 + $0x140] sm:$0xff]  ;;  %v1582_v47 = vld [vmem:[#allocation2 + $0x190] sm:$0xff] }
 0x257   : > { %15449 = vst [vmem:[#allocation62_spill] sm:$0xff] %v12129_v61  ;;  %15451 = vst [vmem:[#allocation64_spill] sm:$0xff] %v12147_v41  ;;  %v3886_v11 = vpack.c.bf16 %v3869_v25, %v12129_v61  ;;  %v12171_v54 = vadd.s32 1, %v15311_v34  ;;  %v15454_v25 = vrot.slane %v12055_v21, 7  ;;  %v3385_v29 = vrot.slane %v11903_v24, 7  ;;  %v1580_v34 = vld [vmem:[#allocation2 + $0x170] sm:$0xff] }
 0x258   : > { %2061 = vrot.lane.b32.xlu0 %v11959_v36, %s10659_s2  ;;  %2919 = vrot.lane.b32.xlu1 %v15453_v35, %s15334_s0  ;;  %v12160_v36 = vadd.s32 4294967295, %v1535_v38  ;;  %v2429_v35 = vsel %vm15333_vm6, %v11939_v56, %v2428_v50  ;;  %v3094_v38 = vsel %vm15333_vm6, %v3800_v44, %v3093_v15  ;;  %vm1474_vm10 = vcmask 122880   ;;  %v15455_v56 = vld [vmem:[#allocation22_spill] sm:$0xff]  ;;  %v1583_v61 = vld [vmem:[#allocation2 + $0x1a0] sm:$0xff] }
 0x259   : > { %v12167_v49 = vpop.permute.xlu0 %3612  ;;  %3902 = vst.msk [vmem:[#allocation3 + $0x238] sm:$0xff] %vm15341_vm2, %v3886_v11  ;;  %v3384_v57 = vsel %vm15343_vm3, %v15454_v25, %v3383_v0  ;;  %vm2574_vm1 = vcmask 392448   ;;  %vm15332_vm4 = vcmp.lt.s32.totalorder %v12171_v54, 16  ;;  %v12187_v44 = vadd.s32 4294967295, %v1539_v5  ;;  %v1584_v41 = vld [vmem:[#allocation2 + $0x1b0] sm:$0xff] }
 0x25a   : > { %v2044_v39 = vpop.permute.xlu1 %2043  ;;  %1475 = vst.msk [vmem:[#allocation2 + $0x250] sm:$0x1] %vm1474_vm10, %v11813_v20  ;;  %v1853_v24 = vrot.slane %v1576_v45, 7  ;;  %v15456_v15 = vpack.c.bf16 %v11506_v7, %v11425_v22  ;;  %vm2866_vm15 = vcmask 523648   ;;  %v12200_v50 = vsel %vm15332_vm4, %v2429_v35, 0.0  ;;  %v1578_v45 = vld [vmem:[#allocation2 + $0x150] sm:$0xff] }
 0x25b   : > { %2091 = vst.msk [vmem:[#allocation3 + $0x28] sm:$0xff] %vm2089_vm5, %v2044_v39  ;;  %v12196_v39 = vrot.slane %v11766_v60, 7  ;;  %15457 = vst [vmem:[#allocation23_spill] sm:$0xff] %v12200_v50  ;;  %v12204_v5 = vsel %vm15332_vm4, %v3094_v38, 0.0  ;;  %v12207_v25 = vsel %vm15343_vm3, %v3383_v0, %v3385_v29  ;;  %vm2947_vm10 = vcmask 654848   ;;  %v1579_v35 = vld [vmem:[#allocation2 + $0x160] sm:$0xff] }
 0x25c   : > { %2921 = vrot.lane.b32.xlu0 %v15455_v56, %s15334_s0  ;;  %3205 = vrot.lane.b32.xlu1 %v15456_v15, %s10666_s29  ;;  %15458 = vst [vmem:[#allocation22_spill] sm:$0xff] %v12204_v5  ;;  %15459 = vst [vmem:[#allocation66_spill] sm:$0xff] %v12207_v25  ;;  %vm1646_vm13 = vcmp.ge.s32.totalorder %v12106_v12, 0  ;;  %vm1652_vm11 = vcmp.ge.s32.totalorder %v12187_v44, 0  ;;  %v1581_v38 = vld [vmem:[#allocation2 + $0x180] sm:$0xff]  ;;  %vm1648_vm9 = vcmp.ge.s32.totalorder %v12160_v36, 0  ;;  %v15462_v5 = vpack.c.bf16 %v11922_v33, %v11934_v2 }
 0x25d   : > { %v2046_v56 = vpop.permute.xlu0 %2045  ;;  %v12221_v29 = vsel %vm1652_vm11, %v3384_v57, 0.0  ;;  %v15461_v7 = vrot.slane %v12065_v43, 7  ;;  %v1855_v15 = vrot.slane %v1577_v53, 7  ;;  %vm3239_vm7 = vcmask 786048  }
 0x25e   : > { %2092 = vst.msk [vmem:[#allocation3 + $0x50] sm:$0xff] %vm2089_vm5, %v2046_v56  ;;  %v12216_v0 = vpop.permute.xlu1 %2903  ;;  %15460 = vst [vmem:[#allocation67_spill] sm:$0xff] %v12221_v29  ;;  %v15463_v50 = vrot.slane %v11905_v52, 1  ;;  %v15464_v57 = vrot.slane %v11797_v3, 1  ;;  %v15465_v2 = vpack.c.bf16 %v11541_v48, %v11425_v22  ;;  %v1859_v16 = vrot.slane %v1579_v35, 7 }
 0x25f   : > { %v1854_v11 = vsel %vm15343_vm3, %v15461_v7, %v1853_v24  ;;  %v1857_v7 = vrot.slane %v1578_v45, 7  ;;  %v1861_v56 = vrot.slane %v1580_v34, 7  ;;  %v1863_v29 = vrot.slane %v1581_v38, 7  ;;  %v1589_v35 = vld [vmem:[#allocation2 + $0x200] sm:$0x7f] }
 0x260   : > { %3497 = vrot.lane.b32.xlu0 %v15462_v5, %s15336_s27  ;;  %v12237_v43 = vsel %vm15333_vm6, %v15464_v57, %v15463_v50  ;;  %v1931_v53 = vsel %vm1640_vm8, %v1854_v11, 0.0  ;;  %2542 = vrot.lane.b32.xlu1 %v15465_v2, %s15338_s26  ;;  %v1856_v5 = vsel %vm15343_vm3, %v1853_v24, %v1855_v15  ;;  %v1865_v57 = vrot.slane %v1582_v47, 7  ;;  %v1586_v24 = vld [vmem:[#allocation2 + $0x1d0] sm:$0xff] }
 0x261   : > { %v12246_v25 = vpop.permute.xlu0 %2905  ;;  %v1954_v3 = vpack.c.bf16 %v1856_v5, %v1931_v53  ;;  %v1858_v50 = vsel %vm15343_vm3, %v1855_v15, %v1857_v7  ;;  %v1867_v19 = vrot.slane %v1583_v61, 7  ;;  %v3709_v45 = vld [vmem:[#allocation2 + $0x250] sm:$0x1]  ;;  %v1860_v62 = vsel %vm15343_vm3, %v1857_v7, %v1859_v16 }
 0x262   : > { %v2819_v11 = vpop.permute.xlu1 %2818  ;;  %v1933_v22 = vsel %vm1642_vm12, %v1858_v50, 0.0  ;;  %v1862_v48 = vsel %vm15343_vm3, %v1859_v16, %v1861_v56  ;;  %v1864_v34 = vsel %vm15343_vm3, %v1861_v56, %v1863_v29  ;;  %v15466_v15 = vpack.c.bf16 %v11922_v33, %v11963_v59  ;;  %4290 = vst [vmem:[#allocation2 + $0x250] sm:$0x1] %v11813_v20 }
 0x263   : > { %v3806_v61 = vrot.slane %v3709_v45, 1  ;;  %1970 = vst.msk [vmem:[#allocation3 + $0x168] sm:$0xff] %vm15341_vm2, %v1954_v3  ;;  %v1955_v47 = vpack.c.bf16 %v1860_v62, %v1933_v22  ;;  %v1935_v38 = vsel %vm1644_vm14, %v1862_v48, 0.0  ;;  %v1866_v16 = vsel %vm15343_vm3, %v1863_v29, %v1865_v57 }
 0x264   : > { %2834 = vrot.lane.b32.xlu0 %v15466_v15, %s10663_s1  ;;  %v15467_v56 = vpack.c.bf16 %v11979_v42, %v11983_v37  ;;  %v1956_v53 = vpack.c.bf16 %v1864_v34, %v1935_v38  ;;  %v1868_v33 = vsel %vm15343_vm3, %v1865_v57, %v1867_v19  ;;  %v1937_v59 = vsel %vm1646_vm13, %v1866_v16, 0.0 }
 0x265   : > { %v1869_v20 = vrot.slane %v1584_v41, 7  ;;  %v2527_v7 = vpop.permute.xlu0 %2526  ;;  %v15468_v3 = vrot.slane %v11905_v52, 1  ;;  %1971 = vst.msk [vmem:[#allocation3 + $0x190] sm:$0xff] %vm15341_vm2, %v1955_v47  ;;  %v1957_v29 = vpack.c.bf16 %v1868_v33, %v1937_v59  ;;  %v1873_v2 = vrot.slane %v1586_v24, 7 }
 0x266   : > { %3499 = vrot.lane.b32.xlu1 %v15467_v56, %s15336_s27  ;;  %v1879_v5 = vrot.slane %v1589_v35, 7  ;;  %2575 = vst.msk [vmem:[#allocation3] sm:$0xff] %vm2574_vm1, %v2527_v7  ;;  %v3484_v37 = vpop.permute.xlu1 %3483  ;;  %v1943_v45 = vsel %vm1652_vm11, %v12086_v30, 0.0  ;;  %v15469_v22 = vpack.c.bf16 %v11598_v32, %v11498_v17  ;;  %v3590_v16 = vpack.c.bf16 %v11676_v28, %v11604_v6 }
 0x267   : > { %v3807_v62 = vsel %vm15333_vm6, %v15468_v3, %v3806_v61  ;;  %1972 = vst.msk [vmem:[#allocation3 + $0x1b8] sm:$0xff] %vm15341_vm2, %v1956_v53  ;;  %v1870_v41 = vsel %vm15343_vm3, %v1867_v19, %v1869_v20  ;;  %v1872_v57 = vsel %vm15343_vm3, %v1869_v20, %v12196_v39  ;;  %1973 = vst.msk [vmem:[#allocation3 + $0x1e0] sm:$0xff] %vm15341_vm2, %v1957_v29  ;;  %vm3660_vm6 = vcmask 1048448   ;;  %v15474_v29 = vld [vmem:[#allocation30_spill] sm:$0xff] }
 0x268   : > { %v3871_v50 = vsel %vm15332_vm4, %v3807_v62, 0.0  ;;  %2867 = vst.msk [vmem:[#allocation3] sm:$0xff] %vm2866_vm15, %v2819_v11  ;;  %3207 = vrot.lane.b32.xlu0 %v15469_v22, %s10666_s29  ;;  %v1939_v19 = vsel %vm1648_vm9, %v1870_v41, 0.0  ;;  %v1874_v34 = vsel %vm15343_vm3, %v12196_v39, %v1873_v2  ;;  %v1876_v24 = vsel %vm15343_vm3, %v1873_v2, %v12046_v63 }
 0x269   : > { %v3887_v48 = vpack.c.bf16 %v3871_v50, %v12237_v43  ;;  %v15470_v11 = vpack.c.bf16 %v11979_v42, %v12025_v18  ;;  %vm3531_vm4 = vcmask 917248   ;;  %2948 = vst.msk [vmem:[#allocation3] sm:$0xff] %vm2947_vm10, %v12135_v46  ;;  %v1958_v32 = vpack.c.bf16 %v1872_v57, %v1939_v19  ;;  %v3192_v15 = vpop.permute.xlu0 %3191 }
 0x26a   : > { %v1941_v43 = vsel %vm1650_vm0, %v1874_v34, 0.0  ;;  %v1880_v35 = vsel %vm15343_vm3, %v12058_v1, %v1879_v5  ;;  %3240 = vst.msk [vmem:[#allocation3] sm:$0xff] %vm3239_vm7, %v3192_v15  ;;  %v2821_v42 = vpop.permute.xlu1 %2820  ;;  %v3589_v18 = vpack.c.bf16 %v11624_v10, %v11519_v31  ;;  %v15471_v46 = vpack.c.bf16 %v11684_v13, %v11498_v17  ;;  %v15479_v15 = vld [vmem:[#allocation36_spill] sm:$0xff] }
 0x26b   : > { %2836 = vrot.lane.b32.xlu1 %v15470_v11, %s10663_s1  ;;  %3903 = vst.msk [vmem:[#allocation3 + $0x260] sm:$0xff] %vm15341_vm2, %v3887_v48  ;;  %v1959_v61 = vpack.c.bf16 %v1876_v24, %v1941_v43  ;;  %v1960_v47 = vpack.c.bf16 %v1880_v35, %v1943_v45  ;;  %1974 = vst.msk [vmem:[#allocation3 + $0x208] sm:$0xff] %vm15341_vm2, %v1958_v32  ;;  %v3359_v17 = vrot.slane %v11519_v31, 7  ;;  %v3361_v53 = vrot.slane %v11624_v10, 7  ;;  %v15473_v31 = vld [vmem:[#allocation31_spill] sm:$0xff] }
 0x26c   : > { %3532 = vst.msk [vmem:[#allocation3] sm:$0xff] %vm3531_vm4, %v3484_v37  ;;  %2544 = vrot.lane.b32.xlu0 %v15471_v46, %s15338_s26  ;;  %v15472_v59 = vrot.slane %v11512_v8, 7  ;;  %v3363_v7 = vrot.slane %v11604_v6, 7  ;;  %v3365_v2 = vrot.slane %v11676_v28, 7  ;;  %v15475_v6 = vpack.c.bf16 %v11693_v58, %v11560_v40  ;;  %v15477_v24 = vld [vmem:[#allocation43_spill] sm:$0xff] }
 0x26d   : > { %1975 = vst.msk [vmem:[#allocation3 + $0x230] sm:$0xff] %vm15341_vm2, %v1959_v61  ;;  %1976 = vst.msk [vmem:[#allocation3 + $0x258] sm:$0xff] %vm15341_vm2, %v1960_v47  ;;  %v2529_v38 = vpop.permute.xlu0 %2528  ;;  %v3362_v62 = vsel %vm15343_vm3, %v3359_v17, %v3361_v53  ;;  %v15476_v58 = vpack.c.bf16 %v11779_v14, %v11560_v40  ;;  %v15478_v11 = vpack.c.bf16 %v15477_v24, %v11664_v27  ;;  %v15480_v47 = vld [vmem:[#allocation46_spill] sm:$0xff] }
 0x26e   : > { %3661 = vst.msk [vmem:[#allocation3] sm:$0xff] %vm3660_vm6, %v12167_v49  ;;  %v3615_v56 = vpop.permute.xlu1 %3614  ;;  %v3360_v20 = vsel %vm15343_vm3, %v15472_v59, %v3359_v17  ;;  %v3364_v5 = vsel %vm15343_vm3, %v3361_v53, %v3363_v7  ;;  %v3366_v28 = vsel %vm15343_vm3, %v3363_v7, %v3365_v2  ;;  %v3591_v61 = vpack.c.bf16 %v11766_v60, %v15479_v15  ;;  %v15483_v60 = vld [vmem:[#allocation47_spill] sm:$0xff]  ;;  %v15484_v59 = vld [vmem:[#allocation33_spill] sm:$0xff] }
 0x26f   : > { %3630 = vrot.lane.b32.xlu1 %v3589_v18, %s10662_s25  ;;  %2576 = vst.msk [vmem:[#allocation3 + $0x28] sm:$0xff] %vm2574_vm1, %v2529_v38  ;;  %v3437_v8 = vsel %vm1640_vm8, %v3360_v20, 0.0  ;;  %v2774_v26 = vsel %vm1642_vm12, %v3360_v20, 0.0  ;;  %v3439_v57 = vsel %vm1642_vm12, %v3364_v5, 0.0  ;;  %v2776_v55 = vsel %vm1644_vm14, %v3364_v5, 0.0  ;;  %v15482_v38 = vld [vmem:[#allocation39_spill] sm:$0xff] }
 0x270   : > { %2868 = vst.msk [vmem:[#allocation3 + $0x28] sm:$0xff] %vm2866_vm15, %v2821_v42  ;;  %3632 = vrot.lane.b32.xlu0 %v3590_v16, %s10662_s25  ;;  %v3460_v50 = vpack.c.bf16 %v3362_v62, %v3437_v8  ;;  %v2796_v22 = vpack.c.bf16 %v3362_v62, %v2774_v26  ;;  %v3461_v19 = vpack.c.bf16 %v3366_v28, %v3439_v57  ;;  %v3909_v42 = vld [vmem:[#allocation3 + $0x58] sm:$0xff]  ;;  %v3371_v20 = vrot.slane %v15482_v38, 7  ;;  %v15486_v62 = vld [vmem:[#allocation41_spill] sm:$0xff]  ;;  %v15488_v26 = vld [vmem:[#allocation54_spill] sm:$0xff] }
 0x271   : > { %2949 = vst.msk [vmem:[#allocation3 + $0x28] sm:$0xff] %vm2947_vm10, %v12123_v4  ;;  %v3617_v13 = vpop.permute.xlu0 %3616  ;;  %v3907_v4 = vld [vmem:[#allocation3 + $0x30] sm:$0xff]  ;;  %v2797_v14 = vpack.c.bf16 %v3366_v28, %v2776_v55  ;;  %v15489_v28 = vpack.c.bf16 %v15488_v26, %v15486_v62 }
 0x272   : > { %v2048_v49 = vpop.permute.xlu1 %2047 }
 0x273   : > { %2063 = vrot.lane.b32.xlu1 %v3589_v18, %s10659_s2  ;;  %2093 = vst.msk [vmem:[#allocation3 + $0x78] sm:$0xff] %vm2089_vm5, %v2048_v49  ;;  %v3367_v18 = vrot.slane %v15479_v15, 7  ;;  %v15496_v15 = vld [vmem:[#allocation49_spill] sm:$0xff] }
 0x274   : > { %2065 = vrot.lane.b32.xlu0 %v3590_v16, %s10659_s2  ;;  %v3592_v16 = vpack.c.bf16 %v15483_v60, %v15482_v38 }
 0x275   : > { %v3904_v33 = vld [vmem:[#allocation3] sm:$0xff]  ;;  %v2050_v3 = vpop.permute.xlu0 %2049  ;;  %v3370_v49 = vsel %vm15343_vm3, %v3367_v18, %v12196_v39 }
 0x276   : > { %4096 = vmatmul.mubr.bf16.vlgmr.msra.gmra.mrb[32].mxu0 %v3904_v33  ;;  %2094 = vst.msk [vmem:[#allocation3 + $0xa0] sm:$0xff] %vm2089_vm5, %v2050_v3  ;;  %v12342_v10 = vpop.permute.xlu1 %2907  ;;  %v15485_v3 = vld [vmem:[#allocation48_spill] sm:$0xff] }
 0x277   : > { %2923 = vrot.lane.b32.xlu1 %v15473_v31, %s15334_s0  ;;  %9552 = vmatprep.mubr.msk.bf16.mxu0 %vm15341_vm2, %v3907_v4  ;;  %v15487_v8 = vpack.c.bf16 %v15485_v3, %v15486_v62  ;;  %v2623_v3 = vld [vmem:[#allocation2 + $0x220] sm:$0x7f] }
 0x278   : > { %2925 = vrot.lane.b32.xlu0 %v15474_v29, %s15334_s0  ;;  %v3372_v29 = vsel %vm15343_vm3, %v12196_v39, %v3371_v20 }
 0x279   : > { %v12355_v37 = vpop.permute.xlu0 %2909  ;;  %v2780_v12 = vsel %vm1648_vm9, %v3372_v29, 0.0 }
 0x27a   : > { %v3194_v41 = vpop.permute.xlu1 %3193 }
 0x27b   : > { %3209 = vrot.lane.b32.xlu1 %v15475_v6, %s10666_s29  ;;  %3241 = vst.msk [vmem:[#allocation3 + $0x28] sm:$0xff] %vm3239_vm7, %v3194_v41  ;;  %v3443_v41 = vsel %vm1646_vm13, %v3372_v29, 0.0 }
 0x27c   : > { %3501 = vrot.lane.b32.xlu0 %v3460_v50, %s15336_s27  ;;  %v3374_v50 = vsel %vm15343_vm3, %v3371_v20, %v12046_v63  ;;  %v15491_v63 = vld [vmem:[#allocation45_spill] sm:$0xff] }
 0x27d   : > { %v3486_v45 = vpop.permute.xlu0 %3485  ;;  %v2799_v55 = vpack.c.bf16 %v3374_v50, %v2780_v12  ;;  %v15513_v12 = vld [vmem:[#allocation66_spill] sm:$0xff] }
 0x27e   : > { %3533 = vst.msk [vmem:[#allocation3 + $0x28] sm:$0xff] %vm3531_vm4, %v3486_v45  ;;  %v2531_v48 = vpop.permute.xlu1 %2530  ;;  %v15490_v45 = vld [vmem:[#allocation55_spill] sm:$0xff] }
 0x27f   : > { %2546 = vrot.lane.b32.xlu1 %v15476_v58, %s15338_s26  ;;  %3662 = vst.msk [vmem:[#allocation3 + $0x28] sm:$0xff] %vm3660_vm6, %v3615_v56  ;;  %v3463_v58 = vpack.c.bf16 %v3374_v50, %v3443_v41  ;;  %v15508_v50 = vld [vmem:[#allocation23_spill] sm:$0xff] }
 0x280   : > { %2577 = vst.msk [vmem:[#allocation3 + $0x50] sm:$0xff] %vm2574_vm1, %v2531_v48  ;;  %2838 = vrot.lane.b32.xlu0 %v2796_v22, %s10663_s1  ;;  %v15492_v22 = vpack.c.bf16 %v15490_v45, %v15491_v63 }
 0x281   : > { %v2823_v34 = vpop.permute.xlu0 %2822 }
 0x282   : > { %2869 = vst.msk [vmem:[#allocation3 + $0x50] sm:$0xff] %vm2866_vm15, %v2823_v34  ;;  %v3488_v40 = vpop.permute.xlu1 %3487  ;;  %v15493_v34 = vld [vmem:[#allocation50_spill] sm:$0xff] }
 0x283   : > { %3503 = vrot.lane.b32.xlu1 %v3461_v19, %s15336_s27  ;;  %2950 = vst.msk [vmem:[#allocation3 + $0x50] sm:$0xff] %vm2947_vm10, %v12216_v0  ;;  %v15481_v0 = vpack.c.bf16 %v15480_v47, %v11664_v27  ;;  %v3368_v27 = vsel %vm15343_vm3, %v3365_v2, %v3367_v18  ;;  %v3445_v47 = vsel %vm1648_vm9, %v12086_v30, 0.0  ;;  %v3379_v30 = vrot.slane %v11916_v51, 7 }
 0x284   : > { %3211 = vrot.lane.b32.xlu0 %v15478_v11, %s10666_s29  ;;  %v3441_v53 = vsel %vm1644_vm14, %v3368_v27, 0.0  ;;  %v2778_v7 = vsel %vm1646_vm13, %v3368_v27, 0.0  ;;  %v15499_v27 = vld [vmem:[#allocation52_spill] sm:$0xff] }
 0x285   : > { %v3196_v32 = vpop.permute.xlu0 %3195  ;;  %v3462_v4 = vpack.c.bf16 %v3370_v49, %v3441_v53  ;;  %v2798_v6 = vpack.c.bf16 %v3370_v49, %v2778_v7  ;;  %v15501_v53 = vld [vmem:[#allocation64_spill] sm:$0xff] }
 0x286   : > { %3242 = vst.msk [vmem:[#allocation3 + $0x50] sm:$0xff] %vm3239_vm7, %v3196_v32  ;;  %v2825_v43 = vpop.permute.xlu1 %2824  ;;  %v3906_v35 = vld [vmem:[#allocation3 + $0x28] sm:$0xff]  ;;  %v3594_v32 = vpack.c.bf16 %v12055_v21, %v11916_v51 }
 0x287   : > { %2840 = vrot.lane.b32.xlu1 %v2797_v14, %s10663_s1  ;;  %3534 = vst.msk [vmem:[#allocation3 + $0x50] sm:$0xff] %vm3531_vm4, %v3488_v40  ;;  %4104 = vmatmul.mubr.bf16.gmra.mrb[36].mxu0 %v3906_v35  ;;  %v3377_v40 = vrot.slane %v15493_v34, 7  ;;  %v15494_v14 = vld [vmem:[#allocation57_spill] sm:$0xff] }
 0x288   : > { %2548 = vrot.lane.b32.xlu0 %v15481_v0, %s15338_s26  ;;  %3663 = vst.msk [vmem:[#allocation3 + $0x50] sm:$0xff] %vm3660_vm6, %v3617_v13  ;;  %9553 = vmatprep.mubr.msk.bf16.mxu0 %vm15341_vm2, %v3909_v42  ;;  %v15495_v24 = vpack.c.bf16 %v15494_v14, %v15491_v63  ;;  %v3913_v0 = vld [vmem:[#allocation3 + $0xa8] sm:$0xff] }
 0x289   : > { %v2533_v46 = vpop.permute.xlu0 %2532 }
 0x28a   : > { %2578 = vst.msk [vmem:[#allocation3 + $0x78] sm:$0xff] %vm2574_vm1, %v2533_v46  ;;  %v3619_v56 = vpop.permute.xlu1 %3618  ;;  %v15497_v46 = vld [vmem:[#allocation60_spill] sm:$0xff] }
 0x28b   : > { %3634 = vrot.lane.b32.xlu1 %v3591_v61, %s10662_s25  ;;  %2870 = vst.msk [vmem:[#allocation3 + $0x78] sm:$0xff] %vm2866_vm15, %v2825_v43 }
 0x28c   : > { %3636 = vrot.lane.b32.xlu0 %v3592_v16, %s10662_s25  ;;  %2951 = vst.msk [vmem:[#allocation3 + $0x78] sm:$0xff] %vm2947_vm10, %v12246_v25  ;;  %v3911_v25 = vld [vmem:[#allocation3 + $0x80] sm:$0xff] }
 0x28d   : > { %v3621_v17 = vpop.permute.xlu0 %3620 }
 0x28e   : > { %v2052_v13 = vpop.permute.xlu1 %2051 }
 0x28f   : > { %2067 = vrot.lane.b32.xlu1 %v3591_v61, %s10659_s2  ;;  %2095 = vst.msk [vmem:[#allocation3 + $0xc8] sm:$0xff] %vm2089_vm5, %v2052_v13  ;;  %v3908_v33 = vld [vmem:[#allocation3 + $0x50] sm:$0xff]  ;;  %v3593_v61 = vpack.c.bf16 %v15493_v34, %v15496_v15  ;;  %v3380_v13 = vsel %vm15343_vm3, %v3377_v40, %v3379_v30  ;;  %v3919_v15 = vld [vmem:[#allocation3 + $0x120] sm:$0xff] }
 0x290   : > { %2069 = vrot.lane.b32.xlu0 %v3592_v16, %s10659_s2  ;;  %4112 = vmatmul.mubr.bf16.gmra.mrb[40].mxu0 %v3908_v33  ;;  %v15502_v33 = vld [vmem:[#allocation56_spill] sm:$0xff] }
 0x291   : > { %v2054_v31 = vpop.permute.xlu0 %2053  ;;  %9554 = vmatprep.mubr.msk.bf16.mxu0 %vm15341_vm2, %v3911_v25  ;;  %v15504_v25 = vrot.slane %v12055_v21, 7  ;;  %v2720_v21 = vrot.slane %v2623_v3, 7  ;;  %v15509_v41 = vpack.c.bf16 %v15508_v50, %v15502_v33 }
 0x292   : > { %2096 = vst.msk [vmem:[#allocation3 + $0xf0] sm:$0xff] %vm2089_vm5, %v2054_v31  ;;  %v12415_v9 = vpop.permute.xlu1 %2911  ;;  %v3447_v31 = vsel %vm1650_vm0, %v3380_v13, 0.0 }
 0x293   : > { %2927 = vrot.lane.b32.xlu1 %v15484_v59, %s15334_s0  ;;  %v15503_v59 = vpack.c.bf16 %v15501_v53, %v15502_v33  ;;  %v3382_v20 = vsel %vm15343_vm3, %v3379_v30, %v15504_v25  ;;  %v2721_v26 = vsel %vm15343_vm3, %v3379_v30, %v2720_v21  ;;  %v3927_v21 = vld [vmem:[#allocation3 + $0x1c0] sm:$0xff] }
 0x294   : > { %3505 = vrot.lane.b32.xlu0 %v3462_v4, %s15336_s27  ;;  %v15505_v4 = vld [vmem:[#allocation65_spill] sm:$0xff]  ;;  %v3465_v29 = vpack.c.bf16 %v3382_v20, %v3447_v31 }
 0x295   : > { %v12426_v2 = vpop.permute.xlu0 %2913  ;;  %v15506_v7 = vpack.c.bf16 %v15505_v4, %v15499_v27 }
 0x296   : > { %v3198_v5 = vpop.permute.xlu1 %3197 }
 0x297   : > { %3213 = vrot.lane.b32.xlu1 %v15487_v8, %s10666_s29  ;;  %3243 = vst.msk [vmem:[#allocation3 + $0x78] sm:$0xff] %vm3239_vm7, %v3198_v5 }
 0x298   : > { %2842 = vrot.lane.b32.xlu0 %v2798_v6, %s10663_s1  ;;  %v15507_v6 = vld [vmem:[#allocation32_spill] sm:$0xff] }
 0x299   : > { %v3490_v39 = vpop.permute.xlu0 %3489 }
 0x29a   : > { %3535 = vst.msk [vmem:[#allocation3 + $0x78] sm:$0xff] %vm3531_vm4, %v3490_v39  ;;  %v2535_v57 = vpop.permute.xlu1 %2534  ;;  %v15510_v39 = vld [vmem:[#allocation22_spill] sm:$0xff] }
 0x29b   : > { %2550 = vrot.lane.b32.xlu1 %v15489_v28, %s15338_s26  ;;  %3664 = vst.msk [vmem:[#allocation3 + $0x78] sm:$0xff] %vm3660_vm6, %v3619_v56  ;;  %v15498_v56 = vld [vmem:[#allocation58_spill] sm:$0xff]  ;;  %v2784_v28 = vsel %vm1652_vm11, %v3380_v13, 0.0 }
 0x29c   : > { %2579 = vst.msk [vmem:[#allocation3 + $0xa0] sm:$0xff] %vm2574_vm1, %v2535_v57  ;;  %3215 = vrot.lane.b32.xlu0 %v15492_v22, %s10666_s29  ;;  %v15511_v57 = vld [vmem:[#allocation62_spill] sm:$0xff]  ;;  %v2801_v22 = vpack.c.bf16 %v2721_v26, %v2784_v28 }
 0x29d   : > { %v2827_v48 = vpop.permute.xlu0 %2826 }
 0x29e   : > { %2871 = vst.msk [vmem:[#allocation3 + $0xa0] sm:$0xff] %vm2866_vm15, %v2827_v48  ;;  %v3492_v19 = vpop.permute.xlu1 %3491  ;;  %v15514_v48 = vld [vmem:[#allocation67_spill] sm:$0xff] }
 0x29f   : > { %3507 = vrot.lane.b32.xlu1 %v3463_v58, %s15336_s27  ;;  %2952 = vst.msk [vmem:[#allocation3 + $0xa0] sm:$0xff] %vm2947_vm10, %v12342_v10  ;;  %v3378_v10 = vsel %vm15343_vm3, %v12058_v1, %v3377_v40  ;;  %v15512_v58 = vpack.c.bf16 %v15510_v39, %v15511_v57  ;;  %v3917_v40 = vld [vmem:[#allocation3 + $0xf8] sm:$0xff] }
 0x2a0   : > { %2552 = vrot.lane.b32.xlu0 %v15495_v24, %s15338_s26  ;;  %v3464_v18 = vpack.c.bf16 %v3378_v10, %v3445_v47  ;;  %v2800_v38 = vpack.c.bf16 %v3378_v10, %v15497_v46  ;;  %v3921_v46 = vld [vmem:[#allocation3 + $0x148] sm:$0xff] }
 0x2a1   : > { %v3200_v11 = vpop.permute.xlu0 %3199 }
 0x2a2   : > { %3244 = vst.msk [vmem:[#allocation3 + $0xa0] sm:$0xff] %vm3239_vm7, %v3200_v11  ;;  %v2829_v43 = vpop.permute.xlu1 %2828  ;;  %v3910_v35 = vld [vmem:[#allocation3 + $0x78] sm:$0xff] }
 0x2a3   : > { %2844 = vrot.lane.b32.xlu1 %v2799_v55, %s10663_s1  ;;  %3536 = vst.msk [vmem:[#allocation3 + $0xa0] sm:$0xff] %vm3531_vm4, %v3492_v19  ;;  %4120 = vmatmul.mubr.bf16.gmra.mrb[44].mxu0 %v3910_v35  ;;  %v15515_v19 = vpack.c.bf16 %v15513_v12, %v15514_v48 }
 0x2a4   : > { %3640 = vrot.lane.b32.xlu0 %v3594_v32, %s10662_s25  ;;  %3665 = vst.msk [vmem:[#allocation3 + $0xa0] sm:$0xff] %vm3660_vm6, %v3621_v17  ;;  %9555 = vmatprep.mubr.msk.bf16.mxu0 %vm15341_vm2, %v3913_v0  ;;  %v15500_v17 = vpack.c.bf16 %v15498_v56, %v15499_v27 }
 0x2a5   : > { %v2537_v42 = vpop.permute.xlu0 %2536 }
 0x2a6   : > { %2580 = vst.msk [vmem:[#allocation3 + $0xc8] sm:$0xff] %vm2574_vm1, %v2537_v42  ;;  %v3623_v1 = vpop.permute.xlu1 %3622 }
 0x2a7   : > { %3638 = vrot.lane.b32.xlu1 %v3593_v61, %s10662_s25  ;;  %2872 = vst.msk [vmem:[#allocation3 + $0xc8] sm:$0xff] %vm2866_vm15, %v2829_v43 }
 0x2a8   : > { %3509 = vrot.lane.b32.xlu0 %v3464_v18, %s15336_s27  ;;  %2953 = vst.msk [vmem:[#allocation3 + $0xc8] sm:$0xff] %vm2947_vm10, %v12355_v37  ;;  %v3915_v37 = vld [vmem:[#allocation3 + $0xd0] sm:$0xff] }
 0x2a9   : > { %v3625_v36 = vpop.permute.xlu0 %3624 }
 0x2aa   : > { %v2056_v60 = vpop.permute.xlu1 %2055 }
 0x2ab   : > { %2071 = vrot.lane.b32.xlu1 %v3593_v61, %s10659_s2  ;;  %2097 = vst.msk [vmem:[#allocation3 + $0x118] sm:$0xff] %vm2089_vm5, %v2056_v60  ;;  %v3912_v16 = vld [vmem:[#allocation3 + $0xa0] sm:$0xff] }
 0x2ac   : > { %2846 = vrot.lane.b32.xlu0 %v2800_v38, %s10663_s1  ;;  %4128 = vmatmul.mubr.bf16.gmra.mrb[48].mxu0 %v3912_v16 }
 0x2ad   : > { %v2058_v49 = vpop.permute.xlu0 %2057  ;;  %9556 = vmatprep.mubr.msk.bf16.mxu0 %vm15341_vm2, %v3915_v37 }
 0x2ae   : > { %2098 = vst.msk [vmem:[#allocation3 + $0x140] sm:$0xff] %vm2089_vm5, %v2058_v49  ;;  %v12489_v51 = vpop.permute.xlu1 %2915 }
 0x2af   : > { %3217 = vrot.lane.b32.xlu1 %v15500_v17, %s10666_s29  ;;  %v3923_v17 = vld [vmem:[#allocation3 + $0x170] sm:$0xff] }
 0x2b0   : > { %3219 = vrot.lane.b32.xlu0 %v15503_v59, %s10666_s29 }
 0x2b1   : > { %v12504_v62 = vpop.permute.xlu0 %2917 }
 0x2b2   : > { %v3202_v8 = vpop.permute.xlu1 %3201 }
 0x2b3   : > { %2554 = vrot.lane.b32.xlu1 %v15506_v7, %s15338_s26  ;;  %3245 = vst.msk [vmem:[#allocation3 + $0xc8] sm:$0xff] %vm3239_vm7, %v3202_v8  ;;  %v3925_v7 = vld [vmem:[#allocation3 + $0x198] sm:$0xff] }
 0x2b4   : > { %2929 = vrot.lane.b32.xlu0 %v15507_v6, %s15334_s0  ;;  %s15687_s0 = smov 64  }
 0x2b5   : > { %v3494_v23 = vpop.permute.xlu0 %3493 }
 0x2b6   : > { %3537 = vst.msk [vmem:[#allocation3 + $0xc8] sm:$0xff] %vm3531_vm4, %v3494_v23  ;;  %v2539_v5 = vpop.permute.xlu1 %2538 }
 0x2b7   : > { %3511 = vrot.lane.b32.xlu1 %v3465_v29, %s15336_s27  ;;  %3666 = vst.msk [vmem:[#allocation3 + $0xc8] sm:$0xff] %vm3660_vm6, %v3623_v1 }
 0x2b8   : > { %2581 = vst.msk [vmem:[#allocation3 + $0xf0] sm:$0xff] %vm2574_vm1, %v2539_v5  ;;  %2556 = vrot.lane.b32.xlu0 %v15509_v41, %s15338_s26 }
 0x2ba   : > { %v2831_v45 = vpop.permute.xlu0 %2830  ;;  %v3496_v63 = vpop.permute.xlu1 %3495 }
 0x2bb   : > { %3221 = vrot.lane.b32.xlu1 %v15512_v58, %s10666_s29  ;;  %2873 = vst.msk [vmem:[#allocation3 + $0xf0] sm:$0xff] %vm2866_vm15, %v2831_v45 }
 0x2bc   : > { %2954 = vst.msk [vmem:[#allocation3 + $0xf0] sm:$0xff] %vm2947_vm10, %v12415_v9  ;;  %3513 = vrot.lane.b32.xlu0 %v15515_v19, %s15336_s27  ;;  %v15516_v9 = vld [vmem:[#allocation44_spill] sm:$0xff] }
 0x2bd   : > { %v15517_v14 = vpack.c.bf16 %v11905_v52, %v15516_v9 }
 0x2be   : > { %v3204_v44 = vpop.permute.xlu0 %3203  ;;  %v2833_v55 = vpop.permute.xlu1 %2832  ;;  %v3914_v34 = vld [vmem:[#allocation3 + $0xc8] sm:$0xff] }
 0x2bf   : > { %2848 = vrot.lane.b32.xlu1 %v2801_v22, %s10663_s1  ;;  %3246 = vst.msk [vmem:[#allocation3 + $0xf0] sm:$0xff] %vm3239_vm7, %v3204_v44  ;;  %4136 = vmatmul.mubr.bf16.gmra.mrb[52].mxu0 %v3914_v34 }
 0x2c0   : > { %3538 = vst.msk [vmem:[#allocation3 + $0xf0] sm:$0xff] %vm3531_vm4, %v3496_v63  ;;  %9557 = vmatprep.mubr.msk.bf16.mxu0 %vm15341_vm2, %v3917_v40  ;;  %v3929_v63 = vld [vmem:[#allocation3 + $0x1e8] sm:$0xff] }
 0x2c1   : > { %3667 = vst.msk [vmem:[#allocation3 + $0xf0] sm:$0xff] %vm3660_vm6, %v3625_v36 }
 0x2c2   : > { %v2541_v24 = vpop.permute.xlu0 %2540  ;;  %v3627_v11 = vpop.permute.xlu1 %3626 }
 0x2c3   : > { %3642 = vrot.lane.b32.xlu1 %v15517_v14, %s10662_s25  ;;  %2582 = vst.msk [vmem:[#allocation3 + $0x118] sm:$0xff] %vm2574_vm1, %v2541_v24  ;;  %s15677_s25 = smov 96  }
 0x2c4   : > { %2874 = vst.msk [vmem:[#allocation3 + $0x118] sm:$0xff] %vm2866_vm15, %v2833_v55  ;;  %v3931_v55 = vld [vmem:[#allocation3 + $0x210] sm:$0xff] }
 0x2c5   : > { %2955 = vst.msk [vmem:[#allocation3 + $0x118] sm:$0xff] %vm2947_vm10, %v12426_v2 }
 0x2c6   : > { %v3629_v32 = vpop.permute.xlu0 %3628  ;;  %v2060_v43 = vpop.permute.xlu1 %2059 }
 0x2c7   : > { %2099 = vst.msk [vmem:[#allocation3 + $0x168] sm:$0xff] %vm2089_vm5, %v2060_v43 }
 0x2c8   : > { %v3916_v35 = vld [vmem:[#allocation3 + $0xf0] sm:$0xff] }
 0x2c9   : > { %4144 = vmatmul.mubr.bf16.gmra.mrb[56].mxu0 %v3916_v35 }
 0x2ca   : > { %v2062_v52 = vpop.permute.xlu0 %2061  ;;  %9558 = vmatprep.mubr.msk.bf16.mxu0 %vm15341_vm2, %v3919_v15  ;;  %v2920_v61 = vpop.permute.xlu1 %2919  ;;  %v3933_v15 = vld [vmem:[#allocation3 + $0x238] sm:$0xff] }
 0x2cb   : > { %2100 = vst.msk [vmem:[#allocation3 + $0x190] sm:$0xff] %vm2089_vm5, %v2062_v52 }
 0x2ce   : > { %v2922_v10 = vpop.permute.xlu0 %2921  ;;  %v3206_v47 = vpop.permute.xlu1 %3205 }
 0x2cf   : > { %3247 = vst.msk [vmem:[#allocation3 + $0x118] sm:$0xff] %vm3239_vm7, %v3206_v47  ;;  %v3935_v47 = vld [vmem:[#allocation3 + $0x260] sm:$0xff] }
 0x2d2   : > { %v3498_v0 = vpop.permute.xlu0 %3497  ;;  %v2543_v2 = vpop.permute.xlu1 %2542 }
 0x2d3   : > { %3539 = vst.msk [vmem:[#allocation3 + $0x118] sm:$0xff] %vm3531_vm4, %v3498_v0 }
 0x2d4   : > { %3668 = vst.msk [vmem:[#allocation3 + $0x118] sm:$0xff] %vm3660_vm6, %v3627_v11 }
 0x2d5   : > { %2583 = vst.msk [vmem:[#allocation3 + $0x140] sm:$0xff] %vm2574_vm1, %v2543_v2 }
 0x2d6   : > { %v2835_v42 = vpop.permute.xlu0 %2834 }
 0x2d7   : > { %2875 = vst.msk [vmem:[#allocation3 + $0x140] sm:$0xff] %vm2866_vm15, %v2835_v42 }
 0x2d8   : > { %v3500_v18 = vpop.permute.xlu1 %3499  ;;  %2956 = vst.msk [vmem:[#allocation3 + $0x140] sm:$0xff] %vm2947_vm10, %v12489_v51 }
 0x2da   : > { %v3208_v1 = vpop.permute.xlu0 %3207 }
 0x2db   : > { %3248 = vst.msk [vmem:[#allocation3 + $0x140] sm:$0xff] %vm3239_vm7, %v3208_v1  ;;  %v3918_v36 = vld [vmem:[#allocation3 + $0x118] sm:$0xff] }
 0x2dc   : > { %3540 = vst.msk [vmem:[#allocation3 + $0x140] sm:$0xff] %vm3531_vm4, %v3500_v18  ;;  %4152 = vmatmul.mubr.bf16.gmra.mrb[60].mxu0 %v3918_v36  ;;  %v12616_v18 = vld [vmem:[%s15518_s23] ss:$0 sm:$0xff] }
 0x2dd   : > { %v2837_v30 = vpop.permute.xlu1 %2836  ;;  %3669 = vst.msk [vmem:[#allocation3 + $0x140] sm:$0xff] %vm3660_vm6, %v3629_v32  ;;  %9559 = vmatprep.mubr.msk.bf16.mxu0 %vm15341_vm2, %v3921_v46 }
 0x2de   : > { %v2545_v38 = vpop.permute.xlu0 %2544 }
 0x2df   : > { %2584 = vst.msk [vmem:[#allocation3 + $0x168] sm:$0xff] %vm2574_vm1, %v2545_v38 }
 0x2e0   : > { %2876 = vst.msk [vmem:[#allocation3 + $0x168] sm:$0xff] %vm2866_vm15, %v2837_v30 }
 0x2e1   : > { %v3631_v60 = vpop.permute.xlu1 %3630  ;;  %2957 = vst.msk [vmem:[#allocation3 + $0x168] sm:$0xff] %vm2947_vm10, %v12504_v62 }
 0x2e2   : > { %v3633_v16 = vpop.permute.xlu0 %3632 }
 0x2e4   : > { %v3920_v27 = vld [vmem:[#allocation3 + $0x140] sm:$0xff] }
 0x2e5   : > { %v2064_v56 = vpop.permute.xlu1 %2063  ;;  %4160 = vmatmul.mubr.bf16.gmra.mrb[64].mxu0 %v3920_v27 }
 0x2e6   : > { %2101 = vst.msk [vmem:[#allocation3 + $0x1b8] sm:$0xff] %vm2089_vm5, %v2064_v56  ;;  %v2066_v37 = vpop.permute.xlu0 %2065  ;;  %9560 = vmatprep.mubr.msk.bf16.mxu0 %vm15341_vm2, %v3923_v17 }
 0x2e7   : > { %2102 = vst.msk [vmem:[#allocation3 + $0x1e0] sm:$0xff] %vm2089_vm5, %v2066_v37 }
 0x2e9   : > { %v2924_v13 = vpop.permute.xlu1 %2923 }
 0x2ea   : > { %v2926_v49 = vpop.permute.xlu0 %2925 }
 0x2ed   : > { %v3210_v51 = vpop.permute.xlu1 %3209 }
 0x2ee   : > { %3249 = vst.msk [vmem:[#allocation3 + $0x168] sm:$0xff] %vm3239_vm7, %v3210_v51  ;;  %v3502_v53 = vpop.permute.xlu0 %3501 }
 0x2ef   : > { %3541 = vst.msk [vmem:[#allocation3 + $0x168] sm:$0xff] %vm3531_vm4, %v3502_v53 }
 0x2f0   : > { %3670 = vst.msk [vmem:[#allocation3 + $0x168] sm:$0xff] %vm3660_vm6, %v3631_v60 }
 0x2f1   : > { %v2547_v33 = vpop.permute.xlu1 %2546 }
 0x2f2   : > { %2585 = vst.msk [vmem:[#allocation3 + $0x190] sm:$0xff] %vm2574_vm1, %v2547_v33  ;;  %v2839_v59 = vpop.permute.xlu0 %2838 }
 0x2f3   : > { %2877 = vst.msk [vmem:[#allocation3 + $0x190] sm:$0xff] %vm2866_vm15, %v2839_v59 }
 0x2f4   : > { %2958 = vst.msk [vmem:[#allocation3 + $0x190] sm:$0xff] %vm2947_vm10, %v2920_v61 }
 0x2f5   : > { %v3504_v25 = vpop.permute.xlu1 %3503 }
 0x2f6   : > { %v3212_v20 = vpop.permute.xlu0 %3211 }
 0x2f7   : > { %3250 = vst.msk [vmem:[#allocation3 + $0x190] sm:$0xff] %vm3239_vm7, %v3212_v20  ;;  %v3922_v4 = vld [vmem:[#allocation3 + $0x168] sm:$0xff] }
 0x2f8   : > { %3542 = vst.msk [vmem:[#allocation3 + $0x190] sm:$0xff] %vm3531_vm4, %v3504_v25  ;;  %4168 = vmatmul.mubr.bf16.gmra.mrb[68].mxu0 %v3922_v4 }
 0x2f9   : > { %v2841_v31 = vpop.permute.xlu1 %2840  ;;  %3671 = vst.msk [vmem:[#allocation3 + $0x190] sm:$0xff] %vm3660_vm6, %v3633_v16  ;;  %9561 = vmatprep.mubr.msk.bf16.mxu0 %vm15341_vm2, %v3925_v7 }
 0x2fa   : > { %v2549_v3 = vpop.permute.xlu0 %2548 }
 0x2fb   : > { %2586 = vst.msk [vmem:[#allocation3 + $0x1b8] sm:$0xff] %vm2574_vm1, %v2549_v3  ;;  %v15520_v3 = vld [vmem:[#allocation5_spill] sm:$0xff] }
 0x2fc   : > { %2878 = vst.msk [vmem:[#allocation3 + $0x1b8] sm:$0xff] %vm2866_vm15, %v2841_v31 }
 0x2fd   : > { %v3635_v62 = vpop.permute.xlu1 %3634  ;;  %2959 = vst.msk [vmem:[#allocation3 + $0x1b8] sm:$0xff] %vm2947_vm10, %v2922_v10 }
 0x2fe   : > { %v3637_v8 = vpop.permute.xlu0 %3636 }
 0x300   : > { %v3924_v6 = vld [vmem:[#allocation3 + $0x190] sm:$0xff] }
 0x301   : > { %v2068_v29 = vpop.permute.xlu1 %2067  ;;  %4176 = vmatmul.mubr.bf16.gmra.mrb[72].mxu0 %v3924_v6 }
 0x302   : > { %2103 = vst.msk [vmem:[#allocation3 + $0x208] sm:$0xff] %vm2089_vm5, %v2068_v29  ;;  %v2070_v23 = vpop.permute.xlu0 %2069  ;;  %9562 = vmatprep.mubr.msk.bf16.mxu0 %vm15341_vm2, %v3927_v21 }
 0x303   : > { %2104 = vst.msk [vmem:[#allocation3 + $0x230] sm:$0xff] %vm2089_vm5, %v2070_v23 }
 0x305   : > { %v2928_v5 = vpop.permute.xlu1 %2927 }
 0x306   : > { %v3506_v50 = vpop.permute.xlu0 %3505 }
 0x309   : > { %v3214_v41 = vpop.permute.xlu1 %3213 }
 0x30a   : > { %3251 = vst.msk [vmem:[#allocation3 + $0x1b8] sm:$0xff] %vm3239_vm7, %v3214_v41  ;;  %v2843_v26 = vpop.permute.xlu0 %2842 }
 0x30b   : > { %3543 = vst.msk [vmem:[#allocation3 + $0x1b8] sm:$0xff] %vm3531_vm4, %v3506_v50 }
 0x30c   : > { %3672 = vst.msk [vmem:[#allocation3 + $0x1b8] sm:$0xff] %vm3660_vm6, %v3635_v62  ;;  %v15521_v62 = vand.u32 15, %v15520_v3 }
 0x30d   : > { %v2551_v28 = vpop.permute.xlu1 %2550 }
 0x30e   : > { %2587 = vst.msk [vmem:[#allocation3 + $0x1e0] sm:$0xff] %vm2574_vm1, %v2551_v28  ;;  %v3216_v39 = vpop.permute.xlu0 %3215 }
 0x30f   : > { %2879 = vst.msk [vmem:[#allocation3 + $0x1e0] sm:$0xff] %vm2866_vm15, %v2843_v26 }
 0x310   : > { %2960 = vst.msk [vmem:[#allocation3 + $0x1e0] sm:$0xff] %vm2947_vm10, %v2924_v13 }
 0x311   : > { %3252 = vst.msk [vmem:[#allocation3 + $0x1e0] sm:$0xff] %vm3239_vm7, %v3216_v39  ;;  %v3508_v57 = vpop.permute.xlu1 %3507 }
 0x312   : > { %3544 = vst.msk [vmem:[#allocation3 + $0x1e0] sm:$0xff] %vm3531_vm4, %v3508_v57  ;;  %v2553_v45 = vpop.permute.xlu0 %2552 }
 0x313   : > { %3673 = vst.msk [vmem:[#allocation3 + $0x1e0] sm:$0xff] %vm3660_vm6, %v3637_v8  ;;  %v3926_v58 = vld [vmem:[#allocation3 + $0x1b8] sm:$0xff]  ;;  %v12625_v8 = vadd.s32 2, %v15521_v62 }
 0x314   : > { %4184 = vmatmul.mubr.bf16.gmra.mrb[76].mxu0 %v3926_v58  ;;  %2588 = vst.msk [vmem:[#allocation3 + $0x208] sm:$0xff] %vm2574_vm1, %v2553_v45  ;;  %v15523_v58 = vld [vmem:[#allocation8_spill] sm:$0xff] }
 0x315   : > { %v2845_v22 = vpop.permute.xlu1 %2844  ;;  %9563 = vmatprep.mubr.msk.bf16.mxu0 %vm15341_vm2, %v3929_v63  ;;  %vm15524_vm9 = vcmp.lt.s32.totalorder %v15523_v58, 16 }
 0x316   : > { %2880 = vst.msk [vmem:[#allocation3 + $0x208] sm:$0xff] %vm2866_vm15, %v2845_v22  ;;  %v3641_v12 = vpop.permute.xlu0 %3640  ;;  %vm15530_vm14 = vmmov %vm15524_vm9 }
 0x317   : > { %2961 = vst.msk [vmem:[#allocation3 + $0x208] sm:$0xff] %vm2947_vm10, %v2926_v49 }
 0x319   : > { %v3639_v48 = vpop.permute.xlu1 %3638 }
 0x31a   : > { %v3928_v19 = vld [vmem:[#allocation3 + $0x1e0] sm:$0xff]  ;;  %v3510_v44 = vpop.permute.xlu0 %3509 }
 0x31c   : > { %4192 = vmatmul.mubr.bf16.gmra.mrb[80].mxu0 %v3928_v19 }
 0x31d   : > { %v2072_v34 = vpop.permute.xlu1 %2071  ;;  %9564 = vmatprep.mubr.msk.bf16.mxu0 %vm15341_vm2, %v3931_v55 }
 0x31e   : > { %2105 = vst.msk [vmem:[#allocation3 + $0x258] sm:$0xff] %vm2089_vm5, %v2072_v34  ;;  %v2847_v40 = vpop.permute.xlu0 %2846  ;;  %vm15519_vm5 = vcmask 1046528  }
 0x31f   : > { %vm15525_vm11 = vmmov %vm15519_vm5 }
 0x320   : > { %vm15528_vm13 = vmmov %vm15519_vm5 }
 0x321   : > { %v3218_v9 = vpop.permute.xlu1 %3217 }
 0x322   : > { %3253 = vst.msk [vmem:[#allocation3 + $0x208] sm:$0xff] %vm3239_vm7, %v3218_v9  ;;  %v3220_v14 = vpop.permute.xlu0 %3219 }
 0x323   : > { %3545 = vst.msk [vmem:[#allocation3 + $0x208] sm:$0xff] %vm3531_vm4, %v3510_v44 }
 0x324   : > { %3674 = vst.msk [vmem:[#allocation3 + $0x208] sm:$0xff] %vm3660_vm6, %v3639_v48 }
 0x325   : > { %v2555_v24 = vpop.permute.xlu1 %2554 }
 0x326   : > { %2589 = vst.msk [vmem:[#allocation3 + $0x230] sm:$0xff] %vm2574_vm1, %v2555_v24  ;;  %v2930_v11 = vpop.permute.xlu0 %2929 }
 0x327   : > { %2881 = vst.msk [vmem:[#allocation3 + $0x230] sm:$0xff] %vm2866_vm15, %v2847_v40 }
 0x328   : > { %2962 = vst.msk [vmem:[#allocation3 + $0x230] sm:$0xff] %vm2947_vm10, %v2928_v5 }
 0x329   : > { %3254 = vst.msk [vmem:[#allocation3 + $0x230] sm:$0xff] %vm3239_vm7, %v3220_v14  ;;  %v3512_v32 = vpop.permute.xlu1 %3511  ;;  %v15526_v14 = vld [vmem:[#allocation7_spill] sm:$0xff] }
 0x32a   : > { %3546 = vst.msk [vmem:[#allocation3 + $0x230] sm:$0xff] %vm3531_vm4, %v3512_v32  ;;  %v2557_v35 = vpop.permute.xlu0 %2556  ;;  %v15527_v24 = vand.u32 15, %v15526_v14 }
 0x32b   : > { %3675 = vst.msk [vmem:[#allocation3 + $0x230] sm:$0xff] %vm3660_vm6, %v3641_v12  ;;  %v3930_v43 = vld [vmem:[#allocation3 + $0x208] sm:$0xff] }
 0x32c   : > { %4200 = vmatmul.mubr.bf16.gmra.mrb[84].mxu0 %v3930_v43  ;;  %2590 = vst.msk [vmem:[#allocation3 + $0x258] sm:$0xff] %vm2574_vm1, %v2557_v35  ;;  %vm4714_vm1 = vcmask 1045504  }
 0x32d   : > { %v3222_v52 = vpop.permute.xlu1 %3221  ;;  %9565 = vmatprep.mubr.msk.bf16.mxu0 %vm15341_vm2, %v3933_v15 }
 0x32e   : > { %v3514_v0 = vpop.permute.xlu0 %3513 }
 0x331   : > { %v2849_v61 = vpop.permute.xlu1 %2848 }
 0x332   : > { %2882 = vst.msk [vmem:[#allocation3 + $0x258] sm:$0xff] %vm2866_vm15, %v2849_v61  ;;  %v3932_v10 = vld [vmem:[#allocation3 + $0x230] sm:$0xff] }
 0x333   : > { %2963 = vst.msk [vmem:[#allocation3 + $0x258] sm:$0xff] %vm2947_vm10, %v2930_v11  ;;  %v12640_v11 = vadd.s32 2, %v15527_v24 }
 0x334   : > { %3255 = vst.msk [vmem:[#allocation3 + $0x258] sm:$0xff] %vm3239_vm7, %v3222_v52  ;;  %4208 = vmatmul.mubr.bf16.gmra.mrb[88].mxu0 %v3932_v10  ;;  %vm15522_vm7 = vmmov %vm15519_vm5 }
 0x335   : > { %3547 = vst.msk [vmem:[#allocation3 + $0x258] sm:$0xff] %vm3531_vm4, %v3514_v0  ;;  %v3643_v2 = vpop.permute.xlu1 %3642  ;;  %9566 = vmatprep.mubr.msk.bf16.mxu0 %vm15341_vm2, %v3935_v47  ;;  %vm4619_vm15 = vcmp.lt.s32.totalorder %v12640_v11, 16  ;;  %vm15529_vm4 = vmmov %vm15519_vm5  ;;  %vm15689_vm2 = vcmask 1046528  }
 0x336   : > { %3676 = vst.msk [vmem:[#allocation3 + $0x258] sm:$0xff] %vm3660_vm6, %v3643_v2  ;;  %vm4617_vm6 = vcmp.lt.s32.totalorder %v12625_v8, 16  ;;  %vm15533_vm12 = vmmov %vm15529_vm4 }
 0x337   : > { %vm15534_vm0 = vmmov %vm15529_vm4 }
 0x338   : > { %vm15539_vm10 = vmmov %vm15534_vm0 }
 0x33d   : > { %v3934_v42 = vld [vmem:[#allocation3 + $0x258] sm:$0xff] }
 0x33e   : > { %4216 = vmatmul.mubr.bf16.gmra.mrb[92].mxu0 %v3934_v42 }
 0x349   : > { %v4097_v1 = vpop.f32.mrb[32].mxu0 }
 0x34a   : > { %v4098_v30 = vadd.f32 %v12616_v18, %v4097_v1  ;;  %v4099_v36 = vpop.f32.mrb[33].mxu0 }
 0x34b   : > { %v4100_v46 = vpop.f32.mrb[34].mxu0 }
 0x34c   : > { %v4224_v38 = vmax.f32 %v4098_v30, 0.0  ;;  %v4101_v60 = vadd.f32 %v12616_v18, %v4100_v46  ;;  %v4102_v16 = vpop.f32.mrb[35].mxu0 }
 0x34e   : > { %4256 = vst [vmem:[#allocation2 + $0x30] sm:$0xff] %v4224_v38  ;;  %v4225_v56 = vmax.f32 %v4101_v60, 0.0 }
 0x350   : > { %4257 = vst [vmem:[#allocation2 + $0x40] sm:$0xff] %v4225_v56  ;;  %v4422_v13 = vrot.slane %v4225_v56, 1  ;;  %v4716_v53 = vrot.slane %v4225_v56, 2 }
 0x355   : > { %v4291_v27 = vld [vmem:[#allocation2 + $0x30] sm:$0xfe] }
 0x356   : > { %v4582_v17 = vld [vmem:[#allocation2 + $0x30] sm:$0xfc]  ;;  %v4421_v37 = vrot.slane %v4291_v27, 1 }
 0x357   : > { %v4715_v49 = vrot.slane %v4582_v17, 2 }
 0x358   : > { %v4423_v51 = vsel %vm15519_vm5, %v4421_v37, %v4422_v13 }
 0x359   : > { %v4550_v33 = vmax.f32 %v4224_v38, %v4423_v51  ;;  %v4717_v59 = vsel %vm4714_vm1, %v4715_v49, %v4716_v53 }
 0x35a   : > { %v4105_v20 = vpop.f32.mrb[36].mxu0 }
 0x35b   : > { %v4844_v25 = vmax.f32 %v4550_v33, %v4717_v59  ;;  %v4106_v31 = vadd.f32 %v12616_v18, %v4105_v20  ;;  %v4107_v4 = vpop.f32.mrb[37].mxu0 }
 0x35c   : > { %v4108_v7 = vpop.f32.mrb[38].mxu0 }
 0x35d   : > { %v4226_v29 = vmax.f32 %v4106_v31, 0.0  ;;  %v4109_v6 = vadd.f32 %v12616_v18, %v4108_v7  ;;  %v4110_v21 = vpop.f32.mrb[39].mxu0 }
 0x35f   : > { %4258 = vst [vmem:[#allocation2 + $0x50] sm:$0xff] %v4226_v29  ;;  %v4227_v23 = vmax.f32 %v4109_v6, 0.0  ;;  %v4424_v5 = vrot.slane %v4226_v29, 1  ;;  %v4718_v50 = vrot.slane %v4226_v29, 2  ;;  %v4878_v41 = vmax.f32 %v4844_v25, %v4226_v29 }
 0x361   : > { %4259 = vst [vmem:[#allocation2 + $0x60] sm:$0xff] %v4227_v23  ;;  %v4425_v26 = vsel %vm15522_vm7, %v4422_v13, %v4424_v5  ;;  %v4426_v28 = vrot.slane %v4227_v23, 1  ;;  %v4719_v39 = vsel %vm4714_vm1, %v4716_v53, %v4718_v50  ;;  %v4720_v57 = vrot.slane %v4227_v23, 2  ;;  %v15531_v13 = vld [vmem:[#allocation9_spill] sm:$0xff] }
 0x362   : > { %v4519_v45 = vsel %vm15524_vm9, %v4425_v26, 0.0  ;;  %v4813_v55 = vsel %vm4617_vm6, %v4719_v39, 0.0  ;;  %vm15532_vm8 = vcmp.lt.s32.totalorder %v15531_v13, 16 }
 0x363   : > { %v4113_v63 = vpop.f32.mrb[40].mxu0  ;;  %v4551_v22 = vmax.f32 %v4225_v56, %v4519_v45  ;;  %v4427_v12 = vsel %vm15525_vm11, %v4424_v5, %v4426_v28  ;;  %v4721_v48 = vsel %vm4714_vm1, %v4718_v50, %v4720_v57  ;;  %vm15542_vm7 = vmmov %vm15532_vm8 }
 0x364   : > { %v4114_v19 = vadd.f32 %v12616_v18, %v4113_v63  ;;  %v4115_v44 = vpop.f32.mrb[41].mxu0  ;;  %v4552_v34 = vmax.f32 %v4226_v29, %v4427_v12  ;;  %vm15543_vm11 = vmmov %vm15534_vm0 }
 0x365   : > { %v4116_v40 = vpop.f32.mrb[42].mxu0  ;;  %v4845_v9 = vmax.f32 %v4551_v22, %v4813_v55 }
 0x366   : > { %v4228_v32 = vmax.f32 %v4114_v19, 0.0  ;;  %v4117_v43 = vadd.f32 %v12616_v18, %v4116_v40  ;;  %v4118_v35 = vpop.f32.mrb[43].mxu0  ;;  %v4910_v15 = vld [vmem:[#allocation2 + $0x50] sm:$0xfe]  ;;  %v4846_v61 = vmax.f32 %v4552_v34, %v4721_v48 }
 0x367   : > { %v4992_v52 = vld [vmem:[#allocation2 + $0x50] sm:$0xfc]  ;;  %v4879_v10 = vmax.f32 %v4845_v9, %v4227_v23  ;;  %v4916_v47 = vrot.slane %v4910_v15, 1 }
 0x368   : > { %v4996_v0 = vrot.slane %v4992_v52, 2  ;;  %4260 = vst [vmem:[#allocation2 + $0x70] sm:$0xff] %v4228_v32  ;;  %v12643_v2 = vmax.f32 %v4117_v43, 0.0  ;;  %v4428_v42 = vrot.slane %v4228_v32, 1  ;;  %v4722_v1 = vrot.slane %v4228_v32, 2  ;;  %v15535_v35 = vld [vmem:[#allocation10_spill] sm:$0xff] }
 0x369   : > { %v4880_v30 = vmax.f32 %v4846_v61, %v4228_v32  ;;  %v4917_v36 = vsel %vm15528_vm13, %v4916_v47, %v4426_v28  ;;  %v15536_v15 = vand.u32 15, %v15535_v35  ;;  %v15537_v61 = vld [vmem:[#allocation14_spill] sm:$0xff]  ;;  %vm15544_vm13 = vcmask 261120  }
 0x36a   : > { %v4997_v46 = vsel %vm4714_vm1, %v4996_v0, %v4720_v57  ;;  %4261 = vst [vmem:[#allocation2 + $0x80] sm:$0xff] %v12643_v2  ;;  %v4429_v38 = vsel %vm15529_vm4, %v4426_v28, %v4428_v42  ;;  %v4430_v60 = vrot.slane %v12643_v2, 1  ;;  %v4723_v16 = vsel %vm4714_vm1, %v4720_v57, %v4722_v1 }
 0x36b   : > { %v4724_v56 = vrot.slane %v12643_v2, 2  ;;  %v4929_v27 = vsel %vm15530_vm14, %v4429_v38, 0.0  ;;  %v4960_v17 = vmax.f32 %v4878_v41, %v4917_v36  ;;  %v5009_v37 = vsel %vm4617_vm6, %v4723_v16, 0.0  ;;  %v15540_v36 = vld [vmem:[#allocation12_spill] sm:$0xff]  ;;  %vm15545_vm14 = vmmov %vm15534_vm0 }
 0x36c   : > { %v4521_v49 = vsel %vm15532_vm8, %v4429_v38, 0.0  ;;  %v4961_v51 = vmax.f32 %v4879_v10, %v4929_v27  ;;  %v4431_v53 = vsel %vm15533_vm12, %v4428_v42, %v4430_v60  ;;  %v4815_v31 = vsel %vm4619_vm15, %v4723_v16, 0.0 }
 0x36d   : > { %v4553_v33 = vmax.f32 %v4227_v23, %v4521_v49  ;;  %v4725_v59 = vsel %vm4714_vm1, %v4722_v1, %v4724_v56  ;;  %v5040_v25 = vmax.f32 %v4960_v17, %v4997_v46  ;;  %v4554_v20 = vmax.f32 %v4228_v32, %v4431_v53 }
 0x36e   : > { %v4962_v4 = vmax.f32 %v4880_v30, %v4431_v53  ;;  %v5041_v7 = vmax.f32 %v4961_v51, %v5009_v37  ;;  %v12673_v52 = vadd.s32 2, %v15536_v15  ;;  %v15538_v10 = vand.u32 15, %v15537_v61 }
 0x36f   : > { %v4847_v62 = vmax.f32 %v4553_v33, %v4815_v31  ;;  %v5074_v29 = vmax.f32 %v5040_v25, %v4228_v32  ;;  %v5106_v6 = vld [vmem:[#allocation2 + $0x70] sm:$0xfe]  ;;  %v4848_v5 = vmax.f32 %v4554_v20, %v4725_v59  ;;  %vm15541_vm5 = vcmp.lt.s32.totalorder %v15540_v36, 16 }
 0x370   : > { %v5188_v21 = vld [vmem:[#allocation2 + $0x70] sm:$0xfc]  ;;  %v5042_v50 = vmax.f32 %v4962_v4, %v4725_v59  ;;  %v5075_v41 = vmax.f32 %v5041_v7, %v12643_v2  ;;  %v5112_v26 = vrot.slane %v5106_v6, 1  ;;  %v12677_v47 = vadd.s32 2, %v15538_v10  ;;  %vm15548_vm12 = vmmov %vm15541_vm5 }
 0x371   : > { %v5192_v28 = vrot.slane %v5188_v21, 2  ;;  %v4881_v23 = vmax.f32 %v4847_v62, %v12643_v2 }
 0x372   : > { %v5113_v39 = vsel %vm15534_vm0, %v5112_v26, %v4430_v60  ;;  %vm4623_vm4 = vcmp.lt.s32.totalorder %v12677_v47, 16  ;;  %vm15549_vm0 = vmmov %vm15542_vm7 }
 0x373   : > { %v5156_v57 = vmax.f32 %v5074_v29, %v5113_v39  ;;  %v5193_v45 = vsel %vm4714_vm1, %v5192_v28, %v4724_v56  ;;  %v12707_v39 = vld [vmem:[#allocation2 + $0x8] sm:$0xff] }
 0x375   : > { %v5236_v63 = vmax.f32 %v5156_v57, %v5193_v45 }
 0x376   : > { %v4121_v22 = vpop.f32.mrb[44].mxu0 }
 0x377   : > { %v4122_v12 = vadd.f32 %v12616_v18, %v4121_v22  ;;  %v4123_v48 = vpop.f32.mrb[45].mxu0 }
 0x378   : > { %v4124_v19 = vpop.f32.mrb[46].mxu0  ;;  %v15546_v48 = vld [vmem:[#allocation16_spill] sm:$0xff] }
 0x379   : > { %v4230_v44 = vmax.f32 %v4122_v12, 0.0  ;;  %v4125_v55 = vadd.f32 %v12616_v18, %v4124_v19  ;;  %v4126_v34 = vpop.f32.mrb[47].mxu0  ;;  %vm15547_vm8 = vcmp.lt.s32.totalorder %v15546_v48, 16 }
 0x37b   : > { %4262 = vst [vmem:[#allocation2 + $0x90] sm:$0xff] %v4230_v44  ;;  %v12669_v40 = vmax.f32 %v4125_v55, 0.0  ;;  %v4432_v9 = vrot.slane %v4230_v44, 1  ;;  %v4726_v24 = vrot.slane %v4230_v44, 2  ;;  %v4882_v32 = vmax.f32 %v4848_v5, %v4230_v44 }
 0x37c   : > { %v5076_v43 = vmax.f32 %v5042_v50, %v4230_v44 }
 0x37d   : > { %4263 = vst [vmem:[#allocation2 + $0xa0] sm:$0xff] %v12669_v40  ;;  %v4433_v0 = vsel %vm15539_vm10, %v4430_v60, %v4432_v9  ;;  %v4727_v42 = vsel %vm4714_vm1, %v4724_v56, %v4726_v24  ;;  %v4434_v1 = vrot.slane %v12669_v40, 1  ;;  %v4728_v30 = vrot.slane %v12669_v40, 2  ;;  %vm15550_vm10 = vmmov %vm15544_vm13 }
 0x37e   : > { %v4523_v46 = vsel %vm15541_vm5, %v4433_v0, 0.0  ;;  %v4931_v38 = vsel %vm15542_vm7, %v4433_v0, 0.0  ;;  %v5125_v16 = vsel %vm15524_vm9, %v4433_v0, 0.0  ;;  %v5205_v27 = vsel %vm4617_vm6, %v4727_v42, 0.0  ;;  %vm15551_vm5 = vmmov %vm15543_vm11 }
 0x37f   : > { %v4129_v17 = vpop.f32.mrb[48].mxu0  ;;  %v5157_v60 = vmax.f32 %v5075_v41, %v5125_v16  ;;  %v4435_v56 = vsel %vm15543_vm11, %v4432_v9, %v4434_v1  ;;  %v4729_v37 = vsel %vm4714_vm1, %v4726_v24, %v4728_v30  ;;  %v4963_v49 = vmax.f32 %v4881_v23, %v4931_v38  ;;  %vm15552_vm7 = vmmov %vm15551_vm5 }
 0x380   : > { %v4130_v51 = vadd.f32 %v12616_v18, %v4129_v17  ;;  %v4131_v53 = vpop.f32.mrb[49].mxu0  ;;  %v4556_v33 = vmax.f32 %v4230_v44, %v4435_v56  ;;  %v4964_v59 = vmax.f32 %v4882_v32, %v4435_v56  ;;  %v5011_v25 = vsel %vm4619_vm15, %v4727_v42, 0.0  ;;  %vm15553_vm9 = vmmov %vm15547_vm8 }
 0x381   : > { %v4132_v58 = vpop.f32.mrb[50].mxu0  ;;  %v5237_v20 = vmax.f32 %v5157_v60, %v5205_v27  ;;  %v5043_v31 = vmax.f32 %v4963_v49, %v5011_v25  ;;  %v5158_v8 = vmax.f32 %v5076_v43, %v4435_v56  ;;  %v4555_v4 = vmax.f32 %v12643_v2, %v4523_v46  ;;  %vm15554_vm11 = vmmov %vm15548_vm12 }
 0x382   : > { %v4232_v7 = vmax.f32 %v4130_v51, 0.0  ;;  %v4133_v62 = vadd.f32 %v12616_v18, %v4132_v58  ;;  %v4134_v29 = vpop.f32.mrb[51].mxu0  ;;  %v4850_v6 = vmax.f32 %v4556_v33, %v4729_v37  ;;  %v5044_v21 = vmax.f32 %v4964_v59, %v4729_v37 }
 0x383   : > { %v12699_v5 = vpack.c.bf16 %v5237_v20, %v5236_v63  ;;  %v5077_v50 = vmax.f32 %v5043_v31, %v12669_v40  ;;  %v12702_v41 = vmax.f32 %v5158_v8, %v4729_v37  ;;  %vm4621_vm6 = vcmp.lt.s32.totalorder %v12673_v52, 16 }
 0x384   : > { %4264 = vst [vmem:[#allocation2 + $0xb0] sm:$0xff] %v4232_v7  ;;  %v12705_v26 = vmax.f32 %v4133_v62, 0.0  ;;  %v4436_v28 = vrot.slane %v4232_v7, 1  ;;  %v4730_v23 = vrot.slane %v4232_v7, 2  ;;  %v4884_v2 = vmax.f32 %v4850_v6, %v4232_v7 }
 0x385   : > { %5553 = vst.msk [vmem:[#allocation2 + $0xb0] sm:$0xff] %vm15544_vm13, %v12707_v39  ;;  %v5078_v57 = vmax.f32 %v5044_v21, %v4232_v7  ;;  %v4817_v34 = vsel %vm4621_vm6, %v4727_v42, 0.0  ;;  %vm15555_vm13 = vmmov %vm15551_vm5 }
 0x386   : > { %4265 = vst [vmem:[#allocation2 + $0xc0] sm:$0xff] %v12705_v26  ;;  %v4437_v45 = vsel %vm15545_vm14, %v4434_v1, %v4436_v28  ;;  %v4731_v63 = vsel %vm4714_vm1, %v4728_v30, %v4730_v23  ;;  %v4438_v22 = vrot.slane %v12705_v26, 1  ;;  %v4732_v12 = vrot.slane %v12705_v26, 2 }
 0x387   : > { %v4525_v19 = vsel %vm15547_vm8, %v4437_v45, 0.0  ;;  %v4933_v44 = vsel %vm15548_vm12, %v4437_v45, 0.0  ;;  %v5127_v55 = vsel %vm15549_vm0, %v4437_v45, 0.0  ;;  %5554 = vst.msk [vmem:[#allocation2 + $0xc0] sm:$0xff] %vm15550_vm10, %v12707_v39  ;;  %v4849_v43 = vmax.f32 %v4555_v4, %v4817_v34  ;;  %vm15563_vm12 = vmmov %vm15553_vm9 }
 0x388   : > { %v5159_v9 = vmax.f32 %v5077_v50, %v5127_v55  ;;  %v4439_v24 = vsel %vm15551_vm5, %v4436_v28, %v4438_v22  ;;  %v4733_v32 = vsel %vm4714_vm1, %v4730_v23, %v4732_v12  ;;  %v5207_v15 = vsel %vm4619_vm15, %v4731_v63, 0.0 }
 0x389   : > { %v4558_v10 = vmax.f32 %v4232_v7, %v4439_v24  ;;  %v4966_v0 = vmax.f32 %v4884_v2, %v4439_v24  ;;  %v5160_v1 = vmax.f32 %v5078_v57, %v4439_v24  ;;  %v4883_v30 = vmax.f32 %v4849_v43, %v12669_v40 }
 0x38a   : > { %v12731_v13 = vmax.f32 %v5159_v9, %v5207_v15  ;;  %v4557_v42 = vmax.f32 %v12669_v40, %v4525_v19  ;;  %v4819_v27 = vsel %vm4623_vm4, %v4731_v63, 0.0  ;;  %v5013_v56 = vsel %vm4621_vm6, %v4731_v63, 0.0 }
 0x38b   : > { %v4852_v46 = vmax.f32 %v4558_v10, %v4733_v32  ;;  %v5046_v38 = vmax.f32 %v4966_v0, %v4733_v32  ;;  %v12735_v16 = vmax.f32 %v5160_v1, %v4733_v32  ;;  %v4965_v17 = vmax.f32 %v4883_v30, %v4933_v44 }
 0x38c   : > { %v5277_v11 = vpack.c.bf16 %v12731_v13, %v12702_v41  ;;  %v4851_v60 = vmax.f32 %v4557_v42, %v4819_v27  ;;  %vm5555_vm15 = vcmask 253952   ;;  %v15556_v42 = vld [vmem:[#allocation15_spill] sm:$0xff] }
 0x38d   : > { %v5045_v37 = vmax.f32 %v4965_v17, %v5013_v56  ;;  %v15559_v56 = vld [vmem:[#allocation17_spill] sm:$0xff] }
 0x38e   : > { %v4885_v49 = vmax.f32 %v4851_v60, %v12705_v26  ;;  %v12783_v27 = vld [vmem:[#allocation2 + $0xc0] sm:$0x1]  ;;  %vm15560_vm14 = vcmp.lt.s32.totalorder %v15559_v56, 16 }
 0x38f   : > { %v5079_v40 = vmax.f32 %v5045_v37, %v12705_v26  ;;  %6476 = vst [vmem:[#allocation2 + $0xc0] sm:$0xff] %v12707_v39 }
 0x392   : > { %v4137_v51 = vpop.f32.mrb[52].mxu0 }
 0x393   : > { %v4138_v53 = vadd.f32 %v12616_v18, %v4137_v51  ;;  %v4139_v33 = vpop.f32.mrb[53].mxu0 }
 0x394   : > { %v4140_v59 = vpop.f32.mrb[54].mxu0 }
 0x395   : > { %v4234_v25 = vmax.f32 %v4138_v53, 0.0  ;;  %v4141_v58 = vadd.f32 %v12616_v18, %v4140_v59  ;;  %v4142_v20 = vpop.f32.mrb[55].mxu0 }
 0x396   : > { %v15564_v20 = vld [vmem:[#allocation20_spill] sm:$0xff] }
 0x397   : > { %4266 = vst [vmem:[#allocation2 + $0xd0] sm:$0xff] %v4234_v25  ;;  %v12747_v31 = vmax.f32 %v4141_v58, 0.0  ;;  %v4440_v8 = vrot.slane %v4234_v25, 1  ;;  %v4734_v4 = vrot.slane %v4234_v25, 2  ;;  %v4886_v7 = vmax.f32 %v4852_v46, %v4234_v25 }
 0x398   : > { %5556 = vst.msk [vmem:[#allocation2 + $0xd0] sm:$0x1] %vm5555_vm15, %v12707_v39  ;;  %v5080_v62 = vmax.f32 %v5046_v38, %v4234_v25  ;;  %v15557_v46 = vand.u32 15, %v15556_v42  ;;  %vm15565_vm0 = vcmp.lt.s32.totalorder %v15564_v20, 16 }
 0x399   : > { %4267 = vst [vmem:[#allocation2 + $0xe0] sm:$0xff] %v12747_v31  ;;  %v4441_v29 = vsel %vm15552_vm7, %v4438_v22, %v4440_v8  ;;  %v4735_v6 = vsel %vm4714_vm1, %v4732_v12, %v4734_v4  ;;  %6477 = vst [vmem:[#allocation2 + $0xd0] sm:$0x1] %v12707_v39  ;;  %v4442_v21 = vrot.slane %v12747_v31, 1  ;;  %v4736_v19 = vrot.slane %v12747_v31, 2 }
 0x39a   : > { %v4935_v50 = vsel %vm15553_vm9, %v4441_v29, 0.0  ;;  %v5129_v28 = vsel %vm15554_vm11, %v4441_v29, 0.0  ;;  %v5209_v57 = vsel %vm4621_vm6, %v4735_v6, 0.0  ;;  %v5015_v43 = vsel %vm4623_vm4, %v4735_v6, 0.0  ;;  %vm15558_vm6 = vmmov %vm15551_vm5 }
 0x39b   : > { %v5161_v2 = vmax.f32 %v5079_v40, %v5129_v28  ;;  %v4443_v45 = vsel %vm15555_vm13, %v4440_v8, %v4442_v21  ;;  %v4967_v44 = vmax.f32 %v4885_v49, %v4935_v50  ;;  %v4737_v32 = vsel %vm4714_vm1, %v4734_v4, %v4736_v19  ;;  %v15561_v49 = vld [vmem:[#allocation18_spill] sm:$0xff]  ;;  %vm15566_vm5 = vmmov %vm15560_vm14 }
 0x39c   : > { %v4145_v23 = vpop.f32.mrb[56].mxu0  ;;  %v4560_v12 = vmax.f32 %v4234_v25, %v4443_v45  ;;  %v4968_v9 = vmax.f32 %v4886_v7, %v4443_v45  ;;  %v12781_v38 = vadd.s32 2, %v15557_v46  ;;  %v4527_v37 = vsel %vm15560_vm14, %v4441_v29, 0.0  ;;  %vm15573_vm9 = vmmov %vm15565_vm0 }
 0x39d   : > { %v4146_v63 = vadd.f32 %v12616_v18, %v4145_v23  ;;  %v4147_v22 = vpop.f32.mrb[57].mxu0  ;;  %v12764_v34 = vmax.f32 %v5161_v2, %v5209_v57  ;;  %v5047_v0 = vmax.f32 %v4967_v44, %v5015_v43  ;;  %v15562_v40 = vand.u32 15, %v15561_v49  ;;  %vm15574_vm11 = vmmov %vm15566_vm5 }
 0x39e   : > { %v4148_v55 = vpop.f32.mrb[58].mxu0  ;;  %v4854_v10 = vmax.f32 %v4560_v12, %v4737_v32  ;;  %v5048_v33 = vmax.f32 %v4968_v9, %v4737_v32  ;;  %vm4625_vm8 = vcmp.lt.s32.totalorder %v12781_v38, 16  ;;  %v5162_v58 = vmax.f32 %v5080_v62, %v4443_v45 }
 0x39f   : > { %v12766_v36 = vmax.f32 %v4146_v63, 0.0  ;;  %v12769_v24 = vadd.f32 %v12616_v18, %v4148_v55  ;;  %v4150_v52 = vpop.f32.mrb[59].mxu0  ;;  %v5278_v15 = vpack.c.bf16 %v12764_v34, %v12735_v16  ;;  %v12794_v51 = vadd.s32 2, %v15562_v40 }
 0x3a0   : > { %v5081_v59 = vmax.f32 %v5047_v0, %v12747_v31  ;;  %v4559_v7 = vmax.f32 %v12705_v26, %v4527_v37  ;;  %v4821_v50 = vsel %vm4625_vm8, %v4735_v6, 0.0 }
 0x3a1   : > { %4268 = vst [vmem:[#allocation2 + $0xf0] sm:$0xff] %v12766_v36  ;;  %v4237_v1 = vmax.f32 %v12769_v24, 0.0  ;;  %v4444_v30 = vrot.slane %v12766_v36, 1  ;;  %v4888_v17 = vmax.f32 %v4854_v10, %v12766_v36  ;;  %v4738_v53 = vrot.slane %v12766_v36, 2 }
 0x3a2   : > { %vm4627_vm10 = vcmp.lt.s32.totalorder %v12794_v51, 16  ;;  %v4853_v28 = vmax.f32 %v4559_v7, %v4821_v50  ;;  %v5082_v62 = vmax.f32 %v5048_v33, %v12766_v36  ;;  %v15568_v33 = vld [vmem:[#allocation19_spill] sm:$0xff] }
 0x3a3   : > { %4269 = vst [vmem:[#allocation2 + $0x100] sm:$0xff] %v4237_v1  ;;  %v4445_v60 = vsel %vm15558_vm6, %v4442_v21, %v4444_v30  ;;  %v4739_v4 = vsel %vm4714_vm1, %v4736_v19, %v4738_v53  ;;  %v12805_v21 = vmax.f32 %v5162_v58, %v4737_v32 }
 0x3a4   : > { %v5131_v25 = vsel %vm15563_vm12, %v4445_v60, 0.0  ;;  %v4529_v8 = vsel %vm15565_vm0, %v4445_v60, 0.0  ;;  %v5211_v48 = vsel %vm4623_vm4, %v4739_v4, 0.0  ;;  %v4937_v23 = vsel %vm15566_vm5, %v4445_v60, 0.0  ;;  %vm15567_vm4 = vmmov %vm15558_vm6 }
 0x3a5   : > { %v5163_v29 = vmax.f32 %v5081_v59, %v5131_v25  ;;  %v4561_v57 = vmax.f32 %v12747_v31, %v4529_v8  ;;  %v4887_v63 = vmax.f32 %v4853_v28, %v12747_v31  ;;  %v4823_v47 = vsel %vm4627_vm10, %v4739_v4, 0.0  ;;  %vm15572_vm7 = vmmov %vm15567_vm4 }
 0x3a6   : > { %v5017_v9 = vsel %vm4625_vm8, %v4739_v4, 0.0  ;;  %v15569_v59 = vand.u32 15, %v15568_v33  ;;  %vm15575_vm13 = vmmov %vm15567_vm4 }
 0x3a7   : > { %v12815_v2 = vmax.f32 %v5163_v29, %v5211_v48  ;;  %v12827_v12 = vmax.f32 %v4561_v57, %v4823_v47  ;;  %v4969_v44 = vmax.f32 %v4887_v63, %v4937_v23  ;;  %v15570_v57 = vld [vmem:[#allocation21_spill] sm:$0xff]  ;;  %vm15576_vm6 = vmmov %vm15567_vm4 }
 0x3a8   : > { %v12854_v25 = vadd.s32 2, %v15569_v59  ;;  %v15571_v63 = vand.u32 15, %v15570_v57  ;;  %v15577_v59 = vld [vmem:[#allocation26_spill] sm:$0xff]  ;;  %vm15579_vm12 = vmmov %vm15567_vm4 }
 0x3a9   : > { %v5049_v43 = vmax.f32 %v4969_v44, %v5017_v9  ;;  %vm15578_vm14 = vcmp.lt.s32.totalorder %v15577_v59, 16  ;;  %vm15582_vm5 = vmmov %vm15573_vm9 }
 0x3aa   : > { %v12817_v26 = vld [vmem:[#allocation2 + $0x100] sm:$0xff]  ;;  %vm4629_vm15 = vcmp.lt.s32.totalorder %v12854_v25, 16  ;;  %v12862_v47 = vadd.s32 2, %v15571_v63 }
 0x3ab   : > { %v4446_v45 = vrot.slane %v12817_v26, 1  ;;  %v4740_v6 = vrot.slane %v12817_v26, 2  ;;  %v4889_v9 = vmax.f32 %v12827_v12, %v12817_v26 }
 0x3ac   : > { %vm4631_vm0 = vcmp.lt.s32.totalorder %v12862_v47, 16 }
 0x3ad   : > { %v4447_v19 = vsel %vm15567_vm4, %v4444_v30, %v4446_v45  ;;  %v12835_v31 = vsel %vm4714_vm1, %v4738_v53, %v4740_v6  ;;  %vm15585_vm4 = vmmov %vm15578_vm14 }
 0x3ae   : > { %v12830_v55 = vmax.f32 %v4888_v17, %v4447_v19  ;;  %v5164_v52 = vmax.f32 %v5082_v62, %v4447_v19  ;;  %v10258_v17 = vld [vmem:[%s15197_s19 + $0x4] ss:$8 sps:$4 sm:$0xff]   ;;  %v4562_v4 = vmax.f32 %v12766_v36, %v4447_v19  ;;  %v5083_v36 = vmax.f32 %v5049_v43, %v12817_v26 }
 0x3af   : > { %v4153_v32 = vpop.f32.mrb[60].mxu0  ;;  %5364 = vmatprep.mubr.bf16.mxu1 %v10258_v17 }
 0x3b0   : > { %v4154_v10 = vadd.f32 %v12616_v18, %v4153_v32  ;;  %v4155_v0 = vpop.f32.mrb[61].mxu0  ;;  %v5050_v42 = vmax.f32 %v12830_v55, %v12835_v31  ;;  %v12841_v30 = vmax.f32 %v5164_v52, %v12835_v31  ;;  %v4856_v55 = vmax.f32 %v4562_v4, %v12835_v31 }
 0x3b1   : > { %v4156_v46 = vpop.f32.mrb[62].mxu0 }
 0x3b2   : > { %v4238_v60 = vmax.f32 %v4154_v10, 0.0  ;;  %v12847_v37 = vadd.f32 %v12616_v18, %v4156_v46  ;;  %v4158_v49 = vpop.f32.mrb[63].mxu0 }
 0x3b4   : > { %4270 = vst [vmem:[#allocation2 + $0x110] sm:$0xff] %v4238_v60  ;;  %v4239_v40 = vmax.f32 %v12847_v37, 0.0 }
 0x3b6   : > { %4271 = vst [vmem:[#allocation2 + $0x120] sm:$0xff] %v4239_v40 }
 0x3b8   : > { %v4161_v53 = vpop.f32.mrb[64].mxu0 }
 0x3b9   : > { %v4162_v58 = vadd.f32 %v12616_v18, %v4161_v53  ;;  %v4163_v8 = vpop.f32.mrb[65].mxu0 }
 0x3ba   : > { %v4164_v7 = vpop.f32.mrb[66].mxu0 }
 0x3bb   : > { %v4240_v29 = vmax.f32 %v4162_v58, 0.0  ;;  %v4165_v50 = vadd.f32 %v12616_v18, %v4164_v7  ;;  %v4166_v48 = vpop.f32.mrb[67].mxu0  ;;  %v4305_v28 = vld [vmem:[#allocation2 + $0x110] sm:$0xff] }
 0x3bc   : > { %v4448_v62 = vrot.slane %v4305_v28, 1  ;;  %v4742_v23 = vrot.slane %v4305_v28, 2  ;;  %v4890_v53 = vmax.f32 %v4856_v55, %v4305_v28 }
 0x3bd   : > { %4272 = vst [vmem:[#allocation2 + $0x130] sm:$0xff] %v4240_v29  ;;  %v12864_v44 = vmax.f32 %v4165_v50, 0.0  ;;  %v4306_v19 = vld [vmem:[#allocation2 + $0x120] sm:$0xff]  ;;  %v4452_v52 = vrot.slane %v4240_v29, 1  ;;  %v4746_v32 = vrot.slane %v4240_v29, 2 }
 0x3be   : > { %v4449_v10 = vsel %vm15572_vm7, %v4446_v45, %v4448_v62  ;;  %v4450_v0 = vrot.slane %v4306_v19, 1  ;;  %v4743_v49 = vsel %vm4714_vm1, %v4740_v6, %v4742_v23  ;;  %v4744_v31 = vrot.slane %v4306_v19, 2 }
 0x3bf   : > { %4273 = vst [vmem:[#allocation2 + $0x140] sm:$0xff] %v12864_v44  ;;  %v4454_v46 = vrot.slane %v12864_v44, 1  ;;  %v4748_v17 = vrot.slane %v12864_v44, 2  ;;  %v4939_v43 = vsel %vm15573_vm9, %v4449_v10, 0.0  ;;  %v5133_v26 = vsel %vm15574_vm11, %v4449_v10, 0.0  ;;  %vm15588_vm9 = vmmov %vm15576_vm6 }
 0x3c0   : > { %v4451_v12 = vsel %vm15575_vm13, %v4448_v62, %v4450_v0  ;;  %v4531_v6 = vsel %vm15578_vm14, %v4449_v10, 0.0  ;;  %v5165_v58 = vmax.f32 %v5083_v36, %v5133_v26  ;;  %v5213_v4 = vsel %vm4625_vm8, %v4743_v49, 0.0  ;;  %v15580_v26 = vld [vmem:[#allocation27_spill] sm:$0xff]  ;;  %vm15591_vm13 = vmmov %vm15585_vm4 }
 0x3c1   : > { %v4455_v45 = vsel %vm15576_vm6, %v4452_v52, %v4454_v46  ;;  %v4749_v33 = vsel %vm4714_vm1, %v4746_v32, %v4748_v17  ;;  %v4453_v56 = vsel %vm15579_vm12, %v4450_v0, %v4452_v52  ;;  %v4564_v7 = vmax.f32 %v4238_v60, %v4451_v12 }
 0x3c2   : > { %v4566_v8 = vmax.f32 %v4240_v29, %v4455_v45  ;;  %v12891_v50 = vmax.f32 %v5165_v58, %v5213_v4  ;;  %v4745_v48 = vsel %vm4714_vm1, %v4742_v23, %v4744_v31  ;;  %v4971_v62 = vmax.f32 %v4889_v9, %v4939_v43 }
 0x3c3   : > { %v4972_v57 = vmax.f32 %v4890_v53, %v4451_v12  ;;  %v4858_v55 = vmax.f32 %v4564_v7, %v4745_v48  ;;  %v5019_v10 = vsel %vm4627_vm10, %v4743_v49, 0.0  ;;  %v5084_v36 = vmax.f32 %v5050_v42, %v4305_v28 }
 0x3c4   : > { %v12894_v63 = vmax.f32 %v4566_v8, %v4749_v33  ;;  %vm15581_vm8 = vcmp.lt.s32.totalorder %v15580_v26, 16  ;;  %v5051_v60 = vmax.f32 %v4971_v62, %v5019_v10  ;;  %v4747_v58 = vsel %vm4714_vm1, %v4744_v31, %v4746_v32  ;;  %v15583_v31 = vld [vmem:[#allocation24_spill] sm:$0xff] }
 0x3c5   : > { %v4533_v52 = vsel %vm15581_vm8, %v4453_v56, 0.0  ;;  %v5052_v0 = vmax.f32 %v4972_v57, %v4745_v48  ;;  %v4892_v23 = vmax.f32 %v4858_v55, %v4240_v29  ;;  %v4563_v9 = vmax.f32 %v4237_v1, %v4531_v6  ;;  %vm15592_vm14 = vmmov %vm15581_vm8 }
 0x3c6   : > { %v5085_v53 = vmax.f32 %v5051_v60, %v4306_v19  ;;  %v5166_v43 = vmax.f32 %v5084_v36, %v4451_v12  ;;  %v4825_v42 = vsel %vm4629_vm15, %v4743_v49, 0.0  ;;  %v5135_v8 = vsel %vm15582_vm5, %v4453_v56, 0.0  ;;  %vm15597_vm5 = vmmov %vm15576_vm6 }
 0x3c7   : > { %v5086_v28 = vmax.f32 %v5052_v0, %v4240_v29  ;;  %v4857_v4 = vmax.f32 %v4563_v9, %v4825_v42  ;;  %v4565_v7 = vmax.f32 %v4239_v40, %v4533_v52  ;;  %v4974_v32 = vmax.f32 %v4892_v23, %v4455_v45  ;;  %v15586_v23 = vld [vmem:[#allocation34_spill] sm:$0xff] }
 0x3c8   : > { %v15584_v62 = vand.u32 15, %v15583_v31  ;;  %v5167_v1 = vmax.f32 %v5085_v53, %v5135_v8  ;;  %v4827_v12 = vsel %vm4631_vm0, %v4747_v58, 0.0  ;;  %v5215_v29 = vsel %vm4627_vm10, %v4747_v58, 0.0 }
 0x3c9   : > { %v5168_v6 = vmax.f32 %v5086_v28, %v4455_v45  ;;  %v4891_v49 = vmax.f32 %v4857_v4, %v4306_v19  ;;  %v4859_v20 = vmax.f32 %v4565_v7, %v4827_v12  ;;  %v5054_v57 = vmax.f32 %v4974_v32, %v4749_v33 }
 0x3ca   : > { %v12914_v24 = vadd.s32 2, %v15584_v62  ;;  %v4941_v37 = vsel %vm15585_vm4, %v4453_v56, 0.0  ;;  %v12922_v40 = vmax.f32 %v5166_v43, %v4745_v48  ;;  %v12924_v10 = vmax.f32 %v5167_v1, %v5215_v29  ;;  %vm15598_vm4 = vmmov %vm15592_vm14 }
 0x3cb   : > { %v4169_v55 = vpop.f32.mrb[68].mxu0  ;;  %v5248_v36 = vmax.f32 %v5168_v6, %v4749_v33  ;;  %v4973_v60 = vmax.f32 %v4891_v49, %v4941_v37  ;;  %v4893_v0 = vmax.f32 %v4859_v20, %v12864_v44  ;;  %v15587_v19 = vand.u32 15, %v15586_v23 }
 0x3cc   : > { %v4170_v45 = vadd.f32 %v12616_v18, %v4169_v55  ;;  %v4171_v52 = vpop.f32.mrb[69].mxu0  ;;  %v5021_v56 = vsel %vm4629_vm15, %v4747_v58, 0.0  ;;  %vm4633_vm10 = vcmp.lt.s32.totalorder %v12914_v24, 16 }
 0x3cd   : > { %v4172_v51 = vpop.f32.mrb[70].mxu0  ;;  %v12930_v9 = vadd.s32 2, %v15587_v19  ;;  %v5053_v42 = vmax.f32 %v4973_v60, %v5021_v56 }
 0x3ce   : > { %v4242_v48 = vmax.f32 %v4170_v45, 0.0  ;;  %v4173_v33 = vadd.f32 %v12616_v18, %v4172_v51  ;;  %v4174_v43 = vpop.f32.mrb[71].mxu0 }
 0x3cf   : > { %vm4635_vm7 = vcmp.lt.s32.totalorder %v12930_v9, 16  ;;  %v5087_v32 = vmax.f32 %v5053_v42, %v12864_v44 }
 0x3d0   : > { %4274 = vst [vmem:[#allocation2 + $0x150] sm:$0xff] %v4242_v48  ;;  %v12938_v28 = vmax.f32 %v4173_v33, 0.0  ;;  %v4456_v8 = vrot.slane %v4242_v48, 1  ;;  %v4750_v4 = vrot.slane %v4242_v48, 2  ;;  %v4894_v7 = vmax.f32 %v12894_v63, %v4242_v48  ;;  %v15589_v63 = vld [vmem:[#allocation28_spill] sm:$0xff] }
 0x3d1   : > { %v5088_v31 = vmax.f32 %v5054_v57, %v4242_v48  ;;  %vm15590_vm11 = vcmp.lt.s32.totalorder %v15589_v63, 16 }
 0x3d2   : > { %4275 = vst [vmem:[#allocation2 + $0x160] sm:$0xff] %v12938_v28  ;;  %v4457_v58 = vsel %vm15588_vm9, %v4454_v46, %v4456_v8  ;;  %v4458_v62 = vrot.slane %v12938_v28, 1  ;;  %v4751_v1 = vsel %vm4714_vm1, %v4748_v17, %v4750_v4  ;;  %v4752_v6 = vrot.slane %v12938_v28, 2  ;;  %vm15594_vm12 = vmmov %vm15590_vm11 }
 0x3d3   : > { %v4535_v12 = vsel %vm15590_vm11, %v4457_v58, 0.0  ;;  %v4829_v29 = vsel %vm4633_vm10, %v4751_v1, 0.0  ;;  %v5137_v49 = vsel %vm15591_vm13, %v4457_v58, 0.0  ;;  %v5217_v46 = vsel %vm4629_vm15, %v4751_v1, 0.0  ;;  %vm15593_vm15 = vmmov %vm15576_vm6 }
 0x3d4   : > { %v4177_v20 = vpop.f32.mrb[72].mxu0  ;;  %v4459_v57 = vsel %vm15576_vm6, %v4456_v8, %v4458_v62  ;;  %v4567_v55 = vmax.f32 %v12864_v44, %v4535_v12  ;;  %v4753_v17 = vsel %vm4714_vm1, %v4750_v4, %v4752_v6  ;;  %v5169_v37 = vmax.f32 %v5087_v32, %v5137_v49  ;;  %vm15603_vm9 = vmmov %vm15597_vm5 }
 0x3d5   : > { %v4178_v45 = vadd.f32 %v12616_v18, %v4177_v20  ;;  %v4179_v52 = vpop.f32.mrb[73].mxu0  ;;  %v4568_v60 = vmax.f32 %v4242_v48, %v4459_v57  ;;  %v4976_v51 = vmax.f32 %v4894_v7, %v4459_v57  ;;  %v4943_v59 = vsel %vm15592_vm14, %v4457_v58, 0.0  ;;  %vm15607_vm6 = vmmov %vm15594_vm12 }
 0x3d6   : > { %v4180_v23 = vpop.f32.mrb[74].mxu0  ;;  %v4861_v19 = vmax.f32 %v4567_v55, %v4829_v29  ;;  %v5249_v25 = vmax.f32 %v5169_v37, %v5217_v46  ;;  %v4975_v56 = vmax.f32 %v4893_v0, %v4943_v59  ;;  %v5023_v33 = vsel %vm4631_vm0, %v4751_v1, 0.0  ;;  %v15595_v52 = vld [vmem:[#allocation35_spill] sm:$0xff]  ;;  %vm15608_vm14 = vmmov %vm15597_vm5 }
 0x3d7   : > { %v4244_v43 = vmax.f32 %v4178_v45, 0.0  ;;  %v4181_v44 = vadd.f32 %v12616_v18, %v4180_v23  ;;  %v4182_v42 = vpop.f32.mrb[75].mxu0  ;;  %v4862_v8 = vmax.f32 %v4568_v60, %v4753_v17  ;;  %v5056_v4 = vmax.f32 %v4976_v51, %v4753_v17 }
 0x3d8   : > { %v4895_v32 = vmax.f32 %v4861_v19, %v12938_v28  ;;  %v12970_v48 = vpack.c.bf16 %v5249_v25, %v5248_v36  ;;  %v5055_v7 = vmax.f32 %v4975_v56, %v5023_v33  ;;  %v5170_v12 = vmax.f32 %v5088_v31, %v4459_v57 }
 0x3d9   : > { %4276 = vst [vmem:[#allocation2 + $0x170] sm:$0xff] %v4244_v43  ;;  %v12972_v58 = vmax.f32 %v4181_v44, 0.0  ;;  %v4460_v29 = vrot.slane %v4244_v43, 1  ;;  %v4754_v0 = vrot.slane %v4244_v43, 2  ;;  %v4896_v49 = vmax.f32 %v4862_v8, %v4244_v43 }
 0x3da   : > { %v5090_v46 = vmax.f32 %v5056_v4, %v4244_v43  ;;  %v5089_v1 = vmax.f32 %v5055_v7, %v12938_v28  ;;  %v5250_v20 = vmax.f32 %v5170_v12, %v4753_v17  ;;  %vm15596_vm8 = vcmp.lt.s32.totalorder %v15595_v52, 16 }
 0x3db   : > { %4277 = vst [vmem:[#allocation2 + $0x180] sm:$0xff] %v12972_v58  ;;  %v4461_v55 = vsel %vm15593_vm15, %v4458_v62, %v4460_v29  ;;  %v4462_v37 = vrot.slane %v12972_v58, 1  ;;  %v4755_v36 = vsel %vm4714_vm1, %v4752_v6, %v4754_v0  ;;  %v4756_v31 = vrot.slane %v12972_v58, 2  ;;  %vm15606_vm13 = vmmov %vm15596_vm8 }
 0x3dc   : > { %v4945_v57 = vsel %vm15594_vm12, %v4461_v55, 0.0  ;;  %v5025_v45 = vsel %vm4633_vm10, %v4755_v36, 0.0  ;;  %v4537_v60 = vsel %vm15596_vm8, %v4461_v55, 0.0  ;;  %v4831_v17 = vsel %vm4635_vm7, %v4755_v36, 0.0  ;;  %vm15609_vm15 = vmmov %vm15597_vm5 }
 0x3dd   : > { %v4463_v62 = vsel %vm15597_vm5, %v4460_v29, %v4462_v37  ;;  %v4757_v51 = vsel %vm4714_vm1, %v4754_v0, %v4756_v31  ;;  %v4977_v59 = vmax.f32 %v4895_v32, %v4945_v57  ;;  %v4569_v6 = vmax.f32 %v12938_v28, %v4537_v60  ;;  %vm15613_vm5 = vmmov %vm15606_vm13 }
 0x3de   : > { %v4570_v23 = vmax.f32 %v4244_v43, %v4463_v62  ;;  %v4978_v19 = vmax.f32 %v4896_v49, %v4463_v62  ;;  %v5172_v25 = vmax.f32 %v5090_v46, %v4463_v62  ;;  %v5139_v56 = vsel %vm15598_vm4, %v4461_v55, 0.0  ;;  %v15599_v55 = vld [vmem:[#allocation37_spill] sm:$0xff]  ;;  %vm15614_vm4 = vmmov %vm15603_vm9 }
 0x3df   : > { %v5057_v33 = vmax.f32 %v4977_v59, %v5025_v45  ;;  %v4863_v44 = vmax.f32 %v4569_v6, %v4831_v17  ;;  %v5171_v42 = vmax.f32 %v5089_v1, %v5139_v56  ;;  %v5219_v12 = vsel %vm4631_vm0, %v4755_v36, 0.0  ;;  %v15601_v59 = vld [vmem:[#allocation38_spill] sm:$0xff] }
 0x3e0   : > { %v4864_v8 = vmax.f32 %v4570_v23, %v4757_v51  ;;  %v5058_v4 = vmax.f32 %v4978_v19, %v4757_v51  ;;  %v5252_v7 = vmax.f32 %v5172_v25, %v4757_v51  ;;  %v15600_v1 = vand.u32 15, %v15599_v55 }
 0x3e1   : > { %v5091_v29 = vmax.f32 %v5057_v33, %v12972_v58  ;;  %v4897_v32 = vmax.f32 %v4863_v44, %v12972_v58  ;;  %v5251_v28 = vmax.f32 %v5171_v42, %v5219_v12  ;;  %v15602_v6 = vand.u32 15, %v15601_v59  ;;  %v15604_v42 = vld [vmem:[#allocation40_spill] sm:$0xff] }
 0x3e2   : > { %v13002_v57 = vadd.s32 2, %v15600_v1  ;;  %vm15605_vm11 = vcmp.lt.s32.totalorder %v15604_v42, 16 }
 0x3e3   : > { %v12997_v43 = vpack.c.bf16 %v5251_v28, %v5250_v20  ;;  %v13010_v23 = vadd.s32 2, %v15602_v6  ;;  %vm15612_vm8 = vmmov %vm15605_vm11 }
 0x3e4   : > { %vm4637_vm0 = vcmp.lt.s32.totalorder %v13002_v57, 16 }
 0x3e7   : > { %v4185_v0 = vpop.f32.mrb[76].mxu0 }
 0x3e8   : > { %v4186_v26 = vadd.f32 %v12616_v18, %v4185_v0  ;;  %v4187_v49 = vpop.f32.mrb[77].mxu0 }
 0x3e9   : > { %v4188_v46 = vpop.f32.mrb[78].mxu0 }
 0x3ea   : > { %v4246_v45 = vmax.f32 %v4186_v26, 0.0  ;;  %v4189_v47 = vadd.f32 %v12616_v18, %v4188_v46  ;;  %v4190_v36 = vpop.f32.mrb[79].mxu0 }
 0x3ec   : > { %4278 = vst [vmem:[#allocation2 + $0x190] sm:$0xff] %v4246_v45  ;;  %v13005_v60 = vmax.f32 %v4189_v47, 0.0  ;;  %v4464_v17 = vrot.slane %v4246_v45, 1  ;;  %v4758_v62 = vrot.slane %v4246_v45, 2  ;;  %v4898_v20 = vmax.f32 %v4864_v8, %v4246_v45 }
 0x3ed   : > { %v5092_v51 = vmax.f32 %v5058_v4, %v4246_v45 }
 0x3ee   : > { %4279 = vst [vmem:[#allocation2 + $0x1a0] sm:$0xff] %v13005_v60  ;;  %v4465_v19 = vsel %vm15603_vm9, %v4462_v37, %v4464_v17  ;;  %v4759_v25 = vsel %vm4714_vm1, %v4756_v31, %v4758_v62  ;;  %v4466_v56 = vrot.slane %v13005_v60, 1  ;;  %v4760_v33 = vrot.slane %v13005_v60, 2 }
 0x3ef   : > { %v4193_v44 = vpop.f32.mrb[80].mxu0  ;;  %v4539_v8 = vsel %vm15605_vm11, %v4465_v19, 0.0  ;;  %v4947_v4 = vsel %vm15606_vm13, %v4465_v19, 0.0  ;;  %v5141_v12 = vsel %vm15607_vm6, %v4465_v19, 0.0  ;;  %v5221_v28 = vsel %vm4633_vm10, %v4759_v25, 0.0  ;;  %vm15625_vm6 = vmmov %vm15614_vm4 }
 0x3f0   : > { %v4194_v37 = vadd.f32 %v12616_v18, %v4193_v44  ;;  %v4195_v31 = vpop.f32.mrb[81].mxu0  ;;  %v5173_v0 = vmax.f32 %v5091_v29, %v5141_v12  ;;  %v4467_v26 = vsel %vm15608_vm14, %v4464_v17, %v4466_v56  ;;  %v4761_v49 = vsel %vm4714_vm1, %v4758_v62, %v4760_v33 }
 0x3f1   : > { %v4196_v46 = vpop.f32.mrb[82].mxu0  ;;  %v4572_v55 = vmax.f32 %v4246_v45, %v4467_v26  ;;  %v4979_v1 = vmax.f32 %v4897_v32, %v4947_v4  ;;  %v4980_v47 = vmax.f32 %v4898_v20, %v4467_v26  ;;  %v5027_v36 = vsel %vm4635_vm7, %v4759_v25, 0.0 }
 0x3f2   : > { %v4248_v63 = vmax.f32 %v4194_v37, 0.0  ;;  %v4197_v59 = vadd.f32 %v12616_v18, %v4196_v46  ;;  %v4198_v24 = vpop.f32.mrb[83].mxu0  ;;  %v5253_v6 = vmax.f32 %v5173_v0, %v5221_v28  ;;  %v5174_v19 = vmax.f32 %v5092_v51, %v4467_v26 }
 0x3f3   : > { %v4866_v44 = vmax.f32 %v4572_v55, %v4761_v49  ;;  %v5059_v31 = vmax.f32 %v4979_v1, %v5027_v36  ;;  %v5060_v29 = vmax.f32 %v4980_v47, %v4761_v49  ;;  %v4571_v17 = vmax.f32 %v12972_v58, %v4539_v8  ;;  %v4993_v47 = vld [vmem:[#allocation2 + $0x250] sm:$0x3] }
 0x3f4   : > { %4280 = vst [vmem:[#allocation2 + $0x1b0] sm:$0xff] %v4248_v63  ;;  %v13032_v62 = vmax.f32 %v4197_v59, 0.0  ;;  %v5284_v45 = vpack.c.bf16 %v5253_v6, %v5252_v7  ;;  %v4468_v32 = vrot.slane %v4248_v63, 1  ;;  %v4762_v20 = vrot.slane %v4248_v63, 2  ;;  %v15610_v7 = vld [vmem:[#allocation42_spill] sm:$0xff] }
 0x3f5   : > { %v4900_v4 = vmax.f32 %v4866_v44, %v4248_v63  ;;  %v5093_v12 = vmax.f32 %v5059_v31, %v13005_v60  ;;  %v5254_v37 = vmax.f32 %v5174_v19, %v4761_v49  ;;  %vm4639_vm10 = vcmp.lt.s32.totalorder %v13010_v23, 16  ;;  %v4911_v49 = vld [vmem:[#allocation2 + $0x250] sm:$0x1] }
 0x3f6   : > { %4281 = vst [vmem:[#allocation2 + $0x1c0] sm:$0xff] %v13032_v62  ;;  %9897 = vmatprep.subr.bf16.mxu1 %v5284_v45  ;;  %v4469_v18 = vsel %vm15609_vm15, %v4466_v56, %v4468_v32  ;;  %v4763_v51 = vsel %vm4714_vm1, %v4760_v33, %v4762_v20  ;;  %v4470_v58 = vrot.slane %v13032_v62, 1  ;;  %v4764_v8 = vrot.slane %v13032_v62, 2 }
 0x3f7   : > { %9898 = vmatpush3.bf16.msra.mxu1 %v12699_v5  ;;  %vm15611_vm12 = vcmp.lt.s32.totalorder %v15610_v7, 16  ;;  %v4949_v0 = vsel %vm15612_vm8, %v4469_v18, 0.0  ;;  %v5143_v26 = vsel %vm15613_vm5, %v4469_v18, 0.0  ;;  %v4833_v56 = vsel %vm4637_vm0, %v4759_v25, 0.0 }
 0x3f8   : > { %v4541_v28 = vsel %vm15611_vm12, %v4469_v18, 0.0  ;;  %v5175_v33 = vmax.f32 %v5093_v12, %v5143_v26  ;;  %v4471_v46 = vsel %vm15614_vm4, %v4468_v32, %v4470_v58  ;;  %v4765_v5 = vsel %vm4714_vm1, %v4762_v20, %v4764_v8  ;;  %v13073_v18 = vld [vmem:[#allocation2 + $0x230] sm:$0x3]  ;;  %vm15628_vm15 = vmmov %vm15611_vm12 }
 0x3f9   : > { %v4865_v55 = vmax.f32 %v4571_v17, %v4833_v56  ;;  %v5223_v1 = vsel %vm4635_vm7, %v4763_v51, 0.0  ;;  %v4574_v52 = vmax.f32 %v4248_v63, %v4471_v46  ;;  %v4982_v36 = vmax.f32 %v4900_v4, %v4471_v46  ;;  %vm15617_vm7 = vmmov %vm15614_vm4 }
 0x3fa   : > { %v5094_v59 = vmax.f32 %v5060_v29, %v4248_v63  ;;  %v5255_v24 = vmax.f32 %v5175_v33, %v5223_v1  ;;  %v4922_v6 = vrot.slane %v4911_v49, 1  ;;  %v4573_v19 = vmax.f32 %v13005_v60, %v4541_v28  ;;  %v15615_v28 = vld [vmem:[#allocation63_spill] sm:$0xff]  ;;  %vm15629_vm12 = vmmov %vm15612_vm8 }
 0x3fb   : > { %v4899_v25 = vmax.f32 %v4865_v55, %v13005_v60  ;;  %v13060_v44 = vmax.f32 %v4574_v52, %v4765_v5  ;;  %v5062_v31 = vmax.f32 %v4982_v36, %v4765_v5  ;;  %v4835_v17 = vsel %vm4639_vm10, %v4763_v51, 0.0  ;;  %v13071_v60 = vld [vmem:[#allocation2 + $0x230] sm:$0x1]  ;;  %vm15630_vm8 = vmmov %vm15614_vm4 }
 0x3fc   : > { %v5176_v45 = vmax.f32 %v5094_v59, %v4471_v46  ;;  %v5285_v32 = vpack.c.bf16 %v5255_v24, %v5254_v37  ;;  %v5002_v9 = vrot.slane %v4993_v47, 2  ;;  %v4867_v12 = vmax.f32 %v4573_v19, %v4835_v17  ;;  %v13091_v46 = vld [vmem:[%s15518_s23] ss:$0 sm:$0xff]  ;;  %v15618_v47 = vld [vmem:[#allocation29_spill] sm:$0xff]  ;;  %v13109_v19 = vld [vmem:[#allocation2 + $0x250] sm:$0xff] }
 0x3fd   : > { %v4981_v20 = vmax.f32 %v4899_v25, %v4949_v0  ;;  %v13065_v4 = vrot.slane %v12707_v39, 1  ;;  %v5029_v63 = vsel %vm4637_vm0, %v4763_v51, 0.0  ;;  %v15616_v26 = vand.u32 15, %v15615_v28  ;;  %v15621_v17 = vld [vmem:[#allocation25_spill] sm:$0xff] }
 0x3fe   : > { %v13069_v29 = vmax.f32 %v5176_v45, %v4765_v5  ;;  %9899 = vmatprep.subr.bf16.mxu1 %v5285_v32  ;;  %v13080_v37 = vrot.slane %v12707_v39, 2  ;;  %v4901_v56 = vmax.f32 %v4867_v12, %v13032_v62  ;;  %v15619_v52 = vand.u32 15, %v15618_v47 }
 0x3ff   : > { %v13077_v49 = vadd.s32 2, %v15616_v26  ;;  %v5061_v0 = vmax.f32 %v4981_v20, %v5029_v63  ;;  %v4201_v33 = vpop.f32.mrb[84].mxu0  ;;  %9900 = vmatpush3.bf16.msra.mxu1 %v5277_v11  ;;  %v4923_v51 = vsel %vm15617_vm7, %v13065_v4, %v4922_v6  ;;  %vm15620_vm11 = vcmp.lt.s32.totalorder %v12171_v54, 16  ;;  %v15623_v20 = vld [vmem:[#allocation59_spill] sm:$0xff] }
 0x400   : > { %v4202_v5 = vadd.f32 %v13091_v46, %v4201_v33  ;;  %v4203_v39 = vpop.f32.mrb[85].mxu0  ;;  %v5003_v55 = vsel %vm4714_vm1, %v13080_v37, %v5002_v9  ;;  %v13099_v41 = vadd.s32 2, %v15619_v52  ;;  %v13107_v25 = vsel %vm15620_vm11, %v4923_v51, 0.0  ;;  %vm15635_vm11 = vmmov %vm15628_vm15 }
 0x401   : > { %v5095_v1 = vmax.f32 %v5061_v0, %v13032_v62  ;;  %v4204_v13 = vpop.f32.mrb[86].mxu0  ;;  %vm4647_vm9 = vcmp.lt.s32.totalorder %v13077_v49, 16  ;;  %v15622_v32 = vand.u32 15, %v15621_v17  ;;  %v15624_v12 = vand.u32 15, %v15623_v20 }
 0x402   : > { %v4250_v59 = vmax.f32 %v4202_v5, 0.0  ;;  %v4205_v24 = vadd.f32 %v13091_v46, %v4204_v13  ;;  %v4206_v6 = vpop.f32.mrb[87].mxu0  ;;  %v13113_v45 = vsel %vm4647_vm9, %v5003_v55, 0.0  ;;  %vm4641_vm13 = vcmp.lt.s32.totalorder %v13099_v41, 16 }
 0x403   : > { %v13117_v9 = vadd.s32 2, %v15622_v32  ;;  %v13121_v63 = vadd.s32 2, %v15624_v12 }
 0x404   : > { %4282 = vst [vmem:[#allocation2 + $0x1d0] sm:$0xff] %v4250_v59  ;;  %v13123_v28 = vmax.f32 %v4205_v24, 0.0  ;;  %v4472_v26 = vrot.slane %v4250_v59, 1  ;;  %v4766_v0 = vrot.slane %v4250_v59, 2  ;;  %v4902_v33 = vmax.f32 %v13060_v44, %v4250_v59 }
 0x405   : > { %v5096_v51 = vmax.f32 %v5062_v31, %v4250_v59  ;;  %v15626_v31 = vld [vmem:[#allocation51_spill] sm:$0xff]  ;;  %vm4643_vm5 = vcmp.lt.s32.totalorder %v13117_v9, 16  ;;  %v15658_v9 = vrot.slane %v13109_v19, 1 }
 0x406   : > { %4283 = vst [vmem:[#allocation2 + $0x1e0] sm:$0xff] %v13123_v28  ;;  %v4473_v55 = vsel %vm15625_vm6, %v4470_v58, %v4472_v26  ;;  %v4767_v47 = vsel %vm4714_vm1, %v4764_v8, %v4766_v0  ;;  %v4474_v52 = vrot.slane %v13123_v28, 1  ;;  %v4768_v44 = vrot.slane %v13123_v28, 2 }
 0x407   : > { %v4209_v13 = vpop.f32.mrb[88].mxu0  ;;  %vm15627_vm14 = vcmp.lt.s32.totalorder %v15626_v31, 16  ;;  %v4951_v6 = vsel %vm15628_vm15, %v4473_v55, 0.0  ;;  %v5145_v17 = vsel %vm15629_vm12, %v4473_v55, 0.0  ;;  %v5225_v58 = vsel %vm4637_vm0, %v4767_v47, 0.0  ;;  %vm15631_vm0 = vmmov %vm15614_vm4 }
 0x408   : > { %v4543_v24 = vsel %vm15627_vm14, %v4473_v55, 0.0  ;;  %v4210_v32 = vadd.f32 %v13091_v46, %v4209_v13  ;;  %v4211_v8 = vpop.f32.mrb[89].mxu0  ;;  %v5177_v20 = vmax.f32 %v5095_v1, %v5145_v17  ;;  %v4475_v12 = vsel %vm15630_vm8, %v4472_v26, %v4474_v52  ;;  %v13153_v1 = vld [vmem:[#allocation2 + $0x270] sm:$0x1]  ;;  %vm15634_vm7 = vmmov %vm15627_vm14 }
 0x409   : > { %v4769_v53 = vsel %vm4714_vm1, %v4766_v0, %v4768_v44  ;;  %v4212_v38 = vpop.f32.mrb[90].mxu0  ;;  %v4576_v36 = vmax.f32 %v4250_v59, %v4475_v12  ;;  %v4983_v11 = vmax.f32 %v4901_v56, %v4951_v6  ;;  %v4984_v39 = vmax.f32 %v4902_v33, %v4475_v12  ;;  %vm15636_vm6 = vmmov %vm15631_vm0 }
 0x40a   : > { %v5031_v42 = vsel %vm4639_vm10, %v4767_v47, 0.0  ;;  %v4252_v55 = vmax.f32 %v4210_v32, 0.0  ;;  %v4213_v57 = vadd.f32 %v13091_v46, %v4212_v38  ;;  %v4214_v22 = vpop.f32.mrb[91].mxu0  ;;  %v5257_v13 = vmax.f32 %v5177_v20, %v5225_v58  ;;  %vm15641_vm15 = vmmov %vm15631_vm0 }
 0x40b   : > { %v5178_v8 = vmax.f32 %v5096_v51, %v4475_v12  ;;  %v4870_v26 = vmax.f32 %v4576_v36, %v4769_v53  ;;  %v5063_v17 = vmax.f32 %v4983_v11, %v5031_v42  ;;  %v5064_v0 = vmax.f32 %v4984_v39, %v4769_v53 }
 0x40c   : > { %v4575_v5 = vmax.f32 %v13032_v62, %v4543_v24  ;;  %4284 = vst [vmem:[#allocation2 + $0x1f0] sm:$0xff] %v4252_v55  ;;  %v13156_v59 = vmax.f32 %v4213_v57, 0.0  ;;  %v5286_v56 = vpack.c.bf16 %v5257_v13, %v13069_v29  ;;  %v4476_v33 = vrot.slane %v4252_v55, 1  ;;  %v15632_v29 = vld [vmem:[#allocation53_spill] sm:$0xff] }
 0x40d   : > { %v4770_v6 = vrot.slane %v4252_v55, 2  ;;  %v4904_v32 = vmax.f32 %v4870_v26, %v4252_v55  ;;  %v5097_v38 = vmax.f32 %v5063_v17, %v13123_v28  ;;  %v5258_v22 = vmax.f32 %v5178_v8, %v4769_v53 }
 0x40e   : > { %v5118_v51 = vrot.slane %v13153_v1, 1  ;;  %4285 = vst [vmem:[#allocation2 + $0x200] sm:$0xff] %v13156_v59  ;;  %9901 = vmatprep.subr.bf16.mxu1 %v5286_v56  ;;  %v4477_v11 = vsel %vm15631_vm0, %v4474_v52, %v4476_v33  ;;  %v4478_v36 = vrot.slane %v13156_v59, 1  ;;  %v4772_v39 = vrot.slane %v13156_v59, 2 }
 0x40f   : > { %v4771_v62 = vsel %vm4714_vm1, %v4768_v44, %v4770_v6  ;;  %9902 = vmatpush3.bf16.msra.mxu1 %v5278_v15  ;;  %vm15633_vm4 = vcmp.lt.s32.totalorder %v15632_v29, 16  ;;  %v4953_v24 = vsel %vm15634_vm7, %v4477_v11, 0.0  ;;  %v5147_v58 = vsel %vm15635_vm11, %v4477_v11, 0.0 }
 0x410   : > { %v4545_v53 = vsel %vm15633_vm4, %v4477_v11, 0.0  ;;  %v4837_v52 = vsel %vm4641_vm13, %v4767_v47, 0.0  ;;  %v5179_v44 = vmax.f32 %v5097_v38, %v5147_v58  ;;  %v4479_v20 = vsel %vm15636_vm6, %v4476_v33, %v4478_v36  ;;  %vm15644_vm8 = vmmov %vm15633_vm4 }
 0x411   : > { %v4773_v12 = vsel %vm4714_vm1, %v4770_v6, %v4772_v39  ;;  %v4869_v42 = vmax.f32 %v4575_v5, %v4837_v52  ;;  %v4217_v16 = vpop.f32.mrb[92].mxu0  ;;  %v5227_v34 = vsel %vm4639_vm10, %v4771_v62, 0.0  ;;  %v4578_v15 = vmax.f32 %v4252_v55, %v4479_v20  ;;  %vm15638_vm10 = vmmov %vm15631_vm0 }
 0x412   : > { %v4986_v57 = vmax.f32 %v4904_v32, %v4479_v20  ;;  %v5098_v13 = vmax.f32 %v5064_v0, %v4252_v55  ;;  %vm4645_vm14 = vcmp.lt.s32.totalorder %v13121_v63, 16  ;;  %v4218_v7 = vadd.f32 %v13091_v46, %v4217_v16  ;;  %v4219_v8 = vpop.f32.mrb[93].mxu0  ;;  %vm15645_vm0 = vmmov %vm15634_vm7 }
 0x413   : > { %v5259_v26 = vmax.f32 %v5179_v44, %v5227_v34  ;;  %v4903_v47 = vmax.f32 %v4869_v42, %v13123_v28  ;;  %v4577_v17 = vmax.f32 %v13123_v28, %v4545_v53  ;;  %v4220_v56 = vpop.f32.mrb[94].mxu0  ;;  %v4872_v33 = vmax.f32 %v4578_v15, %v4773_v12  ;;  %vm15647_vm4 = vmmov %vm15636_vm6 }
 0x414   : > { %v5066_v5 = vmax.f32 %v4986_v57, %v4773_v12  ;;  %v5180_v6 = vmax.f32 %v5098_v13, %v4479_v20  ;;  %v4839_v23 = vsel %vm4643_vm5, %v4771_v62, 0.0  ;;  %v4254_v38 = vmax.f32 %v4218_v7, 0.0  ;;  %v4222_v0 = vpop.f32.mrb[95].mxu0  ;;  %vm15650_vm11 = vmmov %vm15647_vm4 }
 0x415   : > { %v4221_v55 = vadd.f32 %v13091_v46, %v4220_v56  ;;  %v5287_v32 = vpack.c.bf16 %v5259_v26, %v5258_v22  ;;  %v4985_v11 = vmax.f32 %v4903_v47, %v4953_v24  ;;  %v5033_v58 = vsel %vm4641_vm13, %v4771_v62, 0.0  ;;  %v15642_v26 = vld [vmem:[#allocation61_spill] sm:$0xff]  ;;  %v5189_v0 = vld [vmem:[#allocation2 + $0x270] sm:$0x3] }
 0x416   : > { %v5260_v52 = vmax.f32 %v5180_v6, %v4773_v12  ;;  %v4871_v44 = vmax.f32 %v4577_v17, %v4839_v23  ;;  %v15637_v28 = vrot.slane %v13109_v19, 1  ;;  %4286 = vst [vmem:[#allocation2 + $0x210] sm:$0xff] %v4254_v38  ;;  %v4480_v42 = vrot.slane %v4254_v38, 1 }
 0x417   : > { %v4255_v20 = vmax.f32 %v4221_v55, 0.0  ;;  %9903 = vmatprep.subr.bf16.mxu1 %v5287_v32  ;;  %v4774_v16 = vrot.slane %v4254_v38, 2  ;;  %v4906_v46 = vmax.f32 %v4872_v33, %v4254_v38  ;;  %v15639_v22 = vpack.c.bf16 %v12815_v2, %v12805_v21 }
 0x418   : > { %v13194_v53 = vsel %vm15638_vm10, %v13065_v4, %v15637_v28  ;;  %v5065_v24 = vmax.f32 %v4985_v11, %v5033_v58  ;;  %v4905_v62 = vmax.f32 %v4871_v44, %v13156_v59  ;;  %v5100_v12 = vmax.f32 %v5066_v5, %v4254_v38  ;;  %vm15653_vm10 = vmmov %vm15647_vm4 }
 0x419   : > { %9904 = vmatpush3.bf16.msra.mxu1 %v15639_v22  ;;  %v15640_v34 = vrot.slane %v13109_v19, 2  ;;  %4287 = vst [vmem:[#allocation2 + $0x220] sm:$0xff] %v4255_v20  ;;  %v4482_v57 = vrot.slane %v4255_v20, 1  ;;  %v4776_v13 = vrot.slane %v4255_v20, 2  ;;  %v4481_v7 = vsel %vm15641_vm15, %v4478_v36, %v4480_v42  ;;  %vm15655_vm15 = vmmov %vm15644_vm8 }
 0x41a   : > { %v4775_v8 = vsel %vm4714_vm1, %v4772_v39, %v4774_v16  ;;  %vm15643_vm12 = vcmp.lt.s32.totalorder %v15642_v26, 16  ;;  %v4955_v2 = vsel %vm15644_vm8, %v4481_v7, 0.0  ;;  %v5099_v47 = vmax.f32 %v5065_v24, %v13156_v59 }
 0x41b   : > { %v13204_v15 = vsel %vm4714_vm1, %v13080_v37, %v15640_v34  ;;  %v4547_v21 = vsel %vm15643_vm12, %v4481_v7, 0.0  ;;  %v5149_v17 = vsel %vm15645_vm0, %v4481_v7, 0.0  ;;  %v15646_v56 = vrot.slane %v13071_v60, 1  ;;  %vm15652_vm6 = vmmov %vm15643_vm12 }
 0x41c   : > { %v15648_v5 = vrot.slane %v13073_v18, 2  ;;  %v4579_v39 = vmax.f32 %v13156_v59, %v4547_v21  ;;  %v5229_v6 = vsel %vm4641_vm13, %v4775_v8, 0.0  ;;  %vm15649_vm7 = vcmp.lt.s32.totalorder %v12171_v54, 16  ;;  %vm15651_vm13 = vmmov %vm15647_vm4 }
 0x41d   : > { %v4485_v33 = vsel %vm15647_vm4, %v4482_v57, %v15646_v56  ;;  %v5181_v55 = vmax.f32 %v5099_v47, %v5149_v17  ;;  %v4483_v60 = vsel %vm15650_vm11, %v4480_v42, %v4482_v57  ;;  %v4777_v18 = vsel %vm4714_vm1, %v4774_v16, %v4776_v13  ;;  %v13238_v47 = vld [vmem:[#allocation2 + $0x8] sm:$0xff]  ;;  %vm15656_vm12 = vmmov %vm15652_vm6 }
 0x41e   : > { %v4779_v36 = vsel %vm4714_vm1, %v4776_v13, %v15648_v5  ;;  %v4549_v23 = vsel %vm15649_vm7, %v4485_v33, 0.0  ;;  %v4580_v11 = vmax.f32 %v4254_v38, %v4483_v60  ;;  %v4841_v59 = vsel %vm4645_vm14, %v4775_v8, 0.0  ;;  %vm15657_vm8 = vmmov %vm15649_vm7 }
 0x41f   : > { %v4843_v31 = vsel %vm4647_vm9, %v4779_v36, 0.0  ;;  %v4581_v32 = vmax.f32 %v4255_v20, %v4549_v23  ;;  %v5261_v58 = vmax.f32 %v5181_v55, %v5229_v6  ;;  %v4873_v41 = vmax.f32 %v4579_v39, %v4841_v59 }
 0x420   : > { %v4919_v44 = vsel %vm15651_vm13, %v4482_v57, %v13065_v4  ;;  %v4987_v28 = vmax.f32 %v4905_v62, %v4955_v2  ;;  %v4874_v24 = vmax.f32 %v4580_v11, %v4777_v18  ;;  %v4988_v34 = vmax.f32 %v4906_v46, %v4483_v60 }
 0x421   : > { %v4875_v22 = vmax.f32 %v4581_v32, %v4843_v31  ;;  %v5198_v7 = vrot.slane %v5189_v0, 2  ;;  %v5288_v21 = vpack.c.bf16 %v5261_v58, %v5260_v52  ;;  %v4907_v42 = vmax.f32 %v4873_v41, %v4255_v20 }
 0x422   : > { %v4999_v38 = vsel %vm4714_vm1, %v4776_v13, %v13080_v37  ;;  %v5035_v16 = vsel %vm4643_vm5, %v4775_v8, 0.0  ;;  %v4957_v57 = vsel %vm15652_vm6, %v4919_v44, 0.0  ;;  %v5068_v2 = vmax.f32 %v4988_v34, %v4777_v18  ;;  %v10262_v34 = vld [vmem:[%s15197_s19 + $0x24] ss:$8 sps:$4 sm:$0xff]  }
 0x423   : > { %v4909_v17 = vmax.f32 %v4875_v22, %v13238_v47  ;;  %v5067_v62 = vmax.f32 %v4987_v28, %v5035_v16  ;;  %9905 = vmatprep.subr.bf16.mxu1 %v5288_v21  ;;  %v4989_v46 = vmax.f32 %v4907_v42, %v4957_v57  ;;  %v5037_v52 = vsel %vm4645_vm14, %v4999_v38, 0.0  ;;  %v10272_v21 = vld [vmem:[%s15662_s7 + $0x20] sm:$0xff]   ;;  %v10267_v16 = vld [vmem:[%s15197_s19 + $0x30] ss:$8 sps:$4 sm:$0xff]  }
 0x424   : > { %v5182_v56 = vmax.f32 %v5100_v12, %v4483_v60  ;;  %v5119_v13 = vsel %vm15653_vm10, %v13065_v4, %v5118_v51  ;;  %v15654_v33 = vpack.c.bf16 %v12891_v50, %v12841_v30  ;;  %v4908_v36 = vmax.f32 %v4874_v24, %v13238_v47  ;;  %v10264_v42 = vld [vmem:[%s15197_s19 + $0x20] ss:$8 sps:$4 sm:$0xff]   ;;  %v10274_v57 = vld [vmem:[%s15662_s7 + $0x30] sm:$0xff]  }
 0x425   : > { %v4991_v8 = vmax.f32 %v4909_v17, %v13107_v25  ;;  %v5101_v5 = vmax.f32 %v5067_v62, %v4255_v20  ;;  %v5102_v39 = vmax.f32 %v5068_v2, %v13238_v47  ;;  %v5069_v6 = vmax.f32 %v4989_v46, %v5037_v52  ;;  %v10273_v17 = vld [vmem:[%s15662_s7 + $0x28] sm:$0xff]   ;;  %v10275_v62 = vld [vmem:[%s15662_s7 + $0x38] sm:$0xff]  }
 0x426   : > { %9906 = vmatpush3.bf16.msra.mxu1 %v15654_v33  ;;  %v5151_v12 = vsel %vm15655_vm15, %v4919_v44, 0.0  ;;  %v5262_v23 = vmax.f32 %v5182_v56, %v4777_v18  ;;  %v5153_v1 = vsel %vm15656_vm12, %v13194_v53, 0.0  ;;  %v4990_v30 = vmax.f32 %v4908_v36, %v13065_v4 }
 0x427   : > { %v5071_v25 = vmax.f32 %v4991_v8, %v13113_v45  ;;  %v5183_v51 = vmax.f32 %v5101_v5, %v5151_v12  ;;  %v5199_v50 = vsel %vm4714_vm1, %v13080_v37, %v5198_v7  ;;  %v5231_v20 = vsel %vm4643_vm5, %v4999_v38, 0.0  ;;  %vm15659_vm5 = vmmov %vm15647_vm4  ;;  %v10271_v7 = vld [vmem:[%s15662_s7 + $0x18] sm:$0xff]  }
 0x428   : > { %v5103_v31 = vmax.f32 %v5069_v6, %v13238_v47  ;;  %v5184_v29 = vmax.f32 %v5102_v39, %v13065_v4  ;;  %v5155_v55 = vsel %vm15657_vm8, %v5119_v13, 0.0  ;;  %v5070_v53 = vmax.f32 %v4990_v30, %v13080_v37  ;;  %v10265_v38 = vld [vmem:[%s15197_s19 + $0x34] ss:$8 sps:$4 sm:$0xff]   ;;  %vm15675_vm12 = vmmov %vm15659_vm5 }
 0x429   : > { %v5263_v26 = vmax.f32 %v5183_v51, %v5231_v20  ;;  %v5233_v45 = vsel %vm4645_vm14, %v13204_v15, 0.0  ;;  %v5105_v60 = vmax.f32 %v5071_v25, %v13238_v47  ;;  %v5117_v32 = vsel %vm15659_vm5, %v15658_v9, %v13065_v4 }
 0x42a   : > { %v5185_v0 = vmax.f32 %v5103_v31, %v5153_v1  ;;  %v5235_v11 = vsel %vm4647_vm9, %v5199_v50, 0.0  ;;  %v5104_v18 = vmax.f32 %v5070_v53, %v13109_v19  ;;  %v5264_v58 = vmax.f32 %v5184_v29, %v13080_v37 }
 0x42b   : > { %v5289_v54 = vpack.c.bf16 %v5263_v26, %v5262_v23  ;;  %v5187_v59 = vmax.f32 %v5105_v60, %v5155_v55  ;;  %v15660_v63 = vrot.slane %v13109_v19, 2  ;;  %v15661_v4 = vpack.c.bf16 %v12924_v10, %v12922_v40  ;;  %v10268_v19 = vld [vmem:[%s15662_s7] sm:$0xff]   ;;  %v10259_v40 = vld [vmem:[%s15197_s19 + $0x14] ss:$8 sps:$4 sm:$0xff]   ;;  %v10269_v10 = vld [vmem:[%s15662_s7 + $0x8] sm:$0xff]  }
 0x42c   : > { %v5265_v41 = vmax.f32 %v5185_v0, %v5233_v45  ;;  %v5186_v44 = vmax.f32 %v5104_v18, %v5117_v32  ;;  %v10276_v32 = vld [vmem:[%s15187_s9 + $0x80] sm:$0xff]   ;;  %vm15666_vm9 = vcmask 261120  }
 0x42d   : > { %v5197_v15 = vsel %vm4714_vm1, %v15660_v63, %v13080_v37  ;;  %9907 = vmatprep.subr.bf16.mxu1 %v5289_v54  ;;  %v5267_v28 = vmax.f32 %v5187_v59, %v5235_v11  ;;  %v10256_v37 = vld [vmem:[%s15197_s19] ss:$8 sps:$4 sm:$0xff]   ;;  %v13350_v59 = vld [vmem:[#allocation2 + $0xb0] sm:$0xff]  ;;  %vm15667_vm14 = vmmov %vm15666_vm9 }
 0x42e   : > { %9908 = vmatpush3.bf16.msra.mxu1 %v15661_v4  ;;  %v5290_v49 = vpack.c.bf16 %v5265_v41, %v5264_v58  ;;  %v5266_v22 = vmax.f32 %v5186_v44, %v5197_v15  ;;  %v10277_v11 = vld [vmem:[%s15187_s9 + $0x88] sm:$0xff]   ;;  %v10278_v54 = vld [vmem:[%s15187_s9 + $0x40] sm:$0xff]   ;;  %v13352_v58 = vld [vmem:[#allocation2 + $0xb0] sm:$0x1] }
 0x42f   : > { %9949 = vmatprep.subr.bf16.mxu0 %v10278_v54  ;;  %v10279_v18 = vld [vmem:[%s15187_s9] sm:$0xff]   ;;  %v13354_v41 = vld [vmem:[#allocation2 + $0xb0] sm:$0x7f]  ;;  %v10280_v63 = vld [vmem:[%s15187_s9 + $0x48] sm:$0xff]  }
 0x430   : > { %9909 = vmatprep.subr.bf16.mxu1 %v5290_v49  ;;  %v5291_v24 = vpack.c.bf16 %v5267_v28, %v5266_v22  ;;  %9950 = vmatpush3.bf16.msra.mxu0 %v10279_v18  ;;  %v13359_v15 = vld [vmem:[#allocation2 + $0xb0] sm:$0xff]  ;;  %v10281_v44 = vld [vmem:[%s15187_s9 + $0x8] sm:$0xff]   ;;  %v10284_v49 = vld [vmem:[%s15187_s9 + $0x58] sm:$0xff]  }
 0x431   : > { %6475 = vst [vmem:[#allocation2 + $0xb0] sm:$0xff] %v13238_v47  ;;  %9951 = vmatprep.subr.bf16.mxu0 %v10280_v63  ;;  %v10282_v28 = vld [vmem:[%s15187_s9 + $0x50] sm:$0xff]   ;;  %v10285_v22 = vld [vmem:[%s15187_s9 + $0x18] sm:$0xff]   ;;  %vm15669_vm0 = vmmov %vm15666_vm9 }
 0x432   : > { %9910 = vmatpush3.bf16.msra.mxu1 %v12970_v48  ;;  %v10270_v48 = vld [vmem:[%s15662_s7 + $0x10] sm:$0xff]   ;;  %vm15670_vm4 = vmmov %vm15669_vm0  ;;  %s683_s7 = scalar_lea.vmem %s15200_s22, %s9858_s5 }
 0x433   : > { %9911 = vmatprep.subr.bf16.mxu1 %v5291_v24  ;;  %v10283_v4 = vld [vmem:[%s15187_s9 + $0x10] sm:$0xff]   ;;  %v10286_v24 = vld [vmem:[%s15187_s9 + $0x60] sm:$0xff]   ;;  %vm15671_vm7 = vmmov %vm15669_vm0 }
 0x434   : > { %9952 = vmatpush3.bf16.msra.mxu0 %v10281_v44  ;;  %vm15673_vm11 = vmmov %vm15669_vm0 }
 0x435   : > { %9953 = vmatprep.subr.bf16.mxu0 %v10282_v28 }
 0x436   : > { %9912 = vmatpush3.bf16.msra.mxu1 %v12997_v43  ;;  %v10261_v43 = vld [vmem:[%s15197_s19 + $0x10] ss:$8 sps:$4 sm:$0xff]  }
 0x437   : > { %10107 = vmatprep.subr.bf16.mxu1 %v10268_v19 }
 0x438   : > { %9954 = vmatpush3.bf16.msra.mxu0 %v10283_v4 }
 0x439   : > { %5365 = vmatmul.mubr.bf16.vlgmr.msra.gmra.mrb[32].mxu1 %v10256_v37  ;;  %9955 = vmatprep.subr.bf16.mxu0 %v10284_v49  ;;  %v10288_v37 = vld [vmem:[%s15187_s9 + $0x68] sm:$0xff]  }
 0x43a   : > { %5372 = vmatprep.mubr.bf16.mxu1 %v10259_v40  ;;  %10108 = vmatpush3.bf16.msra.mxu1 %v10268_v19  ;;  %v10287_v19 = vld [vmem:[%s15187_s9 + $0x20] sm:$0xff]   ;;  %v10289_v40 = vld [vmem:[%s15187_s9 + $0x28] sm:$0xff]  }
 0x43b   : > { %10109 = vmatprep.subr.bf16.mxu1 %v10269_v10 }
 0x43c   : > { %9956 = vmatpush3.bf16.msra.mxu0 %v10285_v22 }
 0x43d   : > { %9957 = vmatprep.subr.bf16.mxu0 %v10286_v24 }
 0x43e   : > { %10110 = vmatpush3.bf16.msra.mxu1 %v10269_v10  ;;  %v13392_v10 = vld [vmem:[%s15663_s8] ss:$0 sm:$0xff] }
 0x43f   : > { %10111 = vmatprep.subr.bf16.mxu1 %v10270_v48 }
 0x440   : > { %9958 = vmatpush3.bf16.msra.mxu0 %v10287_v19 }
 0x441   : > { %5373 = vmatmul.mubr.bf16.gmra.mrb[36].mxu1 %v10261_v43  ;;  %9959 = vmatprep.subr.bf16.mxu0 %v10288_v37 }
 0x442   : > { %5380 = vmatprep.mubr.bf16.mxu1 %v10262_v34  ;;  %10112 = vmatpush3.bf16.msra.mxu1 %v10270_v48 }
 0x443   : > { %10113 = vmatprep.subr.bf16.mxu1 %v10271_v7 }
 0x444   : > { %9960 = vmatpush3.bf16.msra.mxu0 %v10289_v40 }
 0x446   : > { %10114 = vmatpush3.bf16.msra.mxu1 %v10271_v7 }
 0x447   : > { %10115 = vmatprep.subr.bf16.mxu1 %v10272_v21 }
 0x449   : > { %5381 = vmatmul.mubr.bf16.gmra.mrb[40].mxu1 %v10264_v42 }
 0x44a   : > { %5388 = vmatprep.mubr.bf16.mxu1 %v10265_v38  ;;  %10116 = vmatpush3.bf16.msra.mxu1 %v10272_v21 }
 0x44b   : > { %10117 = vmatprep.subr.bf16.mxu1 %v10273_v17 }
 0x44e   : > { %10118 = vmatpush3.bf16.msra.mxu1 %v10273_v17 }
 0x44f   : > { %10119 = vmatprep.subr.bf16.mxu1 %v10274_v57 }
 0x451   : > { %5389 = vmatmul.mubr.bf16.gmra.mrb[44].mxu1 %v10267_v16 }
 0x452   : > { %10120 = vmatpush3.bf16.msra.mxu1 %v10274_v57 }
 0x453   : > { %10121 = vmatprep.subr.bf16.mxu1 %v10275_v62 }
 0x456   : > { %10122 = vmatpush3.bf16.msra.mxu1 %v10275_v62  ;;  %v15664_v62 = vld [vmem:[#allocation4_spill] sm:$0xff] }
 0x457   : > { %10131 = vmatprep.subr.bf16.mxu1 %v10276_v32 }
 0x50c   : > { %v9913_v2 = vpop.f32.mrb[32].mxu1 }
 0x50d   : > { %v9914_v46 = vpop.f32.mrb[33].mxu1 }
 0x50e   : > { %v9915_v52 = vadd.f32 %v9914_v46, %v9913_v2  ;;  %v9916_v56 = vpop.f32.mrb[34].mxu1  ;;  %v13399_v2 = vand.u32 7, %v15664_v62  ;;  %v13402_v46 = vand.u32 7, %v15520_v3 }
 0x50f   : > { %v9917_v13 = vpop.f32.mrb[35].mxu1 }
 0x510   : > { %v9918_v8 = vadd.f32 %v9917_v13, %v9916_v56  ;;  %v13408_v13 = vand.u32 7, %v15535_v35  ;;  %v13421_v35 = vadd.s32 1, %v13399_v2 }
 0x512   : > { %v5413_v33 = vpack.c.bf16 %v9918_v8, %v9915_v52  ;;  %v15665_v52 = vld [vmem:[#allocation6_spill] sm:$0xff]  ;;  %vm5734_vm13 = vcmp.lt.s32.totalorder %v13421_v35, 8 }
 0x513   : > { %v13405_v56 = vand.u32 7, %v15665_v52 }
 0x514   : > { %v9919_v5 = vpop.f32.mrb[36].mxu1  ;;  %10123 = vmatprep.mubr.bf16.mxu1 %v5413_v33 }
 0x515   : > { %v9920_v36 = vpop.f32.mrb[37].mxu1 }
 0x516   : > { %v9921_v39 = vadd.f32 %v9920_v36, %v9919_v5  ;;  %v9922_v6 = vpop.f32.mrb[38].mxu1  ;;  %v13413_v5 = vand.u32 7, %v15526_v14  ;;  %v15668_v36 = vld [vmem:[#allocation11_spill] sm:$0xff]  ;;  %v13429_v14 = vadd.s32 1, %v13405_v56 }
 0x517   : > { %v9923_v12 = vpop.f32.mrb[39].mxu1 }
 0x518   : > { %v9924_v23 = vadd.f32 %v9923_v12, %v9922_v6 }
 0x51a   : > { %v5414_v1 = vpack.c.bf16 %v9924_v23, %v9921_v39  ;;  %v13416_v39 = vand.u32 7, %v15668_v36  ;;  %v13424_v23 = vadd.s32 1, %v13402_v46 }
 0x51c   : > { %10124 = vmatmul.mubr.bf16.vlgmr.msra.gmra.mrb[48].mxu1 %v5414_v1  ;;  %v9925_v25 = vpop.f32.mrb[40].mxu1  ;;  %v5709_v1 = vld [vmem:[#allocation2 + $0x20] sm:$0xfe]  ;;  %vm15342_vm6 = vcmp.lt.s32.totalorder %v13424_v23, 8 }
 0x51d   : > { %v9926_v51 = vpop.f32.mrb[41].mxu1  ;;  %10132 = vmatpush3.bf16.msra.mxu1 %v10276_v32 }
 0x51e   : > { %v9927_v30 = vadd.f32 %v9926_v51, %v9925_v25  ;;  %v9928_v50 = vpop.f32.mrb[42].mxu1  ;;  %10133 = vmatprep.subr.bf16.mxu1 %v10277_v11  ;;  %v13426_v25 = vld [vmem:[#allocation2 + $0x20] sm:$0x80]  ;;  %v13432_v51 = vadd.s32 1, %v13408_v13 }
 0x51f   : > { %v9929_v20 = vpop.f32.mrb[43].mxu1 }
 0x520   : > { %v9930_v31 = vadd.f32 %v9929_v20, %v9928_v50  ;;  %v15672_v50 = vld [vmem:[#allocation13_spill] sm:$0xff] }
 0x521   : > { %10134 = vmatpush3.bf16.msra.mxu1 %v10277_v11  ;;  %v13439_v20 = vand.u32 7, %v15672_v50 }
 0x522   : > { %v5415_v29 = vpack.c.bf16 %v9930_v31, %v9927_v30  ;;  %10143 = vmatprep.subr.bf16.mxu1 %v13238_v47  ;;  %v13436_v30 = vadd.s32 1, %v13416_v39  ;;  %v13443_v31 = vadd.s32 4294967295, %v13399_v2 }
 0x524   : > { %v9931_v55 = vpop.f32.mrb[44].mxu1  ;;  %10127 = vmatprep.mubr.bf16.mxu1 %v5415_v29  ;;  %v13446_v29 = vadd.s32 4294967295, %v13402_v46  ;;  %vm5586_vm10 = vcmp.ge.s32.totalorder %v13443_v31, 0 }
 0x525   : > { %v9932_v26 = vpop.f32.mrb[45].mxu1 }
 0x526   : > { %v9933_v53 = vadd.f32 %v9932_v26, %v9931_v55  ;;  %v9934_v45 = vpop.f32.mrb[46].mxu1  ;;  %v13449_v55 = vand.u32 7, %v15537_v61  ;;  %v5775_v26 = vrot.slane %v5709_v1, 1  ;;  %vm5587_vm15 = vcmp.ge.s32.totalorder %v13446_v29, 0 }
 0x527   : > { %v9935_v60 = vpop.f32.mrb[47].mxu1 }
 0x528   : > { %v9936_v0 = vadd.f32 %v9935_v60, %v9934_v45  ;;  %v13453_v45 = vadd.s32 1, %v13413_v5 }
 0x52a   : > { %v5416_v9 = vpack.c.bf16 %v9936_v0, %v9933_v53  ;;  %v5851_v53 = vrot.slane %v13426_v25, 7  ;;  %v13460_v0 = vadd.s32 4294967295, %v13405_v56  ;;  %v6126_v25 = vrot.slane %v13350_v59, 1 }
 0x52c   : > { %10128 = vmatmul.mubr.bf16.gmra.mrb[52].mxu1 %v5416_v9  ;;  %v13463_v9 = vadd.s32 4294967295, %v13413_v5  ;;  %vm5588_vm8 = vcmp.ge.s32.totalorder %v13460_v0, 0 }
 0x52e   : > { %vm5589_vm5 = vcmp.ge.s32.totalorder %v13463_v9, 0 }
 0x5ef   : > { %v10125_v48 = vpop.f32.mrb[48].mxu1 }
 0x5f0   : > { %v5515_v43 = vadd.f32 %v10125_v48, %v13392_v10  ;;  %v5506_v34 = vpop.f32.mrb[49].mxu1 }
 0x5f1   : > { %v5507_v7 = vadd.f32 %v13392_v10, %v5506_v34  ;;  %v10126_v21 = vpop.f32.mrb[50].mxu1 }
 0x5f2   : > { %v5539_v42 = vmax.f32 %v5515_v43, 0.0  ;;  %v5518_v38 = vadd.f32 %v10126_v21, %v13392_v10  ;;  %v5509_v16 = vpop.f32.mrb[51].mxu1  ;;  %v10290_v21 = vld [vmem:[%s15187_s9 + $0x70] sm:$0xff]  }
 0x5f3   : > { %v5537_v17 = vmax.f32 %v5507_v7, 0.0  ;;  %v5510_v57 = vadd.f32 %v13392_v10, %v5509_v16  ;;  %9961 = vmatprep.subr.bf16.mxu0 %v10290_v21 }
 0x5f4   : > { %5547 = vst.msk [vmem:[#allocation2 + $0x50] sm:$0xff] %vm15666_vm9, %v5539_v42  ;;  %v5540_v8 = vmax.f32 %v5518_v38, 0.0  ;;  %vm5736_vm9 = vcmp.lt.s32.totalorder %v13429_v14, 8 }
 0x5f5   : > { %5545 = vst.msk [vmem:[#allocation2 + $0x30] sm:$0xff] %vm15667_vm14, %v5537_v17  ;;  %v5538_v33 = vmax.f32 %v5510_v57, 0.0  ;;  %vm15676_vm14 = vmmov %vm15675_vm12 }
 0x5f6   : > { %5548 = vst.msk [vmem:[#allocation2 + $0x60] sm:$0xff] %vm15669_vm0, %v5540_v8  ;;  %v5566_v6 = vpack.c.bf16 %v5540_v8, %v5539_v42  ;;  %v10291_v42 = vld [vmem:[%s15187_s9 + $0x30] sm:$0xff]   ;;  %vm15678_vm0 = vmmov %vm15675_vm12 }
 0x5f7   : > { %5546 = vst.msk [vmem:[#allocation2 + $0x40] sm:$0xff] %vm15670_vm4, %v5538_v33  ;;  %v5565_v12 = vpack.c.bf16 %v5538_v33, %v5537_v17  ;;  %vm15679_vm4 = vmmov %vm15678_vm0  ;;  %9962 = vmatpush3.bf16.msra.mxu0 %v10291_v42 }
 0x5f8   : > { %5910 = vst.msk [vmem:[#allocation3 + $0x30] sm:$0xff] %vm15671_vm7, %v5566_v6  ;;  %vm15680_vm7 = vmmov %vm15678_vm0 }
 0x5f9   : > { %5909 = vst.msk [vmem:[#allocation3 + $0x8] sm:$0xff] %vm15673_vm11, %v5565_v12 }
 0x5fb   : > { %v13455_v60 = vld [vmem:[#allocation2 + $0x50] sm:$0xff] }
 0x5fc   : > { %v5677_v61 = vld [vmem:[#allocation2 + $0x30] sm:$0xff]  ;;  %v5934_v11 = vrot.slane %v13455_v60, 1  ;;  %v6009_v19 = vrot.slane %v13455_v60, 7 }
 0x5fd   : > { %v5913_v32 = vld [vmem:[#allocation2 + $0x30] sm:$0xfe]  ;;  %v5684_v18 = vpack.c.bf16 %v5677_v61, %v13238_v47  ;;  %v13467_v44 = vld [vmem:[#allocation2 + $0x60] sm:$0xff]  ;;  %v5776_v28 = vrot.slane %v5677_v61, 1  ;;  %v13473_v37 = vrot.slane %v5677_v61, 7 }
 0x5fe   : > { %v5988_v54 = vld [vmem:[#allocation2 + $0x30] sm:$0x80]  ;;  %v5931_v63 = vrot.slane %v5913_v32, 1  ;;  %v6063_v49 = vld [vmem:[#allocation2 + $0x40] sm:$0xff]  ;;  %v6116_v24 = vrot.slane %v13467_v44, 1 }
 0x5ff   : > { %v6006_v4 = vrot.slane %v5988_v54, 7  ;;  %v6095_v22 = vld [vmem:[#allocation2 + $0x40] sm:$0xfe]  ;;  %v10129_v40 = vpop.f32.mrb[52].mxu1  ;;  %5692 = vrot.lane.b32.xlu1 %v5684_v18, %s15674_s6  ;;  %v6071_v48 = vpack.c.bf16 %v13455_v60, %v6063_v49  ;;  %v5932_v43 = vrot.slane %v6063_v49, 1  ;;  %v5777_v7 = vsel %vm15675_vm12, %v5775_v26, %v5776_v28  ;;  %vm15681_vm12 = vmmov %vm15678_vm0 }
 0x600   : > { %v6113_v34 = vrot.slane %v6095_v22, 1  ;;  %v5531_v38 = vadd.f32 %v10129_v40, %v13392_v10  ;;  %v5522_v16 = vpop.f32.mrb[53].mxu1  ;;  %v13491_v17 = vsel %vm15676_vm14, %v5934_v11, %v6116_v24  ;;  %v5800_v57 = vsel %vm5734_vm13, %v5777_v7, 0.0  ;;  %v10293_v22 = vld [vmem:[%s15187_s9 + $0x38] sm:$0xff]   ;;  %vm15682_vm14 = vmmov %vm15673_vm11 }
 0x601   : > { %v6007_v52 = vrot.slane %v6063_v49, 7  ;;  %v5523_v8 = vadd.f32 %v13392_v10, %v5522_v16  ;;  %v10130_v33 = vpop.f32.mrb[54].mxu1  ;;  %6079 = vrot.lane.b32.xlu0 %v6071_v48, %s15677_s25  ;;  %v5933_v36 = vsel %vm15678_vm0, %v5931_v63, %v5932_v43  ;;  %v5935_v6 = vsel %vm15679_vm4, %v5932_v43, %v5934_v11  ;;  %v10292_v49 = vld [vmem:[%s15187_s9 + $0x78] sm:$0xff]   ;;  %vm15683_vm0 = vmmov %vm15673_vm11 }
 0x602   : > { %v6115_v12 = vsel %vm15680_vm7, %v6113_v34, %v5934_v11  ;;  %v5543_v1 = vmax.f32 %v5531_v38, 0.0  ;;  %v5534_v50 = vadd.f32 %v10130_v33, %v13392_v10  ;;  %v5525_v26 = vpop.f32.mrb[55].mxu1  ;;  %v5956_v61 = vsel %vm5734_vm13, %v5933_v36, 0.0  ;;  %9963 = vmatprep.subr.bf16.mxu0 %v10292_v49  ;;  %vm15684_vm4 = vmmov %vm15683_vm0 }
 0x603   : > { %v5957_v32 = vsel %vm15342_vm6, %v5935_v6, 0.0  ;;  %v5541_v54 = vmax.f32 %v5523_v8, 0.0  ;;  %v5526_v18 = vadd.f32 %v13392_v10, %v5525_v26  ;;  %5694 = vrot.lane.b32.xlu1 %v6071_v48, %s15674_s6  ;;  %v6138_v11 = vsel %vm5734_vm13, %v6115_v12, 0.0  ;;  %vm15685_vm7 = vmmov %vm15683_vm0  ;;  %9964 = vmatpush3.bf16.msra.mxu0 %v10293_v22 }
 0x604   : > { %v5964_v63 = vpack.c.bf16 %v5957_v32, %v5956_v61  ;;  %5551 = vst.msk [vmem:[#allocation2 + $0x90] sm:$0xff] %vm15673_vm11, %v5543_v1  ;;  %v5544_v40 = vmax.f32 %v5534_v50, 0.0  ;;  %v6139_v10 = vsel %vm15342_vm6, %v13491_v17, 0.0  ;;  %v5779_v48 = vsel %vm15681_vm12, %v5776_v28, %v5932_v43  ;;  %vm15686_vm11 = vmmov %vm15683_vm0  ;;  %10155 = vmatprep.subr.bf16.mxu0 %v13238_v47 }
 0x605   : > { %v6008_v34 = vsel %vm15343_vm3, %v6006_v4, %v6007_v52  ;;  %5549 = vst.msk [vmem:[#allocation2 + $0x70] sm:$0xff] %vm15682_vm14, %v5541_v54  ;;  %v5542_v7 = vmax.f32 %v5526_v18, 0.0  ;;  %v6146_v21 = vpack.c.bf16 %v6139_v10, %v6138_v11  ;;  %v5801_v42 = vsel %vm15342_vm6, %v5779_v48, 0.0  ;;  %vm15688_vm14 = vmmov %vm15683_vm0  ;;  %v5569_v48 = vld [vmem:[#allocation2 + $0x10] sm:$0x80] }
 0x606   : > { %5972 = vrot.lane.b32.xlu0 %v5964_v63, %s15674_s6  ;;  %v6010_v38 = vsel %vm15343_vm3, %v6007_v52, %v6009_v19  ;;  %5552 = vst.msk [vmem:[#allocation2 + $0xa0] sm:$0xff] %vm15683_vm0, %v5544_v40  ;;  %v5568_v16 = vpack.c.bf16 %v5544_v40, %v5543_v1  ;;  %v5808_v28 = vpack.c.bf16 %v5801_v42, %v5800_v57  ;;  %v6031_v4 = vsel %vm5586_vm10, %v6008_v34, 0.0  ;;  %vm15690_vm6 = vmmov %vm15688_vm14 }
 0x607   : > { %v6032_v43 = vsel %vm5587_vm15, %v6010_v38, 0.0  ;;  %5550 = vst.msk [vmem:[#allocation2 + $0x80] sm:$0xff] %vm15684_vm4, %v5542_v7  ;;  %v5567_v8 = vpack.c.bf16 %v5542_v7, %v5541_v54  ;;  %v5853_v36 = vsel %vm15343_vm3, %v5851_v53, %v13473_v37  ;;  %v5855_v57 = vsel %vm15343_vm3, %v13473_v37, %v6007_v52 }
 0x608   : > { %6150 = vst.msk [vmem:[#allocation3 + $0x10] sm:$0xff] %vm15685_vm7, %v6146_v21  ;;  %v6039_v33 = vpack.c.bf16 %v6032_v43, %v6031_v4  ;;  %v13542_v12 = vadd.s32 1, %v13439_v20  ;;  %v13545_v1 = vadd.s32 1, %v13449_v55  ;;  %5816 = vrot.lane.b32.xlu1 %v5808_v28, %s15687_s0  ;;  %v5877_v50 = vsel %vm5587_vm15, %v5855_v57, 0.0 }
 0x609   : > { %5912 = vst.msk [vmem:[#allocation3 + $0x80] sm:$0xff] %vm15686_vm11, %v5568_v16  ;;  %vm5737_vm12 = vcmp.lt.s32.totalorder %v13453_v45, 8  ;;  %v5876_v53 = vsel %vm5586_vm10, %v5853_v36, 0.0  ;;  %v5858_v52 = vrot.slane %v13467_v44, 7  ;;  %v6128_v26 = vrot.slane %v12783_v27, 1 }
 0x60a   : > { %5911 = vst.msk [vmem:[#allocation3 + $0x58] sm:$0xff] %vm15688_vm14, %v5567_v8  ;;  %6047 = vrot.lane.b32.xlu0 %v6039_v33, %s15687_s0  ;;  %v5884_v61 = vpack.c.bf16 %v5877_v50, %v5876_v53  ;;  %v5663_v32 = vsel %vm5589_vm5, %v6010_v38, 0.0  ;;  %v5662_v54 = vsel %vm5588_vm8, %v5855_v57, 0.0  ;;  %v5802_v63 = vsel %vm5736_vm9, %v5935_v6, 0.0 }
 0x60b   : > { %v13564_v18 = vld [vmem:[#allocation2 + $0x90] sm:$0xff]  ;;  %v5803_v11 = vsel %vm5737_vm12, %v13491_v17, 0.0  ;;  %v13574_v27 = vsel %vm15343_vm3, %v6009_v19, %v5858_v52  ;;  %v5669_v49 = vpack.c.bf16 %v5663_v32, %v5662_v54  ;;  %vm5739_vm0 = vcmp.lt.s32.totalorder %v13432_v51, 8 }
 0x60c   : > { %vm5738_vm4 = vcmp.lt.s32.totalorder %v13436_v30, 8  ;;  %vm5740_vm7 = vcmp.lt.s32.totalorder %v13542_v12, 8  ;;  %vm5741_vm11 = vcmp.lt.s32.totalorder %v13545_v1, 8  ;;  %5892 = vrot.lane.b32.xlu1 %v5884_v61, %s15677_s25  ;;  %v13581_v6 = vld [vmem:[#allocation2 + $0x70] sm:$0xff]  ;;  %v5878_v40 = vsel %vm5588_vm8, %v6010_v38, 0.0 }
 0x60d   : > { %v13583_v22 = vld [vmem:[#allocation2 + $0xa0] sm:$0xff]  ;;  %v6072_v60 = vpack.c.bf16 %v13581_v6, %v13467_v44  ;;  %v6118_v19 = vrot.slane %v13581_v6, 1  ;;  %v5879_v10 = vsel %vm5589_vm5, %v13574_v27, 0.0  ;;  %5673 = vst.msk [vmem:[#allocation3 + $0x28] sm:$0xff] %vm15688_vm14, %v5669_v49  ;;  %v6129_v34 = vsel %vm15689_vm2, %v6126_v25, %v6128_v26  ;;  %vm15691_vm14 = vmmov %vm15689_vm2 }
 0x60e   : > { %v13598_v7 = vrot.slane %v13583_v22, 1  ;;  %v5809_v42 = vpack.c.bf16 %v5803_v11, %v5802_v63  ;;  %v6099_v16 = vld [vmem:[#allocation2 + $0x80] sm:$0xff]  ;;  %v13601_v28 = vrot.slane %v13564_v18, 1  ;;  %v6013_v43 = vrot.slane %v13581_v6, 7 }
 0x60f   : > { %v6156_v21 = vld [vmem:[#allocation3 + $0x10] sm:$0xff]  ;;  %6081 = vrot.lane.b32.xlu0 %v6072_v60, %s15677_s25  ;;  %v13608_v38 = vsel %vm15691_vm14, %v6116_v24, %v6118_v19  ;;  %v6120_v4 = vrot.slane %v6099_v16, 1  ;;  %v13612_v8 = vadd.s32 4294967295, %v13416_v39  ;;  %v5885_v33 = vpack.c.bf16 %v5879_v10, %v5878_v40  ;;  %vm15693_vm14 = vmmov %vm15689_vm2 }
 0x610   : > { %10135 = vmatprep.mubr.msk.bf16.mxu1 %vm15690_vm6, %v6156_v21  ;;  %5818 = vrot.lane.b32.xlu1 %v5809_v42, %s15687_s0  ;;  %v13618_v36 = vsel %vm15689_vm2, %v13601_v28, %v13598_v7  ;;  %v5635_v57 = vrot.slane %v5569_v48, 7  ;;  %v5636_v44 = vrot.slane %v13238_v47, 7  ;;  %vm15692_vm6 = vmmov %vm15689_vm2  ;;  %v6140_v53 = vsel %vm5736_vm9, %v13608_v38, 0.0 }
 0x611   : > { %v6121_v24 = vsel %vm15692_vm6, %v6118_v19, %v6120_v4  ;;  %v13624_v50 = vsel %vm15693_vm14, %v6120_v4, %v13601_v28  ;;  %v6073_v26 = vpack.c.bf16 %v13564_v18, %v6099_v16  ;;  %v5959_v47 = vsel %vm5737_vm12, %v13608_v38, 0.0 }
 0x612   : > { %v6141_v61 = vsel %vm5737_vm12, %v6121_v24, 0.0  ;;  %v6142_v32 = vsel %vm5738_vm4, %v13624_v50, 0.0  ;;  %v6143_v54 = vsel %vm5739_vm0, %v13618_v36, 0.0  ;;  %v13643_v11 = vsel %vm15343_vm3, %v5858_v52, %v6013_v43 }
 0x613   : > { %v6147_v63 = vpack.c.bf16 %v6141_v61, %v6140_v53  ;;  %6083 = vrot.lane.b32.xlu0 %v6073_v26, %s15677_s25  ;;  %v6148_v49 = vpack.c.bf16 %v6143_v54, %v6142_v32  ;;  %v5583_v6 = vadd.s32 4294967295, %v13408_v13  ;;  %v6145_v19 = vsel %vm5741_vm11, %v6129_v34, 0.0  ;;  %v5717_v53 = vld [vmem:[#allocation2 + $0xa0] sm:$0x1]  ;;  %v5577_v61 = vld [vmem:[#allocation2 + $0x90] sm:$0x7f] }
 0x614   : > { %5894 = vrot.lane.b32.xlu1 %v5885_v33, %s15677_s25  ;;  %v5958_v40 = vsel %vm5736_vm9, %v13491_v17, 0.0  ;;  %vm15694_vm2 = vcmask 261120   ;;  %v6127_v52 = vsel %vm15693_vm14, %v13598_v7, %v6126_v25  ;;  %v5637_v48 = vsel %vm15343_vm3, %v5635_v57, %v5636_v44 }
 0x615   : > { %6151 = vst.msk [vmem:[#allocation3 + $0x38] sm:$0xff] %vm15694_vm2, %v6147_v63  ;;  %v5965_v10 = vpack.c.bf16 %v5959_v47, %v5958_v40  ;;  %vm15695_vm6 = vmmov %vm15694_vm2  ;;  %v5639_v34 = vsel %vm15343_vm3, %v5636_v44, %v13473_v37  ;;  %v6034_v21 = vsel %vm5589_vm5, %v13643_v11, 0.0  ;;  %v6015_v17 = vrot.slane %v6099_v16, 7  ;;  %v5841_v40 = vld [vmem:[#allocation2 + $0xa0] sm:$0x7f] }
 0x616   : > { %6152 = vst.msk [vmem:[#allocation3 + $0x60] sm:$0xff] %vm15695_vm6, %v6148_v49  ;;  %v6144_v42 = vsel %vm5740_vm7, %v6127_v52, 0.0  ;;  %v13667_v4 = vadd.s32 4294967295, %v13439_v20  ;;  %vm5590_vm2 = vcmp.ge.s32.totalorder %v13612_v8, 0  ;;  %vm5591_vm6 = vcmp.ge.s32.totalorder %v5583_v6, 0 }
 0x617   : > { %5974 = vrot.lane.b32.xlu0 %v5965_v10, %s15674_s6  ;;  %v6149_v59 = vpack.c.bf16 %v6145_v19, %v6144_v42  ;;  %v13672_v25 = vadd.s32 4294967295, %v13449_v55  ;;  %v6033_v9 = vsel %vm5588_vm8, %v13574_v27, 0.0  ;;  %v5946_v37 = vrot.slane %v13352_v58, 1 }
 0x618   : > { %5696 = vrot.lane.b32.xlu1 %v6072_v60, %s15674_s6  ;;  %v5660_v16 = vsel %vm5586_vm10, %v5637_v48, 0.0  ;;  %v5661_v33 = vsel %vm5587_vm15, %v5639_v34, 0.0  ;;  %v6040_v57 = vpack.c.bf16 %v6034_v21, %v6033_v9  ;;  %v6017_v44 = vrot.slane %v13564_v18, 7 }
 0x619   : > { %vm15696_vm5 = vcmask 261120   ;;  %v6021_v60 = vrot.slane %v13354_v41, 7  ;;  %v5960_v0 = vsel %vm5738_vm4, %v6121_v24, 0.0  ;;  %v5961_v58 = vsel %vm5739_vm0, %v13624_v50, 0.0 }
 0x61a   : > { %6153 = vst.msk [vmem:[#allocation3 + $0x88] sm:$0xff] %vm15696_vm5, %v6149_v59  ;;  %v6016_v31 = vsel %vm15343_vm3, %v6013_v43, %v6015_v17  ;;  %vm5592_vm10 = vcmp.ge.s32.totalorder %v13667_v4, 0  ;;  %v5805_v29 = vsel %vm5739_vm0, %v6121_v24, 0.0  ;;  %v6018_v18 = vsel %vm15343_vm3, %v6015_v17, %v6017_v44  ;;  %vm15697_vm8 = vmmov %vm15696_vm5 }
 0x61b   : > { %6049 = vrot.lane.b32.xlu0 %v6040_v57, %s15687_s0  ;;  %vm5593_vm15 = vcmp.ge.s32.totalorder %v13672_v25, 0  ;;  %v5668_v41 = vpack.c.bf16 %v5661_v33, %v5660_v16  ;;  %v5790_v54 = vrot.slane %v5717_v53, 1  ;;  %v5664_v43 = vsel %vm5590_vm2, %v13574_v27, 0.0  ;;  %vm15698_vm14 = vmmov %vm15696_vm5 }
 0x61c   : > { %5698 = vrot.lane.b32.xlu1 %v6073_v26, %s15674_s6  ;;  %v6159_v32 = vld [vmem:[#allocation3 + $0x38] sm:$0xff]  ;;  %v5665_v63 = vsel %vm5591_vm6, %v13643_v11, 0.0  ;;  %v5650_v49 = vrot.slane %v5577_v61, 7  ;;  %v5966_v24 = vpack.c.bf16 %v5961_v58, %v5960_v0  ;;  %v5804_v19 = vsel %vm5738_vm4, %v13608_v38, 0.0 }
 0x61d   : > { %v6162_v47 = vld [vmem:[#allocation3 + $0x60] sm:$0xff]  ;;  %10136 = vmatmul.mubr.msk.bf16.vlgmr.msra.gmra.mrb[56].mxu1 %vm15697_vm8, %v6159_v32  ;;  %5672 = vst.msk [vmem:[#allocation3] sm:$0xff] %vm15698_vm14, %v5668_v41  ;;  %v5670_v26 = vpack.c.bf16 %v5665_v63, %v5664_v43  ;;  %v5666_v10 = vsel %vm5592_vm10, %v6016_v31, 0.0  ;;  %v5810_v27 = vpack.c.bf16 %v5805_v29, %v5804_v19  ;;  %v6035_v52 = vsel %vm5590_vm2, %v6016_v31, 0.0  ;;  %vm15700_vm14 = vmmov %vm15696_vm5 }
 0x61e   : > { %10139 = vmatprep.mubr.msk.bf16.mxu1 %vm15696_vm5, %v6162_v47  ;;  %v6036_v48 = vsel %vm5591_vm6, %v6018_v18, 0.0  ;;  %v5651_v34 = vsel %vm15343_vm3, %v6015_v17, %v5650_v49  ;;  %v5881_v38 = vsel %vm5591_vm6, %v6016_v31, 0.0  ;;  %vm15699_vm8 = vcmask 1046528   ;;  %vm15702_vm6 = vmmov %vm15700_vm14 }
 0x61f   : > { %5976 = vrot.lane.b32.xlu0 %v5966_v24, %s15674_s6  ;;  %v5947_v21 = vsel %vm15699_vm8, %v13598_v7, %v5946_v37  ;;  %v6019_v42 = vrot.slane %v13583_v22, 7  ;;  %5674 = vst.msk [vmem:[#allocation3 + $0x50] sm:$0xff] %vm15700_vm14, %v5670_v26  ;;  %v5667_v59 = vsel %vm5593_vm15, %v5651_v34, 0.0  ;;  %vm15701_vm5 = vmmov %vm15699_vm8  ;;  %v5866_v17 = vrot.slane %v5841_v40, 7 }
 0x620   : > { %5820 = vrot.lane.b32.xlu1 %v5810_v27, %s15687_s0  ;;  %v5791_v9 = vsel %vm15701_vm5, %v13601_v28, %v5790_v54  ;;  %v5671_v16 = vpack.c.bf16 %v5667_v59, %v5666_v10  ;;  %v6041_v33 = vpack.c.bf16 %v6036_v48, %v6035_v52  ;;  %v5880_v6 = vsel %vm5590_vm2, %v13643_v11, 0.0  ;;  %vm15703_vm2 = vmmov %vm15702_vm6 }
 0x621   : > { %v5886_v7 = vpack.c.bf16 %v5881_v38, %v5880_v6  ;;  %v5962_v37 = vsel %vm5740_vm7, %v13618_v36, 0.0  ;;  %v5963_v57 = vsel %vm5741_vm11, %v5947_v21, 0.0  ;;  %v5806_v28 = vsel %vm5740_vm7, %v13624_v50, 0.0  ;;  %v6165_v36 = vld [vmem:[#allocation3 + $0x88] sm:$0xff] }
 0x622   : > { %5675 = vst.msk [vmem:[#allocation3 + $0x78] sm:$0xff] %vm15702_vm6, %v5671_v16  ;;  %v5807_v8 = vsel %vm5741_vm11, %v5791_v9, 0.0  ;;  %v6020_v11 = vsel %vm15343_vm3, %v6017_v44, %v6019_v42  ;;  %v6022_v53 = vsel %vm15343_vm3, %v6019_v42, %v6021_v60  ;;  %v5867_v61 = vsel %vm15343_vm3, %v6017_v44, %v5866_v17 }
 0x623   : > { %6051 = vrot.lane.b32.xlu0 %v6041_v33, %s15687_s0  ;;  %v5967_v0 = vpack.c.bf16 %v5963_v57, %v5962_v37  ;;  %v5811_v58 = vpack.c.bf16 %v5807_v8, %v5806_v28  ;;  %v6037_v31 = vsel %vm5592_vm10, %v6020_v11, 0.0  ;;  %v6038_v50 = vsel %vm5593_vm15, %v6022_v53, 0.0 }
 0x624   : > { %5896 = vrot.lane.b32.xlu1 %v5886_v7, %s15677_s25  ;;  %v5882_v60 = vsel %vm5592_vm10, %v6018_v18, 0.0  ;;  %v5883_v29 = vsel %vm5593_vm15, %v5867_v61, 0.0  ;;  %v6042_v44 = vpack.c.bf16 %v6038_v50, %v6037_v31  ;;  %v6074_v32 = vpack.c.bf16 %v13359_v15, %v13583_v22  ;;  %v13798_v50 = vld [vmem:[#allocation2 + $0x8] sm:$0xff] }
 0x625   : > { %10140 = vmatmul.mubr.msk.bf16.gmra.mrb[60].mxu1 %vm15703_vm2, %v6165_v36  ;;  %v5887_v41 = vpack.c.bf16 %v5883_v29, %v5882_v60  ;;  %vm5704_vm8 = vcmask 523520   ;;  %vm5828_vm10 = vcmask 785920   ;;  %vm5904_vm15 = vcmask 1048320   ;;  %v10295_v60 = vld [vmem:[%s15189_s11] sm:$0xff]   ;;  %v10296_v29 = vld [vmem:[%s15189_s11 + $0x8] sm:$0xff]  }
 0x626   : > { %vm10667_vm14 = vmmov 0   ;;  %vm15704_vm6 = vcmask 1046528   ;;  %vm15708_vm3 = vcmask 523264  }
 0x627   : > { %5978 = vrot.lane.b32.xlu0 %v5967_v0, %s15674_s6  ;;  %10151 = vmatprep.mubr.msk.bf16.mxu1 %vm10667_vm14, %v13798_v50  ;;  %vm15705_vm2 = vmmov %vm15704_vm6 }
 0x628   : > { %5822 = vrot.lane.b32.xlu1 %v5811_v58, %s15687_s0 }
 0x62b   : > { %6053 = vrot.lane.b32.xlu0 %v6042_v44, %s15687_s0  ;;  %v10297_v44 = vld [vmem:[%s15189_s11 + $0x10] sm:$0xff]  }
 0x62c   : > { %5898 = vrot.lane.b32.xlu1 %v5887_v41, %s15677_s25  ;;  %v10298_v41 = vld [vmem:[%s15189_s11 + $0x18] sm:$0xff]  }
 0x62f   : > { %6085 = vrot.lane.b32.xlu0 %v6074_v32, %s15677_s25  ;;  %v10299_v32 = vld [vmem:[%s15189_s11 + $0x20] sm:$0xff]  }
 0x671   : > { %v5693_v47 = vpop.permute.xlu1 %5692 }
 0x672   : > { %5705 = vst.msk [vmem:[#allocation3] sm:$0xff] %vm5704_vm8, %v5693_v47  ;;  %v10300_v47 = vld [vmem:[%s15189_s11 + $0x28] sm:$0xff]  }
 0x673   : > { %v6080_v4 = vpop.permute.xlu0 %6079 }
 0x675   : > { %v5695_v25 = vpop.permute.xlu1 %5694 }
 0x676   : > { %5706 = vst.msk [vmem:[#allocation3 + $0x28] sm:$0xff] %vm5704_vm8, %v5695_v25 }
 0x678   : > { %v5973_v18 = vpop.permute.xlu0 %5972 }
 0x679   : > { %5984 = vst.msk [vmem:[#allocation3 + $0x8] sm:$0xff] %vm5704_vm8, %v5973_v18  ;;  %v13833_v18 = vld [vmem:[%s15188_s10] ss:$0 sm:$0xff] }
 0x67a   : > { %v5817_v54 = vpop.permute.xlu1 %5816 }
 0x67b   : > { %5829 = vst.msk [vmem:[#allocation3] sm:$0xff] %vm5828_vm10, %v5817_v54 }
 0x67c   : > { %v6048_v43 = vpop.permute.xlu0 %6047 }
 0x67d   : > { %6059 = vst.msk [vmem:[#allocation3 + $0x8] sm:$0xff] %vm5828_vm10, %v6048_v43 }
 0x67e   : > { %6091 = vst.msk [vmem:[#allocation3 + $0x8] sm:$0xff] %vm5904_vm15, %v6080_v4  ;;  %v5893_v15 = vpop.permute.xlu1 %5892  ;;  %v10301_v4 = vld [vmem:[%s15189_s11 + $0x30] sm:$0xff]  }
 0x67f   : > { %5905 = vst.msk [vmem:[#allocation3] sm:$0xff] %vm5904_vm15, %v5893_v15 }
 0x681   : > { %v6082_v22 = vpop.permute.xlu0 %6081 }
 0x682   : > { %v5819_v63 = vpop.permute.xlu1 %5818 }
 0x683   : > { %5830 = vst.msk [vmem:[#allocation3 + $0x28] sm:$0xff] %vm5828_vm10, %v5819_v63 }
 0x685   : > { %v6155_v49 = vld [vmem:[#allocation3 + $0x8] sm:$0xff]  ;;  %v6084_v24 = vpop.permute.xlu0 %6083 }
 0x686   : > { %6361 = vmatprep.mubr.bf16.mxu0 %v6155_v49  ;;  %v5895_v19 = vpop.permute.xlu1 %5894  ;;  %v6154_v40 = vld [vmem:[#allocation3] sm:$0xff] }
 0x687   : > { %5906 = vst.msk [vmem:[#allocation3 + $0x28] sm:$0xff] %vm5904_vm15, %v5895_v19  ;;  %6362 = vmatmul.mubr.bf16.vlgmr.msra.gmra.mrb[96].mxu0 %v6154_v40 }
 0x688   : > { %10156 = vmatpush3.bf16.msra.mxu0 %v10295_v60  ;;  %v13859_v60 = vld [vmem:[#allocation2 + $0xb0] sm:$0x3] }
 0x689   : > { %v5975_v26 = vpop.permute.xlu0 %5974  ;;  %10157 = vmatprep.subr.bf16.mxu0 %v13798_v50 }
 0x68a   : > { %5985 = vst.msk [vmem:[#allocation3 + $0x30] sm:$0xff] %vm5704_vm8, %v5975_v26  ;;  %v5697_v10 = vpop.permute.xlu1 %5696 }
 0x68b   : > { %5707 = vst.msk [vmem:[#allocation3 + $0x50] sm:$0xff] %vm5704_vm8, %v5697_v10 }
 0x68c   : > { %10158 = vmatpush3.bf16.msra.mxu0 %v10296_v29 }
 0x68d   : > { %v6050_v27 = vpop.permute.xlu0 %6049  ;;  %10159 = vmatprep.subr.bf16.mxu0 %v13798_v50 }
 0x68e   : > { %6060 = vst.msk [vmem:[#allocation3 + $0x30] sm:$0xff] %vm5828_vm10, %v6050_v27  ;;  %v5699_v52 = vpop.permute.xlu1 %5698  ;;  %v6157_v59 = vld [vmem:[#allocation3 + $0x28] sm:$0xff]  ;;  %v13840_v27 = vadd.s32 2, %v13449_v55 }
 0x68f   : > { %6092 = vst.msk [vmem:[#allocation3 + $0x30] sm:$0xff] %vm5904_vm15, %v6082_v22 }
 0x690   : > { %5708 = vst.msk [vmem:[#allocation3 + $0x78] sm:$0xff] %vm5704_vm8, %v5699_v52  ;;  %10160 = vmatpush3.bf16.msra.mxu0 %v10297_v44  ;;  %v6640_v52 = vld [vmem:[#allocation2 + $0xc0] sm:$0x1]  ;;  %vm6570_vm5 = vcmp.lt.s32.totalorder %v13840_v27, 8 }
 0x691   : > { %v5977_v48 = vpop.permute.xlu0 %5976  ;;  %10161 = vmatprep.subr.bf16.mxu0 %v13798_v50  ;;  %v10294_v27 = vld [vmem:[%s15198_s20] sm:$0xff]  }
 0x692   : > { %5986 = vst.msk [vmem:[#allocation3 + $0x58] sm:$0xff] %vm5704_vm8, %v5977_v48  ;;  %v5821_v34 = vpop.permute.xlu1 %5820  ;;  %v6670_v48 = vld [vmem:[#allocation2 + $0xc0] sm:$0x3] }
 0x693   : > { %5831 = vst.msk [vmem:[#allocation3 + $0x50] sm:$0xff] %vm5828_vm10, %v5821_v34  ;;  %v13845_v34 = vrot.slane %v13798_v50, 1 }
 0x694   : > { %10162 = vmatpush3.bf16.msra.mxu0 %v10298_v41 }
 0x695   : > { %v6052_v38 = vpop.permute.xlu0 %6051  ;;  %10163 = vmatprep.subr.bf16.mxu0 %v13798_v50  ;;  %v6727_v1 = vsel %vm5740_vm7, %v13845_v34, 0.0 }
 0x696   : > { %6061 = vst.msk [vmem:[#allocation3 + $0x58] sm:$0xff] %vm5828_vm10, %v6052_v38  ;;  %v5897_v21 = vpop.permute.xlu1 %5896  ;;  %v6158_v42 = vld [vmem:[#allocation3 + $0x30] sm:$0xff]  ;;  %v6648_v38 = vrot.slane %v6640_v52, 1 }
 0x697   : > { %6093 = vst.msk [vmem:[#allocation3 + $0x58] sm:$0xff] %vm5904_vm15, %v6084_v24  ;;  %5907 = vst.msk [vmem:[#allocation3 + $0x50] sm:$0xff] %vm5904_vm15, %v5897_v21  ;;  %6369 = vmatprep.mubr.bf16.mxu0 %v6158_v42  ;;  %v13848_v21 = vrot.slane %v13798_v50, 2  ;;  %v13851_v42 = vadd.s32 2, %v13399_v2 }
 0x698   : > { %6370 = vmatmul.mubr.bf16.gmra.mrb[100].mxu0 %v6157_v59  ;;  %v13853_v59 = vld [vmem:[#allocation2 + $0xd0] sm:$0x3]  ;;  %v6649_v44 = vsel %vm15704_vm6, %v13845_v34, %v6648_v38  ;;  %vm15707_vm6 = vcmp.lt.s32.totalorder %v13424_v23, 8 }
 0x699   : > { %v5979_v9 = vpop.permute.xlu0 %5978  ;;  %10164 = vmatpush3.bf16.msra.mxu0 %v10299_v32  ;;  %v6745_v2 = vrot.slane %v13853_v59, 2 }
 0x69a   : > { %5987 = vst.msk [vmem:[#allocation3 + $0x80] sm:$0xff] %vm5704_vm8, %v5979_v9  ;;  %v5823_v17 = vpop.permute.xlu1 %5822  ;;  %10165 = vmatprep.subr.bf16.mxu0 %v13798_v50  ;;  %v6677_v9 = vrot.slane %v6670_v48, 2  ;;  %vm6563_vm8 = vcmp.lt.s32.totalorder %v13851_v42, 8 }
 0x69b   : > { %5832 = vst.msk [vmem:[#allocation3 + $0x78] sm:$0xff] %vm5828_vm10, %v5823_v17 }
 0x69d   : > { %v6054_v16 = vpop.permute.xlu0 %6053  ;;  %10166 = vmatpush3.bf16.msra.mxu0 %v10300_v47 }
 0x69e   : > { %6062 = vst.msk [vmem:[#allocation3 + $0x80] sm:$0xff] %vm5828_vm10, %v6054_v16  ;;  %v5899_v33 = vpop.permute.xlu1 %5898  ;;  %v6161_v6 = vld [vmem:[#allocation3 + $0x58] sm:$0xff]  ;;  %v6160_v7 = vld [vmem:[#allocation3 + $0x50] sm:$0xff]  ;;  %10167 = vmatprep.subr.bf16.mxu0 %v13798_v50  ;;  %vm6940_vm10 = vcmask 516096  }
 0x69f   : > { %5908 = vst.msk [vmem:[#allocation3 + $0x78] sm:$0xff] %vm5904_vm15, %v5899_v33  ;;  %6377 = vmatprep.mubr.bf16.mxu0 %v6161_v6 }
 0x6a0   : > { %6378 = vmatmul.mubr.bf16.gmra.mrb[104].mxu0 %v6160_v7 }
 0x6a1   : > { %v6086_v37 = vpop.permute.xlu0 %6085  ;;  %10168 = vmatpush3.bf16.msra.mxu0 %v10301_v4 }
 0x6a2   : > { %6094 = vst.msk [vmem:[#allocation3 + $0x80] sm:$0xff] %vm5904_vm15, %v6086_v37  ;;  %10169 = vmatprep.subr.bf16.mxu0 %v13798_v50 }
 0x6a6   : > { %v6163_v28 = vld [vmem:[#allocation3 + $0x78] sm:$0xff] }
 0x6a9   : > { %v6164_v57 = vld [vmem:[#allocation3 + $0x80] sm:$0xff] }
 0x6aa   : > { %6385 = vmatprep.mubr.bf16.mxu0 %v6164_v57 }
 0x6ab   : > { %6386 = vmatmul.mubr.bf16.gmra.mrb[108].mxu0 %v6163_v28 }
 0x6ac   : > { %10171 = vmatprep.mubr.msk.bf16.mxu0 %vm10667_vm14, %v13798_v50  ;;  %vm15706_vm14 = vmmov %vm15705_vm2 }
 0x6f0   : > { %v13786_v8 = vpop.f32.mrb[56].mxu1 }
 0x6f1   : > { %v6428_v11 = vpop.f32.mrb[57].mxu1 }
 0x6f2   : > { %v13788_v53 = vpop.f32.mrb[58].mxu1 }
 0x6f3   : > { %v6431_v36 = vpop.f32.mrb[59].mxu1 }
 0x6f8   : > { %v13790_v61 = vpop.f32.mrb[60].mxu1 }
 0x6f9   : > { %v13792_v0 = vpop.f32.mrb[61].mxu1 }
 0x6fa   : > { %v13794_v58 = vpop.f32.mrb[62].mxu1 }
 0x6fb   : > { %v13796_v31 = vpop.f32.mrb[63].mxu1 }
 0x75a   : > { %v9965_v25 = vpop.f32.mrb[96].mxu0 }
 0x75b   : > { %v9966_v54 = vpop.f32.mrb[97].mxu0 }
 0x75c   : > { %v9967_v43 = vadd.f32 %v9966_v54, %v9965_v25  ;;  %v9968_v15 = vpop.f32.mrb[98].mxu0  ;;  %v6678_v25 = vsel %vm4714_vm1, %v13848_v21, %v6677_v9 }
 0x75d   : > { %v9969_v22 = vpop.f32.mrb[99].mxu0  ;;  %v13887_v52 = vsel %vm6570_vm5, %v6678_v25, 0.0 }
 0x75e   : > { %v6364_v63 = vadd.f32 %v9967_v43, %v13833_v18  ;;  %v9970_v49 = vadd.f32 %v9969_v22, %v9968_v15  ;;  %v6604_v15 = vrot.slane %v13859_v60, 2 }
 0x760   : > { %v6429_v24 = vadd.f32 %v6428_v11, %v6364_v63  ;;  %v6367_v19 = vadd.f32 %v9970_v49, %v13833_v18  ;;  %v13875_v63 = vadd.s32 2, %v13402_v46  ;;  %v13893_v46 = vadd.s32 2, %v13413_v5 }
 0x761   : > { %v13906_v5 = vadd.s32 2, %v13408_v13 }
 0x762   : > { %v6459_v40 = vmax.f32 %v6429_v24, 0.0  ;;  %v6432_v26 = vadd.f32 %v6431_v36, %v6367_v19  ;;  %v13857_v36 = vld [vmem:[#allocation2 + $0xb0] sm:$0x1]  ;;  %v13881_v19 = vsel %vm5741_vm11, %v6649_v44, 0.0  ;;  %vm6564_vm15 = vcmp.lt.s32.totalorder %v13875_v63, 8 }
 0x763   : > { %v6527_v43 = vrot.slane %v13857_v36, 1 }
 0x764   : > { %6467 = vst [vmem:[#allocation2 + $0x30] sm:$0xff] %v6459_v40  ;;  %v13837_v10 = vmax.f32 %v6432_v26, 0.0 }
 0x766   : > { %6468 = vst [vmem:[#allocation2 + $0x40] sm:$0xff] %v13837_v10  ;;  %v6513_v7 = vrot.slane %v13837_v10, 1  ;;  %v6590_v57 = vrot.slane %v13837_v10, 2 }
 0x76b   : > { %v9971_v55 = vpop.f32.mrb[100].mxu0  ;;  %v6478_v17 = vld [vmem:[#allocation2 + $0x30] sm:$0xfe] }
 0x76c   : > { %v6553_v16 = vld [vmem:[#allocation2 + $0x30] sm:$0xfc]  ;;  %v9972_v33 = vpop.f32.mrb[101].mxu0  ;;  %v6512_v6 = vrot.slane %v6478_v17, 1  ;;  %v6708_v17 = vld [vmem:[#allocation2 + $0xd0] sm:$0x1] }
 0x76d   : > { %v6589_v37 = vrot.slane %v6553_v16, 2  ;;  %v9973_v28 = vadd.f32 %v9972_v33, %v9971_v55  ;;  %v9974_v11 = vpop.f32.mrb[102].mxu0  ;;  %v6639_v9 = vld [vmem:[#allocation2 + $0x40] sm:$0xfe] }
 0x76e   : > { %v9975_v29 = vpop.f32.mrb[103].mxu0  ;;  %v6514_v41 = vsel %vm15705_vm2, %v6512_v6, %v6513_v7  ;;  %v6644_v44 = vrot.slane %v6639_v9, 1  ;;  %v6669_v25 = vld [vmem:[#allocation2 + $0x40] sm:$0xfc] }
 0x76f   : > { %v6591_v32 = vsel %vm4714_vm1, %v6589_v37, %v6590_v57  ;;  %v6372_v47 = vadd.f32 %v9973_v28, %v13833_v18  ;;  %v9976_v4 = vadd.f32 %v9975_v29, %v9974_v11  ;;  %v6537_v54 = vsel %vm5734_vm13, %v6514_v41, 0.0 }
 0x770   : > { %v6545_v22 = vmax.f32 %v6459_v40, %v6537_v54  ;;  %v6614_v26 = vsel %vm6563_vm8, %v6591_v32, 0.0  ;;  %v13890_v40 = vadd.s32 2, %v13405_v56  ;;  %v13903_v56 = vadd.s32 2, %v13416_v39 }
 0x771   : > { %v6437_v49 = vadd.f32 %v13786_v8, %v6372_v47  ;;  %v6375_v24 = vadd.f32 %v9976_v4, %v13833_v18  ;;  %v13914_v41 = vadd.s32 2, %v13439_v20  ;;  %v6716_v39 = vrot.slane %v6708_v17, 1 }
 0x772   : > { %v6622_v48 = vmax.f32 %v6545_v22, %v6614_v26  ;;  %v6673_v9 = vrot.slane %v6669_v25, 2 }
 0x773   : > { %v13895_v8 = vmax.f32 %v6437_v49, 0.0  ;;  %v6440_v38 = vadd.f32 %v13788_v53, %v6375_v24  ;;  %v9977_v55 = vpop.f32.mrb[104].mxu0 }
 0x774   : > { %v9978_v16 = vpop.f32.mrb[105].mxu0  ;;  %v13900_v33 = vmax.f32 %v6622_v48, %v13837_v10 }
 0x775   : > { %6469 = vst [vmem:[#allocation2 + $0x50] sm:$0xff] %v13895_v8  ;;  %v13909_v6 = vmax.f32 %v6440_v38, 0.0  ;;  %v9979_v53 = vadd.f32 %v9978_v16, %v9977_v55  ;;  %v9980_v37 = vpop.f32.mrb[106].mxu0  ;;  %v6515_v28 = vrot.slane %v13895_v8, 1  ;;  %v6592_v11 = vrot.slane %v13895_v8, 2 }
 0x776   : > { %v9981_v29 = vpop.f32.mrb[107].mxu0 }
 0x777   : > { %6470 = vst [vmem:[#allocation2 + $0x60] sm:$0xff] %v13909_v6  ;;  %v6380_v13 = vadd.f32 %v9979_v53, %v13833_v18  ;;  %v9982_v32 = vadd.f32 %v9981_v29, %v9980_v37  ;;  %v6516_v47 = vsel %vm15706_vm14, %v6513_v7, %v6515_v28  ;;  %v6517_v4 = vrot.slane %v13909_v6, 1  ;;  %vm15709_vm14 = vmmov %vm15705_vm2 }
 0x778   : > { %v6538_v54 = vsel %vm15707_vm6, %v6516_v47, 0.0  ;;  %v6593_v22 = vsel %vm4714_vm1, %v6590_v57, %v6592_v11  ;;  %v6594_v49 = vrot.slane %v13909_v6, 2  ;;  %v6645_v20 = vsel %vm15705_vm2, %v6644_v44, %v6515_v28  ;;  %6939 = vst.msk [vmem:[#allocation2 + $0x60] sm:$0xff] %vm15708_vm3, %v13798_v50 }
 0x779   : > { %v6445_v24 = vadd.f32 %v13792_v0, %v6380_v13  ;;  %v6383_v26 = vadd.f32 %v9982_v32, %v13833_v18  ;;  %v6518_v7 = vsel %vm15709_vm14, %v6515_v28, %v6517_v4  ;;  %v6546_v48 = vmax.f32 %v13837_v10, %v6538_v54  ;;  %7703 = vst [vmem:[#allocation2 + $0x60] sm:$0xff] %v13798_v50 }
 0x77a   : > { %v13933_v38 = vsel %vm4714_vm1, %v6592_v11, %v6594_v49  ;;  %v6615_v57 = vsel %vm6564_vm15, %v6593_v22, 0.0  ;;  %v6653_v55 = vsel %vm5734_vm13, %v6645_v20, 0.0  ;;  %vm6565_vm3 = vcmp.lt.s32.totalorder %v13890_v40, 8 }
 0x77b   : > { %v13939_v17 = vmax.f32 %v6445_v24, 0.0  ;;  %v6448_v0 = vadd.f32 %v13796_v31, %v6383_v26  ;;  %v6623_v16 = vmax.f32 %v6546_v48, %v6615_v57  ;;  %v6661_v53 = vmax.f32 %v13900_v33, %v6653_v55 }
 0x77c   : > { %v6654_v10 = vsel %vm15707_vm6, %v6518_v7, 0.0  ;;  %v6674_v37 = vsel %vm4714_vm1, %v6673_v9, %v6592_v11  ;;  %v6707_v28 = vld [vmem:[#allocation2 + $0x50] sm:$0xfe]  ;;  %v6539_v44 = vsel %vm5736_vm9, %v6518_v7, 0.0  ;;  %vm6566_vm2 = vcmp.lt.s32.totalorder %v13893_v46, 8 }
 0x77d   : > { %v6737_v29 = vld [vmem:[#allocation2 + $0x50] sm:$0xfc]  ;;  %v13952_v31 = vsel %vm15709_vm14, %v13845_v34, %v6716_v39  ;;  %6471 = vst [vmem:[#allocation2 + $0x70] sm:$0xff] %v13939_v17  ;;  %v13955_v33 = vmax.f32 %v6448_v0, 0.0  ;;  %v6519_v13 = vrot.slane %v13939_v17, 1  ;;  %v6596_v32 = vrot.slane %v13939_v17, 2 }
 0x77e   : > { %v6632_v11 = vmax.f32 %v6623_v16, %v13895_v8  ;;  %vm15710_vm6 = vcmask 523264   ;;  %v9983_v47 = vpop.f32.mrb[108].mxu0  ;;  %v6682_v25 = vsel %vm6563_vm8, %v6674_v37, 0.0  ;;  %v6712_v54 = vrot.slane %v6707_v28, 1  ;;  %6941 = vst.msk [vmem:[#allocation2 + $0x70] sm:$0x1] %vm6940_vm10, %v13798_v50  ;;  %vm15711_vm10 = vmmov %vm15709_vm14 }
 0x77f   : > { %6938 = vst.msk [vmem:[#allocation2 + $0x50] sm:$0xff] %vm15710_vm6, %v13798_v50  ;;  %v6741_v39 = vrot.slane %v6737_v29, 2  ;;  %v6547_v22 = vmax.f32 %v13895_v8, %v6539_v44  ;;  %6472 = vst [vmem:[#allocation2 + $0x80] sm:$0xff] %v13955_v33  ;;  %v9984_v20 = vpop.f32.mrb[109].mxu0  ;;  %v6520_v24 = vsel %vm15709_vm14, %v6517_v4, %v6519_v13  ;;  %v6597_v26 = vsel %vm4714_vm1, %v6594_v49, %v6596_v32 }
 0x780   : > { %v6662_v7 = vmax.f32 %v6632_v11, %v6654_v10  ;;  %v6690_v48 = vmax.f32 %v6661_v53, %v6682_v25  ;;  %7705 = vst [vmem:[#allocation2 + $0x70] sm:$0x1] %v13798_v50  ;;  %v9985_v57 = vadd.f32 %v9984_v20, %v9983_v47  ;;  %v9986_v55 = vpop.f32.mrb[110].mxu0  ;;  %v6540_v9 = vsel %vm5737_vm12, %v6520_v24, 0.0 }
 0x781   : > { %v6683_v0 = vsel %vm6564_vm15, %v13933_v38, 0.0  ;;  %v6713_v16 = vsel %vm15711_vm10, %v6712_v54, %v6517_v4  ;;  %v9987_v37 = vpop.f32.mrb[111].mxu0  ;;  %v6655_v28 = vsel %vm5736_vm9, %v6520_v24, 0.0  ;;  %vm15712_vm6 = vcmp.lt.s32.totalorder %v13424_v23, 8 }
 0x782   : > { %v6691_v29 = vmax.f32 %v6662_v7, %v6683_v0  ;;  %v6699_v53 = vmax.f32 %v6690_v48, %v13895_v8  ;;  %v6721_v10 = vsel %vm5734_vm13, %v6713_v16, 0.0  ;;  %v6388_v44 = vadd.f32 %v9985_v57, %v13833_v18  ;;  %vm15713_vm13 = vmmov %vm15711_vm10 }
 0x783   : > { %v9988_v11 = vadd.f32 %v9987_v37, %v9986_v55  ;;  %v6722_v47 = vsel %vm15712_vm6, %v6520_v24, 0.0  ;;  %v6742_v25 = vsel %vm4714_vm1, %v6741_v39, %v6594_v49  ;;  %v6521_v7 = vrot.slane %v13955_v33, 1  ;;  %vm15714_vm6 = vmmov %vm15711_vm10 }
 0x784   : > { %v6700_v4 = vmax.f32 %v6691_v29, %v13909_v6  ;;  %v6729_v54 = vmax.f32 %v6699_v53, %v6721_v10  ;;  %v6750_v20 = vsel %vm6563_vm8, %v6742_v25, 0.0  ;;  %v6453_v8 = vadd.f32 %v13790_v61, %v6388_v44 }
 0x785   : > { %v6391_v35 = vadd.f32 %v9988_v11, %v13833_v18  ;;  %v6548_v48 = vmax.f32 %v13909_v6, %v6540_v9  ;;  %v6598_v57 = vrot.slane %v13955_v33, 2  ;;  %v6751_v49 = vsel %vm6564_vm15, %v6597_v26, 0.0 }
 0x786   : > { %v6730_v23 = vmax.f32 %v6700_v4, %v6722_v47  ;;  %v6758_v39 = vmax.f32 %v6729_v54, %v6750_v20  ;;  %v6522_v24 = vsel %vm15713_vm13, %v6519_v13, %v6521_v7  ;;  %v13997_v55 = vmax.f32 %v6453_v8, 0.0  ;;  %vm15715_vm13 = vmmov %vm15714_vm6 }
 0x787   : > { %v6456_v42 = vadd.f32 %v13794_v58, %v6391_v35  ;;  %v6599_v0 = vsel %vm4714_vm1, %v6596_v32, %v6598_v57  ;;  %v6616_v61 = vsel %vm6565_vm3, %v13933_v38, 0.0  ;;  %vm6567_vm8 = vcmp.lt.s32.totalorder %v13903_v56, 8 }
 0x788   : > { %vm6568_vm14 = vcmp.lt.s32.totalorder %v13906_v5, 8  ;;  %v6759_v18 = vmax.f32 %v6730_v23, %v6751_v49  ;;  %v6541_v63 = vsel %vm5738_vm4, %v6522_v24, 0.0  ;;  %v6617_v13 = vsel %vm6566_vm2, %v6597_v26, 0.0  ;;  %6473 = vst [vmem:[#allocation2 + $0x90] sm:$0xff] %v13997_v55 }
 0x789   : > { %v6624_v9 = vmax.f32 %v6547_v22, %v6616_v61  ;;  %vm6569_vm15 = vcmp.lt.s32.totalorder %v13914_v41, 8  ;;  %v14012_v58 = vmax.f32 %v6456_v42, 0.0  ;;  %v6523_v38 = vrot.slane %v13997_v55, 1 }
 0x78a   : > { %v6600_v32 = vrot.slane %v13997_v55, 2  ;;  %v6625_v16 = vmax.f32 %v6548_v48, %v6617_v13  ;;  %v6768_v37 = vpack.c.bf16 %v6759_v18, %v6758_v39  ;;  %v6656_v53 = vsel %vm5737_vm12, %v6522_v24, 0.0 }
 0x78b   : > { %v6633_v29 = vmax.f32 %v6624_v9, %v13909_v6  ;;  %v6684_v22 = vsel %vm6565_vm3, %v6597_v26, 0.0  ;;  %6474 = vst [vmem:[#allocation2 + $0xa0] sm:$0xff] %v14012_v58  ;;  %v6525_v10 = vrot.slane %v14012_v58, 1  ;;  %v6602_v44 = vrot.slane %v14012_v58, 2 }
 0x78c   : > { %v6524_v11 = vsel %vm15711_vm10, %v6521_v7, %v6523_v38  ;;  %v6601_v47 = vsel %vm4714_vm1, %v6598_v57, %v6600_v32  ;;  %10144 = vmatpush3.bf16.msra.mxu1 %v6768_v37  ;;  %v6634_v25 = vmax.f32 %v6625_v16, %v13939_v17  ;;  %v6685_v26 = vsel %vm6566_vm2, %v6599_v0, 0.0 }
 0x78d   : > { %v6542_v6 = vsel %vm5739_vm0, %v6524_v11, 0.0  ;;  %v6663_v4 = vmax.f32 %v6633_v29, %v6655_v28  ;;  %v6528_v54 = vsel %vm15714_vm6, %v6525_v10, %v6527_v43  ;;  %v6605_v20 = vsel %vm4714_vm1, %v6602_v44, %v6604_v15  ;;  %10145 = vmatprep.subr.bf16.mxu1 %v13798_v50 }
 0x78e   : > { %v6657_v7 = vsel %vm5738_vm4, %v6524_v11, 0.0  ;;  %v6723_v8 = vsel %vm5736_vm9, %v6522_v24, 0.0  ;;  %v6544_v28 = vsel %vm5741_vm11, %v6528_v54, 0.0  ;;  %v6664_v35 = vmax.f32 %v6634_v25, %v6656_v53  ;;  %vm15716_vm9 = vmmov %vm15714_vm6 }
 0x78f   : > { %v6692_v48 = vmax.f32 %v6663_v4, %v6684_v22  ;;  %v6724_v36 = vsel %vm5737_vm12, %v6524_v11, 0.0  ;;  %v6552_v60 = vmax.f32 %v14012_v58, %v6544_v28  ;;  %v6621_v43 = vsel %vm6570_vm5, %v6605_v20, 0.0 }
 0x790   : > { %v6752_v15 = vsel %vm6565_vm3, %v6599_v0, 0.0  ;;  %v6526_v57 = vsel %vm15715_vm13, %v6523_v38, %v6525_v10  ;;  %v6693_v14 = vmax.f32 %v6664_v35, %v6685_v26  ;;  %v6549_v39 = vmax.f32 %v13939_v17, %v6541_v63  ;;  %vm15724_vm13 = vmmov %vm15714_vm6 }
 0x791   : > { %v6701_v23 = vmax.f32 %v6692_v48, %v13939_v17  ;;  %v6543_v49 = vsel %vm5740_vm7, %v6526_v57, 0.0  ;;  %v6629_v45 = vmax.f32 %v6552_v60, %v6621_v43  ;;  %v6550_v24 = vmax.f32 %v13955_v33, %v6542_v6 }
 0x792   : > { %v6551_v42 = vmax.f32 %v13997_v55, %v6543_v49  ;;  %v6603_v61 = vsel %vm4714_vm1, %v6600_v32, %v6602_v44  ;;  %v6702_v40 = vmax.f32 %v6693_v14, %v13955_v33  ;;  %v6618_v13 = vsel %vm6567_vm8, %v6599_v0, 0.0 }
 0x793   : > { %v6731_v18 = vmax.f32 %v6701_v23, %v6723_v8  ;;  %v6619_v9 = vsel %vm6568_vm14, %v6601_v47, 0.0  ;;  %v6638_v38 = vmax.f32 %v6629_v45, %v13798_v50  ;;  %v6620_v17 = vsel %vm6569_vm15, %v6603_v61, 0.0 }
 0x794   : > { %v6626_v63 = vmax.f32 %v6549_v39, %v6618_v13  ;;  %v6627_v16 = vmax.f32 %v6550_v24, %v6619_v9  ;;  %v6732_v37 = vmax.f32 %v6702_v40, %v6724_v36  ;;  %v6628_v53 = vmax.f32 %v6551_v42, %v6620_v17  ;;  %v10303_v13 = vld [vmem:[%s15191_s13] ss:$8 sps:$4 sm:$0xff]   ;;  %v10305_v9 = vld [vmem:[%s15191_s13 + $0x4] ss:$8 sps:$4 sm:$0xff]   ;;  %v10306_v17 = vld [vmem:[%s15191_s13 + $0x10] ss:$8 sps:$4 sm:$0xff]  }
 0x795   : > { %v6760_v29 = vmax.f32 %v6731_v18, %v6752_v15  ;;  %v6647_v32 = vsel %vm15716_vm9, %v6525_v10, %v13845_v34  ;;  %v6668_v22 = vmax.f32 %v6638_v38, %v13881_v19  ;;  %v6753_v0 = vsel %vm6566_vm2, %v6601_v47, 0.0  ;;  %v10308_v38 = vld [vmem:[%s15191_s13 + $0x14] ss:$8 sps:$4 sm:$0xff]  }
 0x796   : > { %v6635_v11 = vmax.f32 %v6626_v63, %v13955_v33  ;;  %v6636_v6 = vmax.f32 %v6627_v16, %v13997_v55  ;;  %v6761_v25 = vmax.f32 %v6732_v37, %v6753_v0  ;;  %v6637_v4 = vmax.f32 %v6628_v53, %v14012_v58  ;;  %v10311_v63 = vld [vmem:[%s15191_s13 + $0x24] ss:$8 sps:$4 sm:$0xff]   ;;  %v10309_v16 = vld [vmem:[%s15191_s13 + $0x20] ss:$8 sps:$4 sm:$0xff]   ;;  %v10314_v37 = vld [vmem:[%s15191_s13 + $0x34] ss:$8 sps:$4 sm:$0xff]  }
 0x797   : > { %v6658_v26 = vsel %vm5739_vm0, %v6526_v57, 0.0  ;;  %v6676_v54 = vsel %vm4714_vm1, %v6602_v44, %v13848_v21  ;;  %v6697_v10 = vmax.f32 %v6668_v22, %v13887_v52  ;;  %v6659_v19 = vsel %vm5740_vm7, %v6647_v32, 0.0  ;;  %v10317_v53 = vld [vmem:[%s15191_s13 + $0x44] ss:$8 sps:$4 sm:$0xff]   ;;  %v10320_v22 = vld [vmem:[%s15191_s13 + $0x54] ss:$8 sps:$4 sm:$0xff]  }
 0x798   : > { %v6665_v46 = vmax.f32 %v6635_v11, %v6657_v7  ;;  %v6666_v20 = vmax.f32 %v6636_v6, %v6658_v26  ;;  %v6769_v8 = vpack.c.bf16 %v6761_v25, %v6760_v29  ;;  %v6667_v33 = vmax.f32 %v6637_v4, %v6659_v19  ;;  %v10312_v29 = vld [vmem:[%s15191_s13 + $0x30] ss:$8 sps:$4 sm:$0xff]   ;;  %v10323_v11 = vld [vmem:[%s15191_s13 + $0x64] ss:$8 sps:$4 sm:$0xff]   ;;  %v10321_v6 = vld [vmem:[%s15191_s13 + $0x60] ss:$8 sps:$4 sm:$0xff]  }
 0x799   : > { %v6686_v28 = vsel %vm6567_vm8, %v6601_v47, 0.0  ;;  %v6687_v35 = vsel %vm6568_vm14, %v6603_v61, 0.0  ;;  %v6688_v48 = vsel %vm6569_vm15, %v6676_v54, 0.0  ;;  %v6728_v52 = vsel %vm5741_vm11, %v13952_v31, 0.0  ;;  %v10318_v0 = vld [vmem:[%s15191_s13 + $0x50] ss:$8 sps:$4 sm:$0xff]  }
 0x79a   : > { %v6694_v36 = vmax.f32 %v6665_v46, %v6686_v28  ;;  %v6695_v44 = vmax.f32 %v6666_v20, %v6687_v35  ;;  %10146 = vmatpush3.bf16.msra.mxu1 %v6769_v8  ;;  %v6696_v7 = vmax.f32 %v6667_v33, %v6688_v48  ;;  %v6706_v60 = vmax.f32 %v6697_v10, %v13798_v50  ;;  %v10326_v25 = vld [vmem:[%s15191_s13 + $0x74] ss:$8 sps:$4 sm:$0xff]   ;;  %v10324_v4 = vld [vmem:[%s15191_s13 + $0x70] ss:$8 sps:$4 sm:$0xff]   ;;  %v10329_v26 = vld [vmem:[%s15191_s13 + $0x84] ss:$8 sps:$4 sm:$0xff]  }
 0x79b   : > { %v6746_v47 = vsel %vm4714_vm1, %v13848_v21, %v6745_v2  ;;  %10147 = vmatprep.subr.bf16.mxu1 %v13798_v50  ;;  %v6725_v31 = vsel %vm5738_vm4, %v6526_v57, 0.0  ;;  %v6726_v14 = vsel %vm5739_vm0, %v6647_v32, 0.0  ;;  %v6754_v12 = vsel %vm6567_vm8, %v6603_v61, 0.0  ;;  %v10315_v32 = vld [vmem:[%s15191_s13 + $0x40] ss:$8 sps:$4 sm:$0xff]  }
 0x79c   : > { %v6703_v43 = vmax.f32 %v6694_v36, %v13997_v55  ;;  %v6704_v15 = vmax.f32 %v6695_v44, %v14012_v58  ;;  %v6705_v59 = vmax.f32 %v6696_v7, %v13798_v50  ;;  %v6736_v23 = vmax.f32 %v6706_v60, %v6728_v52  ;;  %v10332_v10 = vld [vmem:[%s15191_s13 + $0x94] ss:$8 sps:$4 sm:$0xff]   ;;  %v10330_v19 = vld [vmem:[%s15191_s13 + $0x90] ss:$8 sps:$4 sm:$0xff]   ;;  %v10335_v46 = vld [vmem:[%s15191_s13 + $0xa4] ss:$8 sps:$4 sm:$0xff]  }
 0x79d   : > { %v6756_v55 = vsel %vm6569_vm15, %v13848_v21, 0.0  ;;  %v6757_v58 = vsel %vm6570_vm5, %v6746_v47, 0.0  ;;  %v6755_v30 = vsel %vm6568_vm14, %v6676_v54, 0.0  ;;  %vm15717_vm12 = vcmask 523264   ;;  %v10302_v21 = vld [vmem:[%s15189_s11 + $0x38] sm:$0xff]  }
 0x79e   : > { %v6733_v2 = vmax.f32 %v6703_v43, %v6725_v31  ;;  %v6734_v49 = vmax.f32 %v6704_v15, %v6726_v14  ;;  %v6735_v51 = vmax.f32 %v6705_v59, %v6727_v1  ;;  %v6765_v34 = vmax.f32 %v6736_v23, %v6757_v58  ;;  %10170 = vmatpush3.bf16.msra.mxu0 %v10302_v21  ;;  %v10327_v54 = vld [vmem:[%s15191_s13 + $0x80] ss:$8 sps:$4 sm:$0xff]   ;;  %v10338_v8 = vld [vmem:[%s15191_s13 + $0xb4] ss:$8 sps:$4 sm:$0xff]   ;;  %v10336_v33 = vld [vmem:[%s15191_s13 + $0xb0] ss:$8 sps:$4 sm:$0xff]  }
 0x79f   : > { %v15718_v18 = vmov 0   ;;  %v10333_v20 = vld [vmem:[%s15191_s13 + $0xa0] ss:$8 sps:$4 sm:$0xff]   ;;  %v10341_v28 = vld [vmem:[%s15191_s13 + $0xc4] ss:$8 sps:$4 sm:$0xff]   ;;  %v14220_v14 = vand.u32 3, %v15664_v62  ;;  %vm15719_vm0 = vmmov %vm15717_vm12 }
 0x7a0   : > { %v6762_v57 = vmax.f32 %v6733_v2, %v6754_v12  ;;  %v6763_v39 = vmax.f32 %v6734_v49, %v6755_v30  ;;  %v6764_v45 = vmax.f32 %v6735_v51, %v6756_v55  ;;  %v10339_v35 = vld [vmem:[%s15191_s13 + $0xc0] ss:$8 sps:$4 sm:$0xff]   ;;  %v10344_v48 = vld [vmem:[%s15191_s13 + $0xd4] ss:$8 sps:$4 sm:$0xff]   ;;  %v10342_v36 = vld [vmem:[%s15191_s13 + $0xd0] ss:$8 sps:$4 sm:$0xff]  }
 0x7a1   : > { %v7083_v44 = vld [vmem:[#allocation2 + $0x50] sm:$0xf]  ;;  %v9609_v47 = vld [vmem:[%s15190_s12] ss:$0 sm:$0xff]  ;;  %v14223_v59 = vand.u32 3, %v15520_v3  ;;  %v14227_v55 = vadd.s32 4294967295, %v14220_v14  ;;  %vm15720_vm4 = vmmov %vm15719_vm0 }
 0x7a2   : > { %v6770_v24 = vpack.c.bf16 %v6763_v39, %v6762_v57  ;;  %v6771_v42 = vpack.c.bf16 %v6765_v34, %v6764_v45  ;;  %v14209_v52 = vld [vmem:[#allocation2 + $0x50] sm:$0x1]  ;;  %v14233_v12 = vadd.s32 1, %v14220_v14  ;;  %v7085_v51 = vpack.c.bf16 %v7083_v44, %v7083_v44  ;;  %v7021_v34 = vld [vmem:[#allocation2 + $0x20] sm:$0x80]  ;;  %vm15721_vm7 = vmmov %vm15719_vm0 }
 0x7a3   : > { %v14211_v7 = vld [vmem:[#allocation2 + $0x50] sm:$0x7]  ;;  %v14230_v58 = vadd.s32 4294967295, %v14223_v59  ;;  %v14236_v30 = vadd.s32 1, %v14223_v59  ;;  %v10345_v57 = vld [vmem:[%s15191_s13 + $0xe0] ss:$8 sps:$4 sm:$0xff]   ;;  %vm15725_vm9 = vmmov %vm15719_vm0 }
 0x7a4   : > { %10148 = vmatpush3.bf16.msra.mxu1 %v6770_v24  ;;  %v14213_v60 = vld [vmem:[#allocation2 + $0x50] sm:$0x1f]  ;;  %v10347_v39 = vld [vmem:[%s15191_s13 + $0xe4] ss:$8 sps:$4 sm:$0xff]   ;;  %vm6950_vm11 = vcmp.ge.s32.totalorder %v14227_v55, 0  ;;  %vm6998_vm3 = vcmp.lt.s32.totalorder %v14233_v12, 4 }
 0x7a5   : > { %10149 = vmatprep.subr.bf16.mxu1 %v13798_v50  ;;  %7701 = vst [vmem:[#allocation2 + $0x50] sm:$0xff] %v13798_v50  ;;  %v6991_v45 = vld [vmem:[#allocation2 + $0x20] sm:$0xe0]  ;;  %vm6951_vm5 = vcmp.ge.s32.totalorder %v14230_v58, 0  ;;  %vm6999_vm2 = vcmp.lt.s32.totalorder %v14236_v30, 4  ;;  %v7089_v21 = vrot.slane %v7085_v51, 2 }
 0x7a6   : > { %v14246_v24 = vld [vmem:[#allocation2 + $0x20] sm:$0xf8]  ;;  %vm7009_vm8 = vcmask 1042432   ;;  %vm6963_vm14 = vcmask 1044480   ;;  %vm15722_vm15 = vcmask 1040384  }
 0x7a7   : > { %vm15723_vm10 = vmmov %vm15722_vm15  ;;  %v10353_v44 = vld [vmem:[%s15191_s13 + $0x104] ss:$8 sps:$4 sm:$0xff]   ;;  %v7939_v12 = vld [vmem:[%s15199_s21] sm:$0x3] }
 0x7a8   : > { %10150 = vmatpush3.bf16.msra.mxu1 %v6771_v42  ;;  %v6975_v42 = vld [vmem:[#allocation2 + $0x20] sm:$0xf0] }
 0x7a9   : > { %7564 = vmatprep.subr.bf16.mxu1 %v10305_v9 }
 0x7ab   : > { %10152 = vmatmul.mubr.msk.bf16.vlgmr.msra.gmra.mrb[64].mxu1 %vm15717_vm12, %v10294_v27  ;;  %v7027_v27 = vrot.slane %v7021_v34, 7  ;;  %vm15726_vm12 = vmmov %vm15719_vm0 }
 0x7ac   : > { %7565 = vmatpush1.bf16.msra.mxu1 %v10303_v13 }
 0x7ad   : > { %7566 = vmatprep.subr.bf16.mxu1 %v10308_v38 }
 0x7b0   : > { %7567 = vmatpush1.bf16.msra.mxu1 %v10306_v17 }
 0x7b1   : > { %7568 = vmatprep.subr.bf16.mxu1 %v10311_v63 }
 0x7b4   : > { %7569 = vmatpush1.bf16.msra.mxu1 %v10309_v16 }
 0x7b5   : > { %7570 = vmatprep.subr.bf16.mxu1 %v10314_v37 }
 0x7b8   : > { %7571 = vmatpush1.bf16.msra.mxu1 %v10312_v29 }
 0x7b9   : > { %7572 = vmatprep.subr.bf16.mxu1 %v10317_v53 }
 0x7bc   : > { %7573 = vmatpush1.bf16.msra.mxu1 %v10315_v32 }
 0x7bd   : > { %7574 = vmatprep.subr.bf16.mxu1 %v10320_v22 }
 0x7c0   : > { %7575 = vmatpush1.bf16.msra.mxu1 %v10318_v0 }
 0x7c1   : > { %7576 = vmatprep.subr.bf16.mxu1 %v10323_v11 }
 0x7c4   : > { %7577 = vmatpush1.bf16.msra.mxu1 %v10321_v6 }
 0x7c5   : > { %7578 = vmatprep.subr.bf16.mxu1 %v10326_v25 }
 0x7c8   : > { %7579 = vmatpush1.bf16.msra.mxu1 %v10324_v4 }
 0x7c9   : > { %7580 = vmatprep.subr.bf16.mxu1 %v10329_v26 }
 0x7cc   : > { %7581 = vmatpush1.bf16.msra.mxu1 %v10327_v54  ;;  %v10348_v54 = vld [vmem:[%s15191_s13 + $0xf0] ss:$8 sps:$4 sm:$0xff]  }
 0x7cd   : > { %7582 = vmatprep.subr.bf16.mxu1 %v10332_v10  ;;  %v10350_v10 = vld [vmem:[%s15191_s13 + $0xf4] ss:$8 sps:$4 sm:$0xff]  }
 0x7d0   : > { %7583 = vmatpush1.bf16.msra.mxu1 %v10330_v19 }
 0x7d1   : > { %7584 = vmatprep.subr.bf16.mxu1 %v10335_v46 }
 0x7d4   : > { %7585 = vmatpush1.bf16.msra.mxu1 %v10333_v20 }
 0x7d5   : > { %7586 = vmatprep.subr.bf16.mxu1 %v10338_v8 }
 0x7d8   : > { %7587 = vmatpush1.bf16.msra.mxu1 %v10336_v33 }
 0x7d9   : > { %7588 = vmatprep.subr.bf16.mxu1 %v10341_v28 }
 0x7dc   : > { %7589 = vmatpush1.bf16.msra.mxu1 %v10339_v35 }
 0x7dd   : > { %7590 = vmatprep.subr.bf16.mxu1 %v10344_v48 }
 0x7e0   : > { %7591 = vmatpush1.bf16.msra.mxu1 %v10342_v36 }
 0x7e1   : > { %7592 = vmatprep.subr.bf16.mxu1 %v10347_v39 }
 0x7e4   : > { %7593 = vmatpush1.bf16.msra.mxu1 %v10345_v57 }
 0x7e5   : > { %7594 = vmatprep.subr.bf16.mxu1 %v10350_v10  ;;  %v10360_v10 = vld [vmem:[%s15191_s13 + $0x130] ss:$8 sps:$4 sm:$0xff]  }
 0x7e8   : > { %7595 = vmatpush1.bf16.msra.mxu1 %v10348_v54  ;;  %v10362_v54 = vld [vmem:[%s15191_s13 + $0x134] ss:$8 sps:$4 sm:$0xff]  }
 0x7e9   : > { %7607 = vmatprep.subr.bf16.mxu1 %v10353_v44  ;;  %v10375_v44 = vld [vmem:[%s15191_s13 + $0x180] ss:$8 sps:$4 sm:$0xff]  }
 0x87e   : > { %v6814_v56 = vpop.f32.mrb[64].mxu1 }
 0x87f   : > { %v10153_v5 = vpop.f32.mrb[65].mxu1 }
 0x880   : > { %v6817_v41 = vpop.f32.mrb[66].mxu1 }
 0x881   : > { %v6837_v61 = vpack.c.bf16 %v6817_v41, %v6814_v56  ;;  %v10154_v40 = vpop.f32.mrb[67].mxu1  ;;  %v7052_v56 = vrot.slane %v14209_v52, 1 }
 0x882   : > { %v6964_v40 = vrot.slane %v14246_v24, 3 }
 0x883   : > { %10172 = vmatmul.mubr.bf16.vlgmr.msra.gmra.mrb[112].mxu0 %v6837_v61  ;;  %v7010_v61 = vrot.slane %v6991_v45, 5 }
 0x884   : > { %7977 = vmatprep.mubr.bf16.mxu0 %v15718_v18 }
 0x956   : > { %v6927_v43 = vpop.f32.mrb[112].mxu0 }
 0x957   : > { %v6928_v15 = vadd.f32 %v9609_v47, %v6927_v43  ;;  %v10173_v1 = vpop.f32.mrb[113].mxu0 }
 0x958   : > { %v6930_v31 = vpop.f32.mrb[114].mxu0 }
 0x959   : > { %v6934_v23 = vmax.f32 %v6928_v15, 0.0  ;;  %v6931_v2 = vadd.f32 %v9609_v47, %v6930_v31  ;;  %v10174_v49 = vpop.f32.mrb[115].mxu0 }
 0x95a   : > { %v7104_v49 = vrot.slane %v14213_v60, 5 }
 0x95b   : > { %6936 = vst.msk [vmem:[#allocation2 + $0x30] sm:$0xff] %vm15719_vm0, %v6934_v23  ;;  %v6935_v50 = vmax.f32 %v6931_v2, 0.0 }
 0x95d   : > { %6937 = vst.msk [vmem:[#allocation2 + $0x40] sm:$0xff] %vm15720_vm4, %v6935_v50  ;;  %v6944_v3 = vpack.c.bf16 %v6935_v50, %v6934_v23  ;;  %v7073_v23 = vrot.slane %v14211_v7, 3  ;;  %vm15727_vm4 = vmmov %vm15719_vm0 }
 0x95f   : > { %7042 = vst.msk [vmem:[#allocation3 + $0x10] sm:$0xff] %vm15721_vm7, %v6944_v3  ;;  %vm6989_vm7 = vcmask 1048064  }
 0x962   : > { %v7022_v5 = vld [vmem:[#allocation2 + $0x30] sm:$0xff] }
 0x963   : > { %v7043_v41 = vld [vmem:[#allocation2 + $0x30] sm:$0xfe]  ;;  %v7028_v13 = vrot.slane %v7022_v5, 7  ;;  %v6978_v9 = vpack.c.bf16 %v7022_v5, %v6975_v42  ;;  %v7011_v17 = vrot.slane %v7022_v5, 5  ;;  %v6965_v29 = vrot.slane %v7022_v5, 3 }
 0x964   : > { %v7049_v38 = vrot.slane %v7043_v41, 1  ;;  %v7023_v63 = vld [vmem:[#allocation2 + $0x40] sm:$0x7f]  ;;  %v7081_v11 = vld [vmem:[#allocation2 + $0x30] sm:$0xf0] }
 0x965   : > { %v6977_v16 = vld [vmem:[#allocation2 + $0x40] sm:$0xf]  ;;  %v7029_v53 = vsel %vm15722_vm15, %v7027_v27, %v7028_v13  ;;  %v7030_v32 = vrot.slane %v7023_v63, 7  ;;  %v6983_v0 = vrot.slane %v6978_v9, 2  ;;  %v7012_v20 = vsel %vm7009_vm8, %v7010_v61, %v7011_v17  ;;  %v7064_v1 = vld [vmem:[#allocation2 + $0x30] sm:$0xf8] }
 0x966   : > { %v14254_v37 = vld [vmem:[#allocation2 + $0x40] sm:$0xff]  ;;  %v6979_v22 = vpack.c.bf16 %v6977_v16, %v6977_v16  ;;  %v7034_v25 = vsel %vm6950_vm11, %v7029_v53, 0.0  ;;  %v7095_v2 = vld [vmem:[#allocation2 + $0x30] sm:$0xe0]  ;;  %v7017_v50 = vsel %vm6998_vm3, %v7012_v20, 0.0  ;;  %v6966_v51 = vsel %vm6963_vm14, %v6964_v40, %v6965_v29 }
 0x967   : > { %v6993_v6 = vld [vmem:[#allocation2 + $0x40] sm:$0x1f]  ;;  %v7084_v4 = vpack.c.bf16 %v14254_v37, %v7081_v11  ;;  %v7050_v26 = vrot.slane %v14254_v37, 1  ;;  %v7031_v19 = vsel %vm15723_vm10, %v7028_v13, %v7030_v32  ;;  %v7070_v45 = vrot.slane %v7064_v1, 3  ;;  %v10368_v20 = vld [vmem:[%s15191_s13 + $0x154] ss:$8 sps:$4 sm:$0xff]  }
 0x968   : > { %v6984_v46 = vrot.slane %v6979_v22, 2  ;;  %v7013_v8 = vrot.slane %v6993_v6, 5  ;;  %v7035_v33 = vsel %vm6951_vm5, %v7031_v19, 0.0  ;;  %v6947_v36 = vld [vmem:[#allocation2 + $0x40] sm:$0x7]  ;;  %v7071_v7 = vrot.slane %v14254_v37, 3 }
 0x969   : > { %v7088_v28 = vrot.slane %v7084_v4, 2  ;;  %v7051_v35 = vsel %vm15714_vm6, %v7049_v38, %v7050_v26  ;;  %v7053_v48 = vsel %vm15724_vm13, %v7050_v26, %v7052_v56  ;;  %v7036_v52 = vpack.c.bf16 %v7035_v33, %v7034_v25  ;;  %v10351_v32 = vld [vmem:[%s15191_s13 + $0x100] ss:$8 sps:$4 sm:$0xff]   ;;  %v10354_v6 = vld [vmem:[%s15191_s13 + $0x110] ss:$8 sps:$4 sm:$0xff]  }
 0x96a   : > { %v6985_v47 = vsel %vm4714_vm1, %v6983_v0, %v6984_v46  ;;  %v7056_v43 = vsel %vm6998_vm3, %v7051_v35, 0.0  ;;  %v7057_v15 = vsel %vm6999_vm2, %v7053_v48, 0.0  ;;  %v7014_v31 = vsel %vm7009_vm8, %v7011_v17, %v7013_v8  ;;  %v10356_v0 = vld [vmem:[%s15191_s13 + $0x114] ss:$8 sps:$4 sm:$0xff]   ;;  %v10359_v4 = vld [vmem:[%s15191_s13 + $0x124] ss:$8 sps:$4 sm:$0xff]  }
 0x96b   : > { %6986 = vrot.lane.b32.xlu1 %v6985_v47, %s15687_s0  ;;  %7038 = vrot.lane.b32.xlu0 %v7036_v52, %s15687_s0  ;;  %v7018_v3 = vsel %vm6999_vm2, %v7014_v31, 0.0  ;;  %v6967_v34 = vrot.slane %v6947_v36, 3  ;;  %v7058_v57 = vpack.c.bf16 %v7057_v15, %v7056_v43  ;;  %v7090_v24 = vsel %vm4714_vm1, %v7088_v28, %v7089_v21  ;;  %v10357_v26 = vld [vmem:[%s15191_s13 + $0x120] ss:$8 sps:$4 sm:$0xff]   ;;  %v10365_v19 = vld [vmem:[%s15191_s13 + $0x144] ss:$8 sps:$4 sm:$0xff]  }
 0x96c   : > { %v7019_v39 = vpack.c.bf16 %v7018_v3, %v7017_v50  ;;  %v7101_v42 = vrot.slane %v7095_v2, 5  ;;  %v7102_v27 = vrot.slane %v14254_v37, 5  ;;  %v6971_v56 = vsel %vm6950_vm11, %v6966_v51, 0.0  ;;  %v10363_v46 = vld [vmem:[%s15191_s13 + $0x140] ss:$8 sps:$4 sm:$0xff]  }
 0x96d   : > { %v6968_v60 = vsel %vm6963_vm14, %v6965_v29, %v6967_v34  ;;  %v7072_v41 = vsel %vm6963_vm14, %v7070_v45, %v7071_v7  ;;  %v7074_v61 = vsel %vm6963_vm14, %v7071_v7, %v7073_v23  ;;  %v10366_v8 = vld [vmem:[%s15191_s13 + $0x150] ss:$8 sps:$4 sm:$0xff]   ;;  %v10371_v33 = vld [vmem:[%s15191_s13 + $0x164] ss:$8 sps:$4 sm:$0xff]   ;;  %v10369_v28 = vld [vmem:[%s15191_s13 + $0x160] ss:$8 sps:$4 sm:$0xff]  }
 0x96e   : > { %7020 = vst.msk [vmem:[#allocation3 + $0x8] sm:$0xff] %vm15725_vm9, %v7019_v39  ;;  %v6972_v5 = vsel %vm6951_vm5, %v6968_v60, 0.0  ;;  %v7077_v40 = vsel %vm6950_vm11, %v7072_v41, 0.0  ;;  %v7078_v13 = vsel %vm6951_vm5, %v7074_v61, 0.0  ;;  %v7103_v9 = vsel %vm7009_vm8, %v7101_v42, %v7102_v27  ;;  %v10374_v35 = vld [vmem:[%s15191_s13 + $0x174] ss:$8 sps:$4 sm:$0xff]   ;;  %vm15728_vm11 = vmmov %vm15719_vm0 }
 0x96f   : > { %7060 = vrot.lane.b32.xlu1 %v7058_v57, %s15687_s0  ;;  %7091 = vrot.lane.b32.xlu0 %v7090_v24, %s15687_s0  ;;  %v6973_v21 = vpack.c.bf16 %v6972_v5, %v6971_v56  ;;  %v7079_v38 = vpack.c.bf16 %v7078_v13, %v7077_v40  ;;  %v7105_v17 = vsel %vm7009_vm8, %v7102_v27, %v7104_v49  ;;  %v7108_v63 = vsel %vm6998_vm3, %v7103_v9, 0.0  ;;  %v10372_v48 = vld [vmem:[%s15191_s13 + $0x170] ss:$8 sps:$4 sm:$0xff]   ;;  %v10377_v36 = vld [vmem:[%s15191_s13 + $0x184] ss:$8 sps:$4 sm:$0xff]   ;;  %vm15729_vm9 = vmmov %vm15714_vm6 }
 0x970   : > { %v7109_v16 = vsel %vm6999_vm2, %v7105_v17, 0.0  ;;  %v10380_v52 = vld [vmem:[%s15191_s13 + $0x194] ss:$8 sps:$4 sm:$0xff]   ;;  %v10378_v47 = vld [vmem:[%s15191_s13 + $0x190] ss:$8 sps:$4 sm:$0xff]   ;;  %vm8169_vm5 = vcmask 520192  }
 0x971   : > { %6974 = vst.msk [vmem:[#allocation3] sm:$0xff] %vm15726_vm12, %v6973_v21  ;;  %v7110_v55 = vpack.c.bf16 %v7109_v16, %v7108_v63  ;;  %v10383_v43 = vld [vmem:[%s15191_s13 + $0x1a4] ss:$8 sps:$4 sm:$0xff]   ;;  %v10381_v15 = vld [vmem:[%s15191_s13 + $0x1a0] ss:$8 sps:$4 sm:$0xff]   ;;  %v7193_v17 = vsub.s32 0, %v15664_v62  ;;  %vm15730_vm12 = vmmov %vm15714_vm6 }
 0x972   : > { %7080 = vst.msk [vmem:[#allocation3 + $0x18] sm:$0xff] %vm15719_vm0, %v7079_v38  ;;  %v10386_v1 = vld [vmem:[%s15191_s13 + $0x1b4] ss:$8 sps:$4 sm:$0xff]   ;;  %v10384_v31 = vld [vmem:[%s15191_s13 + $0x1b0] ss:$8 sps:$4 sm:$0xff]   ;;  %v14446_v38 = vld [vmem:[#allocation2 + $0x8] sm:$0xff] }
 0x973   : > { %7111 = vst.msk [vmem:[#allocation3 + $0x20] sm:$0xff] %vm15727_vm4, %v7110_v55  ;;  %v10389_v23 = vld [vmem:[%s15191_s13 + $0x1c4] ss:$8 sps:$4 sm:$0xff]   ;;  %v10387_v2 = vld [vmem:[%s15191_s13 + $0x1c0] ss:$8 sps:$4 sm:$0xff]   ;;  %v7197_v16 = vsub.s32 1, %v15664_v62  ;;  %vm15731_vm0 = vmmov %vm15714_vm6 }
 0x974   : > { %v10392_v49 = vld [vmem:[%s15191_s13 + $0x1d4] ss:$8 sps:$4 sm:$0xff]   ;;  %v10390_v50 = vld [vmem:[%s15191_s13 + $0x1d0] ss:$8 sps:$4 sm:$0xff]   ;;  %v10395_v3 = vld [vmem:[%s15191_s13 + $0x1e4] ss:$8 sps:$4 sm:$0xff]  }
 0x975   : > { %v10393_v51 = vld [vmem:[%s15191_s13 + $0x1e0] ss:$8 sps:$4 sm:$0xff]   ;;  %v10398_v34 = vld [vmem:[%s15191_s13 + $0x1f4] ss:$8 sps:$4 sm:$0xff]   ;;  %v10396_v57 = vld [vmem:[%s15191_s13 + $0x1f0] ss:$8 sps:$4 sm:$0xff]  }
 0x976   : > { %v10401_v39 = vld [vmem:[%s15191_s13 + $0x204] ss:$8 sps:$4 sm:$0xff]   ;;  %v10399_v45 = vld [vmem:[%s15191_s13 + $0x200] ss:$8 sps:$4 sm:$0xff]   ;;  %v10404_v7 = vld [vmem:[%s15191_s13 + $0x214] ss:$8 sps:$4 sm:$0xff]  }
 0x977   : > { %v10402_v60 = vld [vmem:[%s15191_s13 + $0x210] ss:$8 sps:$4 sm:$0xff]   ;;  %v10407_v42 = vld [vmem:[%s15191_s13 + $0x224] ss:$8 sps:$4 sm:$0xff]   ;;  %v10405_v27 = vld [vmem:[%s15191_s13 + $0x220] ss:$8 sps:$4 sm:$0xff]  }
 0x978   : > { %v10410_v56 = vld [vmem:[%s15191_s13 + $0x234] ss:$8 sps:$4 sm:$0xff]   ;;  %v10408_v5 = vld [vmem:[%s15191_s13 + $0x230] ss:$8 sps:$4 sm:$0xff]   ;;  %v7189_v63 = vld [vmem:[%s15192_s14] sm:$0x3] }
 0x979   : > { %v14436_v61 = vld [vmem:[#allocation2 + $0x50] sm:$0x1]  ;;  %v14455_v55 = vadd.s32 2, %v14223_v59  ;;  %vm7791_vm14 = vcmask 1043456   ;;  %vm7848_vm10 = vcmask 1041408   ;;  %vm15732_vm4 = vmmov %vm15731_vm0 }
 0x97a   : > { %v7116_v41 = vld [vmem:[#allocation3 + $0x20] sm:$0xff]  ;;  %v14438_v21 = vld [vmem:[#allocation2 + $0x50] sm:$0x3] }
 0x97b   : > { %v14440_v40 = vld [vmem:[#allocation2 + $0x50] sm:$0xf]  ;;  %vm7752_vm15 = vcmp.lt.s32.totalorder %v14455_v55, 4  ;;  %v10412_v55 = vld [vmem:[%s15193_s15] sm:$0xff]  }
 0x97c   : > { %v14442_v13 = vld [vmem:[#allocation2 + $0x50] sm:$0x1f] }
 0x97d   : > { %v14444_v9 = vld [vmem:[#allocation2 + $0x50] sm:$0x3f]  ;;  %v7824_v59 = vrot.slane %v14442_v13, 5 }
 0x97e   : > { %8170 = vst.msk [vmem:[#allocation2 + $0x50] sm:$0x1f] %vm8169_vm5, %v14446_v38  ;;  %vm15735_vm5 = vmmov %vm15731_vm0 }
 0x9dd   : > { %v6987_v58 = vpop.permute.xlu1 %6986  ;;  %v7039_v37 = vpop.permute.xlu0 %7038 }
 0x9de   : > { %6990 = vst.msk [vmem:[#allocation3] sm:$0xff] %vm6989_vm7, %v6987_v58  ;;  %7041 = vst.msk [vmem:[#allocation3 + $0x8] sm:$0xff] %vm6989_vm7, %v7039_v37  ;;  %v7194_v58 = vrot.slane %v7189_v63, %v7193_v17  ;;  %v7198_v37 = vrot.slane %v7189_v63, %v7197_v16 }
 0x9e1   : > { %v7061_v29 = vpop.permute.xlu1 %7060  ;;  %v7092_v53 = vpop.permute.xlu0 %7091 }
 0x9e2   : > { %7063 = vst.msk [vmem:[#allocation3 + $0x10] sm:$0xff] %vm6989_vm7, %v7061_v29  ;;  %7094 = vst.msk [vmem:[#allocation3 + $0x18] sm:$0xff] %vm6989_vm7, %v7092_v53  ;;  %v7880_v29 = vld [vmem:[#allocation2 + $0x68] sm:$0x1]  ;;  %v7729_v53 = vrot.slane %v14436_v61, 1 }
 0x9e3   : > { %vm15733_vm7 = vmmov %vm15728_vm11 }
 0x9e5   : > { %v7113_v22 = vld [vmem:[#allocation3 + $0x8] sm:$0xff]  ;;  %v7112_v11 = vld [vmem:[#allocation3] sm:$0xff] }
 0x9e6   : > { %7596 = vmatprep.mubr.bf16.mxu1 %v7113_v22  ;;  %v7798_v22 = vrot.slane %v14440_v40, 4 }
 0x9e7   : > { %7597 = vmatmul.mubr.bf16.vlgmr.msra.gmra.mrb[68].mxu1 %v7112_v11  ;;  %v7712_v11 = vld [vmem:[#allocation2 + $0x58] sm:$0x1] }
 0x9e8   : > { %7608 = vmatpush1.bf16.msra.mxu1 %v10351_v32  ;;  %v7767_v32 = vrot.slane %v14438_v21, 2 }
 0x9e9   : > { %7609 = vmatprep.subr.bf16.mxu1 %v10356_v0  ;;  %v7115_v25 = vld [vmem:[#allocation3 + $0x18] sm:$0xff]  ;;  %v7114_v24 = vld [vmem:[#allocation3 + $0x10] sm:$0xff] }
 0x9ea   : > { %7639 = vmatprep.mubr.bf16.mxu1 %v7115_v25 }
 0x9ec   : > { %7610 = vmatpush1.bf16.msra.mxu1 %v10354_v6 }
 0x9ed   : > { %7611 = vmatprep.subr.bf16.mxu1 %v10359_v4  ;;  %v7748_v4 = vld [vmem:[#allocation2 + $0x58] sm:$0x3] }
 0x9f0   : > { %7612 = vmatpush1.bf16.msra.mxu1 %v10357_v26  ;;  %v14468_v26 = vld [vmem:[#allocation2 + $0x58] sm:$0xf] }
 0x9f1   : > { %7613 = vmatprep.subr.bf16.mxu1 %v10362_v54  ;;  %v7895_v54 = vrot.slane %v7880_v29, 1 }
 0x9f4   : > { %7614 = vmatpush1.bf16.msra.mxu1 %v10360_v10 }
 0x9f5   : > { %7615 = vmatprep.subr.bf16.mxu1 %v10365_v19 }
 0x9f8   : > { %7616 = vmatpush1.bf16.msra.mxu1 %v10363_v46  ;;  %v7855_v46 = vrot.slane %v14444_v9, 6 }
 0x9f9   : > { %7617 = vmatprep.subr.bf16.mxu1 %v10368_v20  ;;  %v14473_v20 = vld [vmem:[#allocation2 + $0x58] sm:$0x1f] }
 0x9fc   : > { %7618 = vmatpush1.bf16.msra.mxu1 %v10366_v8  ;;  %v14475_v8 = vld [vmem:[#allocation2 + $0x58] sm:$0x3f] }
 0x9fd   : > { %7619 = vmatprep.subr.bf16.mxu1 %v10371_v33 }
 0xa00   : > { %7620 = vmatpush1.bf16.msra.mxu1 %v10369_v28 }
 0xa01   : > { %7621 = vmatprep.subr.bf16.mxu1 %v10374_v35 }
 0xa04   : > { %7622 = vmatpush1.bf16.msra.mxu1 %v10372_v48  ;;  %v7731_v48 = vrot.slane %v7712_v11, 1 }
 0xa05   : > { %7623 = vmatprep.subr.bf16.mxu1 %v10377_v36  ;;  %v14479_v36 = vrot.slane %v14446_v38, 1 }
 0xa08   : > { %7624 = vmatpush1.bf16.msra.mxu1 %v10375_v44  ;;  %v7912_v44 = vld [vmem:[#allocation2 + $0x68] sm:$0x3] }
 0xa09   : > { %7625 = vmatprep.subr.bf16.mxu1 %v10380_v52 }
 0xa0c   : > { %7626 = vmatpush1.bf16.msra.mxu1 %v10378_v47 }
 0xa0d   : > { %7627 = vmatprep.subr.bf16.mxu1 %v10383_v43  ;;  %v7769_v43 = vrot.slane %v7748_v4, 2 }
 0xa10   : > { %7628 = vmatpush1.bf16.msra.mxu1 %v10381_v15  ;;  %v14483_v15 = vadd.s32 2, %v14220_v14  ;;  %v7857_v14 = vrot.slane %v14475_v8, 6 }
 0xa11   : > { %7629 = vmatprep.subr.bf16.mxu1 %v10386_v1 }
 0xa12   : > { %vm7751_vm13 = vcmp.lt.s32.totalorder %v14483_v15, 4  ;;  %v10413_v15 = vld [vmem:[%s15193_s15 + $0x48] sm:$0xff]  }
 0xa14   : > { %7630 = vmatpush1.bf16.msra.mxu1 %v10384_v31  ;;  %v7800_v31 = vrot.slane %v14468_v26, 4 }
 0xa15   : > { %7631 = vmatprep.subr.bf16.mxu1 %v10389_v23  ;;  %v7826_v23 = vrot.slane %v14473_v20, 5 }
 0xa18   : > { %7632 = vmatpush1.bf16.msra.mxu1 %v10387_v2  ;;  %v7896_v2 = vsel %vm15714_vm6, %v14479_v36, %v7895_v54  ;;  %vm15738_vm6 = vcmask 1040384  }
 0xa19   : > { %7633 = vmatprep.subr.bf16.mxu1 %v10392_v49 }
 0xa1c   : > { %7634 = vmatpush1.bf16.msra.mxu1 %v10390_v50  ;;  %v14499_v50 = vrot.slane %v14446_v38, 2 }
 0xa1d   : > { %7635 = vmatprep.subr.bf16.mxu1 %v10395_v3  ;;  %v7925_v3 = vrot.slane %v7912_v44, 2 }
 0xa20   : > { %7636 = vmatpush1.bf16.msra.mxu1 %v10393_v51 }
 0xa21   : > { %7637 = vmatprep.subr.bf16.mxu1 %v10398_v34 }
 0xa24   : > { %7638 = vmatpush1.bf16.msra.mxu1 %v10396_v57 }
 0xa25   : > { %7650 = vmatprep.subr.bf16.mxu1 %v10401_v39 }
 0xa27   : > { %7640 = vmatmul.mubr.bf16.vlgmr.msra.gmra.mrb[68].mxu1 %v7114_v24 }
 0xa28   : > { %7651 = vmatpush1.bf16.msra.mxu1 %v10399_v45  ;;  %7682 = vmatprep.mubr.bf16.mxu1 %v15718_v18  ;;  %v14506_v45 = vld [vmem:[#allocation2 + $0x60] sm:$0x1] }
 0xa29   : > { %7652 = vmatprep.subr.bf16.mxu1 %v10404_v7  ;;  %v7893_v13 = vrot.slane %v14506_v45, 1 }
 0xa2c   : > { %7653 = vmatpush1.bf16.msra.mxu1 %v10402_v60 }
 0xa2d   : > { %7654 = vmatprep.subr.bf16.mxu1 %v10407_v42  ;;  %v14515_v42 = vsel %vm6999_vm2, %v7896_v2, 0.0 }
 0xa30   : > { %7655 = vmatpush1.bf16.msra.mxu1 %v10405_v27 }
 0xa31   : > { %7656 = vmatprep.subr.bf16.mxu1 %v10410_v56 }
 0xa34   : > { %7657 = vmatpush1.bf16.msra.mxu1 %v10408_v5 }
 0xa37   : > { %9690 = vmatmul.mubr.msk.bf16.vlgmr.msra.gmra.mrb[68].mxu1 %vm15728_vm11, %v7116_v41  ;;  %vm15734_vm11 = vmmov %vm15731_vm0 }
 0xb0a   : > { %v7684_v0 = vpop.f32.mrb[68].mxu1 }
 0xb0b   : > { %v14466_v6 = vadd.f32 %v7684_v0, %v7194_v58  ;;  %v7686_v25 = vpop.f32.mrb[69].mxu1 }
 0xb0c   : > { %v14470_v10 = vadd.f32 %v7686_v25, %v7198_v37  ;;  %v7688_v19 = vpop.f32.mrb[70].mxu1 }
 0xb0d   : > { %v7693_v33 = vmax.f32 %v14466_v6, 0.0  ;;  %v10177_v28 = vadd.f32 %v7688_v19, %v7194_v58  ;;  %v7690_v35 = vpop.f32.mrb[71].mxu1 }
 0xb0e   : > { %v7694_v52 = vmax.f32 %v14470_v10, 0.0  ;;  %v10178_v47 = vadd.f32 %v7690_v35, %v7198_v37 }
 0xb0f   : > { %7697 = vst [vmem:[#allocation2 + $0x30] sm:$0xff] %v7693_v33  ;;  %v14487_v1 = vmax.f32 %v10177_v28, 0.0 }
 0xb10   : > { %7698 = vst [vmem:[#allocation2 + $0x38] sm:$0xff] %v7694_v52  ;;  %v14495_v49 = vmax.f32 %v10178_v47, 0.0 }
 0xb11   : > { %7699 = vst [vmem:[#allocation2 + $0x40] sm:$0xff] %v14487_v1  ;;  %v7724_v51 = vrot.slane %v14487_v1, 1  ;;  %v7762_v34 = vrot.slane %v14487_v1, 2  ;;  %v7793_v57 = vrot.slane %v14487_v1, 4  ;;  %v7819_v39 = vrot.slane %v14487_v1, 5 }
 0xb12   : > { %v7850_v7 = vrot.slane %v14487_v1, 6  ;;  %7700 = vst [vmem:[#allocation2 + $0x48] sm:$0xff] %v14495_v49  ;;  %v7727_v24 = vrot.slane %v14495_v49, 1  ;;  %v7765_v60 = vrot.slane %v14495_v49, 2  ;;  %v7796_v40 = vrot.slane %v14495_v49, 4 }
 0xb13   : > { %v7730_v27 = vsel %vm15729_vm9, %v7724_v51, %v7729_v53  ;;  %v7768_v56 = vsel %vm4714_vm1, %v7762_v34, %v7767_v32  ;;  %v7799_v5 = vsel %vm7791_vm14, %v7793_v57, %v7798_v22  ;;  %v7825_v41 = vsel %vm7009_vm8, %v7819_v39, %v7824_v59 }
 0xb14   : > { %v7739_v61 = vsel %vm6999_vm2, %v7730_v27, 0.0  ;;  %v7856_v21 = vsel %vm7848_vm10, %v7850_v7, %v7855_v46  ;;  %v7777_v63 = vsel %vm7752_vm15, %v7768_v56, 0.0  ;;  %v7834_v58 = vsel %vm6999_vm2, %v7825_v41, 0.0 }
 0xb15   : > { %v7743_v9 = vmax.f32 %v14487_v1, %v7739_v61  ;;  %v7732_v37 = vsel %vm15730_vm12, %v7727_v24, %v7731_v48  ;;  %v14544_v22 = vsel %vm4714_vm1, %v14499_v50, %v7925_v3  ;;  %v14548_v11 = vsel %vm7752_vm15, %v7856_v21, 0.0  ;;  %vm15740_vm12 = vmmov %vm15733_vm7 }
 0xb16   : > { %v7707_v29 = vld [vmem:[#allocation2 + $0x30] sm:$0xfe]  ;;  %v7770_v4 = vsel %vm4714_vm1, %v7765_v60, %v7769_v43  ;;  %v7740_v54 = vsel %vm6999_vm2, %v7732_v37, 0.0  ;;  %v7801_v46 = vsel %vm7791_vm14, %v7796_v40, %v7800_v31  ;;  %v7822_v28 = vrot.slane %v14495_v49, 5 }
 0xb17   : > { %v7745_v53 = vld [vmem:[#allocation2 + $0x30] sm:$0xfc]  ;;  %v7723_v0 = vrot.slane %v7707_v29, 1  ;;  %v7781_v59 = vmax.f32 %v7743_v9, %v7777_v63  ;;  %v7708_v25 = vld [vmem:[#allocation2 + $0x38] sm:$0xfe]  ;;  %v7744_v3 = vmax.f32 %v14495_v49, %v7740_v54  ;;  %v7778_v61 = vsel %vm7752_vm15, %v7770_v4, 0.0 }
 0xb18   : > { %v14540_v32 = vld [vmem:[#allocation2 + $0x30] sm:$0xf0]  ;;  %v7726_v26 = vrot.slane %v7708_v25, 1  ;;  %v7746_v19 = vld [vmem:[#allocation2 + $0x38] sm:$0xfc]  ;;  %v7761_v48 = vrot.slane %v7745_v53, 2  ;;  %v7827_v6 = vsel %vm7009_vm8, %v7822_v28, %v7826_v23 }
 0xb19   : > { %v7725_v35 = vsel %vm15731_vm0, %v7723_v0, %v7724_v51  ;;  %v7792_v44 = vrot.slane %v14540_v32, 4  ;;  %v7808_v47 = vmax.f32 %v7781_v59, %v7799_v5  ;;  %v7764_v27 = vrot.slane %v7746_v19, 2  ;;  %v7784_v56 = vld [vmem:[#allocation2 + $0x38] sm:$0xf0]  ;;  %v7910_v0 = vld [vmem:[#allocation2 + $0x48] sm:$0xfc] }
 0xb1a   : > { %v7737_v2 = vsel %vm6998_vm3, %v7725_v35, 0.0  ;;  %v7728_v43 = vsel %vm15732_vm4, %v7726_v26, %v7727_v24  ;;  %v7811_v5 = vld [vmem:[#allocation2 + $0x38] sm:$0xe0]  ;;  %v7782_v63 = vmax.f32 %v7744_v3, %v7778_v61  ;;  %v7853_v29 = vrot.slane %v14495_v49, 6  ;;  %v7911_v26 = vld [vmem:[#allocation2 + $0x60] sm:$0x3] }
 0xb1b   : > { %v7741_v31 = vmax.f32 %v7693_v33, %v7737_v2  ;;  %v7838_v41 = vmax.f32 %v7808_v47, %v7834_v58  ;;  %v7738_v51 = vsel %vm6998_vm3, %v7728_v43, 0.0  ;;  %v7841_v21 = vld [vmem:[#allocation2 + $0x38] sm:$0xc0]  ;;  %v7766_v24 = vsel %vm4714_vm1, %v7764_v27, %v7765_v60  ;;  %v14573_v33 = vld [vmem:[#allocation2 + $0x40] sm:$0xfe] }
 0xb1c   : > { %v7742_v9 = vmax.f32 %v7694_v52, %v7738_v51  ;;  %v14575_v58 = vld [vmem:[#allocation2 + $0x40] sm:$0xfc]  ;;  %v7776_v53 = vsel %vm7751_vm13, %v7766_v24, 0.0  ;;  %v7795_v10 = vrot.slane %v7784_v56, 4  ;;  %v7878_v52 = vld [vmem:[#allocation2 + $0x48] sm:$0xfe]  ;;  %v7809_v60 = vmax.f32 %v7782_v63, %v7801_v46 }
 0xb1d   : > { %v7869_v37 = vmax.f32 %v7838_v41, %v14548_v11  ;;  %8168 = vst.msk [vmem:[#allocation2 + $0x40] sm:$0xff] %vm15733_vm7, %v14446_v38  ;;  %v7821_v32 = vrot.slane %v7811_v5, 5  ;;  %v7852_v23 = vrot.slane %v7841_v21, 6  ;;  %v7763_v59 = vsel %vm4714_vm1, %v7761_v48, %v7762_v34  ;;  %v7810_v47 = vld [vmem:[#allocation2 + $0x30] sm:$0xe0] }
 0xb1e   : > { %v7780_v20 = vmax.f32 %v7742_v9, %v7776_v53  ;;  %v7835_v11 = vsel %vm6999_vm2, %v7827_v6, 0.0  ;;  %v7858_v25 = vsel %vm7848_vm10, %v7853_v29, %v7857_v14  ;;  %v7797_v4 = vsel %vm7791_vm14, %v7795_v10, %v7796_v40  ;;  %v7840_v2 = vld [vmem:[#allocation2 + $0x30] sm:$0xc0] }
 0xb1f   : > { %v7839_v54 = vmax.f32 %v7809_v60, %v7835_v11  ;;  %v7823_v46 = vsel %vm7009_vm8, %v7821_v32, %v7822_v28  ;;  %v7890_v35 = vrot.slane %v7878_v52, 1  ;;  %v7866_v34 = vsel %vm7752_vm15, %v7858_v25, 0.0 }
 0xb20   : > { %v7807_v19 = vmax.f32 %v7780_v20, %v7797_v4  ;;  %v7833_v48 = vsel %vm6998_vm3, %v7823_v46, 0.0  ;;  %v7854_v8 = vsel %vm7848_vm10, %v7852_v23, %v7853_v29  ;;  %v7920_v43 = vrot.slane %v7910_v0, 2  ;;  %v10415_v46 = vld [vmem:[%s15193_s15 + $0x50] sm:$0xff]  }
 0xb21   : > { %v7870_v14 = vmax.f32 %v7839_v54, %v7866_v34  ;;  %v7894_v40 = vsel %vm15734_vm11, %v14479_v36, %v7893_v13  ;;  %v7923_v28 = vrot.slane %v7911_v26, 2  ;;  %v7864_v27 = vsel %vm7751_vm13, %v7854_v8, 0.0  ;;  %v10419_v34 = vld [vmem:[%s15193_s15 + $0x60] sm:$0xff]   ;;  %v10421_v8 = vld [vmem:[%s15193_s15 + $0x68] sm:$0xff]  }
 0xb22   : > { %v7837_v3 = vmax.f32 %v7807_v19, %v7833_v48  ;;  %v7775_v56 = vsel %vm7751_vm13, %v7763_v59, 0.0  ;;  %v7818_v41 = vrot.slane %v7810_v47, 5  ;;  %v7849_v51 = vrot.slane %v7840_v2, 6  ;;  %v10417_v47 = vld [vmem:[%s15193_s15 + $0x58] sm:$0xff]   ;;  %v10420_v48 = vld [vmem:[%s15193_s15 + $0x20] sm:$0xff]  }
 0xb23   : > { %v7876_v5 = vmax.f32 %v7870_v14, %v14446_v38  ;;  %v7892_v21 = vsel %vm15735_vm5, %v7890_v35, %v14479_v36  ;;  %v7779_v9 = vmax.f32 %v7741_v31, %v7775_v56  ;;  %v7794_v45 = vsel %vm7791_vm14, %v7792_v44, %v7793_v57  ;;  %vm15736_vm14 = vmmov %vm15731_vm0  ;;  %v10416_v35 = vld [vmem:[%s15193_s15 + $0x10] sm:$0xff]   ;;  %v10418_v2 = vld [vmem:[%s15193_s15 + $0x18] sm:$0xff]  }
 0xb24   : > { %v7868_v61 = vmax.f32 %v7837_v3, %v7864_v27  ;;  %v7922_v13 = vsel %vm4714_vm1, %v7920_v43, %v14499_v50  ;;  %v7820_v24 = vsel %vm7009_vm8, %v7818_v41, %v7819_v39  ;;  %v7851_v63 = vsel %vm7848_vm10, %v7849_v51, %v7850_v7  ;;  %v10422_v43 = vld [vmem:[%s15193_s15 + $0x28] sm:$0xff]   ;;  %v10423_v14 = vld [vmem:[%s15193_s15 + $0x70] sm:$0xff]   ;;  %vm15741_vm0 = vmmov %vm15733_vm7 }
 0xb25   : > { %v7908_v29 = vmax.f32 %v7876_v5, %v14515_v42  ;;  %v7806_v31 = vmax.f32 %v7779_v9, %v7794_v45  ;;  %v7887_v53 = vrot.slane %v14573_v33, 1  ;;  %v7902_v57 = vsel %vm6998_vm3, %v7892_v21, 0.0  ;;  %v10424_v3 = vld [vmem:[%s15193_s15 + $0x30] sm:$0xff]   ;;  %v10430_v45 = vld [vmem:[%s15195_s17 + $0x8] ss:$16 sps:$4 sm:$0xff]  }
 0xb26   : > { %v7874_v6 = vmax.f32 %v7868_v61, %v14495_v49  ;;  %v7934_v44 = vsel %vm7752_vm15, %v14544_v22, 0.0  ;;  %v7832_v39 = vsel %vm6998_vm3, %v7820_v24, 0.0  ;;  %v7875_v10 = vmax.f32 %v7869_v37, %v14446_v38  ;;  %v10427_v21 = vld [vmem:[%s15195_s17] ss:$16 sps:$4 sm:$0xff]   ;;  %v10429_v9 = vld [vmem:[%s15195_s17 + $0x4] ss:$16 sps:$4 sm:$0xff]  }
 0xb27   : > { %v7836_v52 = vmax.f32 %v7806_v31, %v7832_v39  ;;  %v7917_v49 = vrot.slane %v14575_v58, 2  ;;  %v7932_v42 = vsel %vm7751_vm13, %v7922_v13, 0.0  ;;  %v7863_v33 = vsel %vm7751_vm13, %v7851_v63, 0.0  ;;  %v10432_v13 = vld [vmem:[%s15195_s17 + $0xc] ss:$16 sps:$4 sm:$0xff]  }
 0xb28   : > { %v7906_v7 = vmax.f32 %v7874_v6, %v7902_v57  ;;  %v7903_v60 = vsel %vm6999_vm2, %v7894_v40, 0.0  ;;  %v7924_v22 = vsel %vm4714_vm1, %v14499_v50, %v7923_v28  ;;  %v7938_v32 = vmax.f32 %v7908_v29, %v7934_v44  ;;  %v10425_v40 = vld [vmem:[%s15193_s15 + $0x78] sm:$0xff]   ;;  %9284 = vmatprep.subr.bf16.mxu1 %v10432_v13  ;;  %v10433_v63 = vld [vmem:[%s15195_s17 + $0x20] ss:$16 sps:$4 sm:$0xff]   ;;  %v10441_v29 = vld [vmem:[%s15195_s17 + $0x44] ss:$16 sps:$4 sm:$0xff]  }
 0xb29   : > { %v7867_v23 = vmax.f32 %v7836_v52, %v7863_v33  ;;  %v7889_v37 = vsel %vm15736_vm14, %v7887_v53, %v14479_v36  ;;  %v7907_v59 = vmax.f32 %v7875_v10, %v7903_v60  ;;  %v7919_v11 = vsel %vm4714_vm1, %v7917_v49, %v14499_v50  ;;  %v10414_v50 = vld [vmem:[%s15193_s15 + $0x8] sm:$0xff]   ;;  %v10426_v28 = vld [vmem:[%s15193_s15 + $0x38] sm:$0xff]   ;;  %9285 = vmatpush1.bf16.msra.mxu1 %v10430_v45  ;;  %v10439_v53 = vld [vmem:[%s15195_s17 + $0x40] ss:$16 sps:$4 sm:$0xff]  }
 0xb2a   : > { %v7936_v20 = vmax.f32 %v7906_v7, %v7932_v42  ;;  %v7901_v30 = vsel %vm6998_vm3, %v7889_v37, 0.0  ;;  %v7933_v25 = vsel %vm7752_vm15, %v7924_v22, 0.0  ;;  %v7931_v26 = vsel %vm7751_vm13, %v7919_v11, 0.0  ;;  %v10438_v24 = vld [vmem:[%s15195_s17 + $0x2c] ss:$16 sps:$4 sm:$0xff]  }
 0xb2b   : > { %v7873_v58 = vmax.f32 %v7867_v23, %v14487_v1  ;;  %v7937_v36 = vmax.f32 %v7907_v59, %v7933_v25  ;;  %v10411_v1 = vld [vmem:[%s15193_s15 + $0x40] sm:$0xff]   ;;  %vm15737_vm1 = vcmask 130048   ;;  %vm8166_vm3 = vcmask 523268   ;;  %v10436_v6 = vld [vmem:[%s15195_s17 + $0x28] ss:$16 sps:$4 sm:$0xff]   ;;  %9286 = vmatprep.subr.bf16.mxu1 %v10438_v24 }
 0xb2c   : > { %v7941_v0 = vpack.c.bf16 %v7938_v32, %v7936_v20  ;;  %8167 = vst.msk [vmem:[#allocation2 + $0x30] sm:$0xf0] %vm8166_vm3, %v14446_v38  ;;  %v10435_v38 = vld [vmem:[%s15195_s17 + $0x24] ss:$16 sps:$4 sm:$0xff]   ;;  %v10444_v31 = vld [vmem:[%s15195_s17 + $0x4c] ss:$16 sps:$4 sm:$0xff]  }
 0xb2d   : > { %v7905_v4 = vmax.f32 %v7873_v58, %v7901_v30  ;;  %9287 = vmatpush1.bf16.msra.mxu1 %v10436_v6  ;;  %v10442_v57 = vld [vmem:[%s15195_s17 + $0x48] ss:$16 sps:$4 sm:$0xff]   ;;  %v10447_v44 = vld [vmem:[%s15195_s17 + $0x64] ss:$16 sps:$4 sm:$0xff]   ;;  %v10450_v39 = vld [vmem:[%s15195_s17 + $0x6c] ss:$16 sps:$4 sm:$0xff]  }
 0xb2e   : > { %7945 = vmatprep.subr.bf16.mxu0 %v7941_v0  ;;  %9288 = vmatprep.subr.bf16.mxu1 %v10444_v31  ;;  %v10445_v10 = vld [vmem:[%s15195_s17 + $0x60] ss:$16 sps:$4 sm:$0xff]   ;;  %v10448_v7 = vld [vmem:[%s15195_s17 + $0x68] ss:$16 sps:$4 sm:$0xff]   ;;  %v10453_v52 = vld [vmem:[%s15195_s17 + $0x84] ss:$16 sps:$4 sm:$0xff]  }
 0xb2f   : > { %v7935_v54 = vmax.f32 %v7905_v4, %v7931_v26  ;;  %v10456_v49 = vld [vmem:[%s15195_s17 + $0x8c] ss:$16 sps:$4 sm:$0xff]   ;;  %v10451_v42 = vld [vmem:[%s15195_s17 + $0x80] ss:$16 sps:$4 sm:$0xff]   ;;  %v10454_v33 = vld [vmem:[%s15195_s17 + $0x88] ss:$16 sps:$4 sm:$0xff]  }
 0xb30   : > { %v10459_v60 = vld [vmem:[%s15195_s17 + $0xa4] ss:$16 sps:$4 sm:$0xff]   ;;  %v10462_v22 = vld [vmem:[%s15195_s17 + $0xac] ss:$16 sps:$4 sm:$0xff]   ;;  %v10457_v20 = vld [vmem:[%s15195_s17 + $0xa0] ss:$16 sps:$4 sm:$0xff]  }
 0xb31   : > { %v7940_v19 = vpack.c.bf16 %v7937_v36, %v7935_v54  ;;  %9289 = vmatpush1.bf16.msra.mxu1 %v10442_v57  ;;  %v10460_v32 = vld [vmem:[%s15195_s17 + $0xa8] ss:$16 sps:$4 sm:$0xff]   ;;  %v10465_v23 = vld [vmem:[%s15195_s17 + $0xc4] ss:$16 sps:$4 sm:$0xff]   ;;  %v10468_v37 = vld [vmem:[%s15195_s17 + $0xcc] ss:$16 sps:$4 sm:$0xff]  }
 0xb32   : > { %9290 = vmatprep.subr.bf16.mxu1 %v10450_v39  ;;  %v10463_v0 = vld [vmem:[%s15195_s17 + $0xc0] ss:$16 sps:$4 sm:$0xff]   ;;  %v10466_v58 = vld [vmem:[%s15195_s17 + $0xc8] ss:$16 sps:$4 sm:$0xff]   ;;  %v10471_v59 = vld [vmem:[%s15195_s17 + $0xe4] ss:$16 sps:$4 sm:$0xff]  }
 0xb33   : > { %7946 = vmatpush1.bf16.msra.mxu0 %v7940_v19  ;;  %v10474_v11 = vld [vmem:[%s15195_s17 + $0xec] ss:$16 sps:$4 sm:$0xff]   ;;  %v10469_v30 = vld [vmem:[%s15195_s17 + $0xe0] ss:$16 sps:$4 sm:$0xff]   ;;  %v10472_v25 = vld [vmem:[%s15195_s17 + $0xe8] ss:$16 sps:$4 sm:$0xff]  }
 0xb34   : > { %10009 = vmatprep.subr.bf16.mxu0 %v10411_v1  ;;  %v10477_v4 = vld [vmem:[%s15195_s17 + $0x104] ss:$16 sps:$4 sm:$0xff]   ;;  %v10480_v26 = vld [vmem:[%s15195_s17 + $0x10c] ss:$16 sps:$4 sm:$0xff]   ;;  %v10475_v54 = vld [vmem:[%s15195_s17 + $0x100] ss:$16 sps:$4 sm:$0xff]  }
 0xb35   : > { %9291 = vmatpush1.bf16.msra.mxu1 %v10448_v7  ;;  %v10478_v36 = vld [vmem:[%s15195_s17 + $0x108] ss:$16 sps:$4 sm:$0xff]   ;;  %v10483_v1 = vld [vmem:[%s15195_s17 + $0x124] ss:$16 sps:$4 sm:$0xff]   ;;  %v10486_v19 = vld [vmem:[%s15195_s17 + $0x12c] ss:$16 sps:$4 sm:$0xff]  }
 0xb36   : > { %9691 = vmatmul.mubr.msk.bf16.vlgmr.msra.gmra.mrb[116].mxu0 %vm15737_vm1, %v7939_v12  ;;  %9292 = vmatprep.subr.bf16.mxu1 %v10456_v49  ;;  %v10481_v12 = vld [vmem:[%s15195_s17 + $0x120] ss:$16 sps:$4 sm:$0xff]   ;;  %v8171_v13 = vand.u32 1, %v15664_v62  ;;  %vm8164_vm2 = vcmask 519168   ;;  %vm8189_vm15 = vcmask 517120   ;;  %vm8199_vm9 = vcmask 1041920  }
 0xb37   : > { %10010 = vmatpush3.bf16.msra.mxu0 %v10412_v55  ;;  %v10484_v55 = vld [vmem:[%s15195_s17 + $0x128] ss:$16 sps:$4 sm:$0xff]   ;;  %v10511_v6 = vld [vmem:[%s15195_s17 + $0x1c0] ss:$16 sps:$4 sm:$0xff]   ;;  %v10516_v57 = vld [vmem:[%s15195_s17 + $0x1cc] ss:$16 sps:$4 sm:$0xff]  }
 0xb38   : > { %10011 = vmatprep.subr.bf16.mxu0 %v10413_v15  ;;  %v10489_v15 = vld [vmem:[%s15195_s17 + $0x144] ss:$16 sps:$4 sm:$0xff]   ;;  %v10514_v31 = vld [vmem:[%s15195_s17 + $0x1c8] ss:$16 sps:$4 sm:$0xff]   ;;  %v10517_v7 = vld [vmem:[%s15195_s17 + $0x1e0] ss:$16 sps:$4 sm:$0xff]  }
 0xb39   : > { %9293 = vmatpush1.bf16.msra.mxu1 %v10454_v33  ;;  %v8218_v39 = vld [vmem:[#allocation2 + $0x20] sm:$0x80]  ;;  %v10520_v49 = vld [vmem:[%s15195_s17 + $0x1e8] ss:$16 sps:$4 sm:$0xff]  }
 0xb3a   : > { %9294 = vmatprep.subr.bf16.mxu1 %v10462_v22  ;;  %v8191_v33 = vld [vmem:[#allocation2 + $0x20] sm:$0xc0]  ;;  %v8203_v22 = vadd.s32 1, %v8171_v13 }
 0xb3b   : > { %10012 = vmatpush3.bf16.msra.mxu0 %v10414_v50  ;;  %v10492_v50 = vld [vmem:[%s15195_s17 + $0x14c] ss:$16 sps:$4 sm:$0xff]  }
 0xb3c   : > { %10013 = vmatprep.subr.bf16.mxu0 %v10415_v46  ;;  %v10487_v46 = vld [vmem:[%s15195_s17 + $0x140] ss:$16 sps:$4 sm:$0xff]   ;;  %vm8205_vm13 = vcmp.lt.s32.totalorder %v8203_v22, 2 }
 0xb3d   : > { %9295 = vmatpush1.bf16.msra.mxu1 %v10460_v32  ;;  %v10547_v22 = vld [vmem:[%s15195_s17 + $0x280] ss:$16 sps:$4 sm:$0xff]  }
 0xb3e   : > { %9296 = vmatprep.subr.bf16.mxu1 %v10468_v37 }
 0xb3f   : > { %10014 = vmatpush3.bf16.msra.mxu0 %v10416_v35  ;;  %v10490_v35 = vld [vmem:[%s15195_s17 + $0x148] ss:$16 sps:$4 sm:$0xff]  }
 0xb40   : > { %10015 = vmatprep.subr.bf16.mxu0 %v10417_v47  ;;  %v10495_v47 = vld [vmem:[%s15195_s17 + $0x164] ss:$16 sps:$4 sm:$0xff]  }
 0xb41   : > { %9297 = vmatpush1.bf16.msra.mxu1 %v10466_v58 }
 0xb42   : > { %9298 = vmatprep.subr.bf16.mxu1 %v10474_v11 }
 0xb43   : > { %10016 = vmatpush3.bf16.msra.mxu0 %v10418_v2  ;;  %v10498_v2 = vld [vmem:[%s15195_s17 + $0x16c] ss:$16 sps:$4 sm:$0xff]  }
 0xb44   : > { %10017 = vmatprep.subr.bf16.mxu0 %v10419_v34  ;;  %v10493_v34 = vld [vmem:[%s15195_s17 + $0x160] ss:$16 sps:$4 sm:$0xff]  }
 0xb45   : > { %9299 = vmatpush1.bf16.msra.mxu1 %v10472_v25 }
 0xb46   : > { %9300 = vmatprep.subr.bf16.mxu1 %v10480_v26 }
 0xb47   : > { %10018 = vmatpush3.bf16.msra.mxu0 %v10420_v48  ;;  %v10496_v48 = vld [vmem:[%s15195_s17 + $0x168] ss:$16 sps:$4 sm:$0xff]  }
 0xb48   : > { %10019 = vmatprep.subr.bf16.mxu0 %v10421_v8  ;;  %v10501_v8 = vld [vmem:[%s15195_s17 + $0x184] ss:$16 sps:$4 sm:$0xff]  }
 0xb49   : > { %9301 = vmatpush1.bf16.msra.mxu1 %v10478_v36 }
 0xb4a   : > { %9302 = vmatprep.subr.bf16.mxu1 %v10486_v19 }
 0xb4b   : > { %10020 = vmatpush3.bf16.msra.mxu0 %v10422_v43  ;;  %v10504_v43 = vld [vmem:[%s15195_s17 + $0x18c] ss:$16 sps:$4 sm:$0xff]  }
 0xb4c   : > { %10021 = vmatprep.subr.bf16.mxu0 %v10423_v14  ;;  %v10499_v14 = vld [vmem:[%s15195_s17 + $0x180] ss:$16 sps:$4 sm:$0xff]  }
 0xb4d   : > { %9303 = vmatpush1.bf16.msra.mxu1 %v10484_v55 }
 0xb4e   : > { %9304 = vmatprep.subr.bf16.mxu1 %v10492_v50 }
 0xb4f   : > { %10022 = vmatpush3.bf16.msra.mxu0 %v10424_v3  ;;  %v10502_v3 = vld [vmem:[%s15195_s17 + $0x188] ss:$16 sps:$4 sm:$0xff]  }
 0xb50   : > { %10023 = vmatprep.subr.bf16.mxu0 %v10425_v40  ;;  %v10507_v40 = vld [vmem:[%s15195_s17 + $0x1a4] ss:$16 sps:$4 sm:$0xff]  }
 0xb51   : > { %9305 = vmatpush1.bf16.msra.mxu1 %v10490_v35 }
 0xb52   : > { %9306 = vmatprep.subr.bf16.mxu1 %v10498_v2 }
 0xb53   : > { %10024 = vmatpush3.bf16.msra.mxu0 %v10426_v28  ;;  %v10510_v28 = vld [vmem:[%s15195_s17 + $0x1ac] ss:$16 sps:$4 sm:$0xff]  }
 0xb54   : > { %9161 = vmatprep.subr.bf16.mxu0 %v10429_v9 }
 0xb55   : > { %9307 = vmatpush1.bf16.msra.mxu1 %v10496_v48  ;;  %v10528_v48 = vld [vmem:[%s15195_s17 + $0x20c] ss:$16 sps:$4 sm:$0xff]  }
 0xb56   : > { %9308 = vmatprep.subr.bf16.mxu1 %v10504_v43 }
 0xb59   : > { %9309 = vmatpush1.bf16.msra.mxu1 %v10502_v3 }
 0xb5a   : > { %9310 = vmatprep.subr.bf16.mxu1 %v10510_v28 }
 0xc09   : > { %v7979_v27 = vpop.f32.mrb[116].mxu0 }
 0xc0a   : > { %v7981_v56 = vpop.f32.mrb[117].mxu0  ;;  %v8018_v61 = vpack.c.bf16 %v7979_v27, %v7979_v27  ;;  %v10505_v27 = vld [vmem:[%s15195_s17 + $0x1a0] ss:$16 sps:$4 sm:$0xff]  }
 0xc0b   : > { %v8019_v41 = vpack.c.bf16 %v7981_v56, %v7981_v56  ;;  %v7983_v51 = vpop.f32.mrb[118].mxu0  ;;  %v10508_v56 = vld [vmem:[%s15195_s17 + $0x1a8] ss:$16 sps:$4 sm:$0xff]  }
 0xc0c   : > { %v7984_v5 = vpop.f32.mrb[119].mxu0  ;;  %9311 = vmatpush1.bf16.msra.mxu1 %v10508_v56  ;;  %v9692_v51 = vld [vmem:[%s15194_s16] ss:$0 sm:$0xff] }
 0xc0d   : > { %8155 = vmatprep.mubr.bf16.mxu0 %v8019_v41  ;;  %9312 = vmatprep.subr.bf16.mxu1 %v10516_v57 }
 0xc0e   : > { %8156 = vmatmul.mubr.bf16.vlgmr.msra.gmra.mrb[120].mxu0 %v8018_v61 }
 0xc0f   : > { %9162 = vmatpush1.bf16.msra.mxu0 %v10427_v21 }
 0xc10   : > { %9163 = vmatprep.subr.bf16.mxu0 %v10435_v38  ;;  %9313 = vmatpush1.bf16.msra.mxu1 %v10514_v31  ;;  %v10532_v31 = vld [vmem:[%s15195_s17 + $0x228] ss:$16 sps:$4 sm:$0xff]  }
 0xc13   : > { %9164 = vmatpush1.bf16.msra.mxu0 %v10433_v63  ;;  %v8175_v63 = vadd.s32 4294967295, %v8171_v13  ;;  %v10526_v13 = vld [vmem:[%s15195_s17 + $0x208] ss:$16 sps:$4 sm:$0xff]  }
 0xc14   : > { %9165 = vmatprep.subr.bf16.mxu0 %v10441_v29  ;;  %v10513_v29 = vld [vmem:[%s15195_s17 + $0x1c4] ss:$16 sps:$4 sm:$0xff]  }
 0xc15   : > { %vm8176_vm10 = vcmp.ge.s32.totalorder %v8175_v63, 0  ;;  %v10534_v63 = vld [vmem:[%s15195_s17 + $0x22c] ss:$16 sps:$4 sm:$0xff]  }
 0xc17   : > { %9166 = vmatpush1.bf16.msra.mxu0 %v10439_v53  ;;  %v8173_v53 = vld [vmem:[#allocation2 + $0x20] sm:$0xe0] }
 0xc18   : > { %9167 = vmatprep.subr.bf16.mxu0 %v10447_v44  ;;  %v10519_v44 = vld [vmem:[%s15195_s17 + $0x1e4] ss:$16 sps:$4 sm:$0xff]  }
 0xc1b   : > { %9168 = vmatpush1.bf16.msra.mxu0 %v10445_v10  ;;  %v10522_v10 = vld [vmem:[%s15195_s17 + $0x1ec] ss:$16 sps:$4 sm:$0xff]  }
 0xc1c   : > { %9169 = vmatprep.subr.bf16.mxu0 %v10453_v52  ;;  %v8183_v52 = vrot.slane %v8173_v53, 5  ;;  %9314 = vmatprep.subr.bf16.mxu1 %v10522_v10  ;;  %v10537_v53 = vld [vmem:[%s15195_s17 + $0x244] ss:$16 sps:$4 sm:$0xff]   ;;  %v10538_v10 = vld [vmem:[%s15195_s17 + $0x248] ss:$16 sps:$4 sm:$0xff]  }
 0xc1d   : > { %9315 = vmatpush1.bf16.msra.mxu1 %v10520_v49  ;;  %v10541_v49 = vld [vmem:[%s15195_s17 + $0x260] ss:$16 sps:$4 sm:$0xff]  }
 0xc1e   : > { %9325 = vmatprep.subr.bf16.mxu1 %v10528_v48  ;;  %v10591_v48 = vld [vmem:[%s15195_s17 + $0x364] ss:$16 sps:$4 sm:$0xff]  }
 0xc1f   : > { %9170 = vmatpush1.bf16.msra.mxu0 %v10451_v42  ;;  %v8222_v42 = vrot.slane %v8218_v39, 7  ;;  %v10535_v39 = vld [vmem:[%s15195_s17 + $0x240] ss:$16 sps:$4 sm:$0xff]  }
 0xc20   : > { %9171 = vmatprep.subr.bf16.mxu0 %v10459_v60  ;;  %v8201_v60 = vld [vmem:[#allocation2 + $0x20] sm:$0x80] }
 0xc23   : > { %9172 = vmatpush1.bf16.msra.mxu0 %v10457_v20 }
 0xc24   : > { %9173 = vmatprep.subr.bf16.mxu0 %v10465_v23 }
 0xc27   : > { %9174 = vmatpush1.bf16.msra.mxu0 %v10463_v0 }
 0xc28   : > { %9175 = vmatprep.subr.bf16.mxu0 %v10471_v59 }
 0xc2b   : > { %9176 = vmatpush1.bf16.msra.mxu0 %v10469_v30 }
 0xc2c   : > { %9177 = vmatprep.subr.bf16.mxu0 %v10477_v4  ;;  %v8211_v4 = vrot.slane %v8201_v60, 7  ;;  %v10552_v60 = vld [vmem:[%s15195_s17 + $0x28c] ss:$16 sps:$4 sm:$0xff]  }
 0xc2f   : > { %9178 = vmatpush1.bf16.msra.mxu0 %v10475_v54 }
 0xc30   : > { %9179 = vmatprep.subr.bf16.mxu0 %v10483_v1 }
 0xc33   : > { %9180 = vmatpush1.bf16.msra.mxu0 %v10481_v12 }
 0xc34   : > { %9181 = vmatprep.subr.bf16.mxu0 %v10489_v15 }
 0xc37   : > { %9182 = vmatpush1.bf16.msra.mxu0 %v10487_v46  ;;  %v10525_v46 = vld [vmem:[%s15195_s17 + $0x204] ss:$16 sps:$4 sm:$0xff]  }
 0xc38   : > { %9183 = vmatprep.subr.bf16.mxu0 %v10495_v47 }
 0xc3b   : > { %9184 = vmatpush1.bf16.msra.mxu0 %v10493_v34 }
 0xc3c   : > { %9185 = vmatprep.subr.bf16.mxu0 %v10501_v8 }
 0xc3f   : > { %9186 = vmatpush1.bf16.msra.mxu0 %v10499_v14 }
 0xc40   : > { %9187 = vmatprep.subr.bf16.mxu0 %v10507_v40 }
 0xc43   : > { %9188 = vmatpush1.bf16.msra.mxu0 %v10505_v27 }
 0xc44   : > { %9189 = vmatprep.subr.bf16.mxu0 %v10513_v29  ;;  %v10529_v29 = vld [vmem:[%s15195_s17 + $0x220] ss:$16 sps:$4 sm:$0xff]  }
 0xc47   : > { %9190 = vmatpush1.bf16.msra.mxu0 %v10511_v6 }
 0xc48   : > { %9191 = vmatprep.subr.bf16.mxu0 %v10519_v44  ;;  %v10540_v44 = vld [vmem:[%s15195_s17 + $0x24c] ss:$16 sps:$4 sm:$0xff]  }
 0xc4b   : > { %9192 = vmatpush1.bf16.msra.mxu0 %v10517_v7  ;;  %v10543_v7 = vld [vmem:[%s15195_s17 + $0x264] ss:$16 sps:$4 sm:$0xff]  }
 0xc4c   : > { %9202 = vmatprep.subr.bf16.mxu0 %v10525_v46  ;;  %v10580_v46 = vld [vmem:[%s15195_s17 + $0x328] ss:$16 sps:$4 sm:$0xff]  }
 0xce1   : > { %v10025_v41 = vpop.f32.mrb[120].mxu0 }
 0xce2   : > { %v10026_v61 = vpop.f32.mrb[121].mxu0 }
 0xce3   : > { %v10027_v5 = vadd.f32 %v10026_v61, %v10025_v41  ;;  %v10028_v21 = vpop.f32.mrb[122].mxu0 }
 0xce4   : > { %v10029_v9 = vpop.f32.mrb[123].mxu0 }
 0xce5   : > { %v8158_v45 = vadd.f32 %v10027_v5, %v9692_v51 }
 0xce7   : > { %v8163_v38 = vmax.f32 %v8158_v45, 0.0  ;;  %v10523_v45 = vld [vmem:[%s15195_s17 + $0x200] ss:$16 sps:$4 sm:$0xff]  }
 0xce9   : > { %v8172_v24 = vpack.c.bf16 %v8163_v38, %v8163_v38  ;;  %8165 = vst.msk [vmem:[#allocation2 + $0x30] sm:$0xf] %vm8164_vm2, %v8163_v38 }
 0xceb   : > { %8233 = vst.msk [vmem:[#allocation3 + $0x10] sm:$0x3] %vm8189_vm15, %v8172_v24  ;;  %v10531_v24 = vld [vmem:[%s15195_s17 + $0x224] ss:$16 sps:$4 sm:$0xff]  }
 0xcf0   : > { %v8219_v20 = vld [vmem:[#allocation2 + $0x30] sm:$0x7]  ;;  %v8260_v19 = vld [vmem:[#allocation2 + $0x30] sm:$0x78] }
 0xcf1   : > { %v8245_v32 = vld [vmem:[#allocation2 + $0x30] sm:$0x1e]  ;;  %v8174_v23 = vld [vmem:[#allocation2 + $0x30] sm:$0x1]  ;;  %v8223_v37 = vrot.slane %v8219_v20, 7  ;;  %v8262_v43 = vrot.slane %v8260_v19, 3 }
 0xcf2   : > { %v8247_v0 = vrot.slane %v8245_v32, 1  ;;  %v8184_v58 = vrot.slane %v8174_v23, 5  ;;  %v8192_v59 = vld [vmem:[#allocation2 + $0x30] sm:$0x3]  ;;  %v8252_v30 = vld [vmem:[#allocation2 + $0x30] sm:$0x3c] }
 0xcf3   : > { %v8193_v11 = vpack.c.bf16 %v8192_v59, %v8191_v33  ;;  %v8202_v25 = vld [vmem:[#allocation2 + $0x30] sm:$0x7]  ;;  %v8224_v26 = vsel %vm15738_vm6, %v8222_v42, %v8223_v37  ;;  %v8253_v2 = vpack.c.bf16 %v8252_v30, %v8252_v30  ;;  %v8264_v28 = vsel %vm8205_vm13, %v8262_v43, 0.0  ;;  %v10544_v42 = vld [vmem:[%s15195_s17 + $0x268] ss:$16 sps:$4 sm:$0xff]  }
 0xcf4   : > { %v8249_v54 = vsel %vm8176_vm10, %v8247_v0, 0.0  ;;  %v8185_v36 = vsel %vm7009_vm8, %v8183_v52, %v8184_v58  ;;  %v8234_v1 = vld [vmem:[#allocation2 + $0x30] sm:$0x1e]  ;;  %v8226_v12 = vsel %vm8176_vm10, %v8224_v26, 0.0  ;;  %v8212_v34 = vrot.slane %v8202_v25, 7  ;;  %vm15739_vm8 = vmmov %vm15738_vm6 }
 0xcf5   : > { %v8250_v55 = vpack.c.bf16 %v8249_v54, %v8249_v54  ;;  %v8187_v15 = vsel %vm8176_vm10, %v8185_v36, 0.0  ;;  %v8195_v50 = vrot.slane %v8193_v11, 3  ;;  %v8227_v35 = vpack.c.bf16 %v8226_v12, %v8226_v12  ;;  %v10546_v52 = vld [vmem:[%s15195_s17 + $0x26c] ss:$16 sps:$4 sm:$0xff]   ;;  %v10549_v33 = vld [vmem:[%s15195_s17 + $0x284] ss:$16 sps:$4 sm:$0xff]  }
 0xcf6   : > { %v8188_v47 = vpack.c.bf16 %v8187_v15, %v8187_v15  ;;  %v8236_v8 = vrot.slane %v8234_v1, 1  ;;  %v8213_v14 = vsel %vm15739_vm8, %v8211_v4, %v8212_v34  ;;  %v8255_v27 = vrot.slane %v8253_v2, 1  ;;  %v10550_v20 = vld [vmem:[%s15195_s17 + $0x288] ss:$16 sps:$4 sm:$0xff]   ;;  %v10555_v32 = vld [vmem:[%s15195_s17 + $0x2a4] ss:$16 sps:$4 sm:$0xff]  }
 0xcf7   : > { %8196 = vrot.lane.b32.xlu1 %v8195_v50, %s15687_s0  ;;  %8251 = vst.msk [vmem:[#allocation3 + $0x18] sm:$0x3] %vm8189_vm15, %v8250_v55  ;;  %8229 = vrot.lane.b32.xlu0 %v8227_v35, %s15687_s0  ;;  %v8215_v3 = vsel %vm8205_vm13, %v8213_v14, 0.0  ;;  %v8265_v51 = vpack.c.bf16 %v8264_v28, %v8264_v28  ;;  %v10558_v23 = vld [vmem:[%s15195_s17 + $0x2ac] ss:$16 sps:$4 sm:$0xff]  }
 0xcf8   : > { %8190 = vst.msk [vmem:[#allocation3] sm:$0x3] %vm8189_vm15, %v8188_v47  ;;  %v8238_v40 = vsel %vm8205_vm13, %v8236_v8, 0.0  ;;  %v8216_v56 = vpack.c.bf16 %v8215_v3, %v8215_v3  ;;  %v10553_v37 = vld [vmem:[%s15195_s17 + $0x2a0] ss:$16 sps:$4 sm:$0xff]  }
 0xcf9   : > { %v8239_v41 = vpack.c.bf16 %v8238_v40, %v8238_v40  ;;  %8266 = vst.msk [vmem:[#allocation3 + $0x20] sm:$0x3] %vm8189_vm15, %v8265_v51  ;;  %v10556_v0 = vld [vmem:[%s15195_s17 + $0x2a8] ss:$16 sps:$4 sm:$0xff]   ;;  %v10561_v58 = vld [vmem:[%s15195_s17 + $0x2c4] ss:$16 sps:$4 sm:$0xff]  }
 0xcfa   : > { %8217 = vst.msk [vmem:[#allocation3 + $0x8] sm:$0x3] %vm8189_vm15, %v8216_v56  ;;  %v10564_v59 = vld [vmem:[%s15195_s17 + $0x2cc] ss:$16 sps:$4 sm:$0xff]   ;;  %v10559_v11 = vld [vmem:[%s15195_s17 + $0x2c0] ss:$16 sps:$4 sm:$0xff]  }
 0xcfb   : > { %8256 = vrot.lane.b32.xlu0 %v8255_v27, %s15687_s0  ;;  %8241 = vrot.lane.b32.xlu1 %v8239_v41, %s15687_s0  ;;  %v10562_v30 = vld [vmem:[%s15195_s17 + $0x2c8] ss:$16 sps:$4 sm:$0xff]   ;;  %v10567_v25 = vld [vmem:[%s15195_s17 + $0x2e4] ss:$16 sps:$4 sm:$0xff]  }
 0xcfc   : > { %v10570_v4 = vld [vmem:[%s15195_s17 + $0x2ec] ss:$16 sps:$4 sm:$0xff]   ;;  %v10565_v26 = vld [vmem:[%s15195_s17 + $0x2e0] ss:$16 sps:$4 sm:$0xff]   ;;  %v10568_v54 = vld [vmem:[%s15195_s17 + $0x2e8] ss:$16 sps:$4 sm:$0xff]  }
 0xcfd   : > { %v10573_v36 = vld [vmem:[%s15195_s17 + $0x304] ss:$16 sps:$4 sm:$0xff]   ;;  %v10576_v1 = vld [vmem:[%s15195_s17 + $0x30c] ss:$16 sps:$4 sm:$0xff]   ;;  %v10571_v19 = vld [vmem:[%s15195_s17 + $0x300] ss:$16 sps:$4 sm:$0xff]  }
 0xcfe   : > { %v10574_v12 = vld [vmem:[%s15195_s17 + $0x308] ss:$16 sps:$4 sm:$0xff]   ;;  %v10579_v55 = vld [vmem:[%s15195_s17 + $0x324] ss:$16 sps:$4 sm:$0xff]   ;;  %v10582_v15 = vld [vmem:[%s15195_s17 + $0x32c] ss:$16 sps:$4 sm:$0xff]  }
 0xcff   : > { %v10577_v50 = vld [vmem:[%s15195_s17 + $0x320] ss:$16 sps:$4 sm:$0xff]   ;;  %v10585_v35 = vld [vmem:[%s15195_s17 + $0x344] ss:$16 sps:$4 sm:$0xff]   ;;  %v10588_v47 = vld [vmem:[%s15195_s17 + $0x34c] ss:$16 sps:$4 sm:$0xff]  }
 0xd00   : > { %v10583_v2 = vld [vmem:[%s15195_s17 + $0x340] ss:$16 sps:$4 sm:$0xff]   ;;  %v10586_v34 = vld [vmem:[%s15195_s17 + $0x348] ss:$16 sps:$4 sm:$0xff]   ;;  %v10594_v8 = vld [vmem:[%s15195_s17 + $0x36c] ss:$16 sps:$4 sm:$0xff]  }
 0xd01   : > { %v10589_v43 = vld [vmem:[%s15195_s17 + $0x360] ss:$16 sps:$4 sm:$0xff]   ;;  %v10592_v14 = vld [vmem:[%s15195_s17 + $0x368] ss:$16 sps:$4 sm:$0xff]   ;;  %v10597_v3 = vld [vmem:[%s15195_s17 + $0x384] ss:$16 sps:$4 sm:$0xff]  }
 0xd02   : > { %v10600_v40 = vld [vmem:[%s15195_s17 + $0x38c] ss:$16 sps:$4 sm:$0xff]   ;;  %v10595_v28 = vld [vmem:[%s15195_s17 + $0x380] ss:$16 sps:$4 sm:$0xff]   ;;  %v10598_v27 = vld [vmem:[%s15195_s17 + $0x388] ss:$16 sps:$4 sm:$0xff]  }
 0xd03   : > { %v10603_v56 = vld [vmem:[%s15195_s17 + $0x3a4] ss:$16 sps:$4 sm:$0xff]   ;;  %v10606_v41 = vld [vmem:[%s15195_s17 + $0x3ac] ss:$16 sps:$4 sm:$0xff]   ;;  %v10601_v51 = vld [vmem:[%s15195_s17 + $0x3a0] ss:$16 sps:$4 sm:$0xff]  }
 0xd69   : > { %v8197_v61 = vpop.permute.xlu1 %8196  ;;  %v8230_v5 = vpop.permute.xlu0 %8229 }
 0xd6a   : > { %8200 = vst.msk [vmem:[#allocation3] sm:$0x3] %vm8199_vm9, %v8197_v61  ;;  %8232 = vst.msk [vmem:[#allocation3 + $0x8] sm:$0x3] %vm8199_vm9, %v8230_v5  ;;  %v10604_v61 = vld [vmem:[%s15195_s17 + $0x3a8] ss:$16 sps:$4 sm:$0xff]  }
 0xd6b   : > { %v10609_v5 = vld [vmem:[%s15195_s17 + $0x3c4] ss:$16 sps:$4 sm:$0xff]  }
 0xd6d   : > { %v8257_v21 = vpop.permute.xlu0 %8256  ;;  %v8242_v9 = vpop.permute.xlu1 %8241 }
 0xd6e   : > { %8259 = vst.msk [vmem:[#allocation3 + $0x18] sm:$0x3] %vm8199_vm9, %v8257_v21  ;;  %8244 = vst.msk [vmem:[#allocation3 + $0x10] sm:$0x3] %vm8199_vm9, %v8242_v9  ;;  %v10612_v21 = vld [vmem:[%s15195_s17 + $0x3cc] ss:$16 sps:$4 sm:$0xff]  }
 0xd6f   : > { %v10607_v9 = vld [vmem:[%s15195_s17 + $0x3c0] ss:$16 sps:$4 sm:$0xff]  }
 0xd71   : > { %v8268_v38 = vld [vmem:[#allocation3 + $0x8] sm:$0x3]  ;;  %v8267_v6 = vld [vmem:[#allocation3] sm:$0x3] }
 0xd72   : > { %9193 = vmatprep.mubr.bf16.mxu0 %v8268_v38  ;;  %9316 = vmatprep.mubr.bf16.mxu1 %v8268_v38  ;;  %v10618_v38 = vld [vmem:[%s15195_s17 + $0x3ec] ss:$16 sps:$4 sm:$0xff]  }
 0xd73   : > { %9194 = vmatmul.mubr.bf16.vlgmr.msra.gmra.mrb[124].mxu0 %v8267_v6  ;;  %9317 = vmatmul.mubr.bf16.vlgmr.msra.gmra.mrb[72].mxu1 %v8267_v6  ;;  %v10621_v6 = vld [vmem:[%s15195_s17 + $0x404] ss:$16 sps:$4 sm:$0xff]  }
 0xd74   : > { %9203 = vmatpush1.bf16.msra.mxu0 %v10523_v45  ;;  %9326 = vmatpush1.bf16.msra.mxu1 %v10526_v13  ;;  %v10610_v45 = vld [vmem:[%s15195_s17 + $0x3c8] ss:$16 sps:$4 sm:$0xff]   ;;  %v10615_v13 = vld [vmem:[%s15195_s17 + $0x3e4] ss:$16 sps:$4 sm:$0xff]  }
 0xd75   : > { %9204 = vmatprep.subr.bf16.mxu0 %v10531_v24  ;;  %9327 = vmatprep.subr.bf16.mxu1 %v10534_v63  ;;  %v8270_v57 = vld [vmem:[#allocation3 + $0x18] sm:$0x3]  ;;  %v10613_v24 = vld [vmem:[%s15195_s17 + $0x3e0] ss:$16 sps:$4 sm:$0xff]  }
 0xd76   : > { %9234 = vmatprep.mubr.bf16.mxu0 %v8270_v57  ;;  %9357 = vmatprep.mubr.bf16.mxu1 %v8270_v57  ;;  %v10616_v63 = vld [vmem:[%s15195_s17 + $0x3e8] ss:$16 sps:$4 sm:$0xff]   ;;  %v10627_v57 = vld [vmem:[%s15195_s17 + $0x424] ss:$16 sps:$4 sm:$0xff]  }
 0xd78   : > { %9205 = vmatpush1.bf16.msra.mxu0 %v10529_v29  ;;  %9328 = vmatpush1.bf16.msra.mxu1 %v10532_v31  ;;  %v10624_v29 = vld [vmem:[%s15195_s17 + $0x40c] ss:$16 sps:$4 sm:$0xff]   ;;  %v10619_v31 = vld [vmem:[%s15195_s17 + $0x400] ss:$16 sps:$4 sm:$0xff]  }
 0xd79   : > { %9206 = vmatprep.subr.bf16.mxu0 %v10537_v53  ;;  %9329 = vmatprep.subr.bf16.mxu1 %v10540_v44  ;;  %v10622_v53 = vld [vmem:[%s15195_s17 + $0x408] ss:$16 sps:$4 sm:$0xff]   ;;  %v10630_v44 = vld [vmem:[%s15195_s17 + $0x42c] ss:$16 sps:$4 sm:$0xff]  }
 0xd7c   : > { %9207 = vmatpush1.bf16.msra.mxu0 %v10535_v39  ;;  %9330 = vmatpush1.bf16.msra.mxu1 %v10538_v10  ;;  %v8269_v39 = vld [vmem:[#allocation3 + $0x10] sm:$0x3] }
 0xd7d   : > { %9208 = vmatprep.subr.bf16.mxu0 %v10543_v7  ;;  %9331 = vmatprep.subr.bf16.mxu1 %v10546_v52  ;;  %v10625_v10 = vld [vmem:[%s15195_s17 + $0x420] ss:$16 sps:$4 sm:$0xff]   ;;  %v10628_v7 = vld [vmem:[%s15195_s17 + $0x428] ss:$16 sps:$4 sm:$0xff]   ;;  %v10633_v52 = vld [vmem:[%s15195_s17 + $0x444] ss:$16 sps:$4 sm:$0xff]  }
 0xd80   : > { %9209 = vmatpush1.bf16.msra.mxu0 %v10541_v49  ;;  %9332 = vmatpush1.bf16.msra.mxu1 %v10544_v42  ;;  %v10636_v49 = vld [vmem:[%s15195_s17 + $0x44c] ss:$16 sps:$4 sm:$0xff]   ;;  %v10631_v42 = vld [vmem:[%s15195_s17 + $0x440] ss:$16 sps:$4 sm:$0xff]  }
 0xd81   : > { %9210 = vmatprep.subr.bf16.mxu0 %v10549_v33  ;;  %9333 = vmatprep.subr.bf16.mxu1 %v10552_v60  ;;  %v10634_v33 = vld [vmem:[%s15195_s17 + $0x448] ss:$16 sps:$4 sm:$0xff]   ;;  %v10639_v60 = vld [vmem:[%s15195_s17 + $0x464] ss:$16 sps:$4 sm:$0xff]  }
 0xd84   : > { %9211 = vmatpush1.bf16.msra.mxu0 %v10547_v22  ;;  %9334 = vmatpush1.bf16.msra.mxu1 %v10550_v20  ;;  %v10637_v22 = vld [vmem:[%s15195_s17 + $0x460] ss:$16 sps:$4 sm:$0xff]   ;;  %v10640_v20 = vld [vmem:[%s15195_s17 + $0x468] ss:$16 sps:$4 sm:$0xff]  }
 0xd85   : > { %9212 = vmatprep.subr.bf16.mxu0 %v10555_v32  ;;  %9335 = vmatprep.subr.bf16.mxu1 %v10558_v23  ;;  %v8271_v32 = vld [vmem:[#allocation3 + $0x20] sm:$0x3]  ;;  %v8428_v23 = vsub.s32 2, %v15664_v62 }
 0xd88   : > { %9213 = vmatpush1.bf16.msra.mxu0 %v10553_v37  ;;  %9336 = vmatpush1.bf16.msra.mxu1 %v10556_v0  ;;  %v8416_v37 = vld [vmem:[%s15196_s18] sm:$0xf]  ;;  %v8432_v0 = vsub.s32 3, %v15664_v62 }
 0xd89   : > { %9214 = vmatprep.subr.bf16.mxu0 %v10561_v58  ;;  %9337 = vmatprep.subr.bf16.mxu1 %v10564_v59  ;;  %v8421_v58 = vrot.slane %v8416_v37, %v7193_v17  ;;  %v8429_v59 = vrot.slane %v8416_v37, %v8428_v23 }
 0xd8c   : > { %9215 = vmatpush1.bf16.msra.mxu0 %v10559_v11  ;;  %9338 = vmatpush1.bf16.msra.mxu1 %v10562_v30  ;;  %v8425_v11 = vrot.slane %v8416_v37, %v7197_v16  ;;  %v8433_v30 = vrot.slane %v8416_v37, %v8432_v0 }
 0xd8d   : > { %9216 = vmatprep.subr.bf16.mxu0 %v10567_v25  ;;  %9339 = vmatprep.subr.bf16.mxu1 %v10570_v4 }
 0xd90   : > { %9217 = vmatpush1.bf16.msra.mxu0 %v10565_v26  ;;  %9340 = vmatpush1.bf16.msra.mxu1 %v10568_v54 }
 0xd91   : > { %9218 = vmatprep.subr.bf16.mxu0 %v10573_v36  ;;  %9341 = vmatprep.subr.bf16.mxu1 %v10576_v1 }
 0xd94   : > { %9219 = vmatpush1.bf16.msra.mxu0 %v10571_v19  ;;  %9342 = vmatpush1.bf16.msra.mxu1 %v10574_v12 }
 0xd95   : > { %9220 = vmatprep.subr.bf16.mxu0 %v10579_v55  ;;  %9343 = vmatprep.subr.bf16.mxu1 %v10582_v15 }
 0xd98   : > { %9221 = vmatpush1.bf16.msra.mxu0 %v10577_v50  ;;  %9344 = vmatpush1.bf16.msra.mxu1 %v10580_v46 }
 0xd99   : > { %9222 = vmatprep.subr.bf16.mxu0 %v10585_v35  ;;  %9345 = vmatprep.subr.bf16.mxu1 %v10588_v47 }
 0xd9c   : > { %9223 = vmatpush1.bf16.msra.mxu0 %v10583_v2  ;;  %9346 = vmatpush1.bf16.msra.mxu1 %v10586_v34 }
 0xd9d   : > { %9224 = vmatprep.subr.bf16.mxu0 %v10591_v48  ;;  %9347 = vmatprep.subr.bf16.mxu1 %v10594_v8 }
 0xda0   : > { %9225 = vmatpush1.bf16.msra.mxu0 %v10589_v43  ;;  %9348 = vmatpush1.bf16.msra.mxu1 %v10592_v14 }
 0xda1   : > { %9226 = vmatprep.subr.bf16.mxu0 %v10597_v3  ;;  %9349 = vmatprep.subr.bf16.mxu1 %v10600_v40 }
 0xda4   : > { %9227 = vmatpush1.bf16.msra.mxu0 %v10595_v28  ;;  %9350 = vmatpush1.bf16.msra.mxu1 %v10598_v27 }
 0xda5   : > { %9228 = vmatprep.subr.bf16.mxu0 %v10603_v56  ;;  %9351 = vmatprep.subr.bf16.mxu1 %v10606_v41 }
 0xda8   : > { %9229 = vmatpush1.bf16.msra.mxu0 %v10601_v51  ;;  %9352 = vmatpush1.bf16.msra.mxu1 %v10604_v61 }
 0xda9   : > { %9230 = vmatprep.subr.bf16.mxu0 %v10609_v5  ;;  %9353 = vmatprep.subr.bf16.mxu1 %v10612_v21 }
 0xdac   : > { %9231 = vmatpush1.bf16.msra.mxu0 %v10607_v9  ;;  %9354 = vmatpush1.bf16.msra.mxu1 %v10610_v45 }
 0xdad   : > { %9232 = vmatprep.subr.bf16.mxu0 %v10615_v13  ;;  %9355 = vmatprep.subr.bf16.mxu1 %v10618_v38 }
 0xdb0   : > { %9233 = vmatpush1.bf16.msra.mxu0 %v10613_v24  ;;  %9356 = vmatpush1.bf16.msra.mxu1 %v10616_v63 }
 0xdb1   : > { %9243 = vmatprep.subr.bf16.mxu0 %v10621_v6  ;;  %9366 = vmatprep.subr.bf16.mxu1 %v10624_v29 }
 0xdb3   : > { %9235 = vmatmul.mubr.bf16.vlgmr.msra.gmra.mrb[124].mxu0 %v8269_v39  ;;  %9358 = vmatmul.mubr.bf16.vlgmr.msra.gmra.mrb[72].mxu1 %v8269_v39 }
 0xdb4   : > { %9244 = vmatpush1.bf16.msra.mxu0 %v10619_v31  ;;  %9367 = vmatpush1.bf16.msra.mxu1 %v10622_v53 }
 0xdb5   : > { %9245 = vmatprep.subr.bf16.mxu0 %v10627_v57  ;;  %9368 = vmatprep.subr.bf16.mxu1 %v10630_v44 }
 0xdb6   : > { %9275 = vmatprep.mubr.bf16.mxu0 %v15718_v18  ;;  %9398 = vmatprep.mubr.bf16.mxu1 %v15718_v18  ;;  %v10642_v18 = vld [vmem:[%s15195_s17 + $0x46c] ss:$16 sps:$4 sm:$0xff]  }
 0xdb8   : > { %9246 = vmatpush1.bf16.msra.mxu0 %v10625_v10  ;;  %9369 = vmatpush1.bf16.msra.mxu1 %v10628_v7 }
 0xdb9   : > { %9247 = vmatprep.subr.bf16.mxu0 %v10633_v52  ;;  %9370 = vmatprep.subr.bf16.mxu1 %v10636_v49 }
 0xdbc   : > { %9248 = vmatpush1.bf16.msra.mxu0 %v10631_v42  ;;  %9371 = vmatpush1.bf16.msra.mxu1 %v10634_v33 }
 0xdbd   : > { %9249 = vmatprep.subr.bf16.mxu0 %v10639_v60  ;;  %9372 = vmatprep.subr.bf16.mxu1 %v10642_v18 }
 0xdc0   : > { %9250 = vmatpush1.bf16.msra.mxu0 %v10637_v22  ;;  %9373 = vmatpush1.bf16.msra.mxu1 %v10640_v20 }
 0xdc3   : > { %9853 = vmatmul.mubr.msk.bf16.vlgmr.msra.gmra.mrb[124].mxu0 %vm15740_vm12, %v8271_v32  ;;  %9854 = vmatmul.mubr.msk.bf16.vlgmr.msra.gmra.mrb[72].mxu1 %vm15741_vm0, %v8271_v32 }
 0xe96   : > { %v9277_v25 = vpop.f32.mrb[124].mxu0  ;;  %v9400_v4 = vpop.f32.mrb[72].mxu1 }
 0xe97   : > { %v10179_v26 = vadd.f32 %v9277_v25, %v8421_v58  ;;  %v10181_v54 = vadd.f32 %v9400_v4, %v8429_v59  ;;  %v9279_v36 = vpop.f32.mrb[125].mxu0  ;;  %v9402_v1 = vpop.f32.mrb[73].mxu1 }
 0xe98   : > { %v10180_v19 = vadd.f32 %v9279_v36, %v8425_v11  ;;  %v10182_v12 = vadd.f32 %v9402_v1, %v8433_v30  ;;  %v9281_v55 = vpop.f32.mrb[126].mxu0  ;;  %v9404_v15 = vpop.f32.mrb[74].mxu1 }
 0xe99   : > { %v9407_v50 = vmax.f32 %v10179_v26, 0.0  ;;  %v9409_v46 = vmax.f32 %v10181_v54, 0.0  ;;  %v9282_v35 = vpop.f32.mrb[127].mxu0  ;;  %v9405_v17 = vpop.f32.mrb[75].mxu1 }
 0xe9a   : > { %v9408_v47 = vmax.f32 %v10180_v19, 0.0  ;;  %v9410_v2 = vmax.f32 %v10182_v12, 0.0 }
 0xe9c   : > { %v9415_v62 = vcombine.low %v9407_v50, %v9408_v47  ;;  %v9416_v16 = vcombine.low %v9409_v46, %v9410_v2 }
 0xe9e   : > { %9419 = vst [vmem:[%s683_s7] sm:$0xff] %v9415_v62  ;;  %9420 = vst [vmem:[%s683_s7 + $0x8] sm:$0xff] %v9416_v16 }
 0xe9f PF: > { %s32_s3 = sadd.s32 1, %s10655_s3  }
 0xea0   : > { %p29_p4 = scmp.ge.s32.totalorder %s32_s3, 4  }
 0xea2   :  { %31 = sbr.rel (!%p29_p4) target bundleno = 10 (0xa), region = 138 }

</bundles_post_ra>
